<compile_context>
chip_gen: v5e
topology: v5e:2x2
jax: 0.10.0
libtpu: 0.0.40
codegen_flags: <defaults>
</compile_context>

<pallas_src>
import functools

import jax
import jax.numpy as jnp
from jax.experimental import pallas as pl
from jax.experimental.pallas import tpu as pltpu


def _round_up(x, m):
    return (x + m - 1) // m * m


# ----------------------------------------------------------------------------- kernel
def _make_fused_gcn_kernel(num_layers, n_agents, feat):
    """Fused k-layer MonotonicGCN kernel, batch-on-lanes layout."""
    A, F = n_agents, feat
    O = F

    def kernel(*refs):
        idx = 0
        x0_ref = refs[idx]; idx += 1                       # (A, TB)     layer-0 per-agent scalars
        adj_ref = refs[idx]; idx += 1                      # (A, A)      adjacency
        if num_layers > 1:
            kron_ref = refs[idx]; idx += 1                 # (A*F, A*F)  kron(adj, I_F)
        layer_refs = refs[idx: idx + 2 * num_layers]; idx += 2 * num_layers
        o_ref = refs[idx]; idx += 1                        # (A*O, TB)   lane-dense output slab
        if num_layers > 1:
            act_ref = refs[idx]                            # (A*F, TB)   activations between layers
            agg_ref = refs[idx + 1]                        # (A*F, TB)   adjacency-aggregated acts

        # ---- layer 0: agg0 = adj @ x0 (one small MXU matmul for the whole tile) ----
        agg0 = jnp.dot(adj_ref[...], x0_ref[...],
                       preferred_element_type=jnp.float32)          # (A, TB)
        w0 = layer_refs[0][...]                                      # (O, TB)  |W0(states)|
        b0 = layer_refs[1][...]                                      # (O, TB)
        dst0 = o_ref if num_layers == 1 else act_ref
        for a in range(A):
            row = agg0[a:a + 1, :]                                   # (1, TB)
            dst0[a * O:(a + 1) * O, :] = jnp.maximum(row * w0 + b0, 0.0)

        # ---- layers 1..k-1 ----
        for l in range(1, num_layers):
            # adjacency aggregation for ALL agents/features at once: (A*F,A*F)@(A*F,TB)
            agg_ref[...] = jnp.dot(kron_ref[...], act_ref[...],
                                   preferred_element_type=jnp.float32)
            wl_ref = layer_refs[2 * l]                               # (F*O, TB)  |W_l(states)|
            bl = layer_refs[2 * l + 1][...]                          # (O, TB)
            dst = o_ref if l == num_layers - 1 else act_ref
            for a in range(A):
                acc = bl                                             # start from bias (O, TB)
                base = a * F
                for f in range(F):
                    row = agg_ref[base + f: base + f + 1, :]         # (1, TB)
                    acc = acc + row * wl_ref[f * O:(f + 1) * O, :]   # lane-dense AXPY
                dst[a * O:(a + 1) * O, :] = jnp.maximum(acc, 0.0)

    return kernel


# ----------------------------------------------------------------------------- wrapper
@functools.partial(jax.jit, static_argnames=("block_b",))
def monotonic_gcn_forward(input_features, states, adj, layer_params, *, block_b=128):
    """Fused MonotonicGCN forward.

    input_features: (B, n_agents, 1), states: (B, state_dim), adj: (A, A)
    layer_params: tuple of (hw: (S, I*O), hwb: (I*O,), hb: (S, O), hbb: (O,)) per layer.
    Returns (B, n_agents, gnn_feature_size).
    """
    B, A, in0 = input_features.shape
    assert in0 == 1, "layer 0 input feature size must be 1"
    num_layers = len(layer_params)
    F = layer_params[0][2].shape[1]           # gnn_feature_size (from hb: (S, F))
    O = F
    hp = jax.lax.Precision.HIGHEST

    # --- hoisted hypernetwork: ONE fused matmul for all layers' W and b, then split ---
    mats, vecs = [], []
    for (hw, hwb, hb, hbb) in layer_params:
        mats += [hw, hb]
        vecs += [hwb, hbb]
    big = jnp.dot(states, jnp.concatenate(mats, axis=1), precision=hp) \
        + jnp.concatenate(vecs, axis=0)                               # (B, total)

    w_list, b_list = [], []
    off = 0
    for (hw, hwb, hb, hbb) in layer_params:
        wsz, bsz = hw.shape[1], hb.shape[1]
        w_list.append(jnp.abs(big[:, off:off + wsz]).T)               # (I_l*O, B) monotonic |W|
        off += wsz
        b_list.append(big[:, off:off + bsz].T)                        # (O, B)
        off += bsz

    # batch-on-lanes layouts
    x0 = input_features[..., 0].T                                     # (A, B)
    kron_adj = None
    if num_layers > 1:
        kron_adj = jnp.kron(adj, jnp.eye(F, dtype=adj.dtype))         # (A*F, A*F)

    # --- batch tiling: TB lanes per grid step (multiple of 128, lane-dense) ---
    tb = _round_up(min(block_b, B), 128)
    b_pad = _round_up(B, tb)
    if b_pad != B:
        pad = ((0, 0), (0, b_pad - B))
        x0 = jnp.pad(x0, pad)
        w_list = [jnp.pad(w, pad) for w in w_list]
        b_list = [jnp.pad(b, pad) for b in b_list]

    grid = (b_pad // tb,)

    inputs = [x0, adj]
    in_specs = [
        pl.BlockSpec((A, tb), lambda i: (0, i)),                      # x0
        pl.BlockSpec((A, A), lambda i: (0, 0)),                       # adjacency (shared)
    ]
    if num_layers > 1:
        inputs.append(kron_adj)
        in_specs.append(pl.BlockSpec((A * F, A * F), lambda i: (0, 0)))
    for l in range(num_layers):
        i_l = 1 if l == 0 else F
        inputs += [w_list[l], b_list[l]]
        in_specs += [pl.BlockSpec((i_l * O, tb), lambda i: (0, i)),   # W_l
                     pl.BlockSpec((O, tb), lambda i: (0, i))]         # b_l

    scratch_shapes = []
    if num_layers > 1:
        scratch_shapes = [pltpu.VMEM((A * F, tb), jnp.float32),       # activations
                          pltpu.VMEM((A * F, tb), jnp.float32)]       # aggregated activations

    flops = 2 * A * A * b_pad + 2 * A * O * b_pad
    flops += (num_layers - 1) * (2 * (A * F) * (A * F) * b_pad + 2 * A * F * O * b_pad)
    bytes_accessed = 4 * (int(x0.size) + int(adj.size) + A * O * b_pad
                          + sum(int(w.size) for w in w_list)
                          + sum(int(b.size) for b in b_list)
                          + (int(kron_adj.size) if kron_adj is not None else 0))

    out = pl.pallas_call(
        _make_fused_gcn_kernel(num_layers, A, F),
        out_shape=jax.ShapeDtypeStruct((A * O, b_pad), jnp.float32),
        grid_spec=pltpu.PrefetchScalarGridSpec(
            num_scalar_prefetch=0,
            grid=grid,
            in_specs=in_specs,
            out_specs=pl.BlockSpec((A * O, tb), lambda i: (0, i)),
            scratch_shapes=scratch_shapes),
        compiler_params=pltpu.CompilerParams(
            dimension_semantics=("parallel",)),
        cost_estimate=pl.CostEstimate(
            flops=int(flops), transcendentals=0, bytes_accessed=int(bytes_accessed)),
    )(*inputs)

    # (A*O, B) -> (B, A, O)
    return out[:, :B].T.reshape(B, A, O)


# ----------------------------------------------------------------------------- reference (plain JAX)
def monotonic_gcn_reference(input_features, states, adj, layer_params):
    x = input_features
    B = states.shape[0]
    hp = jax.lax.Precision.HIGHEST
    for l, (hw, hwb, hb, hbb) in enumerate(layer_params):
        i_l = x.shape[-1]
        o_l = hb.shape[1]
        w = jnp.abs(jnp.dot(states, hw, precision=hp) + hwb).reshape(B, i_l, o_l)   # (B, I, O)
        b = jnp.dot(states, hb, precision=hp) + hbb                                 # (B, O)
        agg = jnp.einsum('aj,bji->bai', adj, x, precision=hp)                       # (B, A, I)
        x = jax.nn.relu(jnp.einsum('bai,bio->bao', agg, w, precision=hp)
                        + b[:, None, :])
    return x


# ----------------------------------------------------------------------------- setup
def make_ring_adjacency(n_agents):
    # Deterministic stand-in for args.graph_obj.get_adjacency_matrix():
    # ring graph with self loops (kernel supports arbitrary adjacency).
    idx = jnp.arange(n_agents)
    a = (jnp.zeros((n_agents, n_agents))
         .at[idx, idx].set(1.0)
         .at[idx, (idx + 1) % n_agents].set(1.0)
         .at[idx, (idx - 1) % n_agents].set(1.0))
    return a.astype(jnp.float32)


def init_layer_params(key, in_feat, out_feat, state_dim):
    # PyTorch nn.Linear-style uniform(-1/sqrt(fan_in), 1/sqrt(fan_in)) init, deterministic.
    k1, k2, k3, k4 = jax.random.split(key, 4)
    bound = 1.0 / jnp.sqrt(jnp.float32(state_dim))
    hw = jax.random.uniform(k1, (state_dim, in_feat * out_feat), jnp.float32, -bound, bound)
    hwb = jax.random.uniform(k2, (in_feat * out_feat,), jnp.float32, -bound, bound)
    hb = jax.random.uniform(k3, (state_dim, out_feat), jnp.float32, -bound, bound)
    hbb = jax.random.uniform(k4, (out_feat,), jnp.float32, -bound, bound)
    return (hw, hwb, hb, hbb)


if __name__ == "__main__":
    # Small config consistent with the module's __init__:
    batch = 256            # batch tiled TB=128 per grid step -> grid of 2 ("parallel", v7x-friendly)
    n_agents = 8           # args.n_agents
    gnn_feature_size = 32  # args.gnn_feature_size
    state_dim = 16         # hypernetwork conditioning (states) size
    value_depth_k = 2      # args.value_depth_k

    key = jax.random.PRNGKey(0)
    k_x, k_s, *k_layers = jax.random.split(key, 2 + value_depth_k)

    # Layer 0 input feature size is 1 (per-agent scalar utilities).
    input_features = jax.random.normal(k_x, (batch, n_agents, 1), jnp.float32)
    states = jax.random.normal(k_s, (batch, state_dim), jnp.float32)
    adj = make_ring_adjacency(n_agents)

    layer_params = []
    for i in range(value_depth_k):
        in_feat = 1 if i == 0 else gnn_feature_size
        layer_params.append(init_layer_params(k_layers[i], in_feat, gnn_feature_size, state_dim))
    layer_params = tuple(layer_params)

    out = monotonic_gcn_forward(input_features, states, adj, layer_params, block_b=128)
    out = jax.block_until_ready(out)

    ref = monotonic_gcn_reference(input_features, states, adj, layer_params)
    assert out.shape == (batch, n_agents, gnn_feature_size)
    assert jnp.allclose(out, ref, rtol=1e-4, atol=1e-4), "Pallas output mismatch vs JAX reference"

    print("KERNEL_OK")
</pallas_src>

<mosaic_0001>
module attributes {stable_mosaic.version = 11 : i64} {
  func.func @kernel(%arg0: i32, %arg1: memref<8x128xf32, #tpu.memory_space<vmem>>, %arg2: memref<8x8xf32, #tpu.memory_space<vmem>>, %arg3: memref<256x256xf32, #tpu.memory_space<vmem>>, %arg4: memref<32x128xf32, #tpu.memory_space<vmem>>, %arg5: memref<32x128xf32, #tpu.memory_space<vmem>>, %arg6: memref<1024x128xf32, #tpu.memory_space<vmem>>, %arg7: memref<32x128xf32, #tpu.memory_space<vmem>>, %arg8: memref<256x128xf32, #tpu.memory_space<vmem>>, %arg9: memref<256x128xf32, #tpu.memory_space<vmem>>, %arg10: memref<256x128xf32, #tpu.memory_space<vmem>>) attributes {dimension_semantics = [#tpu.dimension_semantics<parallel>], iteration_bounds = array<i64: 2>, scalar_prefetch = 0 : i64, scratch_operands = 2 : i64, tpu.core_type = #tpu.core_type<tc>, window_params = [{transform_indices = @transform_0, window_bounds = array<i64: 8, 128>}, {pipeline_mode = #tpu.pipeline_mode<synchronous>, transform_indices = @transform_1, window_bounds = array<i64: 8, 8>}, {pipeline_mode = #tpu.pipeline_mode<synchronous>, transform_indices = @transform_2, window_bounds = array<i64: 256, 256>}, {transform_indices = @transform_3, window_bounds = array<i64: 32, 128>}, {transform_indices = @transform_4, window_bounds = array<i64: 32, 128>}, {transform_indices = @transform_5, window_bounds = array<i64: 1024, 128>}, {transform_indices = @transform_6, window_bounds = array<i64: 32, 128>}, {transform_indices = @transform_7, window_bounds = array<i64: 256, 128>}]} {
    %c0 = arith.constant 0 : index
    %c0_0 = arith.constant 0 : index
    %0 = vector.load %arg2[%c0, %c0_0] : memref<8x8xf32, #tpu.memory_space<vmem>>, vector<8x8xf32>
    %c0_1 = arith.constant 0 : index
    %c0_2 = arith.constant 0 : index
    %1 = vector.load %arg1[%c0_1, %c0_2] : memref<8x128xf32, #tpu.memory_space<vmem>>, vector<8x128xf32>
    %cst = arith.constant dense<0.000000e+00> : vector<8x128xf32>
    %2 = tpu.matmul %0, %1, %cst {dimension_numbers = #tpu.dot_dimension_numbers<[1], [0], [0], [1], [0, 0, 1, 1], [], []>} : vector<8x8xf32>, vector<8x128xf32>, vector<8x128xf32> -> vector<8x128xf32>
    %c0_3 = arith.constant 0 : index
    %c0_4 = arith.constant 0 : index
    %3 = vector.load %arg4[%c0_3, %c0_4] : memref<32x128xf32, #tpu.memory_space<vmem>>, vector<32x128xf32>
    %c0_5 = arith.constant 0 : index
    %c0_6 = arith.constant 0 : index
    %4 = vector.load %arg5[%c0_5, %c0_6] : memref<32x128xf32, #tpu.memory_space<vmem>>, vector<32x128xf32>
    %5 = vector.extract_strided_slice %2 {offsets = [0, 0], sizes = [1, 128], strides = [1, 1]} : vector<8x128xf32> to vector<1x128xf32>
    %6 = vector.broadcast %5 : vector<1x128xf32> to vector<32x128xf32>
    %7 = arith.mulf %6, %3 : vector<32x128xf32>
    %8 = arith.addf %7, %4 : vector<32x128xf32>
    %cst_7 = arith.constant 0.000000e+00 : f32
    %9 = vector.broadcast %cst_7 : f32 to vector<32x128xf32>
    %10 = arith.maximumf %8, %9 : vector<32x128xf32>
    %c0_8 = arith.constant 0 : index
    %c0_9 = arith.constant 0 : index
    %11 = vector.load %arg9[%c0_8, %c0_9] : memref<256x128xf32, #tpu.memory_space<vmem>>, vector<32x128xf32>
    tpu.vector_store %arg9[%c0_8, %c0_9], %10 {strides = array<i32>} : memref<256x128xf32, #tpu.memory_space<vmem>>, vector<32x128xf32>,
    %12 = vector.extract_strided_slice %2 {offsets = [1, 0], sizes = [1, 128], strides = [1, 1]} : vector<8x128xf32> to vector<1x128xf32>
    %13 = vector.broadcast %12 : vector<1x128xf32> to vector<32x128xf32>
    %14 = arith.mulf %13, %3 : vector<32x128xf32>
    %15 = arith.addf %14, %4 : vector<32x128xf32>
    %cst_10 = arith.constant 0.000000e+00 : f32
    %16 = vector.broadcast %cst_10 : f32 to vector<32x128xf32>
    %17 = arith.maximumf %15, %16 : vector<32x128xf32>
    %c32 = arith.constant 32 : index
    %c0_11 = arith.constant 0 : index
    %18 = vector.load %arg9[%c32, %c0_11] : memref<256x128xf32, #tpu.memory_space<vmem>>, vector<32x128xf32>
    tpu.vector_store %arg9[%c32, %c0_11], %17 {strides = array<i32>} : memref<256x128xf32, #tpu.memory_space<vmem>>, vector<32x128xf32>,
    %19 = vector.extract_strided_slice %2 {offsets = [2, 0], sizes = [1, 128], strides = [1, 1]} : vector<8x128xf32> to vector<1x128xf32>
    %20 = vector.broadcast %19 : vector<1x128xf32> to vector<32x128xf32>
    %21 = arith.mulf %20, %3 : vector<32x128xf32>
    %22 = arith.addf %21, %4 : vector<32x128xf32>
    %cst_12 = arith.constant 0.000000e+00 : f32
    %23 = vector.broadcast %cst_12 : f32 to vector<32x128xf32>
    %24 = arith.maximumf %22, %23 : vector<32x128xf32>
    %c64 = arith.constant 64 : index
    %c0_13 = arith.constant 0 : index
    %25 = vector.load %arg9[%c64, %c0_13] : memref<256x128xf32, #tpu.memory_space<vmem>>, vector<32x128xf32>
    tpu.vector_store %arg9[%c64, %c0_13], %24 {strides = array<i32>} : memref<256x128xf32, #tpu.memory_space<vmem>>, vector<32x128xf32>,
    %26 = vector.extract_strided_slice %2 {offsets = [3, 0], sizes = [1, 128], strides = [1, 1]} : vector<8x128xf32> to vector<1x128xf32>
    %27 = vector.broadcast %26 : vector<1x128xf32> to vector<32x128xf32>
    %28 = arith.mulf %27, %3 : vector<32x128xf32>
    %29 = arith.addf %28, %4 : vector<32x128xf32>
    %cst_14 = arith.constant 0.000000e+00 : f32
    %30 = vector.broadcast %cst_14 : f32 to vector<32x128xf32>
    %31 = arith.maximumf %29, %30 : vector<32x128xf32>
    %c96 = arith.constant 96 : index
    %c0_15 = arith.constant 0 : index
    %32 = vector.load %arg9[%c96, %c0_15] : memref<256x128xf32, #tpu.memory_space<vmem>>, vector<32x128xf32>
    tpu.vector_store %arg9[%c96, %c0_15], %31 {strides = array<i32>} : memref<256x128xf32, #tpu.memory_space<vmem>>, vector<32x128xf32>,
    %33 = vector.extract_strided_slice %2 {offsets = [4, 0], sizes = [1, 128], strides = [1, 1]} : vector<8x128xf32> to vector<1x128xf32>
    %34 = vector.broadcast %33 : vector<1x128xf32> to vector<32x128xf32>
    %35 = arith.mulf %34, %3 : vector<32x128xf32>
    %36 = arith.addf %35, %4 : vector<32x128xf32>
    %cst_16 = arith.constant 0.000000e+00 : f32
    %37 = vector.broadcast %cst_16 : f32 to vector<32x128xf32>
    %38 = arith.maximumf %36, %37 : vector<32x128xf32>
    %c128 = arith.constant 128 : index
    %c0_17 = arith.constant 0 : index
    %39 = vector.load %arg9[%c128, %c0_17] : memref<256x128xf32, #tpu.memory_space<vmem>>, vector<32x128xf32>
    tpu.vector_store %arg9[%c128, %c0_17], %38 {strides = array<i32>} : memref<256x128xf32, #tpu.memory_space<vmem>>, vector<32x128xf32>,
    %40 = vector.extract_strided_slice %2 {offsets = [5, 0], sizes = [1, 128], strides = [1, 1]} : vector<8x128xf32> to vector<1x128xf32>
    %41 = vector.broadcast %40 : vector<1x128xf32> to vector<32x128xf32>
    %42 = arith.mulf %41, %3 : vector<32x128xf32>
    %43 = arith.addf %42, %4 : vector<32x128xf32>
    %cst_18 = arith.constant 0.000000e+00 : f32
    %44 = vector.broadcast %cst_18 : f32 to vector<32x128xf32>
    %45 = arith.maximumf %43, %44 : vector<32x128xf32>
    %c160 = arith.constant 160 : index
    %c0_19 = arith.constant 0 : index
    %46 = vector.load %arg9[%c160, %c0_19] : memref<256x128xf32, #tpu.memory_space<vmem>>, vector<32x128xf32>
    tpu.vector_store %arg9[%c160, %c0_19], %45 {strides = array<i32>} : memref<256x128xf32, #tpu.memory_space<vmem>>, vector<32x128xf32>,
    %47 = vector.extract_strided_slice %2 {offsets = [6, 0], sizes = [1, 128], strides = [1, 1]} : vector<8x128xf32> to vector<1x128xf32>
    %48 = vector.broadcast %47 : vector<1x128xf32> to vector<32x128xf32>
    %49 = arith.mulf %48, %3 : vector<32x128xf32>
    %50 = arith.addf %49, %4 : vector<32x128xf32>
    %cst_20 = arith.constant 0.000000e+00 : f32
    %51 = vector.broadcast %cst_20 : f32 to vector<32x128xf32>
    %52 = arith.maximumf %50, %51 : vector<32x128xf32>
    %c192 = arith.constant 192 : index
    %c0_21 = arith.constant 0 : index
    %53 = vector.load %arg9[%c192, %c0_21] : memref<256x128xf32, #tpu.memory_space<vmem>>, vector<32x128xf32>
    tpu.vector_store %arg9[%c192, %c0_21], %52 {strides = array<i32>} : memref<256x128xf32, #tpu.memory_space<vmem>>, vector<32x128xf32>,
    %54 = vector.extract_strided_slice %2 {offsets = [7, 0], sizes = [1, 128], strides = [1, 1]} : vector<8x128xf32> to vector<1x128xf32>
    %55 = vector.broadcast %54 : vector<1x128xf32> to vector<32x128xf32>
    %56 = arith.mulf %55, %3 : vector<32x128xf32>
    %57 = arith.addf %56, %4 : vector<32x128xf32>
    %cst_22 = arith.constant 0.000000e+00 : f32
    %58 = vector.broadcast %cst_22 : f32 to vector<32x128xf32>
    %59 = arith.maximumf %57, %58 : vector<32x128xf32>
    %c224 = arith.constant 224 : index
    %c0_23 = arith.constant 0 : index
    %60 = vector.load %arg9[%c224, %c0_23] : memref<256x128xf32, #tpu.memory_space<vmem>>, vector<32x128xf32>
    tpu.vector_store %arg9[%c224, %c0_23], %59 {strides = array<i32>} : memref<256x128xf32, #tpu.memory_space<vmem>>, vector<32x128xf32>,
    %c0_24 = arith.constant 0 : index
    %c0_25 = arith.constant 0 : index
    %61 = vector.load %arg3[%c0_24, %c0_25] : memref<256x256xf32, #tpu.memory_space<vmem>>, vector<256x256xf32>
    %c0_26 = arith.constant 0 : index
    %c0_27 = arith.constant 0 : index
    %62 = vector.load %arg9[%c0_26, %c0_27] : memref<256x128xf32, #tpu.memory_space<vmem>>, vector<256x128xf32>
    %cst_28 = arith.constant dense<0.000000e+00> : vector<256x128xf32>
    %63 = tpu.matmul %61, %62, %cst_28 {dimension_numbers = #tpu.dot_dimension_numbers<[1], [0], [0], [1], [0, 0, 1, 1], [], []>} : vector<256x256xf32>, vector<256x128xf32>, vector<256x128xf32> -> vector<256x128xf32>
    %c0_29 = arith.constant 0 : index
    %c0_30 = arith.constant 0 : index
    %64 = vector.load %arg10[%c0_29, %c0_30] : memref<256x128xf32, #tpu.memory_space<vmem>>, vector<256x128xf32>
    tpu.vector_store %arg10[%c0_29, %c0_30], %63 {strides = array<i32>} : memref<256x128xf32, #tpu.memory_space<vmem>>, vector<256x128xf32>,
    %c0_31 = arith.constant 0 : index
    %c0_32 = arith.constant 0 : index
    %65 = vector.load %arg7[%c0_31, %c0_32] : memref<32x128xf32, #tpu.memory_space<vmem>>, vector<32x128xf32>
    %c0_33 = arith.constant 0 : index
    %c0_34 = arith.constant 0 : index
    %66 = vector.load %arg10[%c0_33, %c0_34] : memref<256x128xf32, #tpu.memory_space<vmem>>, vector<1x128xf32>
    %c0_35 = arith.constant 0 : index
    %c0_36 = arith.constant 0 : index
    %67 = vector.load %arg6[%c0_35, %c0_36] : memref<1024x128xf32, #tpu.memory_space<vmem>>, vector<32x128xf32>
    %68 = vector.broadcast %66 : vector<1x128xf32> to vector<32x128xf32>
    %69 = arith.mulf %68, %67 : vector<32x128xf32>
    %70 = arith.addf %65, %69 : vector<32x128xf32>
    %c1 = arith.constant 1 : index
    %c0_37 = arith.constant 0 : index
    %71 = vector.load %arg10[%c1, %c0_37] : memref<256x128xf32, #tpu.memory_space<vmem>>, vector<1x128xf32>
    %c32_38 = arith.constant 32 : index
    %c0_39 = arith.constant 0 : index
    %72 = vector.load %arg6[%c32_38, %c0_39] : memref<1024x128xf32, #tpu.memory_space<vmem>>, vector<32x128xf32>
    %73 = vector.broadcast %71 : vector<1x128xf32> to vector<32x128xf32>
    %74 = arith.mulf %73, %72 : vector<32x128xf32>
    %75 = arith.addf %70, %74 : vector<32x128xf32>
    %c2 = arith.constant 2 : index
    %c0_40 = arith.constant 0 : index
    %76 = vector.load %arg10[%c2, %c0_40] : memref<256x128xf32, #tpu.memory_space<vmem>>, vector<1x128xf32>
    %c64_41 = arith.constant 64 : index
    %c0_42 = arith.constant 0 : index
    %77 = vector.load %arg6[%c64_41, %c0_42] : memref<1024x128xf32, #tpu.memory_space<vmem>>, vector<32x128xf32>
    %78 = vector.broadcast %76 : vector<1x128xf32> to vector<32x128xf32>
    %79 = arith.mulf %78, %77 : vector<32x128xf32>
    %80 = arith.addf %75, %79 : vector<32x128xf32>
    %c3 = arith.constant 3 : index
    %c0_43 = arith.constant 0 : index
    %81 = vector.load %arg10[%c3, %c0_43] : memref<256x128xf32, #tpu.memory_space<vmem>>, vector<1x128xf32>
    %c96_44 = arith.constant 96 : index
    %c0_45 = arith.constant 0 : index
    %82 = vector.load %arg6[%c96_44, %c0_45] : memref<1024x128xf32, #tpu.memory_space<vmem>>, vector<32x128xf32>
    %83 = vector.broadcast %81 : vector<1x128xf32> to vector<32x128xf32>
    %84 = arith.mulf %83, %82 : vector<32x128xf32>
    %85 = arith.addf %80, %84 : vector<32x128xf32>
    %c4 = arith.constant 4 : index
    %c0_46 = arith.constant 0 : index
    %86 = vector.load %arg10[%c4, %c0_46] : memref<256x128xf32, #tpu.memory_space<vmem>>, vector<1x128xf32>
    %c128_47 = arith.constant 128 : index
    %c0_48 = arith.constant 0 : index
    %87 = vector.load %arg6[%c128_47, %c0_48] : memref<1024x128xf32, #tpu.memory_space<vmem>>, vector<32x128xf32>
    %88 = vector.broadcast %86 : vector<1x128xf32> to vector<32x128xf32>
    %89 = arith.mulf %88, %87 : vector<32x128xf32>
    %90 = arith.addf %85, %89 : vector<32x128xf32>
    %c5 = arith.constant 5 : index
    %c0_49 = arith.constant 0 : index
    %91 = vector.load %arg10[%c5, %c0_49] : memref<256x128xf32, #tpu.memory_space<vmem>>, vector<1x128xf32>
    %c160_50 = arith.constant 160 : index
    %c0_51 = arith.constant 0 : index
    %92 = vector.load %arg6[%c160_50, %c0_51] : memref<1024x128xf32, #tpu.memory_space<vmem>>, vector<32x128xf32>
    %93 = vector.broadcast %91 : vector<1x128xf32> to vector<32x128xf32>
    %94 = arith.mulf %93, %92 : vector<32x128xf32>
    %95 = arith.addf %90, %94 : vector<32x128xf32>
    %c6 = arith.constant 6 : index
    %c0_52 = arith.constant 0 : index
    %96 = vector.load %arg10[%c6, %c0_52] : memref<256x128xf32, #tpu.memory_space<vmem>>, vector<1x128xf32>
    %c192_53 = arith.constant 192 : index
    %c0_54 = arith.constant 0 : index
    %97 = vector.load %arg6[%c192_53, %c0_54] : memref<1024x128xf32, #tpu.memory_space<vmem>>, vector<32x128xf32>
    %98 = vector.broadcast %96 : vector<1x128xf32> to vector<32x128xf32>
    %99 = arith.mulf %98, %97 : vector<32x128xf32>
    %100 = arith.addf %95, %99 : vector<32x128xf32>
    %c7 = arith.constant 7 : index
    %c0_55 = arith.constant 0 : index
    %101 = vector.load %arg10[%c7, %c0_55] : memref<256x128xf32, #tpu.memory_space<vmem>>, vector<1x128xf32>
    %c224_56 = arith.constant 224 : index
    %c0_57 = arith.constant 0 : index
    %102 = vector.load %arg6[%c224_56, %c0_57] : memref<1024x128xf32, #tpu.memory_space<vmem>>, vector<32x128xf32>
    %103 = vector.broadcast %101 : vector<1x128xf32> to vector<32x128xf32>
    %104 = arith.mulf %103, %102 : vector<32x128xf32>
    %105 = arith.addf %100, %104 : vector<32x128xf32>
    %c8 = arith.constant 8 : index
    %c0_58 = arith.constant 0 : index
    %106 = vector.load %arg10[%c8, %c0_58] : memref<256x128xf32, #tpu.memory_space<vmem>>, vector<1x128xf32>
    %c256 = arith.constant 256 : index
    %c0_59 = arith.constant 0 : index
    %107 = vector.load %arg6[%c256, %c0_59] : memref<1024x128xf32, #tpu.memory_space<vmem>>, vector<32x128xf32>
    %108 = vector.broadcast %106 : vector<1x128xf32> to vector<32x128xf32>
    %109 = arith.mulf %108, %107 : vector<32x128xf32>
    %110 = arith.addf %105, %109 : vector<32x128xf32>
    %c9 = arith.constant 9 : index
    %c0_60 = arith.constant 0 : index
    %111 = vector.load %arg10[%c9, %c0_60] : memref<256x128xf32, #tpu.memory_space<vmem>>, vector<1x128xf32>
    %c288 = arith.constant 288 : index
    %c0_61 = arith.constant 0 : index
    %112 = vector.load %arg6[%c288, %c0_61] : memref<1024x128xf32, #tpu.memory_space<vmem>>, vector<32x128xf32>
    %113 = vector.broadcast %111 : vector<1x128xf32> to vector<32x128xf32>
    %114 = arith.mulf %113, %112 : vector<32x128xf32>
    %115 = arith.addf %110, %114 : vector<32x128xf32>
    %c10 = arith.constant 10 : index
    %c0_62 = arith.constant 0 : index
    %116 = vector.load %arg10[%c10, %c0_62] : memref<256x128xf32, #tpu.memory_space<vmem>>, vector<1x128xf32>
    %c320 = arith.constant 320 : index
    %c0_63 = arith.constant 0 : index
    %117 = vector.load %arg6[%c320, %c0_63] : memref<1024x128xf32, #tpu.memory_space<vmem>>, vector<32x128xf32>
    %118 = vector.broadcast %116 : vector<1x128xf32> to vector<32x128xf32>
    %119 = arith.mulf %118, %117 : vector<32x128xf32>
    %120 = arith.addf %115, %119 : vector<32x128xf32>
    %c11 = arith.constant 11 : index
    %c0_64 = arith.constant 0 : index
    %121 = vector.load %arg10[%c11, %c0_64] : memref<256x128xf32, #tpu.memory_space<vmem>>, vector<1x128xf32>
    %c352 = arith.constant 352 : index
    %c0_65 = arith.constant 0 : index
    %122 = vector.load %arg6[%c352, %c0_65] : memref<1024x128xf32, #tpu.memory_space<vmem>>, vector<32x128xf32>
    %123 = vector.broadcast %121 : vector<1x128xf32> to vector<32x128xf32>
    %124 = arith.mulf %123, %122 : vector<32x128xf32>
    %125 = arith.addf %120, %124 : vector<32x128xf32>
    %c12 = arith.constant 12 : index
    %c0_66 = arith.constant 0 : index
    %126 = vector.load %arg10[%c12, %c0_66] : memref<256x128xf32, #tpu.memory_space<vmem>>, vector<1x128xf32>
    %c384 = arith.constant 384 : index
    %c0_67 = arith.constant 0 : index
    %127 = vector.load %arg6[%c384, %c0_67] : memref<1024x128xf32, #tpu.memory_space<vmem>>, vector<32x128xf32>
    %128 = vector.broadcast %126 : vector<1x128xf32> to vector<32x128xf32>
    %129 = arith.mulf %128, %127 : vector<32x128xf32>
    %130 = arith.addf %125, %129 : vector<32x128xf32>
    %c13 = arith.constant 13 : index
    %c0_68 = arith.constant 0 : index
    %131 = vector.load %arg10[%c13, %c0_68] : memref<256x128xf32, #tpu.memory_space<vmem>>, vector<1x128xf32>
    %c416 = arith.constant 416 : index
    %c0_69 = arith.constant 0 : index
    %132 = vector.load %arg6[%c416, %c0_69] : memref<1024x128xf32, #tpu.memory_space<vmem>>, vector<32x128xf32>
    %133 = vector.broadcast %131 : vector<1x128xf32> to vector<32x128xf32>
    %134 = arith.mulf %133, %132 : vector<32x128xf32>
    %135 = arith.addf %130, %134 : vector<32x128xf32>
    %c14 = arith.constant 14 : index
    %c0_70 = arith.constant 0 : index
    %136 = vector.load %arg10[%c14, %c0_70] : memref<256x128xf32, #tpu.memory_space<vmem>>, vector<1x128xf32>
    %c448 = arith.constant 448 : index
    %c0_71 = arith.constant 0 : index
    %137 = vector.load %arg6[%c448, %c0_71] : memref<1024x128xf32, #tpu.memory_space<vmem>>, vector<32x128xf32>
    %138 = vector.broadcast %136 : vector<1x128xf32> to vector<32x128xf32>
    %139 = arith.mulf %138, %137 : vector<32x128xf32>
    %140 = arith.addf %135, %139 : vector<32x128xf32>
    %c15 = arith.constant 15 : index
    %c0_72 = arith.constant 0 : index
    %141 = vector.load %arg10[%c15, %c0_72] : memref<256x128xf32, #tpu.memory_space<vmem>>, vector<1x128xf32>
    %c480 = arith.constant 480 : index
    %c0_73 = arith.constant 0 : index
    %142 = vector.load %arg6[%c480, %c0_73] : memref<1024x128xf32, #tpu.memory_space<vmem>>, vector<32x128xf32>
    %143 = vector.broadcast %141 : vector<1x128xf32> to vector<32x128xf32>
    %144 = arith.mulf %143, %142 : vector<32x128xf32>
    %145 = arith.addf %140, %144 : vector<32x128xf32>
    %c16 = arith.constant 16 : index
    %c0_74 = arith.constant 0 : index
    %146 = vector.load %arg10[%c16, %c0_74] : memref<256x128xf32, #tpu.memory_space<vmem>>, vector<1x128xf32>
    %c512 = arith.constant 512 : index
    %c0_75 = arith.constant 0 : index
    %147 = vector.load %arg6[%c512, %c0_75] : memref<1024x128xf32, #tpu.memory_space<vmem>>, vector<32x128xf32>
    %148 = vector.broadcast %146 : vector<1x128xf32> to vector<32x128xf32>
    %149 = arith.mulf %148, %147 : vector<32x128xf32>
    %150 = arith.addf %145, %149 : vector<32x128xf32>
    %c17 = arith.constant 17 : index
    %c0_76 = arith.constant 0 : index
    %151 = vector.load %arg10[%c17, %c0_76] : memref<256x128xf32, #tpu.memory_space<vmem>>, vector<1x128xf32>
    %c544 = arith.constant 544 : index
    %c0_77 = arith.constant 0 : index
    %152 = vector.load %arg6[%c544, %c0_77] : memref<1024x128xf32, #tpu.memory_space<vmem>>, vector<32x128xf32>
    %153 = vector.broadcast %151 : vector<1x128xf32> to vector<32x128xf32>
    %154 = arith.mulf %153, %152 : vector<32x128xf32>
    %155 = arith.addf %150, %154 : vector<32x128xf32>
    %c18 = arith.constant 18 : index
    %c0_78 = arith.constant 0 : index
    %156 = vector.load %arg10[%c18, %c0_78] : memref<256x128xf32, #tpu.memory_space<vmem>>, vector<1x128xf32>
    %c576 = arith.constant 576 : index
    %c0_79 = arith.constant 0 : index
    %157 = vector.load %arg6[%c576, %c0_79] : memref<1024x128xf32, #tpu.memory_space<vmem>>, vector<32x128xf32>
    %158 = vector.broadcast %156 : vector<1x128xf32> to vector<32x128xf32>
    %159 = arith.mulf %158, %157 : vector<32x128xf32>
    %160 = arith.addf %155, %159 : vector<32x128xf32>
    %c19 = arith.constant 19 : index
    %c0_80 = arith.constant 0 : index
    %161 = vector.load %arg10[%c19, %c0_80] : memref<256x128xf32, #tpu.memory_space<vmem>>, vector<1x128xf32>
    %c608 = arith.constant 608 : index
    %c0_81 = arith.constant 0 : index
    %162 = vector.load %arg6[%c608, %c0_81] : memref<1024x128xf32, #tpu.memory_space<vmem>>, vector<32x128xf32>
    %163 = vector.broadcast %161 : vector<1x128xf32> to vector<32x128xf32>
    %164 = arith.mulf %163, %162 : vector<32x128xf32>
    %165 = arith.addf %160, %164 : vector<32x128xf32>
    %c20 = arith.constant 20 : index
    %c0_82 = arith.constant 0 : index
    %166 = vector.load %arg10[%c20, %c0_82] : memref<256x128xf32, #tpu.memory_space<vmem>>, vector<1x128xf32>
    %c640 = arith.constant 640 : index
    %c0_83 = arith.constant 0 : index
    %167 = vector.load %arg6[%c640, %c0_83] : memref<1024x128xf32, #tpu.memory_space<vmem>>, vector<32x128xf32>
    %168 = vector.broadcast %166 : vector<1x128xf32> to vector<32x128xf32>
    %169 = arith.mulf %168, %167 : vector<32x128xf32>
    %170 = arith.addf %165, %169 : vector<32x128xf32>
    %c21 = arith.constant 21 : index
    %c0_84 = arith.constant 0 : index
    %171 = vector.load %arg10[%c21, %c0_84] : memref<256x128xf32, #tpu.memory_space<vmem>>, vector<1x128xf32>
    %c672 = arith.constant 672 : index
    %c0_85 = arith.constant 0 : index
    %172 = vector.load %arg6[%c672, %c0_85] : memref<1024x128xf32, #tpu.memory_space<vmem>>, vector<32x128xf32>
    %173 = vector.broadcast %171 : vector<1x128xf32> to vector<32x128xf32>
    %174 = arith.mulf %173, %172 : vector<32x128xf32>
    %175 = arith.addf %170, %174 : vector<32x128xf32>
    %c22 = arith.constant 22 : index
    %c0_86 = arith.constant 0 : index
    %176 = vector.load %arg10[%c22, %c0_86] : memref<256x128xf32, #tpu.memory_space<vmem>>, vector<1x128xf32>
    %c704 = arith.constant 704 : index
    %c0_87 = arith.constant 0 : index
    %177 = vector.load %arg6[%c704, %c0_87] : memref<1024x128xf32, #tpu.memory_space<vmem>>, vector<32x128xf32>
    %178 = vector.broadcast %176 : vector<1x128xf32> to vector<32x128xf32>
    %179 = arith.mulf %178, %177 : vector<32x128xf32>
    %180 = arith.addf %175, %179 : vector<32x128xf32>
    %c23 = arith.constant 23 : index
    %c0_88 = arith.constant 0 : index
    %181 = vector.load %arg10[%c23, %c0_88] : memref<256x128xf32, #tpu.memory_space<vmem>>, vector<1x128xf32>
    %c736 = arith.constant 736 : index
    %c0_89 = arith.constant 0 : index
    %182 = vector.load %arg6[%c736, %c0_89] : memref<1024x128xf32, #tpu.memory_space<vmem>>, vector<32x128xf32>
    %183 = vector.broadcast %181 : vector<1x128xf32> to vector<32x128xf32>
    %184 = arith.mulf %183, %182 : vector<32x128xf32>
    %185 = arith.addf %180, %184 : vector<32x128xf32>
    %c24 = arith.constant 24 : index
    %c0_90 = arith.constant 0 : index
    %186 = vector.load %arg10[%c24, %c0_90] : memref<256x128xf32, #tpu.memory_space<vmem>>, vector<1x128xf32>
    %c768 = arith.constant 768 : index
    %c0_91 = arith.constant 0 : index
    %187 = vector.load %arg6[%c768, %c0_91] : memref<1024x128xf32, #tpu.memory_space<vmem>>, vector<32x128xf32>
    %188 = vector.broadcast %186 : vector<1x128xf32> to vector<32x128xf32>
    %189 = arith.mulf %188, %187 : vector<32x128xf32>
    %190 = arith.addf %185, %189 : vector<32x128xf32>
    %c25 = arith.constant 25 : index
    %c0_92 = arith.constant 0 : index
    %191 = vector.load %arg10[%c25, %c0_92] : memref<256x128xf32, #tpu.memory_space<vmem>>, vector<1x128xf32>
    %c800 = arith.constant 800 : index
    %c0_93 = arith.constant 0 : index
    %192 = vector.load %arg6[%c800, %c0_93] : memref<1024x128xf32, #tpu.memory_space<vmem>>, vector<32x128xf32>
    %193 = vector.broadcast %191 : vector<1x128xf32> to vector<32x128xf32>
    %194 = arith.mulf %193, %192 : vector<32x128xf32>
    %195 = arith.addf %190, %194 : vector<32x128xf32>
    %c26 = arith.constant 26 : index
    %c0_94 = arith.constant 0 : index
    %196 = vector.load %arg10[%c26, %c0_94] : memref<256x128xf32, #tpu.memory_space<vmem>>, vector<1x128xf32>
    %c832 = arith.constant 832 : index
    %c0_95 = arith.constant 0 : index
    %197 = vector.load %arg6[%c832, %c0_95] : memref<1024x128xf32, #tpu.memory_space<vmem>>, vector<32x128xf32>
    %198 = vector.broadcast %196 : vector<1x128xf32> to vector<32x128xf32>
    %199 = arith.mulf %198, %197 : vector<32x128xf32>
    %200 = arith.addf %195, %199 : vector<32x128xf32>
    %c27 = arith.constant 27 : index
    %c0_96 = arith.constant 0 : index
    %201 = vector.load %arg10[%c27, %c0_96] : memref<256x128xf32, #tpu.memory_space<vmem>>, vector<1x128xf32>
    %c864 = arith.constant 864 : index
    %c0_97 = arith.constant 0 : index
    %202 = vector.load %arg6[%c864, %c0_97] : memref<1024x128xf32, #tpu.memory_space<vmem>>, vector<32x128xf32>
    %203 = vector.broadcast %201 : vector<1x128xf32> to vector<32x128xf32>
    %204 = arith.mulf %203, %202 : vector<32x128xf32>
    %205 = arith.addf %200, %204 : vector<32x128xf32>
    %c28 = arith.constant 28 : index
    %c0_98 = arith.constant 0 : index
    %206 = vector.load %arg10[%c28, %c0_98] : memref<256x128xf32, #tpu.memory_space<vmem>>, vector<1x128xf32>
    %c896 = arith.constant 896 : index
    %c0_99 = arith.constant 0 : index
    %207 = vector.load %arg6[%c896, %c0_99] : memref<1024x128xf32, #tpu.memory_space<vmem>>, vector<32x128xf32>
    %208 = vector.broadcast %206 : vector<1x128xf32> to vector<32x128xf32>
    %209 = arith.mulf %208, %207 : vector<32x128xf32>
    %210 = arith.addf %205, %209 : vector<32x128xf32>
    %c29 = arith.constant 29 : index
    %c0_100 = arith.constant 0 : index
    %211 = vector.load %arg10[%c29, %c0_100] : memref<256x128xf32, #tpu.memory_space<vmem>>, vector<1x128xf32>
    %c928 = arith.constant 928 : index
    %c0_101 = arith.constant 0 : index
    %212 = vector.load %arg6[%c928, %c0_101] : memref<1024x128xf32, #tpu.memory_space<vmem>>, vector<32x128xf32>
    %213 = vector.broadcast %211 : vector<1x128xf32> to vector<32x128xf32>
    %214 = arith.mulf %213, %212 : vector<32x128xf32>
    %215 = arith.addf %210, %214 : vector<32x128xf32>
    %c30 = arith.constant 30 : index
    %c0_102 = arith.constant 0 : index
    %216 = vector.load %arg10[%c30, %c0_102] : memref<256x128xf32, #tpu.memory_space<vmem>>, vector<1x128xf32>
    %c960 = arith.constant 960 : index
    %c0_103 = arith.constant 0 : index
    %217 = vector.load %arg6[%c960, %c0_103] : memref<1024x128xf32, #tpu.memory_space<vmem>>, vector<32x128xf32>
    %218 = vector.broadcast %216 : vector<1x128xf32> to vector<32x128xf32>
    %219 = arith.mulf %218, %217 : vector<32x128xf32>
    %220 = arith.addf %215, %219 : vector<32x128xf32>
    %c31 = arith.constant 31 : index
    %c0_104 = arith.constant 0 : index
    %221 = vector.load %arg10[%c31, %c0_104] : memref<256x128xf32, #tpu.memory_space<vmem>>, vector<1x128xf32>
    %c992 = arith.constant 992 : index
    %c0_105 = arith.constant 0 : index
    %222 = vector.load %arg6[%c992, %c0_105] : memref<1024x128xf32, #tpu.memory_space<vmem>>, vector<32x128xf32>
    %223 = vector.broadcast %221 : vector<1x128xf32> to vector<32x128xf32>
    %224 = arith.mulf %223, %222 : vector<32x128xf32>
    %225 = arith.addf %220, %224 : vector<32x128xf32>
    %cst_106 = arith.constant 0.000000e+00 : f32
    %226 = vector.broadcast %cst_106 : f32 to vector<32x128xf32>
    %227 = arith.maximumf %225, %226 : vector<32x128xf32>
    %c0_107 = arith.constant 0 : index
    %c0_108 = arith.constant 0 : index
    %228 = vector.load %arg8[%c0_107, %c0_108] : memref<256x128xf32, #tpu.memory_space<vmem>>, vector<32x128xf32>
    tpu.vector_store %arg8[%c0_107, %c0_108], %227 {strides = array<i32>} : memref<256x128xf32, #tpu.memory_space<vmem>>, vector<32x128xf32>,
    %c32_109 = arith.constant 32 : index
    %c0_110 = arith.constant 0 : index
    %229 = vector.load %arg10[%c32_109, %c0_110] : memref<256x128xf32, #tpu.memory_space<vmem>>, vector<1x128xf32>
    %c0_111 = arith.constant 0 : index
    %c0_112 = arith.constant 0 : index
    %230 = vector.load %arg6[%c0_111, %c0_112] : memref<1024x128xf32, #tpu.memory_space<vmem>>, vector<32x128xf32>
    %231 = vector.broadcast %229 : vector<1x128xf32> to vector<32x128xf32>
    %232 = arith.mulf %231, %230 : vector<32x128xf32>
    %233 = arith.addf %65, %232 : vector<32x128xf32>
    %c33 = arith.constant 33 : index
    %c0_113 = arith.constant 0 : index
    %234 = vector.load %arg10[%c33, %c0_113] : memref<256x128xf32, #tpu.memory_space<vmem>>, vector<1x128xf32>
    %c32_114 = arith.constant 32 : index
    %c0_115 = arith.constant 0 : index
    %235 = vector.load %arg6[%c32_114, %c0_115] : memref<1024x128xf32, #tpu.memory_space<vmem>>, vector<32x128xf32>
    %236 = vector.broadcast %234 : vector<1x128xf32> to vector<32x128xf32>
    %237 = arith.mulf %236, %235 : vector<32x128xf32>
    %238 = arith.addf %233, %237 : vector<32x128xf32>
    %c34 = arith.constant 34 : index
    %c0_116 = arith.constant 0 : index
    %239 = vector.load %arg10[%c34, %c0_116] : memref<256x128xf32, #tpu.memory_space<vmem>>, vector<1x128xf32>
    %c64_117 = arith.constant 64 : index
    %c0_118 = arith.constant 0 : index
    %240 = vector.load %arg6[%c64_117, %c0_118] : memref<1024x128xf32, #tpu.memory_space<vmem>>, vector<32x128xf32>
    %241 = vector.broadcast %239 : vector<1x128xf32> to vector<32x128xf32>
    %242 = arith.mulf %241, %240 : vector<32x128xf32>
    %243 = arith.addf %238, %242 : vector<32x128xf32>
    %c35 = arith.constant 35 : index
    %c0_119 = arith.constant 0 : index
    %244 = vector.load %arg10[%c35, %c0_119] : memref<256x128xf32, #tpu.memory_space<vmem>>, vector<1x128xf32>
    %c96_120 = arith.constant 96 : index
    %c0_121 = arith.constant 0 : index
    %245 = vector.load %arg6[%c96_120, %c0_121] : memref<1024x128xf32, #tpu.memory_space<vmem>>, vector<32x128xf32>
    %246 = vector.broadcast %244 : vector<1x128xf32> to vector<32x128xf32>
    %247 = arith.mulf %246, %245 : vector<32x128xf32>
    %248 = arith.addf %243, %247 : vector<32x128xf32>
    %c36 = arith.constant 36 : index
    %c0_122 = arith.constant 0 : index
    %249 = vector.load %arg10[%c36, %c0_122] : memref<256x128xf32, #tpu.memory_space<vmem>>, vector<1x128xf32>
    %c128_123 = arith.constant 128 : index
    %c0_124 = arith.constant 0 : index
    %250 = vector.load %arg6[%c128_123, %c0_124] : memref<1024x128xf32, #tpu.memory_space<vmem>>, vector<32x128xf32>
    %251 = vector.broadcast %249 : vector<1x128xf32> to vector<32x128xf32>
    %252 = arith.mulf %251, %250 : vector<32x128xf32>
    %253 = arith.addf %248, %252 : vector<32x128xf32>
    %c37 = arith.constant 37 : index
    %c0_125 = arith.constant 0 : index
    %254 = vector.load %arg10[%c37, %c0_125] : memref<256x128xf32, #tpu.memory_space<vmem>>, vector<1x128xf32>
    %c160_126 = arith.constant 160 : index
    %c0_127 = arith.constant 0 : index
    %255 = vector.load %arg6[%c160_126, %c0_127] : memref<1024x128xf32, #tpu.memory_space<vmem>>, vector<32x128xf32>
    %256 = vector.broadcast %254 : vector<1x128xf32> to vector<32x128xf32>
    %257 = arith.mulf %256, %255 : vector<32x128xf32>
    %258 = arith.addf %253, %257 : vector<32x128xf32>
    %c38 = arith.constant 38 : index
    %c0_128 = arith.constant 0 : index
    %259 = vector.load %arg10[%c38, %c0_128] : memref<256x128xf32, #tpu.memory_space<vmem>>, vector<1x128xf32>
    %c192_129 = arith.constant 192 : index
    %c0_130 = arith.constant 0 : index
    %260 = vector.load %arg6[%c192_129, %c0_130] : memref<1024x128xf32, #tpu.memory_space<vmem>>, vector<32x128xf32>
    %261 = vector.broadcast %259 : vector<1x128xf32> to vector<32x128xf32>
    %262 = arith.mulf %261, %260 : vector<32x128xf32>
    %263 = arith.addf %258, %262 : vector<32x128xf32>
    %c39 = arith.constant 39 : index
    %c0_131 = arith.constant 0 : index
    %264 = vector.load %arg10[%c39, %c0_131] : memref<256x128xf32, #tpu.memory_space<vmem>>, vector<1x128xf32>
    %c224_132 = arith.constant 224 : index
    %c0_133 = arith.constant 0 : index
    %265 = vector.load %arg6[%c224_132, %c0_133] : memref<1024x128xf32, #tpu.memory_space<vmem>>, vector<32x128xf32>
    %266 = vector.broadcast %264 : vector<1x128xf32> to vector<32x128xf32>
    %267 = arith.mulf %266, %265 : vector<32x128xf32>
    %268 = arith.addf %263, %267 : vector<32x128xf32>
    %c40 = arith.constant 40 : index
    %c0_134 = arith.constant 0 : index
    %269 = vector.load %arg10[%c40, %c0_134] : memref<256x128xf32, #tpu.memory_space<vmem>>, vector<1x128xf32>
    %c256_135 = arith.constant 256 : index
    %c0_136 = arith.constant 0 : index
    %270 = vector.load %arg6[%c256_135, %c0_136] : memref<1024x128xf32, #tpu.memory_space<vmem>>, vector<32x128xf32>
    %271 = vector.broadcast %269 : vector<1x128xf32> to vector<32x128xf32>
    %272 = arith.mulf %271, %270 : vector<32x128xf32>
    %273 = arith.addf %268, %272 : vector<32x128xf32>
    %c41 = arith.constant 41 : index
    %c0_137 = arith.constant 0 : index
    %274 = vector.load %arg10[%c41, %c0_137] : memref<256x128xf32, #tpu.memory_space<vmem>>, vector<1x128xf32>
    %c288_138 = arith.constant 288 : index
    %c0_139 = arith.constant 0 : index
    %275 = vector.load %arg6[%c288_138, %c0_139] : memref<1024x128xf32, #tpu.memory_space<vmem>>, vector<32x128xf32>
    %276 = vector.broadcast %274 : vector<1x128xf32> to vector<32x128xf32>
    %277 = arith.mulf %276, %275 : vector<32x128xf32>
    %278 = arith.addf %273, %277 : vector<32x128xf32>
    %c42 = arith.constant 42 : index
    %c0_140 = arith.constant 0 : index
    %279 = vector.load %arg10[%c42, %c0_140] : memref<256x128xf32, #tpu.memory_space<vmem>>, vector<1x128xf32>
    %c320_141 = arith.constant 320 : index
    %c0_142 = arith.constant 0 : index
    %280 = vector.load %arg6[%c320_141, %c0_142] : memref<1024x128xf32, #tpu.memory_space<vmem>>, vector<32x128xf32>
    %281 = vector.broadcast %279 : vector<1x128xf32> to vector<32x128xf32>
    %282 = arith.mulf %281, %280 : vector<32x128xf32>
    %283 = arith.addf %278, %282 : vector<32x128xf32>
    %c43 = arith.constant 43 : index
    %c0_143 = arith.constant 0 : index
    %284 = vector.load %arg10[%c43, %c0_143] : memref<256x128xf32, #tpu.memory_space<vmem>>, vector<1x128xf32>
    %c352_144 = arith.constant 352 : index
    %c0_145 = arith.constant 0 : index
    %285 = vector.load %arg6[%c352_144, %c0_145] : memref<1024x128xf32, #tpu.memory_space<vmem>>, vector<32x128xf32>
    %286 = vector.broadcast %284 : vector<1x128xf32> to vector<32x128xf32>
    %287 = arith.mulf %286, %285 : vector<32x128xf32>
    %288 = arith.addf %283, %287 : vector<32x128xf32>
    %c44 = arith.constant 44 : index
    %c0_146 = arith.constant 0 : index
    %289 = vector.load %arg10[%c44, %c0_146] : memref<256x128xf32, #tpu.memory_space<vmem>>, vector<1x128xf32>
    %c384_147 = arith.constant 384 : index
    %c0_148 = arith.constant 0 : index
    %290 = vector.load %arg6[%c384_147, %c0_148] : memref<1024x128xf32, #tpu.memory_space<vmem>>, vector<32x128xf32>
    %291 = vector.broadcast %289 : vector<1x128xf32> to vector<32x128xf32>
    %292 = arith.mulf %291, %290 : vector<32x128xf32>
    %293 = arith.addf %288, %292 : vector<32x128xf32>
    %c45 = arith.constant 45 : index
    %c0_149 = arith.constant 0 : index
    %294 = vector.load %arg10[%c45, %c0_149] : memref<256x128xf32, #tpu.memory_space<vmem>>, vector<1x128xf32>
    %c416_150 = arith.constant 416 : index
    %c0_151 = arith.constant 0 : index
    %295 = vector.load %arg6[%c416_150, %c0_151] : memref<1024x128xf32, #tpu.memory_space<vmem>>, vector<32x128xf32>
    %296 = vector.broadcast %294 : vector<1x128xf32> to vector<32x128xf32>
    %297 = arith.mulf %296, %295 : vector<32x128xf32>
    %298 = arith.addf %293, %297 : vector<32x128xf32>
    %c46 = arith.constant 46 : index
    %c0_152 = arith.constant 0 : index
    %299 = vector.load %arg10[%c46, %c0_152] : memref<256x128xf32, #tpu.memory_space<vmem>>, vector<1x128xf32>
    %c448_153 = arith.constant 448 : index
    %c0_154 = arith.constant 0 : index
    %300 = vector.load %arg6[%c448_153, %c0_154] : memref<1024x128xf32, #tpu.memory_space<vmem>>, vector<32x128xf32>
    %301 = vector.broadcast %299 : vector<1x128xf32> to vector<32x128xf32>
    %302 = arith.mulf %301, %300 : vector<32x128xf32>
    %303 = arith.addf %298, %302 : vector<32x128xf32>
    %c47 = arith.constant 47 : index
    %c0_155 = arith.constant 0 : index
    %304 = vector.load %arg10[%c47, %c0_155] : memref<256x128xf32, #tpu.memory_space<vmem>>, vector<1x128xf32>
    %c480_156 = arith.constant 480 : index
    %c0_157 = arith.constant 0 : index
    %305 = vector.load %arg6[%c480_156, %c0_157] : memref<1024x128xf32, #tpu.memory_space<vmem>>, vector<32x128xf32>
    %306 = vector.broadcast %304 : vector<1x128xf32> to vector<32x128xf32>
    %307 = arith.mulf %306, %305 : vector<32x128xf32>
    %308 = arith.addf %303, %307 : vector<32x128xf32>
    %c48 = arith.constant 48 : index
    %c0_158 = arith.constant 0 : index
    %309 = vector.load %arg10[%c48, %c0_158] : memref<256x128xf32, #tpu.memory_space<vmem>>, vector<1x128xf32>
    %c512_159 = arith.constant 512 : index
    %c0_160 = arith.constant 0 : index
    %310 = vector.load %arg6[%c512_159, %c0_160] : memref<1024x128xf32, #tpu.memory_space<vmem>>, vector<32x128xf32>
    %311 = vector.broadcast %309 : vector<1x128xf32> to vector<32x128xf32>
    %312 = arith.mulf %311, %310 : vector<32x128xf32>
    %313 = arith.addf %308, %312 : vector<32x128xf32>
    %c49 = arith.constant 49 : index
    %c0_161 = arith.constant 0 : index
    %314 = vector.load %arg10[%c49, %c0_161] : memref<256x128xf32, #tpu.memory_space<vmem>>, vector<1x128xf32>
    %c544_162 = arith.constant 544 : index
    %c0_163 = arith.constant 0 : index
    %315 = vector.load %arg6[%c544_162, %c0_163] : memref<1024x128xf32, #tpu.memory_space<vmem>>, vector<32x128xf32>
    %316 = vector.broadcast %314 : vector<1x128xf32> to vector<32x128xf32>
    %317 = arith.mulf %316, %315 : vector<32x128xf32>
    %318 = arith.addf %313, %317 : vector<32x128xf32>
    %c50 = arith.constant 50 : index
    %c0_164 = arith.constant 0 : index
    %319 = vector.load %arg10[%c50, %c0_164] : memref<256x128xf32, #tpu.memory_space<vmem>>, vector<1x128xf32>
    %c576_165 = arith.constant 576 : index
    %c0_166 = arith.constant 0 : index
    %320 = vector.load %arg6[%c576_165, %c0_166] : memref<1024x128xf32, #tpu.memory_space<vmem>>, vector<32x128xf32>
    %321 = vector.broadcast %319 : vector<1x128xf32> to vector<32x128xf32>
    %322 = arith.mulf %321, %320 : vector<32x128xf32>
    %323 = arith.addf %318, %322 : vector<32x128xf32>
    %c51 = arith.constant 51 : index
    %c0_167 = arith.constant 0 : index
    %324 = vector.load %arg10[%c51, %c0_167] : memref<256x128xf32, #tpu.memory_space<vmem>>, vector<1x128xf32>
    %c608_168 = arith.constant 608 : index
    %c0_169 = arith.constant 0 : index
    %325 = vector.load %arg6[%c608_168, %c0_169] : memref<1024x128xf32, #tpu.memory_space<vmem>>, vector<32x128xf32>
    %326 = vector.broadcast %324 : vector<1x128xf32> to vector<32x128xf32>
    %327 = arith.mulf %326, %325 : vector<32x128xf32>
    %328 = arith.addf %323, %327 : vector<32x128xf32>
    %c52 = arith.constant 52 : index
    %c0_170 = arith.constant 0 : index
    %329 = vector.load %arg10[%c52, %c0_170] : memref<256x128xf32, #tpu.memory_space<vmem>>, vector<1x128xf32>
    %c640_171 = arith.constant 640 : index
    %c0_172 = arith.constant 0 : index
    %330 = vector.load %arg6[%c640_171, %c0_172] : memref<1024x128xf32, #tpu.memory_space<vmem>>, vector<32x128xf32>
    %331 = vector.broadcast %329 : vector<1x128xf32> to vector<32x128xf32>
    %332 = arith.mulf %331, %330 : vector<32x128xf32>
    %333 = arith.addf %328, %332 : vector<32x128xf32>
    %c53 = arith.constant 53 : index
    %c0_173 = arith.constant 0 : index
    %334 = vector.load %arg10[%c53, %c0_173] : memref<256x128xf32, #tpu.memory_space<vmem>>, vector<1x128xf32>
    %c672_174 = arith.constant 672 : index
    %c0_175 = arith.constant 0 : index
    %335 = vector.load %arg6[%c672_174, %c0_175] : memref<1024x128xf32, #tpu.memory_space<vmem>>, vector<32x128xf32>
    %336 = vector.broadcast %334 : vector<1x128xf32> to vector<32x128xf32>
    %337 = arith.mulf %336, %335 : vector<32x128xf32>
    %338 = arith.addf %333, %337 : vector<32x128xf32>
    %c54 = arith.constant 54 : index
    %c0_176 = arith.constant 0 : index
    %339 = vector.load %arg10[%c54, %c0_176] : memref<256x128xf32, #tpu.memory_space<vmem>>, vector<1x128xf32>
    %c704_177 = arith.constant 704 : index
    %c0_178 = arith.constant 0 : index
    %340 = vector.load %arg6[%c704_177, %c0_178] : memref<1024x128xf32, #tpu.memory_space<vmem>>, vector<32x128xf32>
    %341 = vector.broadcast %339 : vector<1x128xf32> to vector<32x128xf32>
    %342 = arith.mulf %341, %340 : vector<32x128xf32>
    %343 = arith.addf %338, %342 : vector<32x128xf32>
    %c55 = arith.constant 55 : index
    %c0_179 = arith.constant 0 : index
    %344 = vector.load %arg10[%c55, %c0_179] : memref<256x128xf32, #tpu.memory_space<vmem>>, vector<1x128xf32>
    %c736_180 = arith.constant 736 : index
    %c0_181 = arith.constant 0 : index
    %345 = vector.load %arg6[%c736_180, %c0_181] : memref<1024x128xf32, #tpu.memory_space<vmem>>, vector<32x128xf32>
    %346 = vector.broadcast %344 : vector<1x128xf32> to vector<32x128xf32>
    %347 = arith.mulf %346, %345 : vector<32x128xf32>
    %348 = arith.addf %343, %347 : vector<32x128xf32>
    %c56 = arith.constant 56 : index
    %c0_182 = arith.constant 0 : index
    %349 = vector.load %arg10[%c56, %c0_182] : memref<256x128xf32, #tpu.memory_space<vmem>>, vector<1x128xf32>
    %c768_183 = arith.constant 768 : index
    %c0_184 = arith.constant 0 : index
    %350 = vector.load %arg6[%c768_183, %c0_184] : memref<1024x128xf32, #tpu.memory_space<vmem>>, vector<32x128xf32>
    %351 = vector.broadcast %349 : vector<1x128xf32> to vector<32x128xf32>
    %352 = arith.mulf %351, %350 : vector<32x128xf32>
    %353 = arith.addf %348, %352 : vector<32x128xf32>
    %c57 = arith.constant 57 : index
    %c0_185 = arith.constant 0 : index
    %354 = vector.load %arg10[%c57, %c0_185] : memref<256x128xf32, #tpu.memory_space<vmem>>, vector<1x128xf32>
    %c800_186 = arith.constant 800 : index
    %c0_187 = arith.constant 0 : index
    %355 = vector.load %arg6[%c800_186, %c0_187] : memref<1024x128xf32, #tpu.memory_space<vmem>>, vector<32x128xf32>
    %356 = vector.broadcast %354 : vector<1x128xf32> to vector<32x128xf32>
    %357 = arith.mulf %356, %355 : vector<32x128xf32>
    %358 = arith.addf %353, %357 : vector<32x128xf32>
    %c58 = arith.constant 58 : index
    %c0_188 = arith.constant 0 : index
    %359 = vector.load %arg10[%c58, %c0_188] : memref<256x128xf32, #tpu.memory_space<vmem>>, vector<1x128xf32>
    %c832_189 = arith.constant 832 : index
    %c0_190 = arith.constant 0 : index
    %360 = vector.load %arg6[%c832_189, %c0_190] : memref<1024x128xf32, #tpu.memory_space<vmem>>, vector<32x128xf32>
    %361 = vector.broadcast %359 : vector<1x128xf32> to vector<32x128xf32>
    %362 = arith.mulf %361, %360 : vector<32x128xf32>
    %363 = arith.addf %358, %362 : vector<32x128xf32>
    %c59 = arith.constant 59 : index
    %c0_191 = arith.constant 0 : index
    %364 = vector.load %arg10[%c59, %c0_191] : memref<256x128xf32, #tpu.memory_space<vmem>>, vector<1x128xf32>
    %c864_192 = arith.constant 864 : index
    %c0_193 = arith.constant 0 : index
    %365 = vector.load %arg6[%c864_192, %c0_193] : memref<1024x128xf32, #tpu.memory_space<vmem>>, vector<32x128xf32>
    %366 = vector.broadcast %364 : vector<1x128xf32> to vector<32x128xf32>
    %367 = arith.mulf %366, %365 : vector<32x128xf32>
    %368 = arith.addf %363, %367 : vector<32x128xf32>
    %c60 = arith.constant 60 : index
    %c0_194 = arith.constant 0 : index
    %369 = vector.load %arg10[%c60, %c0_194] : memref<256x128xf32, #tpu.memory_space<vmem>>, vector<1x128xf32>
    %c896_195 = arith.constant 896 : index
    %c0_196 = arith.constant 0 : index
    %370 = vector.load %arg6[%c896_195, %c0_196] : memref<1024x128xf32, #tpu.memory_space<vmem>>, vector<32x128xf32>
    %371 = vector.broadcast %369 : vector<1x128xf32> to vector<32x128xf32>
    %372 = arith.mulf %371, %370 : vector<32x128xf32>
    %373 = arith.addf %368, %372 : vector<32x128xf32>
    %c61 = arith.constant 61 : index
    %c0_197 = arith.constant 0 : index
    %374 = vector.load %arg10[%c61, %c0_197] : memref<256x128xf32, #tpu.memory_space<vmem>>, vector<1x128xf32>
    %c928_198 = arith.constant 928 : index
    %c0_199 = arith.constant 0 : index
    %375 = vector.load %arg6[%c928_198, %c0_199] : memref<1024x128xf32, #tpu.memory_space<vmem>>, vector<32x128xf32>
    %376 = vector.broadcast %374 : vector<1x128xf32> to vector<32x128xf32>
    %377 = arith.mulf %376, %375 : vector<32x128xf32>
    %378 = arith.addf %373, %377 : vector<32x128xf32>
    %c62 = arith.constant 62 : index
    %c0_200 = arith.constant 0 : index
    %379 = vector.load %arg10[%c62, %c0_200] : memref<256x128xf32, #tpu.memory_space<vmem>>, vector<1x128xf32>
    %c960_201 = arith.constant 960 : index
    %c0_202 = arith.constant 0 : index
    %380 = vector.load %arg6[%c960_201, %c0_202] : memref<1024x128xf32, #tpu.memory_space<vmem>>, vector<32x128xf32>
    %381 = vector.broadcast %379 : vector<1x128xf32> to vector<32x128xf32>
    %382 = arith.mulf %381, %380 : vector<32x128xf32>
    %383 = arith.addf %378, %382 : vector<32x128xf32>
    %c63 = arith.constant 63 : index
    %c0_203 = arith.constant 0 : index
    %384 = vector.load %arg10[%c63, %c0_203] : memref<256x128xf32, #tpu.memory_space<vmem>>, vector<1x128xf32>
    %c992_204 = arith.constant 992 : index
    %c0_205 = arith.constant 0 : index
    %385 = vector.load %arg6[%c992_204, %c0_205] : memref<1024x128xf32, #tpu.memory_space<vmem>>, vector<32x128xf32>
    %386 = vector.broadcast %384 : vector<1x128xf32> to vector<32x128xf32>
    %387 = arith.mulf %386, %385 : vector<32x128xf32>
    %388 = arith.addf %383, %387 : vector<32x128xf32>
    %cst_206 = arith.constant 0.000000e+00 : f32
    %389 = vector.broadcast %cst_206 : f32 to vector<32x128xf32>
    %390 = arith.maximumf %388, %389 : vector<32x128xf32>
    %c32_207 = arith.constant 32 : index
    %c0_208 = arith.constant 0 : index
    %391 = vector.load %arg8[%c32_207, %c0_208] : memref<256x128xf32, #tpu.memory_space<vmem>>, vector<32x128xf32>
    tpu.vector_store %arg8[%c32_207, %c0_208], %390 {strides = array<i32>} : memref<256x128xf32, #tpu.memory_space<vmem>>, vector<32x128xf32>,
    %c64_209 = arith.constant 64 : index
    %c0_210 = arith.constant 0 : index
    %392 = vector.load %arg10[%c64_209, %c0_210] : memref<256x128xf32, #tpu.memory_space<vmem>>, vector<1x128xf32>
    %c0_211 = arith.constant 0 : index
    %c0_212 = arith.constant 0 : index
    %393 = vector.load %arg6[%c0_211, %c0_212] : memref<1024x128xf32, #tpu.memory_space<vmem>>, vector<32x128xf32>
    %394 = vector.broadcast %392 : vector<1x128xf32> to vector<32x128xf32>
    %395 = arith.mulf %394, %393 : vector<32x128xf32>
    %396 = arith.addf %65, %395 : vector<32x128xf32>
    %c65 = arith.constant 65 : index
    %c0_213 = arith.constant 0 : index
    %397 = vector.load %arg10[%c65, %c0_213] : memref<256x128xf32, #tpu.memory_space<vmem>>, vector<1x128xf32>
    %c32_214 = arith.constant 32 : index
    %c0_215 = arith.constant 0 : index
    %398 = vector.load %arg6[%c32_214, %c0_215] : memref<1024x128xf32, #tpu.memory_space<vmem>>, vector<32x128xf32>
    %399 = vector.broadcast %397 : vector<1x128xf32> to vector<32x128xf32>
    %400 = arith.mulf %399, %398 : vector<32x128xf32>
    %401 = arith.addf %396, %400 : vector<32x128xf32>
    %c66 = arith.constant 66 : index
    %c0_216 = arith.constant 0 : index
    %402 = vector.load %arg10[%c66, %c0_216] : memref<256x128xf32, #tpu.memory_space<vmem>>, vector<1x128xf32>
    %c64_217 = arith.constant 64 : index
    %c0_218 = arith.constant 0 : index
    %403 = vector.load %arg6[%c64_217, %c0_218] : memref<1024x128xf32, #tpu.memory_space<vmem>>, vector<32x128xf32>
    %404 = vector.broadcast %402 : vector<1x128xf32> to vector<32x128xf32>
    %405 = arith.mulf %404, %403 : vector<32x128xf32>
    %406 = arith.addf %401, %405 : vector<32x128xf32>
    %c67 = arith.constant 67 : index
    %c0_219 = arith.constant 0 : index
    %407 = vector.load %arg10[%c67, %c0_219] : memref<256x128xf32, #tpu.memory_space<vmem>>, vector<1x128xf32>
    %c96_220 = arith.constant 96 : index
    %c0_221 = arith.constant 0 : index
    %408 = vector.load %arg6[%c96_220, %c0_221] : memref<1024x128xf32, #tpu.memory_space<vmem>>, vector<32x128xf32>
    %409 = vector.broadcast %407 : vector<1x128xf32> to vector<32x128xf32>
    %410 = arith.mulf %409, %408 : vector<32x128xf32>
    %411 = arith.addf %406, %410 : vector<32x128xf32>
    %c68 = arith.constant 68 : index
    %c0_222 = arith.constant 0 : index
    %412 = vector.load %arg10[%c68, %c0_222] : memref<256x128xf32, #tpu.memory_space<vmem>>, vector<1x128xf32>
    %c128_223 = arith.constant 128 : index
    %c0_224 = arith.constant 0 : index
    %413 = vector.load %arg6[%c128_223, %c0_224] : memref<1024x128xf32, #tpu.memory_space<vmem>>, vector<32x128xf32>
    %414 = vector.broadcast %412 : vector<1x128xf32> to vector<32x128xf32>
    %415 = arith.mulf %414, %413 : vector<32x128xf32>
    %416 = arith.addf %411, %415 : vector<32x128xf32>
    %c69 = arith.constant 69 : index
    %c0_225 = arith.constant 0 : index
    %417 = vector.load %arg10[%c69, %c0_225] : memref<256x128xf32, #tpu.memory_space<vmem>>, vector<1x128xf32>
    %c160_226 = arith.constant 160 : index
    %c0_227 = arith.constant 0 : index
    %418 = vector.load %arg6[%c160_226, %c0_227] : memref<1024x128xf32, #tpu.memory_space<vmem>>, vector<32x128xf32>
    %419 = vector.broadcast %417 : vector<1x128xf32> to vector<32x128xf32>
    %420 = arith.mulf %419, %418 : vector<32x128xf32>
    %421 = arith.addf %416, %420 : vector<32x128xf32>
    %c70 = arith.constant 70 : index
    %c0_228 = arith.constant 0 : index
    %422 = vector.load %arg10[%c70, %c0_228] : memref<256x128xf32, #tpu.memory_space<vmem>>, vector<1x128xf32>
    %c192_229 = arith.constant 192 : index
    %c0_230 = arith.constant 0 : index
    %423 = vector.load %arg6[%c192_229, %c0_230] : memref<1024x128xf32, #tpu.memory_space<vmem>>, vector<32x128xf32>
    %424 = vector.broadcast %422 : vector<1x128xf32> to vector<32x128xf32>
    %425 = arith.mulf %424, %423 : vector<32x128xf32>
    %426 = arith.addf %421, %425 : vector<32x128xf32>
    %c71 = arith.constant 71 : index
    %c0_231 = arith.constant 0 : index
    %427 = vector.load %arg10[%c71, %c0_231] : memref<256x128xf32, #tpu.memory_space<vmem>>, vector<1x128xf32>
    %c224_232 = arith.constant 224 : index
    %c0_233 = arith.constant 0 : index
    %428 = vector.load %arg6[%c224_232, %c0_233] : memref<1024x128xf32, #tpu.memory_space<vmem>>, vector<32x128xf32>
    %429 = vector.broadcast %427 : vector<1x128xf32> to vector<32x128xf32>
    %430 = arith.mulf %429, %428 : vector<32x128xf32>
    %431 = arith.addf %426, %430 : vector<32x128xf32>
    %c72 = arith.constant 72 : index
    %c0_234 = arith.constant 0 : index
    %432 = vector.load %arg10[%c72, %c0_234] : memref<256x128xf32, #tpu.memory_space<vmem>>, vector<1x128xf32>
    %c256_235 = arith.constant 256 : index
    %c0_236 = arith.constant 0 : index
    %433 = vector.load %arg6[%c256_235, %c0_236] : memref<1024x128xf32, #tpu.memory_space<vmem>>, vector<32x128xf32>
    %434 = vector.broadcast %432 : vector<1x128xf32> to vector<32x128xf32>
    %435 = arith.mulf %434, %433 : vector<32x128xf32>
    %436 = arith.addf %431, %435 : vector<32x128xf32>
    %c73 = arith.constant 73 : index
    %c0_237 = arith.constant 0 : index
    %437 = vector.load %arg10[%c73, %c0_237] : memref<256x128xf32, #tpu.memory_space<vmem>>, vector<1x128xf32>
    %c288_238 = arith.constant 288 : index
    %c0_239 = arith.constant 0 : index
    %438 = vector.load %arg6[%c288_238, %c0_239] : memref<1024x128xf32, #tpu.memory_space<vmem>>, vector<32x128xf32>
    %439 = vector.broadcast %437 : vector<1x128xf32> to vector<32x128xf32>
    %440 = arith.mulf %439, %438 : vector<32x128xf32>
    %441 = arith.addf %436, %440 : vector<32x128xf32>
    %c74 = arith.constant 74 : index
    %c0_240 = arith.constant 0 : index
    %442 = vector.load %arg10[%c74, %c0_240] : memref<256x128xf32, #tpu.memory_space<vmem>>, vector<1x128xf32>
    %c320_241 = arith.constant 320 : index
    %c0_242 = arith.constant 0 : index
    %443 = vector.load %arg6[%c320_241, %c0_242] : memref<1024x128xf32, #tpu.memory_space<vmem>>, vector<32x128xf32>
    %444 = vector.broadcast %442 : vector<1x128xf32> to vector<32x128xf32>
    %445 = arith.mulf %444, %443 : vector<32x128xf32>
    %446 = arith.addf %441, %445 : vector<32x128xf32>
    %c75 = arith.constant 75 : index
    %c0_243 = arith.constant 0 : index
    %447 = vector.load %arg10[%c75, %c0_243] : memref<256x128xf32, #tpu.memory_space<vmem>>, vector<1x128xf32>
    %c352_244 = arith.constant 352 : index
    %c0_245 = arith.constant 0 : index
    %448 = vector.load %arg6[%c352_244, %c0_245] : memref<1024x128xf32, #tpu.memory_space<vmem>>, vector<32x128xf32>
    %449 = vector.broadcast %447 : vector<1x128xf32> to vector<32x128xf32>
    %450 = arith.mulf %449, %448 : vector<32x128xf32>
    %451 = arith.addf %446, %450 : vector<32x128xf32>
    %c76 = arith.constant 76 : index
    %c0_246 = arith.constant 0 : index
    %452 = vector.load %arg10[%c76, %c0_246] : memref<256x128xf32, #tpu.memory_space<vmem>>, vector<1x128xf32>
    %c384_247 = arith.constant 384 : index
    %c0_248 = arith.constant 0 : index
    %453 = vector.load %arg6[%c384_247, %c0_248] : memref<1024x128xf32, #tpu.memory_space<vmem>>, vector<32x128xf32>
    %454 = vector.broadcast %452 : vector<1x128xf32> to vector<32x128xf32>
    %455 = arith.mulf %454, %453 : vector<32x128xf32>
    %456 = arith.addf %451, %455 : vector<32x128xf32>
    %c77 = arith.constant 77 : index
    %c0_249 = arith.constant 0 : index
    %457 = vector.load %arg10[%c77, %c0_249] : memref<256x128xf32, #tpu.memory_space<vmem>>, vector<1x128xf32>
    %c416_250 = arith.constant 416 : index
    %c0_251 = arith.constant 0 : index
    %458 = vector.load %arg6[%c416_250, %c0_251] : memref<1024x128xf32, #tpu.memory_space<vmem>>, vector<32x128xf32>
    %459 = vector.broadcast %457 : vector<1x128xf32> to vector<32x128xf32>
    %460 = arith.mulf %459, %458 : vector<32x128xf32>
    %461 = arith.addf %456, %460 : vector<32x128xf32>
    %c78 = arith.constant 78 : index
    %c0_252 = arith.constant 0 : index
    %462 = vector.load %arg10[%c78, %c0_252] : memref<256x128xf32, #tpu.memory_space<vmem>>, vector<1x128xf32>
    %c448_253 = arith.constant 448 : index
    %c0_254 = arith.constant 0 : index
    %463 = vector.load %arg6[%c448_253, %c0_254] : memref<1024x128xf32, #tpu.memory_space<vmem>>, vector<32x128xf32>
    %464 = vector.broadcast %462 : vector<1x128xf32> to vector<32x128xf32>
    %465 = arith.mulf %464, %463 : vector<32x128xf32>
    %466 = arith.addf %461, %465 : vector<32x128xf32>
    %c79 = arith.constant 79 : index
    %c0_255 = arith.constant 0 : index
    %467 = vector.load %arg10[%c79, %c0_255] : memref<256x128xf32, #tpu.memory_space<vmem>>, vector<1x128xf32>
    %c480_256 = arith.constant 480 : index
    %c0_257 = arith.constant 0 : index
    %468 = vector.load %arg6[%c480_256, %c0_257] : memref<1024x128xf32, #tpu.memory_space<vmem>>, vector<32x128xf32>
    %469 = vector.broadcast %467 : vector<1x128xf32> to vector<32x128xf32>
    %470 = arith.mulf %469, %468 : vector<32x128xf32>
    %471 = arith.addf %466, %470 : vector<32x128xf32>
    %c80 = arith.constant 80 : index
    %c0_258 = arith.constant 0 : index
    %472 = vector.load %arg10[%c80, %c0_258] : memref<256x128xf32, #tpu.memory_space<vmem>>, vector<1x128xf32>
    %c512_259 = arith.constant 512 : index
    %c0_260 = arith.constant 0 : index
    %473 = vector.load %arg6[%c512_259, %c0_260] : memref<1024x128xf32, #tpu.memory_space<vmem>>, vector<32x128xf32>
    %474 = vector.broadcast %472 : vector<1x128xf32> to vector<32x128xf32>
    %475 = arith.mulf %474, %473 : vector<32x128xf32>
    %476 = arith.addf %471, %475 : vector<32x128xf32>
    %c81 = arith.constant 81 : index
    %c0_261 = arith.constant 0 : index
    %477 = vector.load %arg10[%c81, %c0_261] : memref<256x128xf32, #tpu.memory_space<vmem>>, vector<1x128xf32>
    %c544_262 = arith.constant 544 : index
    %c0_263 = arith.constant 0 : index
    %478 = vector.load %arg6[%c544_262, %c0_263] : memref<1024x128xf32, #tpu.memory_space<vmem>>, vector<32x128xf32>
    %479 = vector.broadcast %477 : vector<1x128xf32> to vector<32x128xf32>
    %480 = arith.mulf %479, %478 : vector<32x128xf32>
    %481 = arith.addf %476, %480 : vector<32x128xf32>
    %c82 = arith.constant 82 : index
    %c0_264 = arith.constant 0 : index
    %482 = vector.load %arg10[%c82, %c0_264] : memref<256x128xf32, #tpu.memory_space<vmem>>, vector<1x128xf32>
    %c576_265 = arith.constant 576 : index
    %c0_266 = arith.constant 0 : index
    %483 = vector.load %arg6[%c576_265, %c0_266] : memref<1024x128xf32, #tpu.memory_space<vmem>>, vector<32x128xf32>
    %484 = vector.broadcast %482 : vector<1x128xf32> to vector<32x128xf32>
    %485 = arith.mulf %484, %483 : vector<32x128xf32>
    %486 = arith.addf %481, %485 : vector<32x128xf32>
    %c83 = arith.constant 83 : index
    %c0_267 = arith.constant 0 : index
    %487 = vector.load %arg10[%c83, %c0_267] : memref<256x128xf32, #tpu.memory_space<vmem>>, vector<1x128xf32>
    %c608_268 = arith.constant 608 : index
    %c0_269 = arith.constant 0 : index
    %488 = vector.load %arg6[%c608_268, %c0_269] : memref<1024x128xf32, #tpu.memory_space<vmem>>, vector<32x128xf32>
    %489 = vector.broadcast %487 : vector<1x128xf32> to vector<32x128xf32>
    %490 = arith.mulf %489, %488 : vector<32x128xf32>
    %491 = arith.addf %486, %490 : vector<32x128xf32>
    %c84 = arith.constant 84 : index
    %c0_270 = arith.constant 0 : index
    %492 = vector.load %arg10[%c84, %c0_270] : memref<256x128xf32, #tpu.memory_space<vmem>>, vector<1x128xf32>
    %c640_271 = arith.constant 640 : index
    %c0_272 = arith.constant 0 : index
    %493 = vector.load %arg6[%c640_271, %c0_272] : memref<1024x128xf32, #tpu.memory_space<vmem>>, vector<32x128xf32>
    %494 = vector.broadcast %492 : vector<1x128xf32> to vector<32x128xf32>
    %495 = arith.mulf %494, %493 : vector<32x128xf32>
    %496 = arith.addf %491, %495 : vector<32x128xf32>
    %c85 = arith.constant 85 : index
    %c0_273 = arith.constant 0 : index
    %497 = vector.load %arg10[%c85, %c0_273] : memref<256x128xf32, #tpu.memory_space<vmem>>, vector<1x128xf32>
    %c672_274 = arith.constant 672 : index
    %c0_275 = arith.constant 0 : index
    %498 = vector.load %arg6[%c672_274, %c0_275] : memref<1024x128xf32, #tpu.memory_space<vmem>>, vector<32x128xf32>
    %499 = vector.broadcast %497 : vector<1x128xf32> to vector<32x128xf32>
    %500 = arith.mulf %499, %498 : vector<32x128xf32>
    %501 = arith.addf %496, %500 : vector<32x128xf32>
    %c86 = arith.constant 86 : index
    %c0_276 = arith.constant 0 : index
    %502 = vector.load %arg10[%c86, %c0_276] : memref<256x128xf32, #tpu.memory_space<vmem>>, vector<1x128xf32>
    %c704_277 = arith.constant 704 : index
    %c0_278 = arith.constant 0 : index
    %503 = vector.load %arg6[%c704_277, %c0_278] : memref<1024x128xf32, #tpu.memory_space<vmem>>, vector<32x128xf32>
    %504 = vector.broadcast %502 : vector<1x128xf32> to vector<32x128xf32>
    %505 = arith.mulf %504, %503 : vector<32x128xf32>
    %506 = arith.addf %501, %505 : vector<32x128xf32>
    %c87 = arith.constant 87 : index
    %c0_279 = arith.constant 0 : index
    %507 = vector.load %arg10[%c87, %c0_279] : memref<256x128xf32, #tpu.memory_space<vmem>>, vector<1x128xf32>
    %c736_280 = arith.constant 736 : index
    %c0_281 = arith.constant 0 : index
    %508 = vector.load %arg6[%c736_280, %c0_281] : memref<1024x128xf32, #tpu.memory_space<vmem>>, vector<32x128xf32>
    %509 = vector.broadcast %507 : vector<1x128xf32> to vector<32x128xf32>
    %510 = arith.mulf %509, %508 : vector<32x128xf32>
    %511 = arith.addf %506, %510 : vector<32x128xf32>
    %c88 = arith.constant 88 : index
    %c0_282 = arith.constant 0 : index
    %512 = vector.load %arg10[%c88, %c0_282] : memref<256x128xf32, #tpu.memory_space<vmem>>, vector<1x128xf32>
    %c768_283 = arith.constant 768 : index
    %c0_284 = arith.constant 0 : index
    %513 = vector.load %arg6[%c768_283, %c0_284] : memref<1024x128xf32, #tpu.memory_space<vmem>>, vector<32x128xf32>
    %514 = vector.broadcast %512 : vector<1x128xf32> to vector<32x128xf32>
    %515 = arith.mulf %514, %513 : vector<32x128xf32>
    %516 = arith.addf %511, %515 : vector<32x128xf32>
    %c89 = arith.constant 89 : index
    %c0_285 = arith.constant 0 : index
    %517 = vector.load %arg10[%c89, %c0_285] : memref<256x128xf32, #tpu.memory_space<vmem>>, vector<1x128xf32>
    %c800_286 = arith.constant 800 : index
    %c0_287 = arith.constant 0 : index
    %518 = vector.load %arg6[%c800_286, %c0_287] : memref<1024x128xf32, #tpu.memory_space<vmem>>, vector<32x128xf32>
    %519 = vector.broadcast %517 : vector<1x128xf32> to vector<32x128xf32>
    %520 = arith.mulf %519, %518 : vector<32x128xf32>
    %521 = arith.addf %516, %520 : vector<32x128xf32>
    %c90 = arith.constant 90 : index
    %c0_288 = arith.constant 0 : index
    %522 = vector.load %arg10[%c90, %c0_288] : memref<256x128xf32, #tpu.memory_space<vmem>>, vector<1x128xf32>
    %c832_289 = arith.constant 832 : index
    %c0_290 = arith.constant 0 : index
    %523 = vector.load %arg6[%c832_289, %c0_290] : memref<1024x128xf32, #tpu.memory_space<vmem>>, vector<32x128xf32>
    %524 = vector.broadcast %522 : vector<1x128xf32> to vector<32x128xf32>
    %525 = arith.mulf %524, %523 : vector<32x128xf32>
    %526 = arith.addf %521, %525 : vector<32x128xf32>
    %c91 = arith.constant 91 : index
    %c0_291 = arith.constant 0 : index
    %527 = vector.load %arg10[%c91, %c0_291] : memref<256x128xf32, #tpu.memory_space<vmem>>, vector<1x128xf32>
    %c864_292 = arith.constant 864 : index
    %c0_293 = arith.constant 0 : index
    %528 = vector.load %arg6[%c864_292, %c0_293] : memref<1024x128xf32, #tpu.memory_space<vmem>>, vector<32x128xf32>
    %529 = vector.broadcast %527 : vector<1x128xf32> to vector<32x128xf32>
    %530 = arith.mulf %529, %528 : vector<32x128xf32>
    %531 = arith.addf %526, %530 : vector<32x128xf32>
    %c92 = arith.constant 92 : index
    %c0_294 = arith.constant 0 : index
    %532 = vector.load %arg10[%c92, %c0_294] : memref<256x128xf32, #tpu.memory_space<vmem>>, vector<1x128xf32>
    %c896_295 = arith.constant 896 : index
    %c0_296 = arith.constant 0 : index
    %533 = vector.load %arg6[%c896_295, %c0_296] : memref<1024x128xf32, #tpu.memory_space<vmem>>, vector<32x128xf32>
    %534 = vector.broadcast %532 : vector<1x128xf32> to vector<32x128xf32>
    %535 = arith.mulf %534, %533 : vector<32x128xf32>
    %536 = arith.addf %531, %535 : vector<32x128xf32>
    %c93 = arith.constant 93 : index
    %c0_297 = arith.constant 0 : index
    %537 = vector.load %arg10[%c93, %c0_297] : memref<256x128xf32, #tpu.memory_space<vmem>>, vector<1x128xf32>
    %c928_298 = arith.constant 928 : index
    %c0_299 = arith.constant 0 : index
    %538 = vector.load %arg6[%c928_298, %c0_299] : memref<1024x128xf32, #tpu.memory_space<vmem>>, vector<32x128xf32>
    %539 = vector.broadcast %537 : vector<1x128xf32> to vector<32x128xf32>
    %540 = arith.mulf %539, %538 : vector<32x128xf32>
    %541 = arith.addf %536, %540 : vector<32x128xf32>
    %c94 = arith.constant 94 : index
    %c0_300 = arith.constant 0 : index
    %542 = vector.load %arg10[%c94, %c0_300] : memref<256x128xf32, #tpu.memory_space<vmem>>, vector<1x128xf32>
    %c960_301 = arith.constant 960 : index
    %c0_302 = arith.constant 0 : index
    %543 = vector.load %arg6[%c960_301, %c0_302] : memref<1024x128xf32, #tpu.memory_space<vmem>>, vector<32x128xf32>
    %544 = vector.broadcast %542 : vector<1x128xf32> to vector<32x128xf32>
    %545 = arith.mulf %544, %543 : vector<32x128xf32>
    %546 = arith.addf %541, %545 : vector<32x128xf32>
    %c95 = arith.constant 95 : index
    %c0_303 = arith.constant 0 : index
    %547 = vector.load %arg10[%c95, %c0_303] : memref<256x128xf32, #tpu.memory_space<vmem>>, vector<1x128xf32>
    %c992_304 = arith.constant 992 : index
    %c0_305 = arith.constant 0 : index
    %548 = vector.load %arg6[%c992_304, %c0_305] : memref<1024x128xf32, #tpu.memory_space<vmem>>, vector<32x128xf32>
    %549 = vector.broadcast %547 : vector<1x128xf32> to vector<32x128xf32>
    %550 = arith.mulf %549, %548 : vector<32x128xf32>
    %551 = arith.addf %546, %550 : vector<32x128xf32>
    %cst_306 = arith.constant 0.000000e+00 : f32
    %552 = vector.broadcast %cst_306 : f32 to vector<32x128xf32>
    %553 = arith.maximumf %551, %552 : vector<32x128xf32>
    %c64_307 = arith.constant 64 : index
    %c0_308 = arith.constant 0 : index
    %554 = vector.load %arg8[%c64_307, %c0_308] : memref<256x128xf32, #tpu.memory_space<vmem>>, vector<32x128xf32>
    tpu.vector_store %arg8[%c64_307, %c0_308], %553 {strides = array<i32>} : memref<256x128xf32, #tpu.memory_space<vmem>>, vector<32x128xf32>,
    %c96_309 = arith.constant 96 : index
    %c0_310 = arith.constant 0 : index
    %555 = vector.load %arg10[%c96_309, %c0_310] : memref<256x128xf32, #tpu.memory_space<vmem>>, vector<1x128xf32>
    %c0_311 = arith.constant 0 : index
    %c0_312 = arith.constant 0 : index
    %556 = vector.load %arg6[%c0_311, %c0_312] : memref<1024x128xf32, #tpu.memory_space<vmem>>, vector<32x128xf32>
    %557 = vector.broadcast %555 : vector<1x128xf32> to vector<32x128xf32>
    %558 = arith.mulf %557, %556 : vector<32x128xf32>
    %559 = arith.addf %65, %558 : vector<32x128xf32>
    %c97 = arith.constant 97 : index
    %c0_313 = arith.constant 0 : index
    %560 = vector.load %arg10[%c97, %c0_313] : memref<256x128xf32, #tpu.memory_space<vmem>>, vector<1x128xf32>
    %c32_314 = arith.constant 32 : index
    %c0_315 = arith.constant 0 : index
    %561 = vector.load %arg6[%c32_314, %c0_315] : memref<1024x128xf32, #tpu.memory_space<vmem>>, vector<32x128xf32>
    %562 = vector.broadcast %560 : vector<1x128xf32> to vector<32x128xf32>
    %563 = arith.mulf %562, %561 : vector<32x128xf32>
    %564 = arith.addf %559, %563 : vector<32x128xf32>
    %c98 = arith.constant 98 : index
    %c0_316 = arith.constant 0 : index
    %565 = vector.load %arg10[%c98, %c0_316] : memref<256x128xf32, #tpu.memory_space<vmem>>, vector<1x128xf32>
    %c64_317 = arith.constant 64 : index
    %c0_318 = arith.constant 0 : index
    %566 = vector.load %arg6[%c64_317, %c0_318] : memref<1024x128xf32, #tpu.memory_space<vmem>>, vector<32x128xf32>
    %567 = vector.broadcast %565 : vector<1x128xf32> to vector<32x128xf32>
    %568 = arith.mulf %567, %566 : vector<32x128xf32>
    %569 = arith.addf %564, %568 : vector<32x128xf32>
    %c99 = arith.constant 99 : index
    %c0_319 = arith.constant 0 : index
    %570 = vector.load %arg10[%c99, %c0_319] : memref<256x128xf32, #tpu.memory_space<vmem>>, vector<1x128xf32>
    %c96_320 = arith.constant 96 : index
    %c0_321 = arith.constant 0 : index
    %571 = vector.load %arg6[%c96_320, %c0_321] : memref<1024x128xf32, #tpu.memory_space<vmem>>, vector<32x128xf32>
    %572 = vector.broadcast %570 : vector<1x128xf32> to vector<32x128xf32>
    %573 = arith.mulf %572, %571 : vector<32x128xf32>
    %574 = arith.addf %569, %573 : vector<32x128xf32>
    %c100 = arith.constant 100 : index
    %c0_322 = arith.constant 0 : index
    %575 = vector.load %arg10[%c100, %c0_322] : memref<256x128xf32, #tpu.memory_space<vmem>>, vector<1x128xf32>
    %c128_323 = arith.constant 128 : index
    %c0_324 = arith.constant 0 : index
    %576 = vector.load %arg6[%c128_323, %c0_324] : memref<1024x128xf32, #tpu.memory_space<vmem>>, vector<32x128xf32>
    %577 = vector.broadcast %575 : vector<1x128xf32> to vector<32x128xf32>
    %578 = arith.mulf %577, %576 : vector<32x128xf32>
    %579 = arith.addf %574, %578 : vector<32x128xf32>
    %c101 = arith.constant 101 : index
    %c0_325 = arith.constant 0 : index
    %580 = vector.load %arg10[%c101, %c0_325] : memref<256x128xf32, #tpu.memory_space<vmem>>, vector<1x128xf32>
    %c160_326 = arith.constant 160 : index
    %c0_327 = arith.constant 0 : index
    %581 = vector.load %arg6[%c160_326, %c0_327] : memref<1024x128xf32, #tpu.memory_space<vmem>>, vector<32x128xf32>
    %582 = vector.broadcast %580 : vector<1x128xf32> to vector<32x128xf32>
    %583 = arith.mulf %582, %581 : vector<32x128xf32>
    %584 = arith.addf %579, %583 : vector<32x128xf32>
    %c102 = arith.constant 102 : index
    %c0_328 = arith.constant 0 : index
    %585 = vector.load %arg10[%c102, %c0_328] : memref<256x128xf32, #tpu.memory_space<vmem>>, vector<1x128xf32>
    %c192_329 = arith.constant 192 : index
    %c0_330 = arith.constant 0 : index
    %586 = vector.load %arg6[%c192_329, %c0_330] : memref<1024x128xf32, #tpu.memory_space<vmem>>, vector<32x128xf32>
    %587 = vector.broadcast %585 : vector<1x128xf32> to vector<32x128xf32>
    %588 = arith.mulf %587, %586 : vector<32x128xf32>
    %589 = arith.addf %584, %588 : vector<32x128xf32>
    %c103 = arith.constant 103 : index
    %c0_331 = arith.constant 0 : index
    %590 = vector.load %arg10[%c103, %c0_331] : memref<256x128xf32, #tpu.memory_space<vmem>>, vector<1x128xf32>
    %c224_332 = arith.constant 224 : index
    %c0_333 = arith.constant 0 : index
    %591 = vector.load %arg6[%c224_332, %c0_333] : memref<1024x128xf32, #tpu.memory_space<vmem>>, vector<32x128xf32>
    %592 = vector.broadcast %590 : vector<1x128xf32> to vector<32x128xf32>
    %593 = arith.mulf %592, %591 : vector<32x128xf32>
    %594 = arith.addf %589, %593 : vector<32x128xf32>
    %c104 = arith.constant 104 : index
    %c0_334 = arith.constant 0 : index
    %595 = vector.load %arg10[%c104, %c0_334] : memref<256x128xf32, #tpu.memory_space<vmem>>, vector<1x128xf32>
    %c256_335 = arith.constant 256 : index
    %c0_336 = arith.constant 0 : index
    %596 = vector.load %arg6[%c256_335, %c0_336] : memref<1024x128xf32, #tpu.memory_space<vmem>>, vector<32x128xf32>
    %597 = vector.broadcast %595 : vector<1x128xf32> to vector<32x128xf32>
    %598 = arith.mulf %597, %596 : vector<32x128xf32>
    %599 = arith.addf %594, %598 : vector<32x128xf32>
    %c105 = arith.constant 105 : index
    %c0_337 = arith.constant 0 : index
    %600 = vector.load %arg10[%c105, %c0_337] : memref<256x128xf32, #tpu.memory_space<vmem>>, vector<1x128xf32>
    %c288_338 = arith.constant 288 : index
    %c0_339 = arith.constant 0 : index
    %601 = vector.load %arg6[%c288_338, %c0_339] : memref<1024x128xf32, #tpu.memory_space<vmem>>, vector<32x128xf32>
    %602 = vector.broadcast %600 : vector<1x128xf32> to vector<32x128xf32>
    %603 = arith.mulf %602, %601 : vector<32x128xf32>
    %604 = arith.addf %599, %603 : vector<32x128xf32>
    %c106 = arith.constant 106 : index
    %c0_340 = arith.constant 0 : index
    %605 = vector.load %arg10[%c106, %c0_340] : memref<256x128xf32, #tpu.memory_space<vmem>>, vector<1x128xf32>
    %c320_341 = arith.constant 320 : index
    %c0_342 = arith.constant 0 : index
    %606 = vector.load %arg6[%c320_341, %c0_342] : memref<1024x128xf32, #tpu.memory_space<vmem>>, vector<32x128xf32>
    %607 = vector.broadcast %605 : vector<1x128xf32> to vector<32x128xf32>
    %608 = arith.mulf %607, %606 : vector<32x128xf32>
    %609 = arith.addf %604, %608 : vector<32x128xf32>
    %c107 = arith.constant 107 : index
    %c0_343 = arith.constant 0 : index
    %610 = vector.load %arg10[%c107, %c0_343] : memref<256x128xf32, #tpu.memory_space<vmem>>, vector<1x128xf32>
    %c352_344 = arith.constant 352 : index
    %c0_345 = arith.constant 0 : index
    %611 = vector.load %arg6[%c352_344, %c0_345] : memref<1024x128xf32, #tpu.memory_space<vmem>>, vector<32x128xf32>
    %612 = vector.broadcast %610 : vector<1x128xf32> to vector<32x128xf32>
    %613 = arith.mulf %612, %611 : vector<32x128xf32>
    %614 = arith.addf %609, %613 : vector<32x128xf32>
    %c108 = arith.constant 108 : index
    %c0_346 = arith.constant 0 : index
    %615 = vector.load %arg10[%c108, %c0_346] : memref<256x128xf32, #tpu.memory_space<vmem>>, vector<1x128xf32>
    %c384_347 = arith.constant 384 : index
    %c0_348 = arith.constant 0 : index
    %616 = vector.load %arg6[%c384_347, %c0_348] : memref<1024x128xf32, #tpu.memory_space<vmem>>, vector<32x128xf32>
    %617 = vector.broadcast %615 : vector<1x128xf32> to vector<32x128xf32>
    %618 = arith.mulf %617, %616 : vector<32x128xf32>
    %619 = arith.addf %614, %618 : vector<32x128xf32>
    %c109 = arith.constant 109 : index
    %c0_349 = arith.constant 0 : index
    %620 = vector.load %arg10[%c109, %c0_349] : memref<256x128xf32, #tpu.memory_space<vmem>>, vector<1x128xf32>
    %c416_350 = arith.constant 416 : index
    %c0_351 = arith.constant 0 : index
    %621 = vector.load %arg6[%c416_350, %c0_351] : memref<1024x128xf32, #tpu.memory_space<vmem>>, vector<32x128xf32>
    %622 = vector.broadcast %620 : vector<1x128xf32> to vector<32x128xf32>
    %623 = arith.mulf %622, %621 : vector<32x128xf32>
    %624 = arith.addf %619, %623 : vector<32x128xf32>
    %c110 = arith.constant 110 : index
    %c0_352 = arith.constant 0 : index
    %625 = vector.load %arg10[%c110, %c0_352] : memref<256x128xf32, #tpu.memory_space<vmem>>, vector<1x128xf32>
    %c448_353 = arith.constant 448 : index
    %c0_354 = arith.constant 0 : index
    %626 = vector.load %arg6[%c448_353, %c0_354] : memref<1024x128xf32, #tpu.memory_space<vmem>>, vector<32x128xf32>
    %627 = vector.broadcast %625 : vector<1x128xf32> to vector<32x128xf32>
    %628 = arith.mulf %627, %626 : vector<32x128xf32>
    %629 = arith.addf %624, %628 : vector<32x128xf32>
    %c111 = arith.constant 111 : index
    %c0_355 = arith.constant 0 : index
    %630 = vector.load %arg10[%c111, %c0_355] : memref<256x128xf32, #tpu.memory_space<vmem>>, vector<1x128xf32>
    %c480_356 = arith.constant 480 : index
    %c0_357 = arith.constant 0 : index
    %631 = vector.load %arg6[%c480_356, %c0_357] : memref<1024x128xf32, #tpu.memory_space<vmem>>, vector<32x128xf32>
    %632 = vector.broadcast %630 : vector<1x128xf32> to vector<32x128xf32>
    %633 = arith.mulf %632, %631 : vector<32x128xf32>
    %634 = arith.addf %629, %633 : vector<32x128xf32>
    %c112 = arith.constant 112 : index
    %c0_358 = arith.constant 0 : index
    %635 = vector.load %arg10[%c112, %c0_358] : memref<256x128xf32, #tpu.memory_space<vmem>>, vector<1x128xf32>
    %c512_359 = arith.constant 512 : index
    %c0_360 = arith.constant 0 : index
    %636 = vector.load %arg6[%c512_359, %c0_360] : memref<1024x128xf32, #tpu.memory_space<vmem>>, vector<32x128xf32>
    %637 = vector.broadcast %635 : vector<1x128xf32> to vector<32x128xf32>
    %638 = arith.mulf %637, %636 : vector<32x128xf32>
    %639 = arith.addf %634, %638 : vector<32x128xf32>
    %c113 = arith.constant 113 : index
    %c0_361 = arith.constant 0 : index
    %640 = vector.load %arg10[%c113, %c0_361] : memref<256x128xf32, #tpu.memory_space<vmem>>, vector<1x128xf32>
    %c544_362 = arith.constant 544 : index
    %c0_363 = arith.constant 0 : index
    %641 = vector.load %arg6[%c544_362, %c0_363] : memref<1024x128xf32, #tpu.memory_space<vmem>>, vector<32x128xf32>
    %642 = vector.broadcast %640 : vector<1x128xf32> to vector<32x128xf32>
    %643 = arith.mulf %642, %641 : vector<32x128xf32>
    %644 = arith.addf %639, %643 : vector<32x128xf32>
    %c114 = arith.constant 114 : index
    %c0_364 = arith.constant 0 : index
    %645 = vector.load %arg10[%c114, %c0_364] : memref<256x128xf32, #tpu.memory_space<vmem>>, vector<1x128xf32>
    %c576_365 = arith.constant 576 : index
    %c0_366 = arith.constant 0 : index
    %646 = vector.load %arg6[%c576_365, %c0_366] : memref<1024x128xf32, #tpu.memory_space<vmem>>, vector<32x128xf32>
    %647 = vector.broadcast %645 : vector<1x128xf32> to vector<32x128xf32>
    %648 = arith.mulf %647, %646 : vector<32x128xf32>
    %649 = arith.addf %644, %648 : vector<32x128xf32>
    %c115 = arith.constant 115 : index
    %c0_367 = arith.constant 0 : index
    %650 = vector.load %arg10[%c115, %c0_367] : memref<256x128xf32, #tpu.memory_space<vmem>>, vector<1x128xf32>
    %c608_368 = arith.constant 608 : index
    %c0_369 = arith.constant 0 : index
    %651 = vector.load %arg6[%c608_368, %c0_369] : memref<1024x128xf32, #tpu.memory_space<vmem>>, vector<32x128xf32>
    %652 = vector.broadcast %650 : vector<1x128xf32> to vector<32x128xf32>
    %653 = arith.mulf %652, %651 : vector<32x128xf32>
    %654 = arith.addf %649, %653 : vector<32x128xf32>
    %c116 = arith.constant 116 : index
    %c0_370 = arith.constant 0 : index
    %655 = vector.load %arg10[%c116, %c0_370] : memref<256x128xf32, #tpu.memory_space<vmem>>, vector<1x128xf32>
    %c640_371 = arith.constant 640 : index
    %c0_372 = arith.constant 0 : index
    %656 = vector.load %arg6[%c640_371, %c0_372] : memref<1024x128xf32, #tpu.memory_space<vmem>>, vector<32x128xf32>
    %657 = vector.broadcast %655 : vector<1x128xf32> to vector<32x128xf32>
    %658 = arith.mulf %657, %656 : vector<32x128xf32>
    %659 = arith.addf %654, %658 : vector<32x128xf32>
    %c117 = arith.constant 117 : index
    %c0_373 = arith.constant 0 : index
    %660 = vector.load %arg10[%c117, %c0_373] : memref<256x128xf32, #tpu.memory_space<vmem>>, vector<1x128xf32>
    %c672_374 = arith.constant 672 : index
    %c0_375 = arith.constant 0 : index
    %661 = vector.load %arg6[%c672_374, %c0_375] : memref<1024x128xf32, #tpu.memory_space<vmem>>, vector<32x128xf32>
    %662 = vector.broadcast %660 : vector<1x128xf32> to vector<32x128xf32>
    %663 = arith.mulf %662, %661 : vector<32x128xf32>
    %664 = arith.addf %659, %663 : vector<32x128xf32>
    %c118 = arith.constant 118 : index
    %c0_376 = arith.constant 0 : index
    %665 = vector.load %arg10[%c118, %c0_376] : memref<256x128xf32, #tpu.memory_space<vmem>>, vector<1x128xf32>
    %c704_377 = arith.constant 704 : index
    %c0_378 = arith.constant 0 : index
    %666 = vector.load %arg6[%c704_377, %c0_378] : memref<1024x128xf32, #tpu.memory_space<vmem>>, vector<32x128xf32>
    %667 = vector.broadcast %665 : vector<1x128xf32> to vector<32x128xf32>
    %668 = arith.mulf %667, %666 : vector<32x128xf32>
    %669 = arith.addf %664, %668 : vector<32x128xf32>
    %c119 = arith.constant 119 : index
    %c0_379 = arith.constant 0 : index
    %670 = vector.load %arg10[%c119, %c0_379] : memref<256x128xf32, #tpu.memory_space<vmem>>, vector<1x128xf32>
    %c736_380 = arith.constant 736 : index
    %c0_381 = arith.constant 0 : index
    %671 = vector.load %arg6[%c736_380, %c0_381] : memref<1024x128xf32, #tpu.memory_space<vmem>>, vector<32x128xf32>
    %672 = vector.broadcast %670 : vector<1x128xf32> to vector<32x128xf32>
    %673 = arith.mulf %672, %671 : vector<32x128xf32>
    %674 = arith.addf %669, %673 : vector<32x128xf32>
    %c120 = arith.constant 120 : index
    %c0_382 = arith.constant 0 : index
    %675 = vector.load %arg10[%c120, %c0_382] : memref<256x128xf32, #tpu.memory_space<vmem>>, vector<1x128xf32>
    %c768_383 = arith.constant 768 : index
    %c0_384 = arith.constant 0 : index
    %676 = vector.load %arg6[%c768_383, %c0_384] : memref<1024x128xf32, #tpu.memory_space<vmem>>, vector<32x128xf32>
    %677 = vector.broadcast %675 : vector<1x128xf32> to vector<32x128xf32>
    %678 = arith.mulf %677, %676 : vector<32x128xf32>
    %679 = arith.addf %674, %678 : vector<32x128xf32>
    %c121 = arith.constant 121 : index
    %c0_385 = arith.constant 0 : index
    %680 = vector.load %arg10[%c121, %c0_385] : memref<256x128xf32, #tpu.memory_space<vmem>>, vector<1x128xf32>
    %c800_386 = arith.constant 800 : index
    %c0_387 = arith.constant 0 : index
    %681 = vector.load %arg6[%c800_386, %c0_387] : memref<1024x128xf32, #tpu.memory_space<vmem>>, vector<32x128xf32>
    %682 = vector.broadcast %680 : vector<1x128xf32> to vector<32x128xf32>
    %683 = arith.mulf %682, %681 : vector<32x128xf32>
    %684 = arith.addf %679, %683 : vector<32x128xf32>
    %c122 = arith.constant 122 : index
    %c0_388 = arith.constant 0 : index
    %685 = vector.load %arg10[%c122, %c0_388] : memref<256x128xf32, #tpu.memory_space<vmem>>, vector<1x128xf32>
    %c832_389 = arith.constant 832 : index
    %c0_390 = arith.constant 0 : index
    %686 = vector.load %arg6[%c832_389, %c0_390] : memref<1024x128xf32, #tpu.memory_space<vmem>>, vector<32x128xf32>
    %687 = vector.broadcast %685 : vector<1x128xf32> to vector<32x128xf32>
    %688 = arith.mulf %687, %686 : vector<32x128xf32>
    %689 = arith.addf %684, %688 : vector<32x128xf32>
    %c123 = arith.constant 123 : index
    %c0_391 = arith.constant 0 : index
    %690 = vector.load %arg10[%c123, %c0_391] : memref<256x128xf32, #tpu.memory_space<vmem>>, vector<1x128xf32>
    %c864_392 = arith.constant 864 : index
    %c0_393 = arith.constant 0 : index
    %691 = vector.load %arg6[%c864_392, %c0_393] : memref<1024x128xf32, #tpu.memory_space<vmem>>, vector<32x128xf32>
    %692 = vector.broadcast %690 : vector<1x128xf32> to vector<32x128xf32>
    %693 = arith.mulf %692, %691 : vector<32x128xf32>
    %694 = arith.addf %689, %693 : vector<32x128xf32>
    %c124 = arith.constant 124 : index
    %c0_394 = arith.constant 0 : index
    %695 = vector.load %arg10[%c124, %c0_394] : memref<256x128xf32, #tpu.memory_space<vmem>>, vector<1x128xf32>
    %c896_395 = arith.constant 896 : index
    %c0_396 = arith.constant 0 : index
    %696 = vector.load %arg6[%c896_395, %c0_396] : memref<1024x128xf32, #tpu.memory_space<vmem>>, vector<32x128xf32>
    %697 = vector.broadcast %695 : vector<1x128xf32> to vector<32x128xf32>
    %698 = arith.mulf %697, %696 : vector<32x128xf32>
    %699 = arith.addf %694, %698 : vector<32x128xf32>
    %c125 = arith.constant 125 : index
    %c0_397 = arith.constant 0 : index
    %700 = vector.load %arg10[%c125, %c0_397] : memref<256x128xf32, #tpu.memory_space<vmem>>, vector<1x128xf32>
    %c928_398 = arith.constant 928 : index
    %c0_399 = arith.constant 0 : index
    %701 = vector.load %arg6[%c928_398, %c0_399] : memref<1024x128xf32, #tpu.memory_space<vmem>>, vector<32x128xf32>
    %702 = vector.broadcast %700 : vector<1x128xf32> to vector<32x128xf32>
    %703 = arith.mulf %702, %701 : vector<32x128xf32>
    %704 = arith.addf %699, %703 : vector<32x128xf32>
    %c126 = arith.constant 126 : index
    %c0_400 = arith.constant 0 : index
    %705 = vector.load %arg10[%c126, %c0_400] : memref<256x128xf32, #tpu.memory_space<vmem>>, vector<1x128xf32>
    %c960_401 = arith.constant 960 : index
    %c0_402 = arith.constant 0 : index
    %706 = vector.load %arg6[%c960_401, %c0_402] : memref<1024x128xf32, #tpu.memory_space<vmem>>, vector<32x128xf32>
    %707 = vector.broadcast %705 : vector<1x128xf32> to vector<32x128xf32>
    %708 = arith.mulf %707, %706 : vector<32x128xf32>
    %709 = arith.addf %704, %708 : vector<32x128xf32>
    %c127 = arith.constant 127 : index
    %c0_403 = arith.constant 0 : index
    %710 = vector.load %arg10[%c127, %c0_403] : memref<256x128xf32, #tpu.memory_space<vmem>>, vector<1x128xf32>
    %c992_404 = arith.constant 992 : index
    %c0_405 = arith.constant 0 : index
    %711 = vector.load %arg6[%c992_404, %c0_405] : memref<1024x128xf32, #tpu.memory_space<vmem>>, vector<32x128xf32>
    %712 = vector.broadcast %710 : vector<1x128xf32> to vector<32x128xf32>
    %713 = arith.mulf %712, %711 : vector<32x128xf32>
    %714 = arith.addf %709, %713 : vector<32x128xf32>
    %cst_406 = arith.constant 0.000000e+00 : f32
    %715 = vector.broadcast %cst_406 : f32 to vector<32x128xf32>
    %716 = arith.maximumf %714, %715 : vector<32x128xf32>
    %c96_407 = arith.constant 96 : index
    %c0_408 = arith.constant 0 : index
    %717 = vector.load %arg8[%c96_407, %c0_408] : memref<256x128xf32, #tpu.memory_space<vmem>>, vector<32x128xf32>
    tpu.vector_store %arg8[%c96_407, %c0_408], %716 {strides = array<i32>} : memref<256x128xf32, #tpu.memory_space<vmem>>, vector<32x128xf32>,
    %c128_409 = arith.constant 128 : index
    %c0_410 = arith.constant 0 : index
    %718 = vector.load %arg10[%c128_409, %c0_410] : memref<256x128xf32, #tpu.memory_space<vmem>>, vector<1x128xf32>
    %c0_411 = arith.constant 0 : index
    %c0_412 = arith.constant 0 : index
    %719 = vector.load %arg6[%c0_411, %c0_412] : memref<1024x128xf32, #tpu.memory_space<vmem>>, vector<32x128xf32>
    %720 = vector.broadcast %718 : vector<1x128xf32> to vector<32x128xf32>
    %721 = arith.mulf %720, %719 : vector<32x128xf32>
    %722 = arith.addf %65, %721 : vector<32x128xf32>
    %c129 = arith.constant 129 : index
    %c0_413 = arith.constant 0 : index
    %723 = vector.load %arg10[%c129, %c0_413] : memref<256x128xf32, #tpu.memory_space<vmem>>, vector<1x128xf32>
    %c32_414 = arith.constant 32 : index
    %c0_415 = arith.constant 0 : index
    %724 = vector.load %arg6[%c32_414, %c0_415] : memref<1024x128xf32, #tpu.memory_space<vmem>>, vector<32x128xf32>
    %725 = vector.broadcast %723 : vector<1x128xf32> to vector<32x128xf32>
    %726 = arith.mulf %725, %724 : vector<32x128xf32>
    %727 = arith.addf %722, %726 : vector<32x128xf32>
    %c130 = arith.constant 130 : index
    %c0_416 = arith.constant 0 : index
    %728 = vector.load %arg10[%c130, %c0_416] : memref<256x128xf32, #tpu.memory_space<vmem>>, vector<1x128xf32>
    %c64_417 = arith.constant 64 : index
    %c0_418 = arith.constant 0 : index
    %729 = vector.load %arg6[%c64_417, %c0_418] : memref<1024x128xf32, #tpu.memory_space<vmem>>, vector<32x128xf32>
    %730 = vector.broadcast %728 : vector<1x128xf32> to vector<32x128xf32>
    %731 = arith.mulf %730, %729 : vector<32x128xf32>
    %732 = arith.addf %727, %731 : vector<32x128xf32>
    %c131 = arith.constant 131 : index
    %c0_419 = arith.constant 0 : index
    %733 = vector.load %arg10[%c131, %c0_419] : memref<256x128xf32, #tpu.memory_space<vmem>>, vector<1x128xf32>
    %c96_420 = arith.constant 96 : index
    %c0_421 = arith.constant 0 : index
    %734 = vector.load %arg6[%c96_420, %c0_421] : memref<1024x128xf32, #tpu.memory_space<vmem>>, vector<32x128xf32>
    %735 = vector.broadcast %733 : vector<1x128xf32> to vector<32x128xf32>
    %736 = arith.mulf %735, %734 : vector<32x128xf32>
    %737 = arith.addf %732, %736 : vector<32x128xf32>
    %c132 = arith.constant 132 : index
    %c0_422 = arith.constant 0 : index
    %738 = vector.load %arg10[%c132, %c0_422] : memref<256x128xf32, #tpu.memory_space<vmem>>, vector<1x128xf32>
    %c128_423 = arith.constant 128 : index
    %c0_424 = arith.constant 0 : index
    %739 = vector.load %arg6[%c128_423, %c0_424] : memref<1024x128xf32, #tpu.memory_space<vmem>>, vector<32x128xf32>
    %740 = vector.broadcast %738 : vector<1x128xf32> to vector<32x128xf32>
    %741 = arith.mulf %740, %739 : vector<32x128xf32>
    %742 = arith.addf %737, %741 : vector<32x128xf32>
    %c133 = arith.constant 133 : index
    %c0_425 = arith.constant 0 : index
    %743 = vector.load %arg10[%c133, %c0_425] : memref<256x128xf32, #tpu.memory_space<vmem>>, vector<1x128xf32>
    %c160_426 = arith.constant 160 : index
    %c0_427 = arith.constant 0 : index
    %744 = vector.load %arg6[%c160_426, %c0_427] : memref<1024x128xf32, #tpu.memory_space<vmem>>, vector<32x128xf32>
    %745 = vector.broadcast %743 : vector<1x128xf32> to vector<32x128xf32>
    %746 = arith.mulf %745, %744 : vector<32x128xf32>
    %747 = arith.addf %742, %746 : vector<32x128xf32>
    %c134 = arith.constant 134 : index
    %c0_428 = arith.constant 0 : index
    %748 = vector.load %arg10[%c134, %c0_428] : memref<256x128xf32, #tpu.memory_space<vmem>>, vector<1x128xf32>
    %c192_429 = arith.constant 192 : index
    %c0_430 = arith.constant 0 : index
    %749 = vector.load %arg6[%c192_429, %c0_430] : memref<1024x128xf32, #tpu.memory_space<vmem>>, vector<32x128xf32>
    %750 = vector.broadcast %748 : vector<1x128xf32> to vector<32x128xf32>
    %751 = arith.mulf %750, %749 : vector<32x128xf32>
    %752 = arith.addf %747, %751 : vector<32x128xf32>
    %c135 = arith.constant 135 : index
    %c0_431 = arith.constant 0 : index
    %753 = vector.load %arg10[%c135, %c0_431] : memref<256x128xf32, #tpu.memory_space<vmem>>, vector<1x128xf32>
    %c224_432 = arith.constant 224 : index
    %c0_433 = arith.constant 0 : index
    %754 = vector.load %arg6[%c224_432, %c0_433] : memref<1024x128xf32, #tpu.memory_space<vmem>>, vector<32x128xf32>
    %755 = vector.broadcast %753 : vector<1x128xf32> to vector<32x128xf32>
    %756 = arith.mulf %755, %754 : vector<32x128xf32>
    %757 = arith.addf %752, %756 : vector<32x128xf32>
    %c136 = arith.constant 136 : index
    %c0_434 = arith.constant 0 : index
    %758 = vector.load %arg10[%c136, %c0_434] : memref<256x128xf32, #tpu.memory_space<vmem>>, vector<1x128xf32>
    %c256_435 = arith.constant 256 : index
    %c0_436 = arith.constant 0 : index
    %759 = vector.load %arg6[%c256_435, %c0_436] : memref<1024x128xf32, #tpu.memory_space<vmem>>, vector<32x128xf32>
    %760 = vector.broadcast %758 : vector<1x128xf32> to vector<32x128xf32>
    %761 = arith.mulf %760, %759 : vector<32x128xf32>
    %762 = arith.addf %757, %761 : vector<32x128xf32>
    %c137 = arith.constant 137 : index
    %c0_437 = arith.constant 0 : index
    %763 = vector.load %arg10[%c137, %c0_437] : memref<256x128xf32, #tpu.memory_space<vmem>>, vector<1x128xf32>
    %c288_438 = arith.constant 288 : index
    %c0_439 = arith.constant 0 : index
    %764 = vector.load %arg6[%c288_438, %c0_439] : memref<1024x128xf32, #tpu.memory_space<vmem>>, vector<32x128xf32>
    %765 = vector.broadcast %763 : vector<1x128xf32> to vector<32x128xf32>
    %766 = arith.mulf %765, %764 : vector<32x128xf32>
    %767 = arith.addf %762, %766 : vector<32x128xf32>
    %c138 = arith.constant 138 : index
    %c0_440 = arith.constant 0 : index
    %768 = vector.load %arg10[%c138, %c0_440] : memref<256x128xf32, #tpu.memory_space<vmem>>, vector<1x128xf32>
    %c320_441 = arith.constant 320 : index
    %c0_442 = arith.constant 0 : index
    %769 = vector.load %arg6[%c320_441, %c0_442] : memref<1024x128xf32, #tpu.memory_space<vmem>>, vector<32x128xf32>
    %770 = vector.broadcast %768 : vector<1x128xf32> to vector<32x128xf32>
    %771 = arith.mulf %770, %769 : vector<32x128xf32>
    %772 = arith.addf %767, %771 : vector<32x128xf32>
    %c139 = arith.constant 139 : index
    %c0_443 = arith.constant 0 : index
    %773 = vector.load %arg10[%c139, %c0_443] : memref<256x128xf32, #tpu.memory_space<vmem>>, vector<1x128xf32>
    %c352_444 = arith.constant 352 : index
    %c0_445 = arith.constant 0 : index
    %774 = vector.load %arg6[%c352_444, %c0_445] : memref<1024x128xf32, #tpu.memory_space<vmem>>, vector<32x128xf32>
    %775 = vector.broadcast %773 : vector<1x128xf32> to vector<32x128xf32>
    %776 = arith.mulf %775, %774 : vector<32x128xf32>
    %777 = arith.addf %772, %776 : vector<32x128xf32>
    %c140 = arith.constant 140 : index
    %c0_446 = arith.constant 0 : index
    %778 = vector.load %arg10[%c140, %c0_446] : memref<256x128xf32, #tpu.memory_space<vmem>>, vector<1x128xf32>
    %c384_447 = arith.constant 384 : index
    %c0_448 = arith.constant 0 : index
    %779 = vector.load %arg6[%c384_447, %c0_448] : memref<1024x128xf32, #tpu.memory_space<vmem>>, vector<32x128xf32>
    %780 = vector.broadcast %778 : vector<1x128xf32> to vector<32x128xf32>
    %781 = arith.mulf %780, %779 : vector<32x128xf32>
    %782 = arith.addf %777, %781 : vector<32x128xf32>
    %c141 = arith.constant 141 : index
    %c0_449 = arith.constant 0 : index
    %783 = vector.load %arg10[%c141, %c0_449] : memref<256x128xf32, #tpu.memory_space<vmem>>, vector<1x128xf32>
    %c416_450 = arith.constant 416 : index
    %c0_451 = arith.constant 0 : index
    %784 = vector.load %arg6[%c416_450, %c0_451] : memref<1024x128xf32, #tpu.memory_space<vmem>>, vector<32x128xf32>
    %785 = vector.broadcast %783 : vector<1x128xf32> to vector<32x128xf32>
    %786 = arith.mulf %785, %784 : vector<32x128xf32>
    %787 = arith.addf %782, %786 : vector<32x128xf32>
    %c142 = arith.constant 142 : index
    %c0_452 = arith.constant 0 : index
    %788 = vector.load %arg10[%c142, %c0_452] : memref<256x128xf32, #tpu.memory_space<vmem>>, vector<1x128xf32>
    %c448_453 = arith.constant 448 : index
    %c0_454 = arith.constant 0 : index
    %789 = vector.load %arg6[%c448_453, %c0_454] : memref<1024x128xf32, #tpu.memory_space<vmem>>, vector<32x128xf32>
    %790 = vector.broadcast %788 : vector<1x128xf32> to vector<32x128xf32>
    %791 = arith.mulf %790, %789 : vector<32x128xf32>
    %792 = arith.addf %787, %791 : vector<32x128xf32>
    %c143 = arith.constant 143 : index
    %c0_455 = arith.constant 0 : index
    %793 = vector.load %arg10[%c143, %c0_455] : memref<256x128xf32, #tpu.memory_space<vmem>>, vector<1x128xf32>
    %c480_456 = arith.constant 480 : index
    %c0_457 = arith.constant 0 : index
    %794 = vector.load %arg6[%c480_456, %c0_457] : memref<1024x128xf32, #tpu.memory_space<vmem>>, vector<32x128xf32>
    %795 = vector.broadcast %793 : vector<1x128xf32> to vector<32x128xf32>
    %796 = arith.mulf %795, %794 : vector<32x128xf32>
    %797 = arith.addf %792, %796 : vector<32x128xf32>
    %c144 = arith.constant 144 : index
    %c0_458 = arith.constant 0 : index
    %798 = vector.load %arg10[%c144, %c0_458] : memref<256x128xf32, #tpu.memory_space<vmem>>, vector<1x128xf32>
    %c512_459 = arith.constant 512 : index
    %c0_460 = arith.constant 0 : index
    %799 = vector.load %arg6[%c512_459, %c0_460] : memref<1024x128xf32, #tpu.memory_space<vmem>>, vector<32x128xf32>
    %800 = vector.broadcast %798 : vector<1x128xf32> to vector<32x128xf32>
    %801 = arith.mulf %800, %799 : vector<32x128xf32>
    %802 = arith.addf %797, %801 : vector<32x128xf32>
    %c145 = arith.constant 145 : index
    %c0_461 = arith.constant 0 : index
    %803 = vector.load %arg10[%c145, %c0_461] : memref<256x128xf32, #tpu.memory_space<vmem>>, vector<1x128xf32>
    %c544_462 = arith.constant 544 : index
    %c0_463 = arith.constant 0 : index
    %804 = vector.load %arg6[%c544_462, %c0_463] : memref<1024x128xf32, #tpu.memory_space<vmem>>, vector<32x128xf32>
    %805 = vector.broadcast %803 : vector<1x128xf32> to vector<32x128xf32>
    %806 = arith.mulf %805, %804 : vector<32x128xf32>
    %807 = arith.addf %802, %806 : vector<32x128xf32>
    %c146 = arith.constant 146 : index
    %c0_464 = arith.constant 0 : index
    %808 = vector.load %arg10[%c146, %c0_464] : memref<256x128xf32, #tpu.memory_space<vmem>>, vector<1x128xf32>
    %c576_465 = arith.constant 576 : index
    %c0_466 = arith.constant 0 : index
    %809 = vector.load %arg6[%c576_465, %c0_466] : memref<1024x128xf32, #tpu.memory_space<vmem>>, vector<32x128xf32>
    %810 = vector.broadcast %808 : vector<1x128xf32> to vector<32x128xf32>
    %811 = arith.mulf %810, %809 : vector<32x128xf32>
    %812 = arith.addf %807, %811 : vector<32x128xf32>
    %c147 = arith.constant 147 : index
    %c0_467 = arith.constant 0 : index
    %813 = vector.load %arg10[%c147, %c0_467] : memref<256x128xf32, #tpu.memory_space<vmem>>, vector<1x128xf32>
    %c608_468 = arith.constant 608 : index
    %c0_469 = arith.constant 0 : index
    %814 = vector.load %arg6[%c608_468, %c0_469] : memref<1024x128xf32, #tpu.memory_space<vmem>>, vector<32x128xf32>
    %815 = vector.broadcast %813 : vector<1x128xf32> to vector<32x128xf32>
    %816 = arith.mulf %815, %814 : vector<32x128xf32>
    %817 = arith.addf %812, %816 : vector<32x128xf32>
    %c148 = arith.constant 148 : index
    %c0_470 = arith.constant 0 : index
    %818 = vector.load %arg10[%c148, %c0_470] : memref<256x128xf32, #tpu.memory_space<vmem>>, vector<1x128xf32>
    %c640_471 = arith.constant 640 : index
    %c0_472 = arith.constant 0 : index
    %819 = vector.load %arg6[%c640_471, %c0_472] : memref<1024x128xf32, #tpu.memory_space<vmem>>, vector<32x128xf32>
    %820 = vector.broadcast %818 : vector<1x128xf32> to vector<32x128xf32>
    %821 = arith.mulf %820, %819 : vector<32x128xf32>
    %822 = arith.addf %817, %821 : vector<32x128xf32>
    %c149 = arith.constant 149 : index
    %c0_473 = arith.constant 0 : index
    %823 = vector.load %arg10[%c149, %c0_473] : memref<256x128xf32, #tpu.memory_space<vmem>>, vector<1x128xf32>
    %c672_474 = arith.constant 672 : index
    %c0_475 = arith.constant 0 : index
    %824 = vector.load %arg6[%c672_474, %c0_475] : memref<1024x128xf32, #tpu.memory_space<vmem>>, vector<32x128xf32>
    %825 = vector.broadcast %823 : vector<1x128xf32> to vector<32x128xf32>
    %826 = arith.mulf %825, %824 : vector<32x128xf32>
    %827 = arith.addf %822, %826 : vector<32x128xf32>
    %c150 = arith.constant 150 : index
    %c0_476 = arith.constant 0 : index
    %828 = vector.load %arg10[%c150, %c0_476] : memref<256x128xf32, #tpu.memory_space<vmem>>, vector<1x128xf32>
    %c704_477 = arith.constant 704 : index
    %c0_478 = arith.constant 0 : index
    %829 = vector.load %arg6[%c704_477, %c0_478] : memref<1024x128xf32, #tpu.memory_space<vmem>>, vector<32x128xf32>
    %830 = vector.broadcast %828 : vector<1x128xf32> to vector<32x128xf32>
    %831 = arith.mulf %830, %829 : vector<32x128xf32>
    %832 = arith.addf %827, %831 : vector<32x128xf32>
    %c151 = arith.constant 151 : index
    %c0_479 = arith.constant 0 : index
    %833 = vector.load %arg10[%c151, %c0_479] : memref<256x128xf32, #tpu.memory_space<vmem>>, vector<1x128xf32>
    %c736_480 = arith.constant 736 : index
    %c0_481 = arith.constant 0 : index
    %834 = vector.load %arg6[%c736_480, %c0_481] : memref<1024x128xf32, #tpu.memory_space<vmem>>, vector<32x128xf32>
    %835 = vector.broadcast %833 : vector<1x128xf32> to vector<32x128xf32>
    %836 = arith.mulf %835, %834 : vector<32x128xf32>
    %837 = arith.addf %832, %836 : vector<32x128xf32>
    %c152 = arith.constant 152 : index
    %c0_482 = arith.constant 0 : index
    %838 = vector.load %arg10[%c152, %c0_482] : memref<256x128xf32, #tpu.memory_space<vmem>>, vector<1x128xf32>
    %c768_483 = arith.constant 768 : index
    %c0_484 = arith.constant 0 : index
    %839 = vector.load %arg6[%c768_483, %c0_484] : memref<1024x128xf32, #tpu.memory_space<vmem>>, vector<32x128xf32>
    %840 = vector.broadcast %838 : vector<1x128xf32> to vector<32x128xf32>
    %841 = arith.mulf %840, %839 : vector<32x128xf32>
    %842 = arith.addf %837, %841 : vector<32x128xf32>
    %c153 = arith.constant 153 : index
    %c0_485 = arith.constant 0 : index
    %843 = vector.load %arg10[%c153, %c0_485] : memref<256x128xf32, #tpu.memory_space<vmem>>, vector<1x128xf32>
    %c800_486 = arith.constant 800 : index
    %c0_487 = arith.constant 0 : index
    %844 = vector.load %arg6[%c800_486, %c0_487] : memref<1024x128xf32, #tpu.memory_space<vmem>>, vector<32x128xf32>
    %845 = vector.broadcast %843 : vector<1x128xf32> to vector<32x128xf32>
    %846 = arith.mulf %845, %844 : vector<32x128xf32>
    %847 = arith.addf %842, %846 : vector<32x128xf32>
    %c154 = arith.constant 154 : index
    %c0_488 = arith.constant 0 : index
    %848 = vector.load %arg10[%c154, %c0_488] : memref<256x128xf32, #tpu.memory_space<vmem>>, vector<1x128xf32>
    %c832_489 = arith.constant 832 : index
    %c0_490 = arith.constant 0 : index
    %849 = vector.load %arg6[%c832_489, %c0_490] : memref<1024x128xf32, #tpu.memory_space<vmem>>, vector<32x128xf32>
    %850 = vector.broadcast %848 : vector<1x128xf32> to vector<32x128xf32>
    %851 = arith.mulf %850, %849 : vector<32x128xf32>
    %852 = arith.addf %847, %851 : vector<32x128xf32>
    %c155 = arith.constant 155 : index
    %c0_491 = arith.constant 0 : index
    %853 = vector.load %arg10[%c155, %c0_491] : memref<256x128xf32, #tpu.memory_space<vmem>>, vector<1x128xf32>
    %c864_492 = arith.constant 864 : index
    %c0_493 = arith.constant 0 : index
    %854 = vector.load %arg6[%c864_492, %c0_493] : memref<1024x128xf32, #tpu.memory_space<vmem>>, vector<32x128xf32>
    %855 = vector.broadcast %853 : vector<1x128xf32> to vector<32x128xf32>
    %856 = arith.mulf %855, %854 : vector<32x128xf32>
    %857 = arith.addf %852, %856 : vector<32x128xf32>
    %c156 = arith.constant 156 : index
    %c0_494 = arith.constant 0 : index
    %858 = vector.load %arg10[%c156, %c0_494] : memref<256x128xf32, #tpu.memory_space<vmem>>, vector<1x128xf32>
    %c896_495 = arith.constant 896 : index
    %c0_496 = arith.constant 0 : index
    %859 = vector.load %arg6[%c896_495, %c0_496] : memref<1024x128xf32, #tpu.memory_space<vmem>>, vector<32x128xf32>
    %860 = vector.broadcast %858 : vector<1x128xf32> to vector<32x128xf32>
    %861 = arith.mulf %860, %859 : vector<32x128xf32>
    %862 = arith.addf %857, %861 : vector<32x128xf32>
    %c157 = arith.constant 157 : index
    %c0_497 = arith.constant 0 : index
    %863 = vector.load %arg10[%c157, %c0_497] : memref<256x128xf32, #tpu.memory_space<vmem>>, vector<1x128xf32>
    %c928_498 = arith.constant 928 : index
    %c0_499 = arith.constant 0 : index
    %864 = vector.load %arg6[%c928_498, %c0_499] : memref<1024x128xf32, #tpu.memory_space<vmem>>, vector<32x128xf32>
    %865 = vector.broadcast %863 : vector<1x128xf32> to vector<32x128xf32>
    %866 = arith.mulf %865, %864 : vector<32x128xf32>
    %867 = arith.addf %862, %866 : vector<32x128xf32>
    %c158 = arith.constant 158 : index
    %c0_500 = arith.constant 0 : index
    %868 = vector.load %arg10[%c158, %c0_500] : memref<256x128xf32, #tpu.memory_space<vmem>>, vector<1x128xf32>
    %c960_501 = arith.constant 960 : index
    %c0_502 = arith.constant 0 : index
    %869 = vector.load %arg6[%c960_501, %c0_502] : memref<1024x128xf32, #tpu.memory_space<vmem>>, vector<32x128xf32>
    %870 = vector.broadcast %868 : vector<1x128xf32> to vector<32x128xf32>
    %871 = arith.mulf %870, %869 : vector<32x128xf32>
    %872 = arith.addf %867, %871 : vector<32x128xf32>
    %c159 = arith.constant 159 : index
    %c0_503 = arith.constant 0 : index
    %873 = vector.load %arg10[%c159, %c0_503] : memref<256x128xf32, #tpu.memory_space<vmem>>, vector<1x128xf32>
    %c992_504 = arith.constant 992 : index
    %c0_505 = arith.constant 0 : index
    %874 = vector.load %arg6[%c992_504, %c0_505] : memref<1024x128xf32, #tpu.memory_space<vmem>>, vector<32x128xf32>
    %875 = vector.broadcast %873 : vector<1x128xf32> to vector<32x128xf32>
    %876 = arith.mulf %875, %874 : vector<32x128xf32>
    %877 = arith.addf %872, %876 : vector<32x128xf32>
    %cst_506 = arith.constant 0.000000e+00 : f32
    %878 = vector.broadcast %cst_506 : f32 to vector<32x128xf32>
    %879 = arith.maximumf %877, %878 : vector<32x128xf32>
    %c128_507 = arith.constant 128 : index
    %c0_508 = arith.constant 0 : index
    %880 = vector.load %arg8[%c128_507, %c0_508] : memref<256x128xf32, #tpu.memory_space<vmem>>, vector<32x128xf32>
    tpu.vector_store %arg8[%c128_507, %c0_508], %879 {strides = array<i32>} : memref<256x128xf32, #tpu.memory_space<vmem>>, vector<32x128xf32>,
    %c160_509 = arith.constant 160 : index
    %c0_510 = arith.constant 0 : index
    %881 = vector.load %arg10[%c160_509, %c0_510] : memref<256x128xf32, #tpu.memory_space<vmem>>, vector<1x128xf32>
    %c0_511 = arith.constant 0 : index
    %c0_512 = arith.constant 0 : index
    %882 = vector.load %arg6[%c0_511, %c0_512] : memref<1024x128xf32, #tpu.memory_space<vmem>>, vector<32x128xf32>
    %883 = vector.broadcast %881 : vector<1x128xf32> to vector<32x128xf32>
    %884 = arith.mulf %883, %882 : vector<32x128xf32>
    %885 = arith.addf %65, %884 : vector<32x128xf32>
    %c161 = arith.constant 161 : index
    %c0_513 = arith.constant 0 : index
    %886 = vector.load %arg10[%c161, %c0_513] : memref<256x128xf32, #tpu.memory_space<vmem>>, vector<1x128xf32>
    %c32_514 = arith.constant 32 : index
    %c0_515 = arith.constant 0 : index
    %887 = vector.load %arg6[%c32_514, %c0_515] : memref<1024x128xf32, #tpu.memory_space<vmem>>, vector<32x128xf32>
    %888 = vector.broadcast %886 : vector<1x128xf32> to vector<32x128xf32>
    %889 = arith.mulf %888, %887 : vector<32x128xf32>
    %890 = arith.addf %885, %889 : vector<32x128xf32>
    %c162 = arith.constant 162 : index
    %c0_516 = arith.constant 0 : index
    %891 = vector.load %arg10[%c162, %c0_516] : memref<256x128xf32, #tpu.memory_space<vmem>>, vector<1x128xf32>
    %c64_517 = arith.constant 64 : index
    %c0_518 = arith.constant 0 : index
    %892 = vector.load %arg6[%c64_517, %c0_518] : memref<1024x128xf32, #tpu.memory_space<vmem>>, vector<32x128xf32>
    %893 = vector.broadcast %891 : vector<1x128xf32> to vector<32x128xf32>
    %894 = arith.mulf %893, %892 : vector<32x128xf32>
    %895 = arith.addf %890, %894 : vector<32x128xf32>
    %c163 = arith.constant 163 : index
    %c0_519 = arith.constant 0 : index
    %896 = vector.load %arg10[%c163, %c0_519] : memref<256x128xf32, #tpu.memory_space<vmem>>, vector<1x128xf32>
    %c96_520 = arith.constant 96 : index
    %c0_521 = arith.constant 0 : index
    %897 = vector.load %arg6[%c96_520, %c0_521] : memref<1024x128xf32, #tpu.memory_space<vmem>>, vector<32x128xf32>
    %898 = vector.broadcast %896 : vector<1x128xf32> to vector<32x128xf32>
    %899 = arith.mulf %898, %897 : vector<32x128xf32>
    %900 = arith.addf %895, %899 : vector<32x128xf32>
    %c164 = arith.constant 164 : index
    %c0_522 = arith.constant 0 : index
    %901 = vector.load %arg10[%c164, %c0_522] : memref<256x128xf32, #tpu.memory_space<vmem>>, vector<1x128xf32>
    %c128_523 = arith.constant 128 : index
    %c0_524 = arith.constant 0 : index
    %902 = vector.load %arg6[%c128_523, %c0_524] : memref<1024x128xf32, #tpu.memory_space<vmem>>, vector<32x128xf32>
    %903 = vector.broadcast %901 : vector<1x128xf32> to vector<32x128xf32>
    %904 = arith.mulf %903, %902 : vector<32x128xf32>
    %905 = arith.addf %900, %904 : vector<32x128xf32>
    %c165 = arith.constant 165 : index
    %c0_525 = arith.constant 0 : index
    %906 = vector.load %arg10[%c165, %c0_525] : memref<256x128xf32, #tpu.memory_space<vmem>>, vector<1x128xf32>
    %c160_526 = arith.constant 160 : index
    %c0_527 = arith.constant 0 : index
    %907 = vector.load %arg6[%c160_526, %c0_527] : memref<1024x128xf32, #tpu.memory_space<vmem>>, vector<32x128xf32>
    %908 = vector.broadcast %906 : vector<1x128xf32> to vector<32x128xf32>
    %909 = arith.mulf %908, %907 : vector<32x128xf32>
    %910 = arith.addf %905, %909 : vector<32x128xf32>
    %c166 = arith.constant 166 : index
    %c0_528 = arith.constant 0 : index
    %911 = vector.load %arg10[%c166, %c0_528] : memref<256x128xf32, #tpu.memory_space<vmem>>, vector<1x128xf32>
    %c192_529 = arith.constant 192 : index
    %c0_530 = arith.constant 0 : index
    %912 = vector.load %arg6[%c192_529, %c0_530] : memref<1024x128xf32, #tpu.memory_space<vmem>>, vector<32x128xf32>
    %913 = vector.broadcast %911 : vector<1x128xf32> to vector<32x128xf32>
    %914 = arith.mulf %913, %912 : vector<32x128xf32>
    %915 = arith.addf %910, %914 : vector<32x128xf32>
    %c167 = arith.constant 167 : index
    %c0_531 = arith.constant 0 : index
    %916 = vector.load %arg10[%c167, %c0_531] : memref<256x128xf32, #tpu.memory_space<vmem>>, vector<1x128xf32>
    %c224_532 = arith.constant 224 : index
    %c0_533 = arith.constant 0 : index
    %917 = vector.load %arg6[%c224_532, %c0_533] : memref<1024x128xf32, #tpu.memory_space<vmem>>, vector<32x128xf32>
    %918 = vector.broadcast %916 : vector<1x128xf32> to vector<32x128xf32>
    %919 = arith.mulf %918, %917 : vector<32x128xf32>
    %920 = arith.addf %915, %919 : vector<32x128xf32>
    %c168 = arith.constant 168 : index
    %c0_534 = arith.constant 0 : index
    %921 = vector.load %arg10[%c168, %c0_534] : memref<256x128xf32, #tpu.memory_space<vmem>>, vector<1x128xf32>
    %c256_535 = arith.constant 256 : index
    %c0_536 = arith.constant 0 : index
    %922 = vector.load %arg6[%c256_535, %c0_536] : memref<1024x128xf32, #tpu.memory_space<vmem>>, vector<32x128xf32>
    %923 = vector.broadcast %921 : vector<1x128xf32> to vector<32x128xf32>
    %924 = arith.mulf %923, %922 : vector<32x128xf32>
    %925 = arith.addf %920, %924 : vector<32x128xf32>
    %c169 = arith.constant 169 : index
    %c0_537 = arith.constant 0 : index
    %926 = vector.load %arg10[%c169, %c0_537] : memref<256x128xf32, #tpu.memory_space<vmem>>, vector<1x128xf32>
    %c288_538 = arith.constant 288 : index
    %c0_539 = arith.constant 0 : index
    %927 = vector.load %arg6[%c288_538, %c0_539] : memref<1024x128xf32, #tpu.memory_space<vmem>>, vector<32x128xf32>
    %928 = vector.broadcast %926 : vector<1x128xf32> to vector<32x128xf32>
    %929 = arith.mulf %928, %927 : vector<32x128xf32>
    %930 = arith.addf %925, %929 : vector<32x128xf32>
    %c170 = arith.constant 170 : index
    %c0_540 = arith.constant 0 : index
    %931 = vector.load %arg10[%c170, %c0_540] : memref<256x128xf32, #tpu.memory_space<vmem>>, vector<1x128xf32>
    %c320_541 = arith.constant 320 : index
    %c0_542 = arith.constant 0 : index
    %932 = vector.load %arg6[%c320_541, %c0_542] : memref<1024x128xf32, #tpu.memory_space<vmem>>, vector<32x128xf32>
    %933 = vector.broadcast %931 : vector<1x128xf32> to vector<32x128xf32>
    %934 = arith.mulf %933, %932 : vector<32x128xf32>
    %935 = arith.addf %930, %934 : vector<32x128xf32>
    %c171 = arith.constant 171 : index
    %c0_543 = arith.constant 0 : index
    %936 = vector.load %arg10[%c171, %c0_543] : memref<256x128xf32, #tpu.memory_space<vmem>>, vector<1x128xf32>
    %c352_544 = arith.constant 352 : index
    %c0_545 = arith.constant 0 : index
    %937 = vector.load %arg6[%c352_544, %c0_545] : memref<1024x128xf32, #tpu.memory_space<vmem>>, vector<32x128xf32>
    %938 = vector.broadcast %936 : vector<1x128xf32> to vector<32x128xf32>
    %939 = arith.mulf %938, %937 : vector<32x128xf32>
    %940 = arith.addf %935, %939 : vector<32x128xf32>
    %c172 = arith.constant 172 : index
    %c0_546 = arith.constant 0 : index
    %941 = vector.load %arg10[%c172, %c0_546] : memref<256x128xf32, #tpu.memory_space<vmem>>, vector<1x128xf32>
    %c384_547 = arith.constant 384 : index
    %c0_548 = arith.constant 0 : index
    %942 = vector.load %arg6[%c384_547, %c0_548] : memref<1024x128xf32, #tpu.memory_space<vmem>>, vector<32x128xf32>
    %943 = vector.broadcast %941 : vector<1x128xf32> to vector<32x128xf32>
    %944 = arith.mulf %943, %942 : vector<32x128xf32>
    %945 = arith.addf %940, %944 : vector<32x128xf32>
    %c173 = arith.constant 173 : index
    %c0_549 = arith.constant 0 : index
    %946 = vector.load %arg10[%c173, %c0_549] : memref<256x128xf32, #tpu.memory_space<vmem>>, vector<1x128xf32>
    %c416_550 = arith.constant 416 : index
    %c0_551 = arith.constant 0 : index
    %947 = vector.load %arg6[%c416_550, %c0_551] : memref<1024x128xf32, #tpu.memory_space<vmem>>, vector<32x128xf32>
    %948 = vector.broadcast %946 : vector<1x128xf32> to vector<32x128xf32>
    %949 = arith.mulf %948, %947 : vector<32x128xf32>
    %950 = arith.addf %945, %949 : vector<32x128xf32>
    %c174 = arith.constant 174 : index
    %c0_552 = arith.constant 0 : index
    %951 = vector.load %arg10[%c174, %c0_552] : memref<256x128xf32, #tpu.memory_space<vmem>>, vector<1x128xf32>
    %c448_553 = arith.constant 448 : index
    %c0_554 = arith.constant 0 : index
    %952 = vector.load %arg6[%c448_553, %c0_554] : memref<1024x128xf32, #tpu.memory_space<vmem>>, vector<32x128xf32>
    %953 = vector.broadcast %951 : vector<1x128xf32> to vector<32x128xf32>
    %954 = arith.mulf %953, %952 : vector<32x128xf32>
    %955 = arith.addf %950, %954 : vector<32x128xf32>
    %c175 = arith.constant 175 : index
    %c0_555 = arith.constant 0 : index
    %956 = vector.load %arg10[%c175, %c0_555] : memref<256x128xf32, #tpu.memory_space<vmem>>, vector<1x128xf32>
    %c480_556 = arith.constant 480 : index
    %c0_557 = arith.constant 0 : index
    %957 = vector.load %arg6[%c480_556, %c0_557] : memref<1024x128xf32, #tpu.memory_space<vmem>>, vector<32x128xf32>
    %958 = vector.broadcast %956 : vector<1x128xf32> to vector<32x128xf32>
    %959 = arith.mulf %958, %957 : vector<32x128xf32>
    %960 = arith.addf %955, %959 : vector<32x128xf32>
    %c176 = arith.constant 176 : index
    %c0_558 = arith.constant 0 : index
    %961 = vector.load %arg10[%c176, %c0_558] : memref<256x128xf32, #tpu.memory_space<vmem>>, vector<1x128xf32>
    %c512_559 = arith.constant 512 : index
    %c0_560 = arith.constant 0 : index
    %962 = vector.load %arg6[%c512_559, %c0_560] : memref<1024x128xf32, #tpu.memory_space<vmem>>, vector<32x128xf32>
    %963 = vector.broadcast %961 : vector<1x128xf32> to vector<32x128xf32>
    %964 = arith.mulf %963, %962 : vector<32x128xf32>
    %965 = arith.addf %960, %964 : vector<32x128xf32>
    %c177 = arith.constant 177 : index
    %c0_561 = arith.constant 0 : index
    %966 = vector.load %arg10[%c177, %c0_561] : memref<256x128xf32, #tpu.memory_space<vmem>>, vector<1x128xf32>
    %c544_562 = arith.constant 544 : index
    %c0_563 = arith.constant 0 : index
    %967 = vector.load %arg6[%c544_562, %c0_563] : memref<1024x128xf32, #tpu.memory_space<vmem>>, vector<32x128xf32>
    %968 = vector.broadcast %966 : vector<1x128xf32> to vector<32x128xf32>
    %969 = arith.mulf %968, %967 : vector<32x128xf32>
    %970 = arith.addf %965, %969 : vector<32x128xf32>
    %c178 = arith.constant 178 : index
    %c0_564 = arith.constant 0 : index
    %971 = vector.load %arg10[%c178, %c0_564] : memref<256x128xf32, #tpu.memory_space<vmem>>, vector<1x128xf32>
    %c576_565 = arith.constant 576 : index
    %c0_566 = arith.constant 0 : index
    %972 = vector.load %arg6[%c576_565, %c0_566] : memref<1024x128xf32, #tpu.memory_space<vmem>>, vector<32x128xf32>
    %973 = vector.broadcast %971 : vector<1x128xf32> to vector<32x128xf32>
    %974 = arith.mulf %973, %972 : vector<32x128xf32>
    %975 = arith.addf %970, %974 : vector<32x128xf32>
    %c179 = arith.constant 179 : index
    %c0_567 = arith.constant 0 : index
    %976 = vector.load %arg10[%c179, %c0_567] : memref<256x128xf32, #tpu.memory_space<vmem>>, vector<1x128xf32>
    %c608_568 = arith.constant 608 : index
    %c0_569 = arith.constant 0 : index
    %977 = vector.load %arg6[%c608_568, %c0_569] : memref<1024x128xf32, #tpu.memory_space<vmem>>, vector<32x128xf32>
    %978 = vector.broadcast %976 : vector<1x128xf32> to vector<32x128xf32>
    %979 = arith.mulf %978, %977 : vector<32x128xf32>
    %980 = arith.addf %975, %979 : vector<32x128xf32>
    %c180 = arith.constant 180 : index
    %c0_570 = arith.constant 0 : index
    %981 = vector.load %arg10[%c180, %c0_570] : memref<256x128xf32, #tpu.memory_space<vmem>>, vector<1x128xf32>
    %c640_571 = arith.constant 640 : index
    %c0_572 = arith.constant 0 : index
    %982 = vector.load %arg6[%c640_571, %c0_572] : memref<1024x128xf32, #tpu.memory_space<vmem>>, vector<32x128xf32>
    %983 = vector.broadcast %981 : vector<1x128xf32> to vector<32x128xf32>
    %984 = arith.mulf %983, %982 : vector<32x128xf32>
    %985 = arith.addf %980, %984 : vector<32x128xf32>
    %c181 = arith.constant 181 : index
    %c0_573 = arith.constant 0 : index
    %986 = vector.load %arg10[%c181, %c0_573] : memref<256x128xf32, #tpu.memory_space<vmem>>, vector<1x128xf32>
    %c672_574 = arith.constant 672 : index
    %c0_575 = arith.constant 0 : index
    %987 = vector.load %arg6[%c672_574, %c0_575] : memref<1024x128xf32, #tpu.memory_space<vmem>>, vector<32x128xf32>
    %988 = vector.broadcast %986 : vector<1x128xf32> to vector<32x128xf32>
    %989 = arith.mulf %988, %987 : vector<32x128xf32>
    %990 = arith.addf %985, %989 : vector<32x128xf32>
    %c182 = arith.constant 182 : index
    %c0_576 = arith.constant 0 : index
    %991 = vector.load %arg10[%c182, %c0_576] : memref<256x128xf32, #tpu.memory_space<vmem>>, vector<1x128xf32>
    %c704_577 = arith.constant 704 : index
    %c0_578 = arith.constant 0 : index
    %992 = vector.load %arg6[%c704_577, %c0_578] : memref<1024x128xf32, #tpu.memory_space<vmem>>, vector<32x128xf32>
    %993 = vector.broadcast %991 : vector<1x128xf32> to vector<32x128xf32>
    %994 = arith.mulf %993, %992 : vector<32x128xf32>
    %995 = arith.addf %990, %994 : vector<32x128xf32>
    %c183 = arith.constant 183 : index
    %c0_579 = arith.constant 0 : index
    %996 = vector.load %arg10[%c183, %c0_579] : memref<256x128xf32, #tpu.memory_space<vmem>>, vector<1x128xf32>
    %c736_580 = arith.constant 736 : index
    %c0_581 = arith.constant 0 : index
    %997 = vector.load %arg6[%c736_580, %c0_581] : memref<1024x128xf32, #tpu.memory_space<vmem>>, vector<32x128xf32>
    %998 = vector.broadcast %996 : vector<1x128xf32> to vector<32x128xf32>
    %999 = arith.mulf %998, %997 : vector<32x128xf32>
    %1000 = arith.addf %995, %999 : vector<32x128xf32>
    %c184 = arith.constant 184 : index
    %c0_582 = arith.constant 0 : index
    %1001 = vector.load %arg10[%c184, %c0_582] : memref<256x128xf32, #tpu.memory_space<vmem>>, vector<1x128xf32>
    %c768_583 = arith.constant 768 : index
    %c0_584 = arith.constant 0 : index
    %1002 = vector.load %arg6[%c768_583, %c0_584] : memref<1024x128xf32, #tpu.memory_space<vmem>>, vector<32x128xf32>
    %1003 = vector.broadcast %1001 : vector<1x128xf32> to vector<32x128xf32>
    %1004 = arith.mulf %1003, %1002 : vector<32x128xf32>
    %1005 = arith.addf %1000, %1004 : vector<32x128xf32>
    %c185 = arith.constant 185 : index
    %c0_585 = arith.constant 0 : index
    %1006 = vector.load %arg10[%c185, %c0_585] : memref<256x128xf32, #tpu.memory_space<vmem>>, vector<1x128xf32>
    %c800_586 = arith.constant 800 : index
    %c0_587 = arith.constant 0 : index
    %1007 = vector.load %arg6[%c800_586, %c0_587] : memref<1024x128xf32, #tpu.memory_space<vmem>>, vector<32x128xf32>
    %1008 = vector.broadcast %1006 : vector<1x128xf32> to vector<32x128xf32>
    %1009 = arith.mulf %1008, %1007 : vector<32x128xf32>
    %1010 = arith.addf %1005, %1009 : vector<32x128xf32>
    %c186 = arith.constant 186 : index
    %c0_588 = arith.constant 0 : index
    %1011 = vector.load %arg10[%c186, %c0_588] : memref<256x128xf32, #tpu.memory_space<vmem>>, vector<1x128xf32>
    %c832_589 = arith.constant 832 : index
    %c0_590 = arith.constant 0 : index
    %1012 = vector.load %arg6[%c832_589, %c0_590] : memref<1024x128xf32, #tpu.memory_space<vmem>>, vector<32x128xf32>
    %1013 = vector.broadcast %1011 : vector<1x128xf32> to vector<32x128xf32>
    %1014 = arith.mulf %1013, %1012 : vector<32x128xf32>
    %1015 = arith.addf %1010, %1014 : vector<32x128xf32>
    %c187 = arith.constant 187 : index
    %c0_591 = arith.constant 0 : index
    %1016 = vector.load %arg10[%c187, %c0_591] : memref<256x128xf32, #tpu.memory_space<vmem>>, vector<1x128xf32>
    %c864_592 = arith.constant 864 : index
    %c0_593 = arith.constant 0 : index
    %1017 = vector.load %arg6[%c864_592, %c0_593] : memref<1024x128xf32, #tpu.memory_space<vmem>>, vector<32x128xf32>
    %1018 = vector.broadcast %1016 : vector<1x128xf32> to vector<32x128xf32>
    %1019 = arith.mulf %1018, %1017 : vector<32x128xf32>
    %1020 = arith.addf %1015, %1019 : vector<32x128xf32>
    %c188 = arith.constant 188 : index
    %c0_594 = arith.constant 0 : index
    %1021 = vector.load %arg10[%c188, %c0_594] : memref<256x128xf32, #tpu.memory_space<vmem>>, vector<1x128xf32>
    %c896_595 = arith.constant 896 : index
    %c0_596 = arith.constant 0 : index
    %1022 = vector.load %arg6[%c896_595, %c0_596] : memref<1024x128xf32, #tpu.memory_space<vmem>>, vector<32x128xf32>
    %1023 = vector.broadcast %1021 : vector<1x128xf32> to vector<32x128xf32>
    %1024 = arith.mulf %1023, %1022 : vector<32x128xf32>
    %1025 = arith.addf %1020, %1024 : vector<32x128xf32>
    %c189 = arith.constant 189 : index
    %c0_597 = arith.constant 0 : index
    %1026 = vector.load %arg10[%c189, %c0_597] : memref<256x128xf32, #tpu.memory_space<vmem>>, vector<1x128xf32>
    %c928_598 = arith.constant 928 : index
    %c0_599 = arith.constant 0 : index
    %1027 = vector.load %arg6[%c928_598, %c0_599] : memref<1024x128xf32, #tpu.memory_space<vmem>>, vector<32x128xf32>
    %1028 = vector.broadcast %1026 : vector<1x128xf32> to vector<32x128xf32>
    %1029 = arith.mulf %1028, %1027 : vector<32x128xf32>
    %1030 = arith.addf %1025, %1029 : vector<32x128xf32>
    %c190 = arith.constant 190 : index
    %c0_600 = arith.constant 0 : index
    %1031 = vector.load %arg10[%c190, %c0_600] : memref<256x128xf32, #tpu.memory_space<vmem>>, vector<1x128xf32>
    %c960_601 = arith.constant 960 : index
    %c0_602 = arith.constant 0 : index
    %1032 = vector.load %arg6[%c960_601, %c0_602] : memref<1024x128xf32, #tpu.memory_space<vmem>>, vector<32x128xf32>
    %1033 = vector.broadcast %1031 : vector<1x128xf32> to vector<32x128xf32>
    %1034 = arith.mulf %1033, %1032 : vector<32x128xf32>
    %1035 = arith.addf %1030, %1034 : vector<32x128xf32>
    %c191 = arith.constant 191 : index
    %c0_603 = arith.constant 0 : index
    %1036 = vector.load %arg10[%c191, %c0_603] : memref<256x128xf32, #tpu.memory_space<vmem>>, vector<1x128xf32>
    %c992_604 = arith.constant 992 : index
    %c0_605 = arith.constant 0 : index
    %1037 = vector.load %arg6[%c992_604, %c0_605] : memref<1024x128xf32, #tpu.memory_space<vmem>>, vector<32x128xf32>
    %1038 = vector.broadcast %1036 : vector<1x128xf32> to vector<32x128xf32>
    %1039 = arith.mulf %1038, %1037 : vector<32x128xf32>
    %1040 = arith.addf %1035, %1039 : vector<32x128xf32>
    %cst_606 = arith.constant 0.000000e+00 : f32
    %1041 = vector.broadcast %cst_606 : f32 to vector<32x128xf32>
    %1042 = arith.maximumf %1040, %1041 : vector<32x128xf32>
    %c160_607 = arith.constant 160 : index
    %c0_608 = arith.constant 0 : index
    %1043 = vector.load %arg8[%c160_607, %c0_608] : memref<256x128xf32, #tpu.memory_space<vmem>>, vector<32x128xf32>
    tpu.vector_store %arg8[%c160_607, %c0_608], %1042 {strides = array<i32>} : memref<256x128xf32, #tpu.memory_space<vmem>>, vector<32x128xf32>,
    %c192_609 = arith.constant 192 : index
    %c0_610 = arith.constant 0 : index
    %1044 = vector.load %arg10[%c192_609, %c0_610] : memref<256x128xf32, #tpu.memory_space<vmem>>, vector<1x128xf32>
    %c0_611 = arith.constant 0 : index
    %c0_612 = arith.constant 0 : index
    %1045 = vector.load %arg6[%c0_611, %c0_612] : memref<1024x128xf32, #tpu.memory_space<vmem>>, vector<32x128xf32>
    %1046 = vector.broadcast %1044 : vector<1x128xf32> to vector<32x128xf32>
    %1047 = arith.mulf %1046, %1045 : vector<32x128xf32>
    %1048 = arith.addf %65, %1047 : vector<32x128xf32>
    %c193 = arith.constant 193 : index
    %c0_613 = arith.constant 0 : index
    %1049 = vector.load %arg10[%c193, %c0_613] : memref<256x128xf32, #tpu.memory_space<vmem>>, vector<1x128xf32>
    %c32_614 = arith.constant 32 : index
    %c0_615 = arith.constant 0 : index
    %1050 = vector.load %arg6[%c32_614, %c0_615] : memref<1024x128xf32, #tpu.memory_space<vmem>>, vector<32x128xf32>
    %1051 = vector.broadcast %1049 : vector<1x128xf32> to vector<32x128xf32>
    %1052 = arith.mulf %1051, %1050 : vector<32x128xf32>
    %1053 = arith.addf %1048, %1052 : vector<32x128xf32>
    %c194 = arith.constant 194 : index
    %c0_616 = arith.constant 0 : index
    %1054 = vector.load %arg10[%c194, %c0_616] : memref<256x128xf32, #tpu.memory_space<vmem>>, vector<1x128xf32>
    %c64_617 = arith.constant 64 : index
    %c0_618 = arith.constant 0 : index
    %1055 = vector.load %arg6[%c64_617, %c0_618] : memref<1024x128xf32, #tpu.memory_space<vmem>>, vector<32x128xf32>
    %1056 = vector.broadcast %1054 : vector<1x128xf32> to vector<32x128xf32>
    %1057 = arith.mulf %1056, %1055 : vector<32x128xf32>
    %1058 = arith.addf %1053, %1057 : vector<32x128xf32>
    %c195 = arith.constant 195 : index
    %c0_619 = arith.constant 0 : index
    %1059 = vector.load %arg10[%c195, %c0_619] : memref<256x128xf32, #tpu.memory_space<vmem>>, vector<1x128xf32>
    %c96_620 = arith.constant 96 : index
    %c0_621 = arith.constant 0 : index
    %1060 = vector.load %arg6[%c96_620, %c0_621] : memref<1024x128xf32, #tpu.memory_space<vmem>>, vector<32x128xf32>
    %1061 = vector.broadcast %1059 : vector<1x128xf32> to vector<32x128xf32>
    %1062 = arith.mulf %1061, %1060 : vector<32x128xf32>
    %1063 = arith.addf %1058, %1062 : vector<32x128xf32>
    %c196 = arith.constant 196 : index
    %c0_622 = arith.constant 0 : index
    %1064 = vector.load %arg10[%c196, %c0_622] : memref<256x128xf32, #tpu.memory_space<vmem>>, vector<1x128xf32>
    %c128_623 = arith.constant 128 : index
    %c0_624 = arith.constant 0 : index
    %1065 = vector.load %arg6[%c128_623, %c0_624] : memref<1024x128xf32, #tpu.memory_space<vmem>>, vector<32x128xf32>
    %1066 = vector.broadcast %1064 : vector<1x128xf32> to vector<32x128xf32>
    %1067 = arith.mulf %1066, %1065 : vector<32x128xf32>
    %1068 = arith.addf %1063, %1067 : vector<32x128xf32>
    %c197 = arith.constant 197 : index
    %c0_625 = arith.constant 0 : index
    %1069 = vector.load %arg10[%c197, %c0_625] : memref<256x128xf32, #tpu.memory_space<vmem>>, vector<1x128xf32>
    %c160_626 = arith.constant 160 : index
    %c0_627 = arith.constant 0 : index
    %1070 = vector.load %arg6[%c160_626, %c0_627] : memref<1024x128xf32, #tpu.memory_space<vmem>>, vector<32x128xf32>
    %1071 = vector.broadcast %1069 : vector<1x128xf32> to vector<32x128xf32>
    %1072 = arith.mulf %1071, %1070 : vector<32x128xf32>
    %1073 = arith.addf %1068, %1072 : vector<32x128xf32>
    %c198 = arith.constant 198 : index
    %c0_628 = arith.constant 0 : index
    %1074 = vector.load %arg10[%c198, %c0_628] : memref<256x128xf32, #tpu.memory_space<vmem>>, vector<1x128xf32>
    %c192_629 = arith.constant 192 : index
    %c0_630 = arith.constant 0 : index
    %1075 = vector.load %arg6[%c192_629, %c0_630] : memref<1024x128xf32, #tpu.memory_space<vmem>>, vector<32x128xf32>
    %1076 = vector.broadcast %1074 : vector<1x128xf32> to vector<32x128xf32>
    %1077 = arith.mulf %1076, %1075 : vector<32x128xf32>
    %1078 = arith.addf %1073, %1077 : vector<32x128xf32>
    %c199 = arith.constant 199 : index
    %c0_631 = arith.constant 0 : index
    %1079 = vector.load %arg10[%c199, %c0_631] : memref<256x128xf32, #tpu.memory_space<vmem>>, vector<1x128xf32>
    %c224_632 = arith.constant 224 : index
    %c0_633 = arith.constant 0 : index
    %1080 = vector.load %arg6[%c224_632, %c0_633] : memref<1024x128xf32, #tpu.memory_space<vmem>>, vector<32x128xf32>
    %1081 = vector.broadcast %1079 : vector<1x128xf32> to vector<32x128xf32>
    %1082 = arith.mulf %1081, %1080 : vector<32x128xf32>
    %1083 = arith.addf %1078, %1082 : vector<32x128xf32>
    %c200 = arith.constant 200 : index
    %c0_634 = arith.constant 0 : index
    %1084 = vector.load %arg10[%c200, %c0_634] : memref<256x128xf32, #tpu.memory_space<vmem>>, vector<1x128xf32>
    %c256_635 = arith.constant 256 : index
    %c0_636 = arith.constant 0 : index
    %1085 = vector.load %arg6[%c256_635, %c0_636] : memref<1024x128xf32, #tpu.memory_space<vmem>>, vector<32x128xf32>
    %1086 = vector.broadcast %1084 : vector<1x128xf32> to vector<32x128xf32>
    %1087 = arith.mulf %1086, %1085 : vector<32x128xf32>
    %1088 = arith.addf %1083, %1087 : vector<32x128xf32>
    %c201 = arith.constant 201 : index
    %c0_637 = arith.constant 0 : index
    %1089 = vector.load %arg10[%c201, %c0_637] : memref<256x128xf32, #tpu.memory_space<vmem>>, vector<1x128xf32>
    %c288_638 = arith.constant 288 : index
    %c0_639 = arith.constant 0 : index
    %1090 = vector.load %arg6[%c288_638, %c0_639] : memref<1024x128xf32, #tpu.memory_space<vmem>>, vector<32x128xf32>
    %1091 = vector.broadcast %1089 : vector<1x128xf32> to vector<32x128xf32>
    %1092 = arith.mulf %1091, %1090 : vector<32x128xf32>
    %1093 = arith.addf %1088, %1092 : vector<32x128xf32>
    %c202 = arith.constant 202 : index
    %c0_640 = arith.constant 0 : index
    %1094 = vector.load %arg10[%c202, %c0_640] : memref<256x128xf32, #tpu.memory_space<vmem>>, vector<1x128xf32>
    %c320_641 = arith.constant 320 : index
    %c0_642 = arith.constant 0 : index
    %1095 = vector.load %arg6[%c320_641, %c0_642] : memref<1024x128xf32, #tpu.memory_space<vmem>>, vector<32x128xf32>
    %1096 = vector.broadcast %1094 : vector<1x128xf32> to vector<32x128xf32>
    %1097 = arith.mulf %1096, %1095 : vector<32x128xf32>
    %1098 = arith.addf %1093, %1097 : vector<32x128xf32>
    %c203 = arith.constant 203 : index
    %c0_643 = arith.constant 0 : index
    %1099 = vector.load %arg10[%c203, %c0_643] : memref<256x128xf32, #tpu.memory_space<vmem>>, vector<1x128xf32>
    %c352_644 = arith.constant 352 : index
    %c0_645 = arith.constant 0 : index
    %1100 = vector.load %arg6[%c352_644, %c0_645] : memref<1024x128xf32, #tpu.memory_space<vmem>>, vector<32x128xf32>
    %1101 = vector.broadcast %1099 : vector<1x128xf32> to vector<32x128xf32>
    %1102 = arith.mulf %1101, %1100 : vector<32x128xf32>
    %1103 = arith.addf %1098, %1102 : vector<32x128xf32>
    %c204 = arith.constant 204 : index
    %c0_646 = arith.constant 0 : index
    %1104 = vector.load %arg10[%c204, %c0_646] : memref<256x128xf32, #tpu.memory_space<vmem>>, vector<1x128xf32>
    %c384_647 = arith.constant 384 : index
    %c0_648 = arith.constant 0 : index
    %1105 = vector.load %arg6[%c384_647, %c0_648] : memref<1024x128xf32, #tpu.memory_space<vmem>>, vector<32x128xf32>
    %1106 = vector.broadcast %1104 : vector<1x128xf32> to vector<32x128xf32>
    %1107 = arith.mulf %1106, %1105 : vector<32x128xf32>
    %1108 = arith.addf %1103, %1107 : vector<32x128xf32>
    %c205 = arith.constant 205 : index
    %c0_649 = arith.constant 0 : index
    %1109 = vector.load %arg10[%c205, %c0_649] : memref<256x128xf32, #tpu.memory_space<vmem>>, vector<1x128xf32>
    %c416_650 = arith.constant 416 : index
    %c0_651 = arith.constant 0 : index
    %1110 = vector.load %arg6[%c416_650, %c0_651] : memref<1024x128xf32, #tpu.memory_space<vmem>>, vector<32x128xf32>
    %1111 = vector.broadcast %1109 : vector<1x128xf32> to vector<32x128xf32>
    %1112 = arith.mulf %1111, %1110 : vector<32x128xf32>
    %1113 = arith.addf %1108, %1112 : vector<32x128xf32>
    %c206 = arith.constant 206 : index
    %c0_652 = arith.constant 0 : index
    %1114 = vector.load %arg10[%c206, %c0_652] : memref<256x128xf32, #tpu.memory_space<vmem>>, vector<1x128xf32>
    %c448_653 = arith.constant 448 : index
    %c0_654 = arith.constant 0 : index
    %1115 = vector.load %arg6[%c448_653, %c0_654] : memref<1024x128xf32, #tpu.memory_space<vmem>>, vector<32x128xf32>
    %1116 = vector.broadcast %1114 : vector<1x128xf32> to vector<32x128xf32>
    %1117 = arith.mulf %1116, %1115 : vector<32x128xf32>
    %1118 = arith.addf %1113, %1117 : vector<32x128xf32>
    %c207 = arith.constant 207 : index
    %c0_655 = arith.constant 0 : index
    %1119 = vector.load %arg10[%c207, %c0_655] : memref<256x128xf32, #tpu.memory_space<vmem>>, vector<1x128xf32>
    %c480_656 = arith.constant 480 : index
    %c0_657 = arith.constant 0 : index
    %1120 = vector.load %arg6[%c480_656, %c0_657] : memref<1024x128xf32, #tpu.memory_space<vmem>>, vector<32x128xf32>
    %1121 = vector.broadcast %1119 : vector<1x128xf32> to vector<32x128xf32>
    %1122 = arith.mulf %1121, %1120 : vector<32x128xf32>
    %1123 = arith.addf %1118, %1122 : vector<32x128xf32>
    %c208 = arith.constant 208 : index
    %c0_658 = arith.constant 0 : index
    %1124 = vector.load %arg10[%c208, %c0_658] : memref<256x128xf32, #tpu.memory_space<vmem>>, vector<1x128xf32>
    %c512_659 = arith.constant 512 : index
    %c0_660 = arith.constant 0 : index
    %1125 = vector.load %arg6[%c512_659, %c0_660] : memref<1024x128xf32, #tpu.memory_space<vmem>>, vector<32x128xf32>
    %1126 = vector.broadcast %1124 : vector<1x128xf32> to vector<32x128xf32>
    %1127 = arith.mulf %1126, %1125 : vector<32x128xf32>
    %1128 = arith.addf %1123, %1127 : vector<32x128xf32>
    %c209 = arith.constant 209 : index
    %c0_661 = arith.constant 0 : index
    %1129 = vector.load %arg10[%c209, %c0_661] : memref<256x128xf32, #tpu.memory_space<vmem>>, vector<1x128xf32>
    %c544_662 = arith.constant 544 : index
    %c0_663 = arith.constant 0 : index
    %1130 = vector.load %arg6[%c544_662, %c0_663] : memref<1024x128xf32, #tpu.memory_space<vmem>>, vector<32x128xf32>
    %1131 = vector.broadcast %1129 : vector<1x128xf32> to vector<32x128xf32>
    %1132 = arith.mulf %1131, %1130 : vector<32x128xf32>
    %1133 = arith.addf %1128, %1132 : vector<32x128xf32>
    %c210 = arith.constant 210 : index
    %c0_664 = arith.constant 0 : index
    %1134 = vector.load %arg10[%c210, %c0_664] : memref<256x128xf32, #tpu.memory_space<vmem>>, vector<1x128xf32>
    %c576_665 = arith.constant 576 : index
    %c0_666 = arith.constant 0 : index
    %1135 = vector.load %arg6[%c576_665, %c0_666] : memref<1024x128xf32, #tpu.memory_space<vmem>>, vector<32x128xf32>
    %1136 = vector.broadcast %1134 : vector<1x128xf32> to vector<32x128xf32>
    %1137 = arith.mulf %1136, %1135 : vector<32x128xf32>
    %1138 = arith.addf %1133, %1137 : vector<32x128xf32>
    %c211 = arith.constant 211 : index
    %c0_667 = arith.constant 0 : index
    %1139 = vector.load %arg10[%c211, %c0_667] : memref<256x128xf32, #tpu.memory_space<vmem>>, vector<1x128xf32>
    %c608_668 = arith.constant 608 : index
    %c0_669 = arith.constant 0 : index
    %1140 = vector.load %arg6[%c608_668, %c0_669] : memref<1024x128xf32, #tpu.memory_space<vmem>>, vector<32x128xf32>
    %1141 = vector.broadcast %1139 : vector<1x128xf32> to vector<32x128xf32>
    %1142 = arith.mulf %1141, %1140 : vector<32x128xf32>
    %1143 = arith.addf %1138, %1142 : vector<32x128xf32>
    %c212 = arith.constant 212 : index
    %c0_670 = arith.constant 0 : index
    %1144 = vector.load %arg10[%c212, %c0_670] : memref<256x128xf32, #tpu.memory_space<vmem>>, vector<1x128xf32>
    %c640_671 = arith.constant 640 : index
    %c0_672 = arith.constant 0 : index
    %1145 = vector.load %arg6[%c640_671, %c0_672] : memref<1024x128xf32, #tpu.memory_space<vmem>>, vector<32x128xf32>
    %1146 = vector.broadcast %1144 : vector<1x128xf32> to vector<32x128xf32>
    %1147 = arith.mulf %1146, %1145 : vector<32x128xf32>
    %1148 = arith.addf %1143, %1147 : vector<32x128xf32>
    %c213 = arith.constant 213 : index
    %c0_673 = arith.constant 0 : index
    %1149 = vector.load %arg10[%c213, %c0_673] : memref<256x128xf32, #tpu.memory_space<vmem>>, vector<1x128xf32>
    %c672_674 = arith.constant 672 : index
    %c0_675 = arith.constant 0 : index
    %1150 = vector.load %arg6[%c672_674, %c0_675] : memref<1024x128xf32, #tpu.memory_space<vmem>>, vector<32x128xf32>
    %1151 = vector.broadcast %1149 : vector<1x128xf32> to vector<32x128xf32>
    %1152 = arith.mulf %1151, %1150 : vector<32x128xf32>
    %1153 = arith.addf %1148, %1152 : vector<32x128xf32>
    %c214 = arith.constant 214 : index
    %c0_676 = arith.constant 0 : index
    %1154 = vector.load %arg10[%c214, %c0_676] : memref<256x128xf32, #tpu.memory_space<vmem>>, vector<1x128xf32>
    %c704_677 = arith.constant 704 : index
    %c0_678 = arith.constant 0 : index
    %1155 = vector.load %arg6[%c704_677, %c0_678] : memref<1024x128xf32, #tpu.memory_space<vmem>>, vector<32x128xf32>
    %1156 = vector.broadcast %1154 : vector<1x128xf32> to vector<32x128xf32>
    %1157 = arith.mulf %1156, %1155 : vector<32x128xf32>
    %1158 = arith.addf %1153, %1157 : vector<32x128xf32>
    %c215 = arith.constant 215 : index
    %c0_679 = arith.constant 0 : index
    %1159 = vector.load %arg10[%c215, %c0_679] : memref<256x128xf32, #tpu.memory_space<vmem>>, vector<1x128xf32>
    %c736_680 = arith.constant 736 : index
    %c0_681 = arith.constant 0 : index
    %1160 = vector.load %arg6[%c736_680, %c0_681] : memref<1024x128xf32, #tpu.memory_space<vmem>>, vector<32x128xf32>
    %1161 = vector.broadcast %1159 : vector<1x128xf32> to vector<32x128xf32>
    %1162 = arith.mulf %1161, %1160 : vector<32x128xf32>
    %1163 = arith.addf %1158, %1162 : vector<32x128xf32>
    %c216 = arith.constant 216 : index
    %c0_682 = arith.constant 0 : index
    %1164 = vector.load %arg10[%c216, %c0_682] : memref<256x128xf32, #tpu.memory_space<vmem>>, vector<1x128xf32>
    %c768_683 = arith.constant 768 : index
    %c0_684 = arith.constant 0 : index
    %1165 = vector.load %arg6[%c768_683, %c0_684] : memref<1024x128xf32, #tpu.memory_space<vmem>>, vector<32x128xf32>
    %1166 = vector.broadcast %1164 : vector<1x128xf32> to vector<32x128xf32>
    %1167 = arith.mulf %1166, %1165 : vector<32x128xf32>
    %1168 = arith.addf %1163, %1167 : vector<32x128xf32>
    %c217 = arith.constant 217 : index
    %c0_685 = arith.constant 0 : index
    %1169 = vector.load %arg10[%c217, %c0_685] : memref<256x128xf32, #tpu.memory_space<vmem>>, vector<1x128xf32>
    %c800_686 = arith.constant 800 : index
    %c0_687 = arith.constant 0 : index
    %1170 = vector.load %arg6[%c800_686, %c0_687] : memref<1024x128xf32, #tpu.memory_space<vmem>>, vector<32x128xf32>
    %1171 = vector.broadcast %1169 : vector<1x128xf32> to vector<32x128xf32>
    %1172 = arith.mulf %1171, %1170 : vector<32x128xf32>
    %1173 = arith.addf %1168, %1172 : vector<32x128xf32>
    %c218 = arith.constant 218 : index
    %c0_688 = arith.constant 0 : index
    %1174 = vector.load %arg10[%c218, %c0_688] : memref<256x128xf32, #tpu.memory_space<vmem>>, vector<1x128xf32>
    %c832_689 = arith.constant 832 : index
    %c0_690 = arith.constant 0 : index
    %1175 = vector.load %arg6[%c832_689, %c0_690] : memref<1024x128xf32, #tpu.memory_space<vmem>>, vector<32x128xf32>
    %1176 = vector.broadcast %1174 : vector<1x128xf32> to vector<32x128xf32>
    %1177 = arith.mulf %1176, %1175 : vector<32x128xf32>
    %1178 = arith.addf %1173, %1177 : vector<32x128xf32>
    %c219 = arith.constant 219 : index
    %c0_691 = arith.constant 0 : index
    %1179 = vector.load %arg10[%c219, %c0_691] : memref<256x128xf32, #tpu.memory_space<vmem>>, vector<1x128xf32>
    %c864_692 = arith.constant 864 : index
    %c0_693 = arith.constant 0 : index
    %1180 = vector.load %arg6[%c864_692, %c0_693] : memref<1024x128xf32, #tpu.memory_space<vmem>>, vector<32x128xf32>
    %1181 = vector.broadcast %1179 : vector<1x128xf32> to vector<32x128xf32>
    %1182 = arith.mulf %1181, %1180 : vector<32x128xf32>
    %1183 = arith.addf %1178, %1182 : vector<32x128xf32>
    %c220 = arith.constant 220 : index
    %c0_694 = arith.constant 0 : index
    %1184 = vector.load %arg10[%c220, %c0_694] : memref<256x128xf32, #tpu.memory_space<vmem>>, vector<1x128xf32>
    %c896_695 = arith.constant 896 : index
    %c0_696 = arith.constant 0 : index
    %1185 = vector.load %arg6[%c896_695, %c0_696] : memref<1024x128xf32, #tpu.memory_space<vmem>>, vector<32x128xf32>
    %1186 = vector.broadcast %1184 : vector<1x128xf32> to vector<32x128xf32>
    %1187 = arith.mulf %1186, %1185 : vector<32x128xf32>
    %1188 = arith.addf %1183, %1187 : vector<32x128xf32>
    %c221 = arith.constant 221 : index
    %c0_697 = arith.constant 0 : index
    %1189 = vector.load %arg10[%c221, %c0_697] : memref<256x128xf32, #tpu.memory_space<vmem>>, vector<1x128xf32>
    %c928_698 = arith.constant 928 : index
    %c0_699 = arith.constant 0 : index
    %1190 = vector.load %arg6[%c928_698, %c0_699] : memref<1024x128xf32, #tpu.memory_space<vmem>>, vector<32x128xf32>
    %1191 = vector.broadcast %1189 : vector<1x128xf32> to vector<32x128xf32>
    %1192 = arith.mulf %1191, %1190 : vector<32x128xf32>
    %1193 = arith.addf %1188, %1192 : vector<32x128xf32>
    %c222 = arith.constant 222 : index
    %c0_700 = arith.constant 0 : index
    %1194 = vector.load %arg10[%c222, %c0_700] : memref<256x128xf32, #tpu.memory_space<vmem>>, vector<1x128xf32>
    %c960_701 = arith.constant 960 : index
    %c0_702 = arith.constant 0 : index
    %1195 = vector.load %arg6[%c960_701, %c0_702] : memref<1024x128xf32, #tpu.memory_space<vmem>>, vector<32x128xf32>
    %1196 = vector.broadcast %1194 : vector<1x128xf32> to vector<32x128xf32>
    %1197 = arith.mulf %1196, %1195 : vector<32x128xf32>
    %1198 = arith.addf %1193, %1197 : vector<32x128xf32>
    %c223 = arith.constant 223 : index
    %c0_703 = arith.constant 0 : index
    %1199 = vector.load %arg10[%c223, %c0_703] : memref<256x128xf32, #tpu.memory_space<vmem>>, vector<1x128xf32>
    %c992_704 = arith.constant 992 : index
    %c0_705 = arith.constant 0 : index
    %1200 = vector.load %arg6[%c992_704, %c0_705] : memref<1024x128xf32, #tpu.memory_space<vmem>>, vector<32x128xf32>
    %1201 = vector.broadcast %1199 : vector<1x128xf32> to vector<32x128xf32>
    %1202 = arith.mulf %1201, %1200 : vector<32x128xf32>
    %1203 = arith.addf %1198, %1202 : vector<32x128xf32>
    %cst_706 = arith.constant 0.000000e+00 : f32
    %1204 = vector.broadcast %cst_706 : f32 to vector<32x128xf32>
    %1205 = arith.maximumf %1203, %1204 : vector<32x128xf32>
    %c192_707 = arith.constant 192 : index
    %c0_708 = arith.constant 0 : index
    %1206 = vector.load %arg8[%c192_707, %c0_708] : memref<256x128xf32, #tpu.memory_space<vmem>>, vector<32x128xf32>
    tpu.vector_store %arg8[%c192_707, %c0_708], %1205 {strides = array<i32>} : memref<256x128xf32, #tpu.memory_space<vmem>>, vector<32x128xf32>,
    %c224_709 = arith.constant 224 : index
    %c0_710 = arith.constant 0 : index
    %1207 = vector.load %arg10[%c224_709, %c0_710] : memref<256x128xf32, #tpu.memory_space<vmem>>, vector<1x128xf32>
    %c0_711 = arith.constant 0 : index
    %c0_712 = arith.constant 0 : index
    %1208 = vector.load %arg6[%c0_711, %c0_712] : memref<1024x128xf32, #tpu.memory_space<vmem>>, vector<32x128xf32>
    %1209 = vector.broadcast %1207 : vector<1x128xf32> to vector<32x128xf32>
    %1210 = arith.mulf %1209, %1208 : vector<32x128xf32>
    %1211 = arith.addf %65, %1210 : vector<32x128xf32>
    %c225 = arith.constant 225 : index
    %c0_713 = arith.constant 0 : index
    %1212 = vector.load %arg10[%c225, %c0_713] : memref<256x128xf32, #tpu.memory_space<vmem>>, vector<1x128xf32>
    %c32_714 = arith.constant 32 : index
    %c0_715 = arith.constant 0 : index
    %1213 = vector.load %arg6[%c32_714, %c0_715] : memref<1024x128xf32, #tpu.memory_space<vmem>>, vector<32x128xf32>
    %1214 = vector.broadcast %1212 : vector<1x128xf32> to vector<32x128xf32>
    %1215 = arith.mulf %1214, %1213 : vector<32x128xf32>
    %1216 = arith.addf %1211, %1215 : vector<32x128xf32>
    %c226 = arith.constant 226 : index
    %c0_716 = arith.constant 0 : index
    %1217 = vector.load %arg10[%c226, %c0_716] : memref<256x128xf32, #tpu.memory_space<vmem>>, vector<1x128xf32>
    %c64_717 = arith.constant 64 : index
    %c0_718 = arith.constant 0 : index
    %1218 = vector.load %arg6[%c64_717, %c0_718] : memref<1024x128xf32, #tpu.memory_space<vmem>>, vector<32x128xf32>
    %1219 = vector.broadcast %1217 : vector<1x128xf32> to vector<32x128xf32>
    %1220 = arith.mulf %1219, %1218 : vector<32x128xf32>
    %1221 = arith.addf %1216, %1220 : vector<32x128xf32>
    %c227 = arith.constant 227 : index
    %c0_719 = arith.constant 0 : index
    %1222 = vector.load %arg10[%c227, %c0_719] : memref<256x128xf32, #tpu.memory_space<vmem>>, vector<1x128xf32>
    %c96_720 = arith.constant 96 : index
    %c0_721 = arith.constant 0 : index
    %1223 = vector.load %arg6[%c96_720, %c0_721] : memref<1024x128xf32, #tpu.memory_space<vmem>>, vector<32x128xf32>
    %1224 = vector.broadcast %1222 : vector<1x128xf32> to vector<32x128xf32>
    %1225 = arith.mulf %1224, %1223 : vector<32x128xf32>
    %1226 = arith.addf %1221, %1225 : vector<32x128xf32>
    %c228 = arith.constant 228 : index
    %c0_722 = arith.constant 0 : index
    %1227 = vector.load %arg10[%c228, %c0_722] : memref<256x128xf32, #tpu.memory_space<vmem>>, vector<1x128xf32>
    %c128_723 = arith.constant 128 : index
    %c0_724 = arith.constant 0 : index
    %1228 = vector.load %arg6[%c128_723, %c0_724] : memref<1024x128xf32, #tpu.memory_space<vmem>>, vector<32x128xf32>
    %1229 = vector.broadcast %1227 : vector<1x128xf32> to vector<32x128xf32>
    %1230 = arith.mulf %1229, %1228 : vector<32x128xf32>
    %1231 = arith.addf %1226, %1230 : vector<32x128xf32>
    %c229 = arith.constant 229 : index
    %c0_725 = arith.constant 0 : index
    %1232 = vector.load %arg10[%c229, %c0_725] : memref<256x128xf32, #tpu.memory_space<vmem>>, vector<1x128xf32>
    %c160_726 = arith.constant 160 : index
    %c0_727 = arith.constant 0 : index
    %1233 = vector.load %arg6[%c160_726, %c0_727] : memref<1024x128xf32, #tpu.memory_space<vmem>>, vector<32x128xf32>
    %1234 = vector.broadcast %1232 : vector<1x128xf32> to vector<32x128xf32>
    %1235 = arith.mulf %1234, %1233 : vector<32x128xf32>
    %1236 = arith.addf %1231, %1235 : vector<32x128xf32>
    %c230 = arith.constant 230 : index
    %c0_728 = arith.constant 0 : index
    %1237 = vector.load %arg10[%c230, %c0_728] : memref<256x128xf32, #tpu.memory_space<vmem>>, vector<1x128xf32>
    %c192_729 = arith.constant 192 : index
    %c0_730 = arith.constant 0 : index
    %1238 = vector.load %arg6[%c192_729, %c0_730] : memref<1024x128xf32, #tpu.memory_space<vmem>>, vector<32x128xf32>
    %1239 = vector.broadcast %1237 : vector<1x128xf32> to vector<32x128xf32>
    %1240 = arith.mulf %1239, %1238 : vector<32x128xf32>
    %1241 = arith.addf %1236, %1240 : vector<32x128xf32>
    %c231 = arith.constant 231 : index
    %c0_731 = arith.constant 0 : index
    %1242 = vector.load %arg10[%c231, %c0_731] : memref<256x128xf32, #tpu.memory_space<vmem>>, vector<1x128xf32>
    %c224_732 = arith.constant 224 : index
    %c0_733 = arith.constant 0 : index
    %1243 = vector.load %arg6[%c224_732, %c0_733] : memref<1024x128xf32, #tpu.memory_space<vmem>>, vector<32x128xf32>
    %1244 = vector.broadcast %1242 : vector<1x128xf32> to vector<32x128xf32>
    %1245 = arith.mulf %1244, %1243 : vector<32x128xf32>
    %1246 = arith.addf %1241, %1245 : vector<32x128xf32>
    %c232 = arith.constant 232 : index
    %c0_734 = arith.constant 0 : index
    %1247 = vector.load %arg10[%c232, %c0_734] : memref<256x128xf32, #tpu.memory_space<vmem>>, vector<1x128xf32>
    %c256_735 = arith.constant 256 : index
    %c0_736 = arith.constant 0 : index
    %1248 = vector.load %arg6[%c256_735, %c0_736] : memref<1024x128xf32, #tpu.memory_space<vmem>>, vector<32x128xf32>
    %1249 = vector.broadcast %1247 : vector<1x128xf32> to vector<32x128xf32>
    %1250 = arith.mulf %1249, %1248 : vector<32x128xf32>
    %1251 = arith.addf %1246, %1250 : vector<32x128xf32>
    %c233 = arith.constant 233 : index
    %c0_737 = arith.constant 0 : index
    %1252 = vector.load %arg10[%c233, %c0_737] : memref<256x128xf32, #tpu.memory_space<vmem>>, vector<1x128xf32>
    %c288_738 = arith.constant 288 : index
    %c0_739 = arith.constant 0 : index
    %1253 = vector.load %arg6[%c288_738, %c0_739] : memref<1024x128xf32, #tpu.memory_space<vmem>>, vector<32x128xf32>
    %1254 = vector.broadcast %1252 : vector<1x128xf32> to vector<32x128xf32>
    %1255 = arith.mulf %1254, %1253 : vector<32x128xf32>
    %1256 = arith.addf %1251, %1255 : vector<32x128xf32>
    %c234 = arith.constant 234 : index
    %c0_740 = arith.constant 0 : index
    %1257 = vector.load %arg10[%c234, %c0_740] : memref<256x128xf32, #tpu.memory_space<vmem>>, vector<1x128xf32>
    %c320_741 = arith.constant 320 : index
    %c0_742 = arith.constant 0 : index
    %1258 = vector.load %arg6[%c320_741, %c0_742] : memref<1024x128xf32, #tpu.memory_space<vmem>>, vector<32x128xf32>
    %1259 = vector.broadcast %1257 : vector<1x128xf32> to vector<32x128xf32>
    %1260 = arith.mulf %1259, %1258 : vector<32x128xf32>
    %1261 = arith.addf %1256, %1260 : vector<32x128xf32>
    %c235 = arith.constant 235 : index
    %c0_743 = arith.constant 0 : index
    %1262 = vector.load %arg10[%c235, %c0_743] : memref<256x128xf32, #tpu.memory_space<vmem>>, vector<1x128xf32>
    %c352_744 = arith.constant 352 : index
    %c0_745 = arith.constant 0 : index
    %1263 = vector.load %arg6[%c352_744, %c0_745] : memref<1024x128xf32, #tpu.memory_space<vmem>>, vector<32x128xf32>
    %1264 = vector.broadcast %1262 : vector<1x128xf32> to vector<32x128xf32>
    %1265 = arith.mulf %1264, %1263 : vector<32x128xf32>
    %1266 = arith.addf %1261, %1265 : vector<32x128xf32>
    %c236 = arith.constant 236 : index
    %c0_746 = arith.constant 0 : index
    %1267 = vector.load %arg10[%c236, %c0_746] : memref<256x128xf32, #tpu.memory_space<vmem>>, vector<1x128xf32>
    %c384_747 = arith.constant 384 : index
    %c0_748 = arith.constant 0 : index
    %1268 = vector.load %arg6[%c384_747, %c0_748] : memref<1024x128xf32, #tpu.memory_space<vmem>>, vector<32x128xf32>
    %1269 = vector.broadcast %1267 : vector<1x128xf32> to vector<32x128xf32>
    %1270 = arith.mulf %1269, %1268 : vector<32x128xf32>
    %1271 = arith.addf %1266, %1270 : vector<32x128xf32>
    %c237 = arith.constant 237 : index
    %c0_749 = arith.constant 0 : index
    %1272 = vector.load %arg10[%c237, %c0_749] : memref<256x128xf32, #tpu.memory_space<vmem>>, vector<1x128xf32>
    %c416_750 = arith.constant 416 : index
    %c0_751 = arith.constant 0 : index
    %1273 = vector.load %arg6[%c416_750, %c0_751] : memref<1024x128xf32, #tpu.memory_space<vmem>>, vector<32x128xf32>
    %1274 = vector.broadcast %1272 : vector<1x128xf32> to vector<32x128xf32>
    %1275 = arith.mulf %1274, %1273 : vector<32x128xf32>
    %1276 = arith.addf %1271, %1275 : vector<32x128xf32>
    %c238 = arith.constant 238 : index
    %c0_752 = arith.constant 0 : index
    %1277 = vector.load %arg10[%c238, %c0_752] : memref<256x128xf32, #tpu.memory_space<vmem>>, vector<1x128xf32>
    %c448_753 = arith.constant 448 : index
    %c0_754 = arith.constant 0 : index
    %1278 = vector.load %arg6[%c448_753, %c0_754] : memref<1024x128xf32, #tpu.memory_space<vmem>>, vector<32x128xf32>
    %1279 = vector.broadcast %1277 : vector<1x128xf32> to vector<32x128xf32>
    %1280 = arith.mulf %1279, %1278 : vector<32x128xf32>
    %1281 = arith.addf %1276, %1280 : vector<32x128xf32>
    %c239 = arith.constant 239 : index
    %c0_755 = arith.constant 0 : index
    %1282 = vector.load %arg10[%c239, %c0_755] : memref<256x128xf32, #tpu.memory_space<vmem>>, vector<1x128xf32>
    %c480_756 = arith.constant 480 : index
    %c0_757 = arith.constant 0 : index
    %1283 = vector.load %arg6[%c480_756, %c0_757] : memref<1024x128xf32, #tpu.memory_space<vmem>>, vector<32x128xf32>
    %1284 = vector.broadcast %1282 : vector<1x128xf32> to vector<32x128xf32>
    %1285 = arith.mulf %1284, %1283 : vector<32x128xf32>
    %1286 = arith.addf %1281, %1285 : vector<32x128xf32>
    %c240 = arith.constant 240 : index
    %c0_758 = arith.constant 0 : index
    %1287 = vector.load %arg10[%c240, %c0_758] : memref<256x128xf32, #tpu.memory_space<vmem>>, vector<1x128xf32>
    %c512_759 = arith.constant 512 : index
    %c0_760 = arith.constant 0 : index
    %1288 = vector.load %arg6[%c512_759, %c0_760] : memref<1024x128xf32, #tpu.memory_space<vmem>>, vector<32x128xf32>
    %1289 = vector.broadcast %1287 : vector<1x128xf32> to vector<32x128xf32>
    %1290 = arith.mulf %1289, %1288 : vector<32x128xf32>
    %1291 = arith.addf %1286, %1290 : vector<32x128xf32>
    %c241 = arith.constant 241 : index
    %c0_761 = arith.constant 0 : index
    %1292 = vector.load %arg10[%c241, %c0_761] : memref<256x128xf32, #tpu.memory_space<vmem>>, vector<1x128xf32>
    %c544_762 = arith.constant 544 : index
    %c0_763 = arith.constant 0 : index
    %1293 = vector.load %arg6[%c544_762, %c0_763] : memref<1024x128xf32, #tpu.memory_space<vmem>>, vector<32x128xf32>
    %1294 = vector.broadcast %1292 : vector<1x128xf32> to vector<32x128xf32>
    %1295 = arith.mulf %1294, %1293 : vector<32x128xf32>
    %1296 = arith.addf %1291, %1295 : vector<32x128xf32>
    %c242 = arith.constant 242 : index
    %c0_764 = arith.constant 0 : index
    %1297 = vector.load %arg10[%c242, %c0_764] : memref<256x128xf32, #tpu.memory_space<vmem>>, vector<1x128xf32>
    %c576_765 = arith.constant 576 : index
    %c0_766 = arith.constant 0 : index
    %1298 = vector.load %arg6[%c576_765, %c0_766] : memref<1024x128xf32, #tpu.memory_space<vmem>>, vector<32x128xf32>
    %1299 = vector.broadcast %1297 : vector<1x128xf32> to vector<32x128xf32>
    %1300 = arith.mulf %1299, %1298 : vector<32x128xf32>
    %1301 = arith.addf %1296, %1300 : vector<32x128xf32>
    %c243 = arith.constant 243 : index
    %c0_767 = arith.constant 0 : index
    %1302 = vector.load %arg10[%c243, %c0_767] : memref<256x128xf32, #tpu.memory_space<vmem>>, vector<1x128xf32>
    %c608_768 = arith.constant 608 : index
    %c0_769 = arith.constant 0 : index
    %1303 = vector.load %arg6[%c608_768, %c0_769] : memref<1024x128xf32, #tpu.memory_space<vmem>>, vector<32x128xf32>
    %1304 = vector.broadcast %1302 : vector<1x128xf32> to vector<32x128xf32>
    %1305 = arith.mulf %1304, %1303 : vector<32x128xf32>
    %1306 = arith.addf %1301, %1305 : vector<32x128xf32>
    %c244 = arith.constant 244 : index
    %c0_770 = arith.constant 0 : index
    %1307 = vector.load %arg10[%c244, %c0_770] : memref<256x128xf32, #tpu.memory_space<vmem>>, vector<1x128xf32>
    %c640_771 = arith.constant 640 : index
    %c0_772 = arith.constant 0 : index
    %1308 = vector.load %arg6[%c640_771, %c0_772] : memref<1024x128xf32, #tpu.memory_space<vmem>>, vector<32x128xf32>
    %1309 = vector.broadcast %1307 : vector<1x128xf32> to vector<32x128xf32>
    %1310 = arith.mulf %1309, %1308 : vector<32x128xf32>
    %1311 = arith.addf %1306, %1310 : vector<32x128xf32>
    %c245 = arith.constant 245 : index
    %c0_773 = arith.constant 0 : index
    %1312 = vector.load %arg10[%c245, %c0_773] : memref<256x128xf32, #tpu.memory_space<vmem>>, vector<1x128xf32>
    %c672_774 = arith.constant 672 : index
    %c0_775 = arith.constant 0 : index
    %1313 = vector.load %arg6[%c672_774, %c0_775] : memref<1024x128xf32, #tpu.memory_space<vmem>>, vector<32x128xf32>
    %1314 = vector.broadcast %1312 : vector<1x128xf32> to vector<32x128xf32>
    %1315 = arith.mulf %1314, %1313 : vector<32x128xf32>
    %1316 = arith.addf %1311, %1315 : vector<32x128xf32>
    %c246 = arith.constant 246 : index
    %c0_776 = arith.constant 0 : index
    %1317 = vector.load %arg10[%c246, %c0_776] : memref<256x128xf32, #tpu.memory_space<vmem>>, vector<1x128xf32>
    %c704_777 = arith.constant 704 : index
    %c0_778 = arith.constant 0 : index
    %1318 = vector.load %arg6[%c704_777, %c0_778] : memref<1024x128xf32, #tpu.memory_space<vmem>>, vector<32x128xf32>
    %1319 = vector.broadcast %1317 : vector<1x128xf32> to vector<32x128xf32>
    %1320 = arith.mulf %1319, %1318 : vector<32x128xf32>
    %1321 = arith.addf %1316, %1320 : vector<32x128xf32>
    %c247 = arith.constant 247 : index
    %c0_779 = arith.constant 0 : index
    %1322 = vector.load %arg10[%c247, %c0_779] : memref<256x128xf32, #tpu.memory_space<vmem>>, vector<1x128xf32>
    %c736_780 = arith.constant 736 : index
    %c0_781 = arith.constant 0 : index
    %1323 = vector.load %arg6[%c736_780, %c0_781] : memref<1024x128xf32, #tpu.memory_space<vmem>>, vector<32x128xf32>
    %1324 = vector.broadcast %1322 : vector<1x128xf32> to vector<32x128xf32>
    %1325 = arith.mulf %1324, %1323 : vector<32x128xf32>
    %1326 = arith.addf %1321, %1325 : vector<32x128xf32>
    %c248 = arith.constant 248 : index
    %c0_782 = arith.constant 0 : index
    %1327 = vector.load %arg10[%c248, %c0_782] : memref<256x128xf32, #tpu.memory_space<vmem>>, vector<1x128xf32>
    %c768_783 = arith.constant 768 : index
    %c0_784 = arith.constant 0 : index
    %1328 = vector.load %arg6[%c768_783, %c0_784] : memref<1024x128xf32, #tpu.memory_space<vmem>>, vector<32x128xf32>
    %1329 = vector.broadcast %1327 : vector<1x128xf32> to vector<32x128xf32>
    %1330 = arith.mulf %1329, %1328 : vector<32x128xf32>
    %1331 = arith.addf %1326, %1330 : vector<32x128xf32>
    %c249 = arith.constant 249 : index
    %c0_785 = arith.constant 0 : index
    %1332 = vector.load %arg10[%c249, %c0_785] : memref<256x128xf32, #tpu.memory_space<vmem>>, vector<1x128xf32>
    %c800_786 = arith.constant 800 : index
    %c0_787 = arith.constant 0 : index
    %1333 = vector.load %arg6[%c800_786, %c0_787] : memref<1024x128xf32, #tpu.memory_space<vmem>>, vector<32x128xf32>
    %1334 = vector.broadcast %1332 : vector<1x128xf32> to vector<32x128xf32>
    %1335 = arith.mulf %1334, %1333 : vector<32x128xf32>
    %1336 = arith.addf %1331, %1335 : vector<32x128xf32>
    %c250 = arith.constant 250 : index
    %c0_788 = arith.constant 0 : index
    %1337 = vector.load %arg10[%c250, %c0_788] : memref<256x128xf32, #tpu.memory_space<vmem>>, vector<1x128xf32>
    %c832_789 = arith.constant 832 : index
    %c0_790 = arith.constant 0 : index
    %1338 = vector.load %arg6[%c832_789, %c0_790] : memref<1024x128xf32, #tpu.memory_space<vmem>>, vector<32x128xf32>
    %1339 = vector.broadcast %1337 : vector<1x128xf32> to vector<32x128xf32>
    %1340 = arith.mulf %1339, %1338 : vector<32x128xf32>
    %1341 = arith.addf %1336, %1340 : vector<32x128xf32>
    %c251 = arith.constant 251 : index
    %c0_791 = arith.constant 0 : index
    %1342 = vector.load %arg10[%c251, %c0_791] : memref<256x128xf32, #tpu.memory_space<vmem>>, vector<1x128xf32>
    %c864_792 = arith.constant 864 : index
    %c0_793 = arith.constant 0 : index
    %1343 = vector.load %arg6[%c864_792, %c0_793] : memref<1024x128xf32, #tpu.memory_space<vmem>>, vector<32x128xf32>
    %1344 = vector.broadcast %1342 : vector<1x128xf32> to vector<32x128xf32>
    %1345 = arith.mulf %1344, %1343 : vector<32x128xf32>
    %1346 = arith.addf %1341, %1345 : vector<32x128xf32>
    %c252 = arith.constant 252 : index
    %c0_794 = arith.constant 0 : index
    %1347 = vector.load %arg10[%c252, %c0_794] : memref<256x128xf32, #tpu.memory_space<vmem>>, vector<1x128xf32>
    %c896_795 = arith.constant 896 : index
    %c0_796 = arith.constant 0 : index
    %1348 = vector.load %arg6[%c896_795, %c0_796] : memref<1024x128xf32, #tpu.memory_space<vmem>>, vector<32x128xf32>
    %1349 = vector.broadcast %1347 : vector<1x128xf32> to vector<32x128xf32>
    %1350 = arith.mulf %1349, %1348 : vector<32x128xf32>
    %1351 = arith.addf %1346, %1350 : vector<32x128xf32>
    %c253 = arith.constant 253 : index
    %c0_797 = arith.constant 0 : index
    %1352 = vector.load %arg10[%c253, %c0_797] : memref<256x128xf32, #tpu.memory_space<vmem>>, vector<1x128xf32>
    %c928_798 = arith.constant 928 : index
    %c0_799 = arith.constant 0 : index
    %1353 = vector.load %arg6[%c928_798, %c0_799] : memref<1024x128xf32, #tpu.memory_space<vmem>>, vector<32x128xf32>
    %1354 = vector.broadcast %1352 : vector<1x128xf32> to vector<32x128xf32>
    %1355 = arith.mulf %1354, %1353 : vector<32x128xf32>
    %1356 = arith.addf %1351, %1355 : vector<32x128xf32>
    %c254 = arith.constant 254 : index
    %c0_800 = arith.constant 0 : index
    %1357 = vector.load %arg10[%c254, %c0_800] : memref<256x128xf32, #tpu.memory_space<vmem>>, vector<1x128xf32>
    %c960_801 = arith.constant 960 : index
    %c0_802 = arith.constant 0 : index
    %1358 = vector.load %arg6[%c960_801, %c0_802] : memref<1024x128xf32, #tpu.memory_space<vmem>>, vector<32x128xf32>
    %1359 = vector.broadcast %1357 : vector<1x128xf32> to vector<32x128xf32>
    %1360 = arith.mulf %1359, %1358 : vector<32x128xf32>
    %1361 = arith.addf %1356, %1360 : vector<32x128xf32>
    %c255 = arith.constant 255 : index
    %c0_803 = arith.constant 0 : index
    %1362 = vector.load %arg10[%c255, %c0_803] : memref<256x128xf32, #tpu.memory_space<vmem>>, vector<1x128xf32>
    %c992_804 = arith.constant 992 : index
    %c0_805 = arith.constant 0 : index
    %1363 = vector.load %arg6[%c992_804, %c0_805] : memref<1024x128xf32, #tpu.memory_space<vmem>>, vector<32x128xf32>
    %1364 = vector.broadcast %1362 : vector<1x128xf32> to vector<32x128xf32>
    %1365 = arith.mulf %1364, %1363 : vector<32x128xf32>
    %1366 = arith.addf %1361, %1365 : vector<32x128xf32>
    %cst_806 = arith.constant 0.000000e+00 : f32
    %1367 = vector.broadcast %cst_806 : f32 to vector<32x128xf32>
    %1368 = arith.maximumf %1366, %1367 : vector<32x128xf32>
    %c224_807 = arith.constant 224 : index
    %c0_808 = arith.constant 0 : index
    %1369 = vector.load %arg8[%c224_807, %c0_808] : memref<256x128xf32, #tpu.memory_space<vmem>>, vector<32x128xf32>
    tpu.vector_store %arg8[%c224_807, %c0_808], %1368 {strides = array<i32>} : memref<256x128xf32, #tpu.memory_space<vmem>>, vector<32x128xf32>,
    return
  }
  func.func @transform_0(%arg0: i32) -> (i32, i32) {
    %c0_i32 = arith.constant 0 : i32
    %c0_i32_0 = arith.constant 0 : i32
    return %c0_i32, %arg0 : i32, i32
  }
  func.func @transform_1(%arg0: i32) -> (i32, i32) {
    %c0_i32 = arith.constant 0 : i32
    %c0_i32_0 = arith.constant 0 : i32
    %c0_i32_1 = arith.constant 0 : i32
    return %c0_i32, %c0_i32_0 : i32, i32
  }
  func.func @transform_2(%arg0: i32) -> (i32, i32) {
    %c0_i32 = arith.constant 0 : i32
    %c0_i32_0 = arith.constant 0 : i32
    %c0_i32_1 = arith.constant 0 : i32
    return %c0_i32, %c0_i32_0 : i32, i32
  }
  func.func @transform_3(%arg0: i32) -> (i32, i32) {
    %c0_i32 = arith.constant 0 : i32
    %c0_i32_0 = arith.constant 0 : i32
    return %c0_i32, %arg0 : i32, i32
  }
  func.func @transform_4(%arg0: i32) -> (i32, i32) {
    %c0_i32 = arith.constant 0 : i32
    %c0_i32_0 = arith.constant 0 : i32
    return %c0_i32, %arg0 : i32, i32
  }
  func.func @transform_5(%arg0: i32) -> (i32, i32) {
    %c0_i32 = arith.constant 0 : i32
    %c0_i32_0 = arith.constant 0 : i32
    return %c0_i32, %arg0 : i32, i32
  }
  func.func @transform_6(%arg0: i32) -> (i32, i32) {
    %c0_i32 = arith.constant 0 : i32
    %c0_i32_0 = arith.constant 0 : i32
    return %c0_i32, %arg0 : i32, i32
  }
  func.func @transform_7(%arg0: i32) -> (i32, i32) {
    %c0_i32 = arith.constant 0 : i32
    %c0_i32_0 = arith.constant 0 : i32
    return %c0_i32, %arg0 : i32, i32
  }
}

</mosaic_0001>

<bundles_post_ra>
// kernel: monotonic_gcn_forward.1
= control target key start
LH: loop header
LB: loop body
LE: loop exit
PB: predicated region body
PF: predicated region fallthrough
CT: control target
= control target key end

     0   :  { %12 = vsyncpa [#allocation9], 0  ;;  %s8981_s0 = inlined_call_operand.vmem [shape: f32[8,256], index: 0, kind: input, shape index: {}]   ;;  %s8982_s1 = inlined_call_operand.vmem [shape: f32[8,8], index: 1, kind: input, shape index: {}]   ;;  %s8983_s2 = inlined_call_operand.vmem [shape: f32[256,256], index: 2, kind: input, shape index: {}]   ;;  %s8984_s3 = inlined_call_operand.vmem [shape: f32[32,256], index: 3, kind: input, shape index: {}]   ;;  %s8985_s4 = inlined_call_operand.vmem [shape: f32[32,256], index: 4, kind: input, shape index: {}]   ;;  %s8986_s5 = inlined_call_operand.vmem [shape: f32[1024,256], index: 5, kind: input, shape index: {}]   ;;  %s8987_s6 = inlined_call_operand.vmem [shape: f32[32,256], index: 6, kind: input, shape index: {}]   ;;  %s8988_s7 = inlined_call_operand.hbm [shape: f32[256,256], index: 7, kind: output, shape index: {}]  }
   0x1   :  { %14 = vsyncpa [#allocation9 + $0x1], 0  ;;  %s5835_s24 = smov 0   ;;  %s5837_s25 = smov 0  }
   0x2   :  { %s5839_s26 = smov 0   ;;  %s5841_s27 = smov 0  }
   0x3 LB: > { %s5856_s28 = sadd.s32 4294967295, %s5790_s27   ;;  %s5363_s29 = sadd.s32 4294967294, %s5790_s27   ;;  %s5790_s27 = sphi %s5841_s27, %s9058_s27   ;;  %s5786_s26 = sphi %s5839_s26, %s9057_s26   ;;  %s5782_s25 = sphi %s5837_s25, %s9056_s25   ;;  %s5778_s24 = sphi %s5835_s24, %s9055_s24  }
   0x4   : > { %s5860_s30 = sadd.s32 1, %s5790_s27   ;;  %s95_s8 = sadd.s32 1, %s5786_s26 }
   0x5   : > { %s92_s9 = ssub.s32 %s5790_s27, %s5860_s30  ;;  %p102_p0 = scmp.ne.s32.totalorder %s5786_s26, %s5782_s25 }
   0x6   : > { %p93_p1 = scmp.eq.s32.totalorder %s92_s9, 0  ;;  %p103_p2 = scmp.eq.s32.totalorder %s5790_s27, 0 }
   0x7   : > { %p210_p3 = scmp.eq.s32.totalorder %s5856_s28, 1  ;;  %p215_p4 = scmp.ne.s32.totalorder %s5782_s25, %s5778_s24 }
   0x8   : > { %s5872_s10 = scalar_select %p93_p1, %s5786_s26, %s95_s8  }
   0x9   : > { %p5874_p5 = por %p103_p2, %p102_p0  ;;  %p5878_p6 = por %p210_p3, %p102_p0 }
   0xa   : > { %p216_p7 = scmp.eq.s32.totalorder %s5363_s29, 1  ;;  %p5365_p9 = scmp.ge.s32.totalorder %s5790_s27, 2 }
   0xc   : > { %p5882_p8 = por %p216_p7, %p215_p4  ;;  %238 = sbr.rel (%p5365_p9) target bundleno = 173 (0xad), region = 24 }
  0x11   : > { %248 = sbr.rel (!%p5874_p5) target bundleno = 25 (0x19), region = 32  ;;  %s250_s14 = sand.u32 (%p5874_p5), 1, %s5786_s26  }
  0x12   : > { %s5367_s15 = sshll.u32 (%p5874_p5), %s5790_s27, 3  ;;  %s5366_s16 = sshll.u32 (%p5874_p5), %s250_s14, 5 }
  0x13   : > { %s254_s19 = scalar_lea.vmem (%p5874_p5), %s8984_s3, %s5367_s15  ;;  %s252_s20 = scalar_lea.vmem (%p5874_p5), [#allocation4], %s5366_s16 }
  0x14   : > { %v289_v0 = vld [vmem:[%s254_s19] sm:$0xff] (%p5874_p5)  ;;  %v291_v1 = vld [vmem:[%s254_s19 + $0x10] sm:$0xff] (%p5874_p5) }
  0x15   : > { %v293_v2 = vld [vmem:[%s254_s19 + $0x20] sm:$0xff] (%p5874_p5)  ;;  %290 = vst [vmem:[%s252_s20] sm:$0xff] (%p5874_p5), %v289_v0  ;;  %v295_v3 = vld [vmem:[%s254_s19 + $0x30] sm:$0xff] (%p5874_p5) }
  0x16   : > { %292 = vst [vmem:[%s252_s20 + $0x8] sm:$0xff] %v291_v1 }
  0x17   : > { %294 = vst [vmem:[%s252_s20 + $0x10] sm:$0xff] %v293_v2 }
  0x18   : > { %296 = vst [vmem:[%s252_s20 + $0x18] sm:$0xff] %v295_v3 }
  0x19 PF: > { %302 = sbr.rel (!%p5874_p5) target bundleno = 33 (0x21), region = 70  ;;  %s304_s21 = sand.u32 (%p5874_p5), 1, %s5786_s26  }
  0x1a   : > { %s5369_s22 = sshll.u32 (%p5874_p5), %s5790_s27, 3  ;;  %s5368_s23 = sshll.u32 (%p5874_p5), %s304_s21, 5 }
  0x1b   : > { %s308_s9 = scalar_lea.vmem (%p5874_p5), %s8985_s4, %s5369_s22  ;;  %s306_s14 = scalar_lea.vmem (%p5874_p5), [#allocation5], %s5368_s23 }
  0x1c   : > { %v343_v4 = vld [vmem:[%s308_s9] sm:$0xff] (%p5874_p5)  ;;  %v345_v5 = vld [vmem:[%s308_s9 + $0x10] sm:$0xff] (%p5874_p5) }
  0x1d   : > { %v347_v6 = vld [vmem:[%s308_s9 + $0x20] sm:$0xff] (%p5874_p5)  ;;  %344 = vst [vmem:[%s306_s14] sm:$0xff] (%p5874_p5), %v343_v4  ;;  %v349_v7 = vld [vmem:[%s308_s9 + $0x30] sm:$0xff] (%p5874_p5) }
  0x1e   : > { %346 = vst [vmem:[%s306_s14 + $0x8] sm:$0xff] %v345_v5 }
  0x1f   : > { %348 = vst [vmem:[%s306_s14 + $0x10] sm:$0xff] %v347_v6 }
  0x20   : > { %350 = vst [vmem:[%s306_s14 + $0x18] sm:$0xff] %v349_v7 }
  0x21 PF: > { %356 = sbr.rel (!%p5874_p5) target bundleno = 165 (0xa5), region = 108  ;;  %s358_s15 = sand.u32 (%p5874_p5), 1, %s5786_s26  }
  0x22   : > { %s5371_s16 = sshll.u32 (%p5874_p5), %s5790_s27, 3  ;;  %s5370_s17 = sshll.u32 (%p5874_p5), %s358_s15, 10 }
  0x23   : > { %s5910_s20 = scalar_lea.vmem (%p5874_p5), %s8986_s5, %s5371_s16  ;;  %s5915_s21 = scalar_lea.vmem (%p5874_p5), [#allocation6], %s5370_s17 }
  0x24   : > { %v645_v8 = vld [vmem:[%s5910_s20] sm:$0xff] (%p5874_p5)  ;;  %v647_v9 = vld [vmem:[%s5910_s20 + $0x10] sm:$0xff] (%p5874_p5) }
  0x25   : > { %v649_v10 = vld [vmem:[%s5910_s20 + $0x20] sm:$0xff] (%p5874_p5)  ;;  %646 = vst [vmem:[%s5915_s21] sm:$0xff] (%p5874_p5), %v645_v8  ;;  %v651_v11 = vld [vmem:[%s5910_s20 + $0x30] sm:$0xff] (%p5874_p5) }
  0x26   : > { %648 = vst [vmem:[%s5915_s21 + $0x8] sm:$0xff] %v647_v9  ;;  %v653_v12 = vld [vmem:[%s5910_s20 + $0x40] sm:$0xff]  ;;  %v655_v13 = vld [vmem:[%s5910_s20 + $0x50] sm:$0xff] }
  0x27   : > { %650 = vst [vmem:[%s5915_s21 + $0x10] sm:$0xff] %v649_v10  ;;  %v657_v14 = vld [vmem:[%s5910_s20 + $0x60] sm:$0xff]  ;;  %v659_v15 = vld [vmem:[%s5910_s20 + $0x70] sm:$0xff] }
  0x28   : > { %652 = vst [vmem:[%s5915_s21 + $0x18] sm:$0xff] %v651_v11  ;;  %v661_v16 = vld [vmem:[%s5910_s20 + $0x80] sm:$0xff]  ;;  %v663_v17 = vld [vmem:[%s5910_s20 + $0x90] sm:$0xff] }
  0x29   : > { %654 = vst [vmem:[%s5915_s21 + $0x20] sm:$0xff] %v653_v12  ;;  %v665_v18 = vld [vmem:[%s5910_s20 + $0xa0] sm:$0xff]  ;;  %v667_v19 = vld [vmem:[%s5910_s20 + $0xb0] sm:$0xff] }
  0x2a   : > { %656 = vst [vmem:[%s5915_s21 + $0x28] sm:$0xff] %v655_v13  ;;  %v669_v20 = vld [vmem:[%s5910_s20 + $0xc0] sm:$0xff]  ;;  %v671_v21 = vld [vmem:[%s5910_s20 + $0xd0] sm:$0xff] }
  0x2b   : > { %658 = vst [vmem:[%s5915_s21 + $0x30] sm:$0xff] %v657_v14  ;;  %v673_v22 = vld [vmem:[%s5910_s20 + $0xe0] sm:$0xff]  ;;  %v675_v23 = vld [vmem:[%s5910_s20 + $0xf0] sm:$0xff] }
  0x2c   : > { %660 = vst [vmem:[%s5915_s21 + $0x38] sm:$0xff] %v659_v15  ;;  %v677_v24 = vld [vmem:[%s5910_s20 + $0x100] sm:$0xff]  ;;  %v679_v25 = vld [vmem:[%s5910_s20 + $0x110] sm:$0xff] }
  0x2d   : > { %662 = vst [vmem:[%s5915_s21 + $0x40] sm:$0xff] %v661_v16  ;;  %v681_v26 = vld [vmem:[%s5910_s20 + $0x120] sm:$0xff]  ;;  %v683_v27 = vld [vmem:[%s5910_s20 + $0x130] sm:$0xff] }
  0x2e   : > { %664 = vst [vmem:[%s5915_s21 + $0x48] sm:$0xff] %v663_v17  ;;  %v685_v28 = vld [vmem:[%s5910_s20 + $0x140] sm:$0xff]  ;;  %v687_v29 = vld [vmem:[%s5910_s20 + $0x150] sm:$0xff] }
  0x2f   : > { %666 = vst [vmem:[%s5915_s21 + $0x50] sm:$0xff] %v665_v18  ;;  %v689_v30 = vld [vmem:[%s5910_s20 + $0x160] sm:$0xff]  ;;  %v691_v31 = vld [vmem:[%s5910_s20 + $0x170] sm:$0xff] }
  0x30   : > { %668 = vst [vmem:[%s5915_s21 + $0x58] sm:$0xff] %v667_v19  ;;  %v693_v32 = vld [vmem:[%s5910_s20 + $0x180] sm:$0xff]  ;;  %v695_v33 = vld [vmem:[%s5910_s20 + $0x190] sm:$0xff] }
  0x31   : > { %670 = vst [vmem:[%s5915_s21 + $0x60] sm:$0xff] %v669_v20  ;;  %v697_v34 = vld [vmem:[%s5910_s20 + $0x1a0] sm:$0xff]  ;;  %v699_v35 = vld [vmem:[%s5910_s20 + $0x1b0] sm:$0xff] }
  0x32   : > { %672 = vst [vmem:[%s5915_s21 + $0x68] sm:$0xff] %v671_v21  ;;  %v701_v36 = vld [vmem:[%s5910_s20 + $0x1c0] sm:$0xff]  ;;  %v703_v37 = vld [vmem:[%s5910_s20 + $0x1d0] sm:$0xff] }
  0x33   : > { %674 = vst [vmem:[%s5915_s21 + $0x70] sm:$0xff] %v673_v22  ;;  %v705_v38 = vld [vmem:[%s5910_s20 + $0x1e0] sm:$0xff]  ;;  %v707_v39 = vld [vmem:[%s5910_s20 + $0x1f0] sm:$0xff] }
  0x34   : > { %676 = vst [vmem:[%s5915_s21 + $0x78] sm:$0xff] %v675_v23  ;;  %v709_v40 = vld [vmem:[%s5910_s20 + $0x200] sm:$0xff]  ;;  %v711_v41 = vld [vmem:[%s5910_s20 + $0x210] sm:$0xff] }
  0x35   : > { %678 = vst [vmem:[%s5915_s21 + $0x80] sm:$0xff] %v677_v24  ;;  %v713_v42 = vld [vmem:[%s5910_s20 + $0x220] sm:$0xff]  ;;  %v715_v43 = vld [vmem:[%s5910_s20 + $0x230] sm:$0xff] }
  0x36   : > { %680 = vst [vmem:[%s5915_s21 + $0x88] sm:$0xff] %v679_v25  ;;  %v717_v44 = vld [vmem:[%s5910_s20 + $0x240] sm:$0xff]  ;;  %v719_v45 = vld [vmem:[%s5910_s20 + $0x250] sm:$0xff] }
  0x37   : > { %682 = vst [vmem:[%s5915_s21 + $0x90] sm:$0xff] %v681_v26  ;;  %v721_v46 = vld [vmem:[%s5910_s20 + $0x260] sm:$0xff]  ;;  %v723_v47 = vld [vmem:[%s5910_s20 + $0x270] sm:$0xff] }
  0x38   : > { %684 = vst [vmem:[%s5915_s21 + $0x98] sm:$0xff] %v683_v27  ;;  %v725_v48 = vld [vmem:[%s5910_s20 + $0x280] sm:$0xff]  ;;  %v727_v49 = vld [vmem:[%s5910_s20 + $0x290] sm:$0xff] }
  0x39   : > { %686 = vst [vmem:[%s5915_s21 + $0xa0] sm:$0xff] %v685_v28  ;;  %v729_v50 = vld [vmem:[%s5910_s20 + $0x2a0] sm:$0xff]  ;;  %v731_v51 = vld [vmem:[%s5910_s20 + $0x2b0] sm:$0xff] }
  0x3a   : > { %688 = vst [vmem:[%s5915_s21 + $0xa8] sm:$0xff] %v687_v29  ;;  %v733_v52 = vld [vmem:[%s5910_s20 + $0x2c0] sm:$0xff]  ;;  %v735_v53 = vld [vmem:[%s5910_s20 + $0x2d0] sm:$0xff] }
  0x3b   : > { %690 = vst [vmem:[%s5915_s21 + $0xb0] sm:$0xff] %v689_v30  ;;  %v737_v54 = vld [vmem:[%s5910_s20 + $0x2e0] sm:$0xff]  ;;  %v739_v55 = vld [vmem:[%s5910_s20 + $0x2f0] sm:$0xff] }
  0x3c   : > { %692 = vst [vmem:[%s5915_s21 + $0xb8] sm:$0xff] %v691_v31  ;;  %v741_v56 = vld [vmem:[%s5910_s20 + $0x300] sm:$0xff]  ;;  %v743_v57 = vld [vmem:[%s5910_s20 + $0x310] sm:$0xff] }
  0x3d   : > { %694 = vst [vmem:[%s5915_s21 + $0xc0] sm:$0xff] %v693_v32  ;;  %v745_v58 = vld [vmem:[%s5910_s20 + $0x320] sm:$0xff]  ;;  %v747_v59 = vld [vmem:[%s5910_s20 + $0x330] sm:$0xff] }
  0x3e   : > { %696 = vst [vmem:[%s5915_s21 + $0xc8] sm:$0xff] %v695_v33  ;;  %v749_v60 = vld [vmem:[%s5910_s20 + $0x340] sm:$0xff]  ;;  %v751_v61 = vld [vmem:[%s5910_s20 + $0x350] sm:$0xff] }
  0x3f   : > { %698 = vst [vmem:[%s5915_s21 + $0xd0] sm:$0xff] %v697_v34  ;;  %v753_v62 = vld [vmem:[%s5910_s20 + $0x360] sm:$0xff]  ;;  %v755_v63 = vld [vmem:[%s5910_s20 + $0x370] sm:$0xff] }
  0x40   : > { %700 = vst [vmem:[%s5915_s21 + $0xd8] sm:$0xff] %v699_v35  ;;  %v757_v0 = vld [vmem:[%s5910_s20 + $0x380] sm:$0xff]  ;;  %v759_v1 = vld [vmem:[%s5910_s20 + $0x390] sm:$0xff] }
  0x41   : > { %702 = vst [vmem:[%s5915_s21 + $0xe0] sm:$0xff] %v701_v36  ;;  %v761_v2 = vld [vmem:[%s5910_s20 + $0x3a0] sm:$0xff]  ;;  %v763_v3 = vld [vmem:[%s5910_s20 + $0x3b0] sm:$0xff] }
  0x42   : > { %704 = vst [vmem:[%s5915_s21 + $0xe8] sm:$0xff] %v703_v37  ;;  %v765_v4 = vld [vmem:[%s5910_s20 + $0x3c0] sm:$0xff]  ;;  %v767_v5 = vld [vmem:[%s5910_s20 + $0x3d0] sm:$0xff] }
  0x43   : > { %706 = vst [vmem:[%s5915_s21 + $0xf0] sm:$0xff] %v705_v38  ;;  %v769_v6 = vld [vmem:[%s5910_s20 + $0x3e0] sm:$0xff]  ;;  %v771_v7 = vld [vmem:[%s5910_s20 + $0x3f0] sm:$0xff] }
  0x44   : > { %708 = vst [vmem:[%s5915_s21 + $0xf8] sm:$0xff] %v707_v39  ;;  %v773_v8 = vld [vmem:[%s5910_s20 + $0x400] sm:$0xff]  ;;  %v775_v9 = vld [vmem:[%s5910_s20 + $0x410] sm:$0xff] }
  0x45   : > { %710 = vst [vmem:[%s5915_s21 + $0x100] sm:$0xff] %v709_v40  ;;  %v777_v10 = vld [vmem:[%s5910_s20 + $0x420] sm:$0xff]  ;;  %v779_v11 = vld [vmem:[%s5910_s20 + $0x430] sm:$0xff] }
  0x46   : > { %712 = vst [vmem:[%s5915_s21 + $0x108] sm:$0xff] %v711_v41  ;;  %v781_v12 = vld [vmem:[%s5910_s20 + $0x440] sm:$0xff]  ;;  %v783_v13 = vld [vmem:[%s5910_s20 + $0x450] sm:$0xff] }
  0x47   : > { %714 = vst [vmem:[%s5915_s21 + $0x110] sm:$0xff] %v713_v42  ;;  %v785_v14 = vld [vmem:[%s5910_s20 + $0x460] sm:$0xff]  ;;  %v787_v15 = vld [vmem:[%s5910_s20 + $0x470] sm:$0xff] }
  0x48   : > { %716 = vst [vmem:[%s5915_s21 + $0x118] sm:$0xff] %v715_v43  ;;  %v789_v16 = vld [vmem:[%s5910_s20 + $0x480] sm:$0xff]  ;;  %v791_v17 = vld [vmem:[%s5910_s20 + $0x490] sm:$0xff] }
  0x49   : > { %718 = vst [vmem:[%s5915_s21 + $0x120] sm:$0xff] %v717_v44  ;;  %v793_v18 = vld [vmem:[%s5910_s20 + $0x4a0] sm:$0xff]  ;;  %v795_v19 = vld [vmem:[%s5910_s20 + $0x4b0] sm:$0xff] }
  0x4a   : > { %720 = vst [vmem:[%s5915_s21 + $0x128] sm:$0xff] %v719_v45  ;;  %v797_v20 = vld [vmem:[%s5910_s20 + $0x4c0] sm:$0xff]  ;;  %v799_v21 = vld [vmem:[%s5910_s20 + $0x4d0] sm:$0xff] }
  0x4b   : > { %722 = vst [vmem:[%s5915_s21 + $0x130] sm:$0xff] %v721_v46  ;;  %v801_v22 = vld [vmem:[%s5910_s20 + $0x4e0] sm:$0xff]  ;;  %v803_v23 = vld [vmem:[%s5910_s20 + $0x4f0] sm:$0xff] }
  0x4c   : > { %724 = vst [vmem:[%s5915_s21 + $0x138] sm:$0xff] %v723_v47  ;;  %v805_v24 = vld [vmem:[%s5910_s20 + $0x500] sm:$0xff]  ;;  %v807_v25 = vld [vmem:[%s5910_s20 + $0x510] sm:$0xff] }
  0x4d   : > { %726 = vst [vmem:[%s5915_s21 + $0x140] sm:$0xff] %v725_v48  ;;  %v809_v26 = vld [vmem:[%s5910_s20 + $0x520] sm:$0xff]  ;;  %v811_v27 = vld [vmem:[%s5910_s20 + $0x530] sm:$0xff] }
  0x4e   : > { %728 = vst [vmem:[%s5915_s21 + $0x148] sm:$0xff] %v727_v49  ;;  %v813_v28 = vld [vmem:[%s5910_s20 + $0x540] sm:$0xff]  ;;  %v815_v29 = vld [vmem:[%s5910_s20 + $0x550] sm:$0xff] }
  0x4f   : > { %730 = vst [vmem:[%s5915_s21 + $0x150] sm:$0xff] %v729_v50  ;;  %v817_v30 = vld [vmem:[%s5910_s20 + $0x560] sm:$0xff]  ;;  %v819_v31 = vld [vmem:[%s5910_s20 + $0x570] sm:$0xff] }
  0x50   : > { %732 = vst [vmem:[%s5915_s21 + $0x158] sm:$0xff] %v731_v51  ;;  %v821_v32 = vld [vmem:[%s5910_s20 + $0x580] sm:$0xff]  ;;  %v823_v33 = vld [vmem:[%s5910_s20 + $0x590] sm:$0xff] }
  0x51   : > { %734 = vst [vmem:[%s5915_s21 + $0x160] sm:$0xff] %v733_v52  ;;  %v825_v34 = vld [vmem:[%s5910_s20 + $0x5a0] sm:$0xff]  ;;  %v827_v35 = vld [vmem:[%s5910_s20 + $0x5b0] sm:$0xff] }
  0x52   : > { %736 = vst [vmem:[%s5915_s21 + $0x168] sm:$0xff] %v735_v53  ;;  %v829_v36 = vld [vmem:[%s5910_s20 + $0x5c0] sm:$0xff]  ;;  %v831_v37 = vld [vmem:[%s5910_s20 + $0x5d0] sm:$0xff] }
  0x53   : > { %738 = vst [vmem:[%s5915_s21 + $0x170] sm:$0xff] %v737_v54  ;;  %v833_v38 = vld [vmem:[%s5910_s20 + $0x5e0] sm:$0xff]  ;;  %v835_v39 = vld [vmem:[%s5910_s20 + $0x5f0] sm:$0xff] }
  0x54   : > { %740 = vst [vmem:[%s5915_s21 + $0x178] sm:$0xff] %v739_v55  ;;  %v837_v40 = vld [vmem:[%s5910_s20 + $0x600] sm:$0xff]  ;;  %v839_v41 = vld [vmem:[%s5910_s20 + $0x610] sm:$0xff] }
  0x55   : > { %742 = vst [vmem:[%s5915_s21 + $0x180] sm:$0xff] %v741_v56  ;;  %v841_v42 = vld [vmem:[%s5910_s20 + $0x620] sm:$0xff]  ;;  %v843_v43 = vld [vmem:[%s5910_s20 + $0x630] sm:$0xff] }
  0x56   : > { %744 = vst [vmem:[%s5915_s21 + $0x188] sm:$0xff] %v743_v57  ;;  %v845_v44 = vld [vmem:[%s5910_s20 + $0x640] sm:$0xff]  ;;  %v847_v45 = vld [vmem:[%s5910_s20 + $0x650] sm:$0xff] }
  0x57   : > { %746 = vst [vmem:[%s5915_s21 + $0x190] sm:$0xff] %v745_v58  ;;  %v849_v46 = vld [vmem:[%s5910_s20 + $0x660] sm:$0xff]  ;;  %v851_v47 = vld [vmem:[%s5910_s20 + $0x670] sm:$0xff] }
  0x58   : > { %748 = vst [vmem:[%s5915_s21 + $0x198] sm:$0xff] %v747_v59  ;;  %v853_v48 = vld [vmem:[%s5910_s20 + $0x680] sm:$0xff]  ;;  %v855_v49 = vld [vmem:[%s5910_s20 + $0x690] sm:$0xff] }
  0x59   : > { %750 = vst [vmem:[%s5915_s21 + $0x1a0] sm:$0xff] %v749_v60  ;;  %v857_v50 = vld [vmem:[%s5910_s20 + $0x6a0] sm:$0xff]  ;;  %v859_v51 = vld [vmem:[%s5910_s20 + $0x6b0] sm:$0xff] }
  0x5a   : > { %752 = vst [vmem:[%s5915_s21 + $0x1a8] sm:$0xff] %v751_v61  ;;  %v861_v52 = vld [vmem:[%s5910_s20 + $0x6c0] sm:$0xff]  ;;  %v863_v53 = vld [vmem:[%s5910_s20 + $0x6d0] sm:$0xff] }
  0x5b   : > { %754 = vst [vmem:[%s5915_s21 + $0x1b0] sm:$0xff] %v753_v62  ;;  %v865_v54 = vld [vmem:[%s5910_s20 + $0x6e0] sm:$0xff]  ;;  %v867_v55 = vld [vmem:[%s5910_s20 + $0x6f0] sm:$0xff] }
  0x5c   : > { %756 = vst [vmem:[%s5915_s21 + $0x1b8] sm:$0xff] %v755_v63  ;;  %v869_v56 = vld [vmem:[%s5910_s20 + $0x700] sm:$0xff]  ;;  %v871_v57 = vld [vmem:[%s5910_s20 + $0x710] sm:$0xff] }
  0x5d   : > { %758 = vst [vmem:[%s5915_s21 + $0x1c0] sm:$0xff] %v757_v0  ;;  %v873_v58 = vld [vmem:[%s5910_s20 + $0x720] sm:$0xff]  ;;  %v875_v59 = vld [vmem:[%s5910_s20 + $0x730] sm:$0xff] }
  0x5e   : > { %760 = vst [vmem:[%s5915_s21 + $0x1c8] sm:$0xff] %v759_v1  ;;  %v877_v60 = vld [vmem:[%s5910_s20 + $0x740] sm:$0xff]  ;;  %v879_v61 = vld [vmem:[%s5910_s20 + $0x750] sm:$0xff] }
  0x5f   : > { %762 = vst [vmem:[%s5915_s21 + $0x1d0] sm:$0xff] %v761_v2  ;;  %v881_v62 = vld [vmem:[%s5910_s20 + $0x760] sm:$0xff]  ;;  %v883_v63 = vld [vmem:[%s5910_s20 + $0x770] sm:$0xff] }
  0x60   : > { %764 = vst [vmem:[%s5915_s21 + $0x1d8] sm:$0xff] %v763_v3  ;;  %v885_v0 = vld [vmem:[%s5910_s20 + $0x780] sm:$0xff]  ;;  %v887_v1 = vld [vmem:[%s5910_s20 + $0x790] sm:$0xff] }
  0x61   : > { %766 = vst [vmem:[%s5915_s21 + $0x1e0] sm:$0xff] %v765_v4  ;;  %v889_v2 = vld [vmem:[%s5910_s20 + $0x7a0] sm:$0xff]  ;;  %v891_v3 = vld [vmem:[%s5910_s20 + $0x7b0] sm:$0xff] }
  0x62   : > { %768 = vst [vmem:[%s5915_s21 + $0x1e8] sm:$0xff] %v767_v5  ;;  %v893_v4 = vld [vmem:[%s5910_s20 + $0x7c0] sm:$0xff]  ;;  %v895_v5 = vld [vmem:[%s5910_s20 + $0x7d0] sm:$0xff] }
  0x63   : > { %770 = vst [vmem:[%s5915_s21 + $0x1f0] sm:$0xff] %v769_v6  ;;  %v897_v6 = vld [vmem:[%s5910_s20 + $0x7e0] sm:$0xff] }
  0x64   : > { %772 = vst [vmem:[%s5915_s21 + $0x1f8] sm:$0xff] %v771_v7  ;;  %v899_v7 = vld [vmem:[%s5910_s20 + $0x7f0] sm:$0xff] }
  0x65   : > { %774 = vst [vmem:[%s5915_s21 + $0x200] sm:$0xff] %v773_v8 }
  0x66   : > { %776 = vst [vmem:[%s5915_s21 + $0x208] sm:$0xff] %v775_v9 }
  0x67   : > { %778 = vst [vmem:[%s5915_s21 + $0x210] sm:$0xff] %v777_v10 }
  0x68   : > { %780 = vst [vmem:[%s5915_s21 + $0x218] sm:$0xff] %v779_v11 }
  0x69   : > { %782 = vst [vmem:[%s5915_s21 + $0x220] sm:$0xff] %v781_v12 }
  0x6a   : > { %784 = vst [vmem:[%s5915_s21 + $0x228] sm:$0xff] %v783_v13 }
  0x6b   : > { %786 = vst [vmem:[%s5915_s21 + $0x230] sm:$0xff] %v785_v14 }
  0x6c   : > { %788 = vst [vmem:[%s5915_s21 + $0x238] sm:$0xff] %v787_v15 }
  0x6d   : > { %790 = vst [vmem:[%s5915_s21 + $0x240] sm:$0xff] %v789_v16 }
  0x6e   : > { %792 = vst [vmem:[%s5915_s21 + $0x248] sm:$0xff] %v791_v17 }
  0x6f   : > { %794 = vst [vmem:[%s5915_s21 + $0x250] sm:$0xff] %v793_v18 }
  0x70   : > { %796 = vst [vmem:[%s5915_s21 + $0x258] sm:$0xff] %v795_v19 }
  0x71   : > { %798 = vst [vmem:[%s5915_s21 + $0x260] sm:$0xff] %v797_v20 }
  0x72   : > { %800 = vst [vmem:[%s5915_s21 + $0x268] sm:$0xff] %v799_v21 }
  0x73   : > { %802 = vst [vmem:[%s5915_s21 + $0x270] sm:$0xff] %v801_v22 }
  0x74   : > { %804 = vst [vmem:[%s5915_s21 + $0x278] sm:$0xff] %v803_v23 }
  0x75   : > { %806 = vst [vmem:[%s5915_s21 + $0x280] sm:$0xff] %v805_v24 }
  0x76   : > { %808 = vst [vmem:[%s5915_s21 + $0x288] sm:$0xff] %v807_v25 }
  0x77   : > { %810 = vst [vmem:[%s5915_s21 + $0x290] sm:$0xff] %v809_v26 }
  0x78   : > { %812 = vst [vmem:[%s5915_s21 + $0x298] sm:$0xff] %v811_v27 }
  0x79   : > { %814 = vst [vmem:[%s5915_s21 + $0x2a0] sm:$0xff] %v813_v28 }
  0x7a   : > { %816 = vst [vmem:[%s5915_s21 + $0x2a8] sm:$0xff] %v815_v29 }
  0x7b   : > { %818 = vst [vmem:[%s5915_s21 + $0x2b0] sm:$0xff] %v817_v30 }
  0x7c   : > { %820 = vst [vmem:[%s5915_s21 + $0x2b8] sm:$0xff] %v819_v31 }
  0x7d   : > { %822 = vst [vmem:[%s5915_s21 + $0x2c0] sm:$0xff] %v821_v32 }
  0x7e   : > { %824 = vst [vmem:[%s5915_s21 + $0x2c8] sm:$0xff] %v823_v33 }
  0x7f   : > { %826 = vst [vmem:[%s5915_s21 + $0x2d0] sm:$0xff] %v825_v34 }
  0x80   : > { %828 = vst [vmem:[%s5915_s21 + $0x2d8] sm:$0xff] %v827_v35 }
  0x81   : > { %830 = vst [vmem:[%s5915_s21 + $0x2e0] sm:$0xff] %v829_v36 }
  0x82   : > { %832 = vst [vmem:[%s5915_s21 + $0x2e8] sm:$0xff] %v831_v37 }
  0x83   : > { %834 = vst [vmem:[%s5915_s21 + $0x2f0] sm:$0xff] %v833_v38 }
  0x84   : > { %836 = vst [vmem:[%s5915_s21 + $0x2f8] sm:$0xff] %v835_v39 }
  0x85   : > { %838 = vst [vmem:[%s5915_s21 + $0x300] sm:$0xff] %v837_v40 }
  0x86   : > { %840 = vst [vmem:[%s5915_s21 + $0x308] sm:$0xff] %v839_v41 }
  0x87   : > { %842 = vst [vmem:[%s5915_s21 + $0x310] sm:$0xff] %v841_v42 }
  0x88   : > { %844 = vst [vmem:[%s5915_s21 + $0x318] sm:$0xff] %v843_v43 }
  0x89   : > { %846 = vst [vmem:[%s5915_s21 + $0x320] sm:$0xff] %v845_v44 }
  0x8a   : > { %848 = vst [vmem:[%s5915_s21 + $0x328] sm:$0xff] %v847_v45 }
  0x8b   : > { %850 = vst [vmem:[%s5915_s21 + $0x330] sm:$0xff] %v849_v46 }
  0x8c   : > { %852 = vst [vmem:[%s5915_s21 + $0x338] sm:$0xff] %v851_v47 }
  0x8d   : > { %854 = vst [vmem:[%s5915_s21 + $0x340] sm:$0xff] %v853_v48 }
  0x8e   : > { %856 = vst [vmem:[%s5915_s21 + $0x348] sm:$0xff] %v855_v49 }
  0x8f   : > { %858 = vst [vmem:[%s5915_s21 + $0x350] sm:$0xff] %v857_v50 }
  0x90   : > { %860 = vst [vmem:[%s5915_s21 + $0x358] sm:$0xff] %v859_v51 }
  0x91   : > { %862 = vst [vmem:[%s5915_s21 + $0x360] sm:$0xff] %v861_v52 }
  0x92   : > { %864 = vst [vmem:[%s5915_s21 + $0x368] sm:$0xff] %v863_v53 }
  0x93   : > { %866 = vst [vmem:[%s5915_s21 + $0x370] sm:$0xff] %v865_v54 }
  0x94   : > { %868 = vst [vmem:[%s5915_s21 + $0x378] sm:$0xff] %v867_v55 }
  0x95   : > { %870 = vst [vmem:[%s5915_s21 + $0x380] sm:$0xff] %v869_v56 }
  0x96   : > { %872 = vst [vmem:[%s5915_s21 + $0x388] sm:$0xff] %v871_v57 }
  0x97   : > { %874 = vst [vmem:[%s5915_s21 + $0x390] sm:$0xff] %v873_v58 }
  0x98   : > { %876 = vst [vmem:[%s5915_s21 + $0x398] sm:$0xff] %v875_v59 }
  0x99   : > { %878 = vst [vmem:[%s5915_s21 + $0x3a0] sm:$0xff] %v877_v60 }
  0x9a   : > { %880 = vst [vmem:[%s5915_s21 + $0x3a8] sm:$0xff] %v879_v61 }
  0x9b   : > { %882 = vst [vmem:[%s5915_s21 + $0x3b0] sm:$0xff] %v881_v62 }
  0x9c   : > { %884 = vst [vmem:[%s5915_s21 + $0x3b8] sm:$0xff] %v883_v63 }
  0x9d   : > { %886 = vst [vmem:[%s5915_s21 + $0x3c0] sm:$0xff] %v885_v0 }
  0x9e   : > { %888 = vst [vmem:[%s5915_s21 + $0x3c8] sm:$0xff] %v887_v1 }
  0x9f   : > { %890 = vst [vmem:[%s5915_s21 + $0x3d0] sm:$0xff] %v889_v2 }
  0xa0   : > { %892 = vst [vmem:[%s5915_s21 + $0x3d8] sm:$0xff] %v891_v3 }
  0xa1   : > { %894 = vst [vmem:[%s5915_s21 + $0x3e0] sm:$0xff] %v893_v4 }
  0xa2   : > { %896 = vst [vmem:[%s5915_s21 + $0x3e8] sm:$0xff] %v895_v5 }
  0xa3   : > { %898 = vst [vmem:[%s5915_s21 + $0x3f0] sm:$0xff] %v897_v6 }
  0xa4   : > { %900 = vst [vmem:[%s5915_s21 + $0x3f8] sm:$0xff] %v899_v7 }
  0xa5 PF: > { %906 = sbr.rel (!%p5874_p5) target bundleno = 173 (0xad), region = 146  ;;  %s908_s22 = sand.u32 (%p5874_p5), 1, %s5786_s26  }
  0xa6   : > { %s5373_s23 = sshll.u32 (%p5874_p5), %s5790_s27, 3  ;;  %s5372_s29 = sshll.u32 (%p5874_p5), %s908_s22, 5 }
  0xa7   : > { %s912_s14 = scalar_lea.vmem (%p5874_p5), %s8987_s6, %s5373_s23  ;;  %s910_s15 = scalar_lea.vmem (%p5874_p5), [#allocation7], %s5372_s29 }
  0xa8   : > { %v947_v8 = vld [vmem:[%s912_s14] sm:$0xff] (%p5874_p5)  ;;  %v949_v9 = vld [vmem:[%s912_s14 + $0x10] sm:$0xff] (%p5874_p5) }
  0xa9   : > { %v951_v10 = vld [vmem:[%s912_s14 + $0x20] sm:$0xff] (%p5874_p5)  ;;  %948 = vst [vmem:[%s910_s15] sm:$0xff] (%p5874_p5), %v947_v8  ;;  %v953_v11 = vld [vmem:[%s912_s14 + $0x30] sm:$0xff] (%p5874_p5) }
  0xaa   : > { %950 = vst [vmem:[%s910_s15 + $0x8] sm:$0xff] %v949_v9 }
  0xab   : > { %952 = vst [vmem:[%s910_s15 + $0x10] sm:$0xff] %v951_v10 }
  0xac   : > { %954 = vst [vmem:[%s910_s15 + $0x18] sm:$0xff] %v953_v11 }
  0xad PF: > { %p5374_p10 = scmp.ge.s32.totalorder %s5790_s27, 1  ;;  %p959_p11 = scmp.lt.s32.totalorder %s5790_s27, 3 }
  0xaf   : > { %p960_p12 = pnand %p5374_p10, %p959_p11 }
  0xb1   : > { %963 = sbr.rel (%p960_p12) target bundleno = 1041 (0x411), region = 184 }
  0xb6   : > { %p1034_p13 = scmp.lt.s32.totalorder %s5856_s28, 1  ;;  %v1038_v12 = vld [vmem:[%s8982_s1] sm:$0xff]  ;;  %vm1040_vm0 = vcmask 64512   ;;  %s6188_s22 = sand.u32 1, %s5782_s25  }
  0xb7   : > { %s6191_s23 = sshll.u32 %s6188_s22, 5  ;;  %s5377_s9 = sshll.u32 %s6188_s22, 10 }
  0xb8   : > { %s1035_s11 = scalar_select %p1034_p13, %s5856_s28, 1 }
  0xb9   : > { %s968_s29 = scalar_lea.vmem [#allocation4], %s6191_s23  ;;  %s975_s8 = scalar_lea.vmem [#allocation5], %s6191_s23 }
  0xba   : > { %s5380_s16 = sshll.u32 %s1035_s11, 3  ;;  %v6196_v15 = vld [vmem:[%s968_s29 + $0x18] sm:$0xff]  ;;  %v6198_v16 = vld [vmem:[%s968_s29 + $0x10] sm:$0xff]  ;;  %v6202_v19 = vld [vmem:[%s968_s29 + $0x8] sm:$0xff]  ;;  %s6466_s14 = scalar_lea.vmem [#allocation6], %s5377_s9 }
  0xbb   : > { %s1037_s19 = scalar_lea.vmem %s8981_s0, %s5380_s16  ;;  %v6204_v20 = vld [vmem:[%s968_s29] sm:$0xff]  ;;  %v6207_v21 = vld [vmem:[%s975_s8 + $0x18] sm:$0xff]  ;;  %v6209_v22 = vld [vmem:[%s975_s8 + $0x10] sm:$0xff]  ;;  %s6473_s15 = scalar_lea.vmem [#allocation7], %s6191_s23 }
  0xbc   : > { %v1039_v13 = vld [vmem:[%s1037_s19] sm:$0xff]  ;;  %v6215_v27 = vld [vmem:[%s975_s8 + $0x8] sm:$0xff]  ;;  %s5379_s29 = sshll.u32 %s6188_s22, 8  ;;  %s5383_s9 = sshll.u32 %s5856_s28, 3 }
  0xbd   : > { %1059 = vmatpush.msra.mxu0 %v1039_v13  ;;  %v6224_v35 = vld [vmem:[%s975_s8] sm:$0xff]  ;;  %s6958_s8 = scalar_lea.vmem [#allocation8], %s5379_s29  ;;  %s5215_s16 = scalar_lea.sflag [#allocation9], %s6188_s22 }
  0xbe   : > { %5381 = vmatmul.msk.f32.vlgmr.msra.gmra.mxu0 %vm1040_vm0, %v1038_v12  ;;  %s5226_s23 = sshll.u32 %s6958_s8, 4  ;;  %s5748_s21 = scalar_lea.hbm %s8988_s7, 512  ;;  %s5227_s23 = int_to_ptr.vmem [resolvable:$true] %s5226_s23 }
 0x13b   : > { %v6193_v14 = vpop.f32.mrf.mxu0 }
 0x13c   : > { %v1123_v17 = vperm.slane %v6193_v14, 3  ;;  %v1191_v18 = vperm.slane %v6193_v14, 7  ;;  %v1106_v31 = vperm.slane %v6193_v14, 2  ;;  %v1174_v36 = vperm.slane %v6193_v14, 6 }
 0x13d   : > { %v1089_v54 = vperm.slane %v6193_v14, 1  ;;  %v1157_v58 = vperm.slane %v6193_v14, 5 }
 0x13e   : > { %v1127_v23 = vmul.f32 %v1123_v17, %v6196_v15  ;;  %v1195_v24 = vmul.f32 %v1191_v18, %v6196_v15  ;;  %v1126_v25 = vmul.f32 %v1123_v17, %v6198_v16  ;;  %v1194_v26 = vmul.f32 %v1191_v18, %v6198_v16 }
 0x13f   : > { %v1125_v28 = vmul.f32 %v1123_v17, %v6202_v19  ;;  %v1193_v29 = vmul.f32 %v1191_v18, %v6202_v19  ;;  %v1124_v30 = vmul.f32 %v1123_v17, %v6204_v20  ;;  %v1192_v38 = vmul.f32 %v1191_v18, %v6204_v20 }
 0x140   : > { %v1131_v32 = vadd.f32 %v1127_v23, %v6207_v21  ;;  %v1199_v33 = vadd.f32 %v1195_v24, %v6207_v21  ;;  %v1130_v34 = vadd.f32 %v1126_v25, %v6209_v22  ;;  %v1198_v37 = vadd.f32 %v1194_v26, %v6209_v22 }
 0x141   : > { %v1129_v41 = vadd.f32 %v1125_v28, %v6215_v27  ;;  %v1197_v42 = vadd.f32 %v1193_v29, %v6215_v27  ;;  %v1128_v43 = vadd.f32 %v1124_v30, %v6224_v35  ;;  %v1110_v45 = vmul.f32 %v1106_v31, %v6196_v15 }
 0x142   : > { %v1135_v39 = vmax.f32 %v1131_v32, 0.0  ;;  %v1203_v40 = vmax.f32 %v1199_v33, 0.0  ;;  %v1134_v44 = vmax.f32 %v1130_v34, 0.0  ;;  %v1178_v46 = vmul.f32 %v1174_v36, %v6196_v15 }
 0x143   : > { %v1109_v47 = vmul.f32 %v1106_v31, %v6198_v16  ;;  %v1202_v48 = vmax.f32 %v1198_v37, 0.0  ;;  %v1196_v49 = vadd.f32 %v1192_v38, %v6224_v35  ;;  %v1177_v50 = vmul.f32 %v1174_v36, %v6198_v16 }
 0x144   : > { %1304 = vmatpush.msra.mxu1 %v1135_v39  ;;  %5386 = vmatpush.msra.mxu3 %v1135_v39  ;;  %v1133_v51 = vmax.f32 %v1129_v41, 0.0  ;;  %v1114_v52 = vadd.f32 %v1110_v45, %v6207_v21  ;;  %v1108_v53 = vmul.f32 %v1106_v31, %v6202_v19  ;;  %v1201_v55 = vmax.f32 %v1197_v42, 0.0 }
 0x145   : > { %1417 = vmatpush.msrb.mxu0 %v1203_v40  ;;  %5402 = vmatpush.msra.mxu2 %v1203_v40  ;;  %v1182_v56 = vadd.f32 %v1178_v46, %v6207_v21  ;;  %v1176_v57 = vmul.f32 %v1174_v36, %v6202_v19  ;;  %v1132_v59 = vmax.f32 %v1128_v43, 0.0  ;;  %v1113_v60 = vadd.f32 %v1109_v47, %v6209_v22 }
 0x146   : > { %1305 = vmatpush.msra.mxu1 %v1134_v44  ;;  %5387 = vmatpush.msra.mxu3 %v1134_v44  ;;  %v1107_v61 = vmul.f32 %v1106_v31, %v6204_v20  ;;  %v1200_v62 = vmax.f32 %v1196_v49, 0.0  ;;  %v1181_v63 = vadd.f32 %v1177_v50, %v6209_v22  ;;  %v1175_v0 = vmul.f32 %v1174_v36, %v6204_v20 }
 0x147   : > { %1418 = vmatpush.msrb.mxu0 %v1202_v48  ;;  %5403 = vmatpush.msra.mxu2 %v1202_v48  ;;  %v1118_v1 = vmax.f32 %v1114_v52, 0.0  ;;  %v1112_v2 = vadd.f32 %v1108_v53, %v6215_v27  ;;  %v1093_v3 = vmul.f32 %v1089_v54, %v6196_v15  ;;  %v1186_v4 = vmax.f32 %v1182_v56, 0.0 }
 0x148   : > { %1306 = vmatpush.msra.mxu1 %v1133_v51  ;;  %5388 = vmatpush.msra.mxu3 %v1133_v51  ;;  %v1180_v5 = vadd.f32 %v1176_v57, %v6215_v27  ;;  %v1161_v6 = vmul.f32 %v1157_v58, %v6196_v15  ;;  %v1117_v7 = vmax.f32 %v1113_v60, 0.0  ;;  %v1111_v8 = vadd.f32 %v1107_v61, %v6224_v35 }
 0x149   : > { %1419 = vmatpush.msrb.mxu0 %v1201_v55  ;;  %5404 = vmatpush.msra.mxu2 %v1201_v55  ;;  %v1092_v9 = vmul.f32 %v1089_v54, %v6198_v16  ;;  %v1185_v10 = vmax.f32 %v1181_v63, 0.0  ;;  %v1179_v11 = vadd.f32 %v1175_v0, %v6224_v35  ;;  %v1160_v12 = vmul.f32 %v1157_v58, %v6198_v16  ;;  %v1208_v0 = vld [vmem:[%s8983_s2] sm:$0xff] }
 0x14a   : > { %1307 = vmatpush.msra.mxu1 %v1132_v59  ;;  %5389 = vmatpush.msra.mxu3 %v1132_v59  ;;  %v1116_v13 = vmax.f32 %v1112_v2, 0.0  ;;  %v1097_v17 = vadd.f32 %v1093_v3, %v6207_v21  ;;  %v1091_v18 = vmul.f32 %v1089_v54, %v6202_v19  ;;  %v1072_v23 = vperm.slane %v6193_v14, 0  ;;  %v1241_v2 = vld [vmem:[%s8983_s2 + $0x108] sm:$0xff]  ;;  %v1210_v3 = vld [vmem:[%s8983_s2 + $0x10] sm:$0xff] }
 0x14b   : > { %1420 = vmatpush.msrb.mxu0 %v1200_v62  ;;  %5405 = vmatpush.msra.mxu2 %v1200_v62  ;;  %v1184_v24 = vmax.f32 %v1180_v5, 0.0  ;;  %v1165_v25 = vadd.f32 %v1161_v6, %v6207_v21  ;;  %v1159_v26 = vmul.f32 %v1157_v58, %v6202_v19  ;;  %v1140_v28 = vperm.slane %v6193_v14, 4  ;;  %v1211_v5 = vld [vmem:[%s8983_s2 + $0x18] sm:$0xff] }
 0x14c   : > { %1308 = vmatpush.msra.mxu1 %v1118_v1  ;;  %5390 = vmatpush.msra.mxu3 %v1118_v1  ;;  %v1115_v29 = vmax.f32 %v1111_v8, 0.0  ;;  %v1096_v30 = vadd.f32 %v1092_v9, %v6209_v22  ;;  %v1090_v31 = vmul.f32 %v1089_v54, %v6204_v20  ;;  %v1183_v32 = vmax.f32 %v1179_v11, 0.0  ;;  %v1209_v1 = vld [vmem:[%s8983_s2 + $0x8] sm:$0xff]  ;;  %v1243_v6 = vld [vmem:[%s8983_s2 + $0x118] sm:$0xff]  ;;  %v1244_v8 = vld [vmem:[%s8983_s2 + $0x120] sm:$0xff] }
 0x14d   : > { %1421 = vmatpush.msrb.mxu0 %v1186_v4  ;;  %5406 = vmatpush.msra.mxu2 %v1186_v4  ;;  %v1164_v33 = vadd.f32 %v1160_v12, %v6209_v22  ;;  %v1158_v34 = vmul.f32 %v1157_v58, %v6204_v20  ;;  %v1101_v36 = vmax.f32 %v1097_v17, 0.0  ;;  %v1095_v37 = vadd.f32 %v1091_v18, %v6215_v27  ;;  %v1242_v4 = vld [vmem:[%s8983_s2 + $0x110] sm:$0xff]  ;;  %v1213_v9 = vld [vmem:[%s8983_s2 + $0x28] sm:$0xff]  ;;  %v1247_v17 = vld [vmem:[%s8983_s2 + $0x138] sm:$0xff] }
 0x14e   : > { %1309 = vmatpush.msra.mxu1 %v1117_v7  ;;  %5391 = vmatpush.msra.mxu3 %v1117_v7  ;;  %v1076_v14 = vmul.f32 %v1072_v23, %v6196_v15  ;;  %v1169_v38 = vmax.f32 %v1165_v25, 0.0  ;;  %v1163_v39 = vadd.f32 %v1159_v26, %v6215_v27  ;;  %v1144_v40 = vmul.f32 %v1140_v28, %v6196_v15  ;;  %v1212_v7 = vld [vmem:[%s8983_s2 + $0x20] sm:$0xff]  ;;  %v1214_v11 = vld [vmem:[%s8983_s2 + $0x30] sm:$0xff]  ;;  %v1249_v25 = vld [vmem:[%s8983_s2 + $0x148] sm:$0xff] }
 0x14f   : > { %1422 = vmatpush.msrb.mxu0 %v1185_v10  ;;  %5407 = vmatpush.msra.mxu2 %v1185_v10  ;;  %v1100_v41 = vmax.f32 %v1096_v30, 0.0  ;;  %v1094_v42 = vadd.f32 %v1090_v31, %v6224_v35  ;;  %v1075_v43 = vmul.f32 %v1072_v23, %v6198_v16  ;;  %v1168_v44 = vmax.f32 %v1164_v33, 0.0  ;;  %v1245_v10 = vld [vmem:[%s8983_s2 + $0x128] sm:$0xff]  ;;  %v1246_v12 = vld [vmem:[%s8983_s2 + $0x130] sm:$0xff]  ;;  %v1216_v18 = vld [vmem:[%s8983_s2 + $0x40] sm:$0xff] }
 0x150   : > { %1310 = vmatpush.msra.mxu1 %v1116_v13  ;;  %5392 = vmatpush.msra.mxu3 %v1116_v13  ;;  %v1162_v45 = vadd.f32 %v1158_v34, %v6224_v35  ;;  %v1143_v46 = vmul.f32 %v1140_v28, %v6198_v16  ;;  %v1099_v47 = vmax.f32 %v1095_v37, 0.0  ;;  %v1080_v48 = vadd.f32 %v1076_v14, %v6207_v21  ;;  %v1215_v13 = vld [vmem:[%s8983_s2 + $0x38] sm:$0xff]  ;;  %v1218_v26 = vld [vmem:[%s8983_s2 + $0x50] sm:$0xff]  ;;  %v1220_v31 = vld [vmem:[%s8983_s2 + $0x60] sm:$0xff] }
 0x151   : > { %1423 = vmatpush.msrb.mxu0 %v1184_v24  ;;  %5408 = vmatpush.msra.mxu2 %v1184_v24  ;;  %v1074_v15 = vmul.f32 %v1072_v23, %v6202_v19  ;;  %v1167_v49 = vmax.f32 %v1163_v39, 0.0  ;;  %v1148_v50 = vadd.f32 %v1144_v40, %v6207_v21  ;;  %v1142_v51 = vmul.f32 %v1140_v28, %v6202_v19  ;;  %v1217_v24 = vld [vmem:[%s8983_s2 + $0x48] sm:$0xff]  ;;  %v1251_v30 = vld [vmem:[%s8983_s2 + $0x158] sm:$0xff]  ;;  %v1254_v37 = vld [vmem:[%s8983_s2 + $0x170] sm:$0xff] }
 0x152   : > { %1311 = vmatpush.msra.mxu1 %v1115_v29  ;;  %5393 = vmatpush.msra.mxu3 %v1115_v29  ;;  %v1098_v52 = vmax.f32 %v1094_v42, 0.0  ;;  %v1079_v53 = vadd.f32 %v1075_v43, %v6209_v22  ;;  %v1073_v16 = vmul.f32 %v1072_v23, %v6204_v20  ;;  %v1166_v54 = vmax.f32 %v1162_v45, 0.0  ;;  %v1248_v23 = vld [vmem:[%s8983_s2 + $0x140] sm:$0xff]  ;;  %v1219_v29 = vld [vmem:[%s8983_s2 + $0x58] sm:$0xff]  ;;  %v1221_v33 = vld [vmem:[%s8983_s2 + $0x68] sm:$0xff] }
 0x153   : > { %1424 = vmatpush.msrb.mxu0 %v1183_v32  ;;  %5409 = vmatpush.msra.mxu2 %v1183_v32  ;;  %v1147_v55 = vadd.f32 %v1143_v46, %v6209_v22  ;;  %v1141_v56 = vmul.f32 %v1140_v28, %v6204_v20  ;;  %v1084_v57 = vmax.f32 %v1080_v48, 0.0  ;;  %v1078_v21 = vadd.f32 %v1074_v15, %v6215_v27  ;;  %v1250_v28 = vld [vmem:[%s8983_s2 + $0x150] sm:$0xff]  ;;  %v1252_v32 = vld [vmem:[%s8983_s2 + $0x160] sm:$0xff]  ;;  %v1253_v34 = vld [vmem:[%s8983_s2 + $0x168] sm:$0xff] }
 0x154   : > { %1312 = vmatpush.msra.mxu1 %v1101_v36  ;;  %5394 = vmatpush.msra.mxu3 %v1101_v36  ;;  %v1152_v19 = vmax.f32 %v1148_v50, 0.0  ;;  %v1146_v58 = vadd.f32 %v1142_v51, %v6215_v27  ;;  %v1083_v59 = vmax.f32 %v1079_v53, 0.0  ;;  %v1077_v60 = vadd.f32 %v1073_v16, %v6224_v35  ;;  %v1222_v36 = vld [vmem:[%s8983_s2 + $0x70] sm:$0xff]  ;;  %v1223_v14 = vld [vmem:[%s8983_s2 + $0x78] sm:$0xff]  ;;  %v1224_v39 = vld [vmem:[%s8983_s2 + $0x80] sm:$0xff] }
 0x155   : > { %1425 = vmatpush.msrb.mxu0 %v1169_v38  ;;  %5410 = vmatpush.msra.mxu2 %v1169_v38  ;;  %v1151_v22 = vmax.f32 %v1147_v55, 0.0  ;;  %v1145_v20 = vadd.f32 %v1141_v56, %v6224_v35  ;;  %v1082_v61 = vmax.f32 %v1078_v21, 0.0  ;;  %v1240_v35 = vld [vmem:[%s8983_s2 + $0x100] sm:$0xff]  ;;  %v1255_v38 = vld [vmem:[%s8983_s2 + $0x178] sm:$0xff]  ;;  %v1257_v42 = vld [vmem:[%s8983_s2 + $0x188] sm:$0xff] }
 0x156   : > { %1313 = vmatpush.msra.mxu1 %v1100_v41  ;;  %5395 = vmatpush.msra.mxu3 %v1100_v41  ;;  %v1150_v62 = vmax.f32 %v1146_v58, 0.0  ;;  %v1081_v63 = vmax.f32 %v1077_v60, 0.0  ;;  %v1256_v40 = vld [vmem:[%s8983_s2 + $0x180] sm:$0xff]  ;;  %v1225_v41 = vld [vmem:[%s8983_s2 + $0x88] sm:$0xff]  ;;  %v1226_v43 = vld [vmem:[%s8983_s2 + $0x90] sm:$0xff] }
 0x157   : > { %1426 = vmatpush.msrb.mxu0 %v1168_v44  ;;  %5411 = vmatpush.msra.mxu2 %v1168_v44  ;;  %v1149_v27 = vmax.f32 %v1145_v20, 0.0  ;;  %v1258_v44 = vld [vmem:[%s8983_s2 + $0x190] sm:$0xff]  ;;  %v1227_v45 = vld [vmem:[%s8983_s2 + $0x98] sm:$0xff]  ;;  %v1260_v48 = vld [vmem:[%s8983_s2 + $0x1a0] sm:$0xff] }
 0x158   : > { %1314 = vmatpush.msra.mxu1 %v1099_v47  ;;  %5396 = vmatpush.msra.mxu3 %v1099_v47  ;;  %v1259_v46 = vld [vmem:[%s8983_s2 + $0x198] sm:$0xff]  ;;  %v1228_v47 = vld [vmem:[%s8983_s2 + $0xa0] sm:$0xff]  ;;  %v1229_v15 = vld [vmem:[%s8983_s2 + $0xa8] sm:$0xff] }
 0x159   : > { %1427 = vmatpush.msrb.mxu0 %v1167_v49  ;;  %5412 = vmatpush.msra.mxu2 %v1167_v49  ;;  %v1261_v49 = vld [vmem:[%s8983_s2 + $0x1a8] sm:$0xff]  ;;  %v1230_v50 = vld [vmem:[%s8983_s2 + $0xb0] sm:$0xff]  ;;  %v1263_v53 = vld [vmem:[%s8983_s2 + $0x1b8] sm:$0xff] }
 0x15a   : > { %1315 = vmatpush.msra.mxu1 %v1098_v52  ;;  %5397 = vmatpush.msra.mxu3 %v1098_v52  ;;  %v1262_v51 = vld [vmem:[%s8983_s2 + $0x1b0] sm:$0xff]  ;;  %v1231_v52 = vld [vmem:[%s8983_s2 + $0xb8] sm:$0xff]  ;;  %v1232_v16 = vld [vmem:[%s8983_s2 + $0xc0] sm:$0xff] }
 0x15b   : > { %1428 = vmatpush.msrb.mxu0 %v1166_v54  ;;  %5413 = vmatpush.msra.mxu2 %v1166_v54  ;;  %v1264_v54 = vld [vmem:[%s8983_s2 + $0x1c0] sm:$0xff]  ;;  %v1233_v55 = vld [vmem:[%s8983_s2 + $0xc8] sm:$0xff]  ;;  %v1266_v21 = vld [vmem:[%s8983_s2 + $0x1d0] sm:$0xff] }
 0x15c   : > { %1316 = vmatpush.msra.mxu1 %v1084_v57  ;;  %5398 = vmatpush.msra.mxu3 %v1084_v57  ;;  %v1265_v56 = vld [vmem:[%s8983_s2 + $0x1c8] sm:$0xff]  ;;  %v1234_v57 = vld [vmem:[%s8983_s2 + $0xd0] sm:$0xff]  ;;  %v1267_v58 = vld [vmem:[%s8983_s2 + $0x1d8] sm:$0xff] }
 0x15d   : > { %1429 = vmatpush.msrb.mxu0 %v1152_v19  ;;  %5414 = vmatpush.msra.mxu2 %v1152_v19  ;;  %v1235_v19 = vld [vmem:[%s8983_s2 + $0xd8] sm:$0xff]  ;;  %v1268_v60 = vld [vmem:[%s8983_s2 + $0x1e0] sm:$0xff]  ;;  %v1269_v20 = vld [vmem:[%s8983_s2 + $0x1e8] sm:$0xff] }
 0x15e   : > { %1317 = vmatpush.msra.mxu1 %v1083_v59  ;;  %5399 = vmatpush.msra.mxu3 %v1083_v59  ;;  %v1236_v59 = vld [vmem:[%s8983_s2 + $0xe0] sm:$0xff] }
 0x15f   : > { %1430 = vmatpush.msrb.mxu0 %v1151_v22  ;;  %5415 = vmatpush.msra.mxu2 %v1151_v22  ;;  %v1237_v22 = vld [vmem:[%s8983_s2 + $0xe8] sm:$0xff] }
 0x160   : > { %1318 = vmatpush.msra.mxu1 %v1082_v61  ;;  %5400 = vmatpush.msra.mxu3 %v1082_v61 }
 0x161   : > { %1431 = vmatpush.msrb.mxu0 %v1150_v62  ;;  %5416 = vmatpush.msra.mxu2 %v1150_v62 }
 0x162   : > { %1319 = vmatpush.msra.mxu1 %v1081_v63  ;;  %5401 = vmatpush.msra.mxu3 %v1081_v63 }
 0x163   : > { %1432 = vmatpush.msrb.mxu0 %v1149_v27  ;;  %5417 = vmatpush.msra.mxu2 %v1149_v27 }
 0x164   : > { %1320 = vmatmul.f32.vlgmr.msra.gmra.mxu1 %v1208_v0  ;;  %1368 = vmatmul.f32.vlgmr.msra.gmra.mxu3 %v1240_v35 }
 0x165   : > { %1433 = vmatmul.f32.vlgmr.msrb.gmra.mxu0 %v1209_v1  ;;  %1481 = vmatmul.f32.vlgmr.msra.gmra.mxu2 %v1241_v2 }
 0x16c   : > { %1323 = vmatmul.f32.gmra.mxu1 %v1210_v3  ;;  %1371 = vmatmul.f32.gmra.mxu3 %v1242_v4 }
 0x16d   : > { %1436 = vmatmul.f32.gmra.mxu0 %v1211_v5  ;;  %1484 = vmatmul.f32.gmra.mxu2 %v1243_v6  ;;  %v1567_v5 = vld [vmem:[%s6466_s14] sm:$0xff]  ;;  %v1568_v6 = vld [vmem:[%s6466_s14 + $0x8] sm:$0xff] }
 0x174   : > { %1326 = vmatmul.f32.gmra.mxu1 %v1212_v7  ;;  %1374 = vmatmul.f32.gmra.mxu3 %v1244_v8  ;;  %v1569_v7 = vld [vmem:[%s6466_s14 + $0x10] sm:$0xff]  ;;  %v1570_v8 = vld [vmem:[%s6466_s14 + $0x18] sm:$0xff] }
 0x175   : > { %1439 = vmatmul.f32.gmra.mxu0 %v1213_v9  ;;  %1487 = vmatmul.f32.gmra.mxu2 %v1245_v10  ;;  %v1562_v9 = vld [vmem:[%s6473_s15] sm:$0xff] }
 0x17c   : > { %1329 = vmatmul.f32.gmra.mxu1 %v1214_v11  ;;  %1377 = vmatmul.f32.gmra.mxu3 %v1246_v12  ;;  %v1563_v12 = vld [vmem:[%s6473_s15 + $0x8] sm:$0xff] }
 0x17d   : > { %1442 = vmatmul.f32.gmra.mxu0 %v1215_v13  ;;  %1490 = vmatmul.f32.gmra.mxu2 %v1247_v17 }
 0x184   : > { %1332 = vmatmul.f32.gmra.mxu1 %v1216_v18  ;;  %1380 = vmatmul.f32.gmra.mxu3 %v1248_v23  ;;  %v1581_v18 = vld [vmem:[%s6466_s14 + $0x20] sm:$0xff]  ;;  %v1564_v23 = vld [vmem:[%s6473_s15 + $0x10] sm:$0xff] }
 0x185   : > { %1445 = vmatmul.f32.gmra.mxu0 %v1217_v24  ;;  %1493 = vmatmul.f32.gmra.mxu2 %v1249_v25  ;;  %v1582_v25 = vld [vmem:[%s6466_s14 + $0x28] sm:$0xff] }
 0x18c   : > { %1335 = vmatmul.f32.gmra.mxu1 %v1218_v26  ;;  %1383 = vmatmul.f32.gmra.mxu3 %v1250_v28  ;;  %v1583_v26 = vld [vmem:[%s6466_s14 + $0x30] sm:$0xff]  ;;  %v1565_v28 = vld [vmem:[%s6473_s15 + $0x18] sm:$0xff] }
 0x18d   : > { %1448 = vmatmul.f32.gmra.mxu0 %v1219_v29  ;;  %1496 = vmatmul.f32.gmra.mxu2 %v1251_v30  ;;  %v6483_v29 = vld [vmem:[%s6466_s14 + $0x38] sm:$0xff] }
 0x194   : > { %1338 = vmatmul.f32.gmra.mxu1 %v1220_v31  ;;  %1386 = vmatmul.f32.gmra.mxu3 %v1252_v32 }
 0x195   : > { %1451 = vmatmul.f32.gmra.mxu0 %v1221_v33  ;;  %1499 = vmatmul.f32.gmra.mxu2 %v1253_v34 }
 0x19c   : > { %1341 = vmatmul.f32.gmra.mxu1 %v1222_v36  ;;  %1389 = vmatmul.f32.gmra.mxu3 %v1254_v37 }
 0x19d   : > { %1454 = vmatmul.f32.gmra.mxu0 %v1223_v14  ;;  %1502 = vmatmul.f32.gmra.mxu2 %v1255_v38  ;;  %v6486_v14 = vld [vmem:[%s6466_s14 + $0x40] sm:$0xff] }
 0x1a4   : > { %1344 = vmatmul.f32.gmra.mxu1 %v1224_v39  ;;  %1392 = vmatmul.f32.gmra.mxu3 %v1256_v40  ;;  %v1596_v40 = vld [vmem:[%s6466_s14 + $0x48] sm:$0xff] }
 0x1a5   : > { %1457 = vmatmul.f32.gmra.mxu0 %v1225_v41  ;;  %1505 = vmatmul.f32.gmra.mxu2 %v1257_v42  ;;  %v6491_v41 = vld [vmem:[%s6466_s14 + $0x50] sm:$0xff] }
 0x1ac   : > { %1347 = vmatmul.f32.gmra.mxu1 %v1226_v43  ;;  %1395 = vmatmul.f32.gmra.mxu3 %v1258_v44  ;;  %v6494_v43 = vld [vmem:[%s6466_s14 + $0x58] sm:$0xff] }
 0x1ad   : > { %1460 = vmatmul.f32.gmra.mxu0 %v1227_v45  ;;  %1508 = vmatmul.f32.gmra.mxu2 %v1259_v46 }
 0x1b4   : > { %1350 = vmatmul.f32.gmra.mxu1 %v1228_v47  ;;  %1398 = vmatmul.f32.gmra.mxu3 %v1260_v48 }
 0x1b5   : > { %1463 = vmatmul.f32.gmra.mxu0 %v1229_v15  ;;  %1511 = vmatmul.f32.gmra.mxu2 %v1261_v49 }
 0x1bc   : > { %1353 = vmatmul.f32.gmra.mxu1 %v1230_v50  ;;  %1401 = vmatmul.f32.gmra.mxu3 %v1262_v51  ;;  %v6499_v50 = vld [vmem:[%s6466_s14 + $0x60] sm:$0xff]  ;;  %v6502_v51 = vld [vmem:[%s6466_s14 + $0x68] sm:$0xff] }
 0x1bd   : > { %1466 = vmatmul.f32.gmra.mxu0 %v1231_v52  ;;  %1514 = vmatmul.f32.gmra.mxu2 %v1263_v53 }
 0x1c4   : > { %1356 = vmatmul.f32.gmra.mxu1 %v1232_v16  ;;  %1404 = vmatmul.f32.gmra.mxu3 %v1264_v54  ;;  %v6506_v16 = vld [vmem:[%s6466_s14 + $0x70] sm:$0xff] }
 0x1c5   : > { %1469 = vmatmul.f32.gmra.mxu0 %v1233_v55  ;;  %1517 = vmatmul.f32.gmra.mxu2 %v1265_v56  ;;  %v6509_v56 = vld [vmem:[%s6466_s14 + $0x78] sm:$0xff] }
 0x1cc   : > { %1359 = vmatmul.f32.gmra.mxu1 %v1234_v57  ;;  %1407 = vmatmul.f32.gmra.mxu3 %v1266_v21 }
 0x1cd   : > { %1472 = vmatmul.f32.gmra.mxu0 %v1235_v19  ;;  %1520 = vmatmul.f32.gmra.mxu2 %v1267_v58 }
 0x1d4   : > { %1362 = vmatmul.f32.gmra.mxu1 %v1236_v59  ;;  %1410 = vmatmul.f32.gmra.mxu3 %v1268_v60 }
 0x1d5   : > { %1475 = vmatmul.f32.gmra.mxu0 %v1237_v22  ;;  %1523 = vmatmul.f32.gmra.mxu2 %v1269_v20 }
 0x1e1   : > { %v1321_v61 = vpop.f32.mrf.mxu1 }
 0x1e2   : > { %v1434_v62 = vpop.f32.mrf.mxu0 }
 0x1e3   : > { %v1435_v63 = vadd.f32 %v1434_v62, %v1321_v61 }
 0x1e5   : > { %1530 = vst [vmem:[#allocation3] sm:$0xff] %v1435_v63 }
 0x1e7   : > { %v1369_v27 = vpop.f32.mrf.mxu3 }
 0x1e8   : > { %v1482_v0 = vpop.f32.mrf.mxu2 }
 0x1e9   : > { %v1483_v35 = vadd.f32 %v1482_v0, %v1369_v27  ;;  %v1324_v1 = vpop.f32.mrf.mxu1 }
 0x1ea   : > { %v1437_v2 = vpop.f32.mrf.mxu0 }
 0x1eb   : > { %1546 = vst [vmem:[#allocation3 + $0x80] sm:$0xff] %v1483_v35  ;;  %v1438_v3 = vadd.f32 %v1437_v2, %v1324_v1  ;;  %v6516_v1 = vld [vmem:[%s6466_s14 + $0x80] sm:$0xff] }
 0x1ec   : > { %v5460_v4 = vld [vmem:[#allocation3] ss:$0 sm:$0xff]  ;;  %v5461_v11 = vld [vmem:[#allocation3 + $0x1] ss:$0 sm:$0xff]  ;;  %v5462_v32 = vld [vmem:[#allocation3 + $0x2] ss:$0 sm:$0xff] }
 0x1ed   : > { %1531 = vst [vmem:[#allocation3 + $0x8] sm:$0xff] %v1438_v3  ;;  %v1572_v10 = vmul.f32 %v5460_v4, %v1567_v5  ;;  %v1573_v13 = vmul.f32 %v5460_v4, %v1568_v6  ;;  %v1574_v17 = vmul.f32 %v5460_v4, %v1569_v7  ;;  %v1575_v24 = vmul.f32 %v5460_v4, %v1570_v8  ;;  %v5463_v46 = vld [vmem:[#allocation3 + $0x3] ss:$0 sm:$0xff]  ;;  %v5464_v27 = vld [vmem:[#allocation3 + $0x4] ss:$0 sm:$0xff]  ;;  %v6519_v4 = vld [vmem:[%s6466_s14 + $0x88] sm:$0xff] }
 0x1ee   : > { %v1586_v31 = vmul.f32 %v5461_v11, %v1581_v18  ;;  %v1587_v36 = vmul.f32 %v5461_v11, %v1582_v25  ;;  %v1588_v37 = vmul.f32 %v5461_v11, %v1583_v26  ;;  %v1589_v39 = vmul.f32 %v5461_v11, %v6483_v29 }
 0x1ef   : > { %v1576_v30 = vadd.f32 %v1572_v10, %v1562_v9  ;;  %v1577_v33 = vadd.f32 %v1573_v13, %v1563_v12  ;;  %v1578_v34 = vadd.f32 %v1574_v17, %v1564_v23  ;;  %v1579_v38 = vadd.f32 %v1575_v24, %v1565_v28  ;;  %v6525_v13 = vld [vmem:[%s6466_s14 + $0x98] sm:$0xff]  ;;  %v5465_v24 = vld [vmem:[#allocation3 + $0x5] ss:$0 sm:$0xff] }
 0x1f0   : > { %v1600_v45 = vmul.f32 %v5462_v32, %v6486_v14  ;;  %v1601_v15 = vmul.f32 %v5462_v32, %v1596_v40  ;;  %v1602_v49 = vmul.f32 %v5462_v32, %v6491_v41  ;;  %v1603_v53 = vmul.f32 %v5462_v32, %v6494_v43 }
 0x1f1   : > { %v1590_v44 = vadd.f32 %v1586_v31, %v1576_v30  ;;  %v1591_v47 = vadd.f32 %v1587_v36, %v1577_v33  ;;  %v1592_v48 = vadd.f32 %v1588_v37, %v1578_v34  ;;  %v1593_v52 = vadd.f32 %v1589_v39, %v1579_v38  ;;  %v6539_v37 = vld [vmem:[%s6466_s14 + $0xb0] sm:$0xff] }
 0x1f2   : > { %v5468_v42 = vld [vmem:[#allocation3 + $0x80] ss:$0 sm:$0xff]  ;;  %v1614_v19 = vmul.f32 %v5463_v46, %v6499_v50  ;;  %v1615_v58 = vmul.f32 %v5463_v46, %v6502_v51  ;;  %v5469_v59 = vld [vmem:[#allocation3 + $0x81] ss:$0 sm:$0xff]  ;;  %v1616_v20 = vmul.f32 %v5463_v46, %v6506_v16  ;;  %v1617_v63 = vmul.f32 %v5463_v46, %v6509_v56  ;;  %v5470_v10 = vld [vmem:[#allocation3 + $0x82] ss:$0 sm:$0xff] }
 0x1f3   : > { %v3396_v54 = vmul.f32 %v5468_v42, %v1567_v5  ;;  %v3397_v55 = vmul.f32 %v5468_v42, %v1568_v6  ;;  %v3398_v57 = vmul.f32 %v5468_v42, %v1569_v7  ;;  %v1604_v21 = vadd.f32 %v1600_v45, %v1590_v44  ;;  %v6522_v5 = vld [vmem:[%s6466_s14 + $0x90] sm:$0xff]  ;;  %v6543_v46 = vld [vmem:[%s6466_s14 + $0xb8] sm:$0xff] }
 0x1f4   : > { %v1605_v60 = vadd.f32 %v1601_v15, %v1591_v47  ;;  %v1606_v22 = vadd.f32 %v1602_v49, %v1592_v48  ;;  %v3399_v61 = vmul.f32 %v5468_v42, %v1570_v8  ;;  %v1607_v62 = vadd.f32 %v1603_v53, %v1593_v52  ;;  %v5471_v42 = vld [vmem:[#allocation3 + $0x83] ss:$0 sm:$0xff]  ;;  %v5466_v49 = vld [vmem:[#allocation3 + $0x6] ss:$0 sm:$0xff] }
 0x1f5   : > { %v3400_v0 = vadd.f32 %v3396_v54, %v1562_v9  ;;  %v3401_v35 = vadd.f32 %v3397_v55, %v1563_v12  ;;  %v3402_v2 = vadd.f32 %v3398_v57, %v1564_v23  ;;  %v1618_v3 = vadd.f32 %v1614_v19, %v1604_v21  ;;  %v6553_v21 = vpop.f32.mrf.mxu3 }
 0x1f6   : > { %v3410_v6 = vmul.f32 %v5469_v59, %v1581_v18  ;;  %v3411_v7 = vmul.f32 %v5469_v59, %v1582_v25  ;;  %v1619_v8 = vadd.f32 %v1615_v58, %v1605_v60  ;;  %v1620_v11 = vadd.f32 %v1616_v20, %v1606_v22  ;;  %v6531_v25 = vld [vmem:[%s6466_s14 + $0xa0] sm:$0xff]  ;;  %v6562_v60 = vld [vmem:[%s6466_s14 + $0xd0] sm:$0xff] }
 0x1f7   : > { %v3403_v9 = vadd.f32 %v3399_v61, %v1565_v28  ;;  %v3412_v12 = vmul.f32 %v5469_v59, %v1583_v26  ;;  %v1621_v17 = vadd.f32 %v1617_v63, %v1607_v62  ;;  %v1628_v23 = vmul.f32 %v5464_v27, %v6516_v1  ;;  %v6536_v26 = vld [vmem:[%s6466_s14 + $0xa8] sm:$0xff]  ;;  %v6567_v63 = vld [vmem:[%s6466_s14 + $0xd8] sm:$0xff] }
 0x1f8   : > { %v3414_v30 = vadd.f32 %v3410_v6, %v3400_v0  ;;  %v3415_v31 = vadd.f32 %v3411_v7, %v3401_v35  ;;  %v1629_v32 = vmul.f32 %v5464_v27, %v6519_v4  ;;  %v1630_v18 = vmul.f32 %v5464_v27, %v6522_v5  ;;  %v5467_v6 = vld [vmem:[#allocation3 + $0x7] ss:$0 sm:$0xff] }
 0x1f9   : > { %v3413_v33 = vmul.f32 %v5469_v59, %v6483_v29  ;;  %v3416_v34 = vadd.f32 %v3412_v12, %v3402_v2  ;;  %v1631_v36 = vmul.f32 %v5464_v27, %v6525_v13  ;;  %v1632_v28 = vadd.f32 %v1628_v23, %v1618_v3  ;;  %v6559_v59 = vld [vmem:[%s6466_s14 + $0xc8] sm:$0xff]  ;;  %v6572_v3 = vld [vmem:[%s6466_s14 + $0xe0] sm:$0xff] }
 0x1fa   : > { %v3424_v38 = vmul.f32 %v5470_v10, %v6486_v14  ;;  %v3425_v39 = vmul.f32 %v5470_v10, %v1596_v40  ;;  %v1633_v44 = vadd.f32 %v1629_v32, %v1619_v8  ;;  %v1634_v45 = vadd.f32 %v1630_v18, %v1620_v11  ;;  %v6550_v40 = vld [vmem:[%s6466_s14 + $0xc0] sm:$0xff]  ;;  %v6577_v8 = vld [vmem:[%s6466_s14 + $0xe8] sm:$0xff]  ;;  %v6580_v11 = vld [vmem:[%s6466_s14 + $0xf0] sm:$0xff] }
 0x1fb   : > { %v3417_v47 = vadd.f32 %v3413_v33, %v3403_v9  ;;  %v3426_v29 = vmul.f32 %v5470_v10, %v6491_v41  ;;  %v1635_v48 = vadd.f32 %v1631_v36, %v1621_v17  ;;  %v1642_v15 = vmul.f32 %v5465_v24, %v6531_v25  ;;  %v6555_v41 = vpop.f32.mrf.mxu2  ;;  %v5473_v12 = vld [vmem:[#allocation3 + $0x85] ss:$0 sm:$0xff]  ;;  %v1270_v32 = vld [vmem:[%s8983_s2 + $0x1f0] sm:$0xff] }
 0x1fc   : > { %v3428_v52 = vadd.f32 %v3424_v38, %v3414_v30  ;;  %v3429_v53 = vadd.f32 %v3425_v39, %v3415_v31  ;;  %v1643_v54 = vmul.f32 %v5465_v24, %v6536_v26  ;;  %v1644_v14 = vmul.f32 %v5465_v24, %v6539_v37  ;;  %v1238_v31 = vld [vmem:[%s8983_s2 + $0xf0] sm:$0xff]  ;;  %1413 = vmatmul.f32.gmra.mxu3 %v1270_v32  ;;  %v6638_v32 = vld [vmem:[%s6466_s14 + $0x138] sm:$0xff] }
 0x1fd   : > { %v3427_v55 = vmul.f32 %v5470_v10, %v6494_v43  ;;  %v3430_v57 = vadd.f32 %v3426_v29, %v3416_v34  ;;  %v1645_v19 = vmul.f32 %v5465_v24, %v6543_v46  ;;  %v1646_v58 = vadd.f32 %v1642_v15, %v1632_v28  ;;  %v5472_v43 = vld [vmem:[#allocation3 + $0x84] ss:$0 sm:$0xff]  ;;  %v6596_v34 = vld [vmem:[%s6466_s14 + $0xf8] sm:$0xff]  ;;  %1365 = vmatmul.f32.gmra.mxu1 %v1238_v31  ;;  %v5476_v29 = vld [vmem:[#allocation3 + $0x8] ss:$0 sm:$0xff] }
 0x1fe   : > { %v3438_v22 = vmul.f32 %v5471_v42, %v6499_v50  ;;  %v3439_v20 = vmul.f32 %v5471_v42, %v6502_v51  ;;  %v1647_v61 = vadd.f32 %v1643_v54, %v1633_v44  ;;  %v1648_v62 = vadd.f32 %v1644_v14, %v1634_v45  ;;  %v6613_v54 = vld [vmem:[%s6466_s14 + $0x108] sm:$0xff]  ;;  %v6616_v14 = vld [vmem:[%s6466_s14 + $0x110] sm:$0xff] }
 0x1ff   : > { %v3431_v27 = vadd.f32 %v3427_v55, %v3417_v47  ;;  %v3440_v0 = vmul.f32 %v5471_v42, %v6506_v16  ;;  %v1649_v35 = vadd.f32 %v1645_v19, %v1635_v48  ;;  %v1656_v2 = vmul.f32 %v5466_v49, %v6550_v40  ;;  %v1695_v31 = vld [vmem:[%s6466_s14 + $0x130] sm:$0xff] }
 0x200   : > { %v3442_v7 = vadd.f32 %v3438_v22, %v3428_v52  ;;  %v3443_v50 = vadd.f32 %v3439_v20, %v3429_v53  ;;  %v1657_v10 = vmul.f32 %v5466_v49, %v6559_v59  ;;  %v1658_v51 = vmul.f32 %v5466_v49, %v6562_v60  ;;  %v6610_v53 = vld [vmem:[%s6466_s14 + $0x100] sm:$0xff]  ;;  %v6620_v22 = vld [vmem:[%s6466_s14 + $0x118] sm:$0xff]  ;;  %v1375_v20 = vpop.f32.mrf.mxu3 }
 0x201   : > { %v3441_v9 = vmul.f32 %v5471_v42, %v6509_v56  ;;  %v3444_v16 = vadd.f32 %v3440_v0, %v3430_v57  ;;  %v1659_v17 = vmul.f32 %v5466_v49, %v6567_v63  ;;  %v1660_v23 = vadd.f32 %v1656_v2, %v1646_v58  ;;  %v1239_v56 = vld [vmem:[%s8983_s2 + $0xf8] sm:$0xff]  ;;  %v5474_v58 = vld [vmem:[#allocation3 + $0x86] ss:$0 sm:$0xff]  ;;  %v1327_v2 = vpop.f32.mrf.mxu1 }
 0x202   : > { %v3452_v24 = vmul.f32 %v5472_v43, %v6516_v1  ;;  %v3453_v30 = vmul.f32 %v5472_v43, %v6519_v4  ;;  %v1661_v18 = vadd.f32 %v1657_v10, %v1647_v61  ;;  %v1662_v33 = vadd.f32 %v1658_v51, %v1648_v62  ;;  %v1271_v4 = vld [vmem:[%s8983_s2 + $0x1f8] sm:$0xff]  ;;  %1478 = vmatmul.f32.gmra.mxu0 %v1239_v56  ;;  %v6628_v10 = vld [vmem:[%s6466_s14 + $0x120] sm:$0xff] }
 0x203   : > { %v3445_v36 = vadd.f32 %v3441_v9, %v3431_v27  ;;  %v3454_v1 = vmul.f32 %v5472_v43, %v6522_v5  ;;  %v1663_v28 = vadd.f32 %v1659_v17, %v1649_v35  ;;  %v1670_v38 = vmul.f32 %v5467_v6, %v6572_v3  ;;  %1526 = vmatmul.f32.gmra.mxu2 %v1271_v4 }
 0x204   : > { %v3456_v39 = vadd.f32 %v3452_v24, %v3442_v7  ;;  %v3457_v42 = vadd.f32 %v3453_v30, %v3443_v50  ;;  %v1671_v44 = vmul.f32 %v5467_v6, %v6577_v8  ;;  %v1672_v45 = vmul.f32 %v5467_v6, %v6580_v11  ;;  %v5475_v7 = vld [vmem:[#allocation3 + $0x87] ss:$0 sm:$0xff]  ;;  %v1694_v30 = vld [vmem:[%s6466_s14 + $0x128] sm:$0xff] }
 0x205   : > { %v3455_v5 = vmul.f32 %v5472_v43, %v6525_v13  ;;  %v3458_v47 = vadd.f32 %v3454_v1, %v3444_v16  ;;  %v1673_v48 = vmul.f32 %v5467_v6, %v6596_v34  ;;  %v1674_v15 = vadd.f32 %v1670_v38, %v1660_v23  ;;  %v1440_v6 = vpop.f32.mrf.mxu0  ;;  %v6644_v38 = vld [vmem:[%s6466_s14 + $0x140] sm:$0xff] }
 0x206   : > { %v3466_v49 = vmul.f32 %v5473_v12, %v6531_v25  ;;  %v3467_v52 = vmul.f32 %v5473_v12, %v6536_v26  ;;  %v1675_v55 = vadd.f32 %v1671_v44, %v1661_v18  ;;  %v1676_v13 = vadd.f32 %v1672_v45, %v1662_v33  ;;  %v1488_v25 = vpop.f32.mrf.mxu2 }
 0x207   : > { %v3459_v57 = vadd.f32 %v3455_v5, %v3445_v36  ;;  %v3468_v19 = vmul.f32 %v5473_v12, %v6539_v37  ;;  %v1677_v43 = vadd.f32 %v1673_v48, %v1663_v28  ;;  %v3469_v26 = vmul.f32 %v5473_v12, %v6543_v46  ;;  %v5477_v46 = vld [vmem:[#allocation3 + $0x9] ss:$0 sm:$0xff]  ;;  %v5479_v48 = vld [vmem:[#allocation3 + $0xb] ss:$0 sm:$0xff] }
 0x208   : > { %v3470_v61 = vadd.f32 %v3466_v49, %v3456_v39  ;;  %v3471_v62 = vadd.f32 %v3467_v52, %v3457_v42  ;;  %v1684_v0 = vmul.f32 %v5476_v29, %v6610_v53  ;;  %v1685_v35 = vmul.f32 %v5476_v29, %v6613_v54  ;;  %v6647_v39 = vld [vmem:[%s6466_s14 + $0x148] sm:$0xff] }
 0x209   : > { %v3472_v27 = vadd.f32 %v3468_v19, %v3458_v47  ;;  %v1686_v37 = vmul.f32 %v5476_v29, %v6616_v14  ;;  %v1687_v50 = vmul.f32 %v5476_v29, %v6620_v22  ;;  %v1486_v51 = vadd.f32 %v6555_v41, %v6553_v21  ;;  %v1709_v47 = vld [vmem:[%s6466_s14 + $0x150] sm:$0xff]  ;;  %v6654_v29 = vld [vmem:[%s6466_s14 + $0x158] sm:$0xff] }
 0x20a   : > { %v1441_v9 = vadd.f32 %v1440_v6, %v1327_v2  ;;  %v1489_v16 = vadd.f32 %v1488_v25, %v1375_v20  ;;  %v3473_v12 = vadd.f32 %v3469_v26, %v3459_v57  ;;  %v3480_v17 = vmul.f32 %v5474_v58, %v6550_v40  ;;  %v6660_v57 = vld [vmem:[%s6466_s14 + $0x168] sm:$0xff]  ;;  %v6663_v19 = vld [vmem:[%s6466_s14 + $0x170] sm:$0xff] }
 0x20b   : > { %v3481_v23 = vmul.f32 %v5474_v58, %v6559_v59  ;;  %v3482_v24 = vmul.f32 %v5474_v58, %v6562_v60  ;;  %v1688_v56 = vadd.f32 %v1684_v0, %v1674_v15  ;;  %v1689_v18 = vadd.f32 %v1685_v35, %v1675_v55  ;;  %1547 = vst [vmem:[#allocation3 + $0x88] sm:$0xff] %v1486_v51 }
 0x20c   : > { %v1690_v33 = vadd.f32 %v1686_v37, %v1676_v13  ;;  %v1691_v36 = vadd.f32 %v1687_v50, %v1677_v43  ;;  %v3483_v21 = vmul.f32 %v5474_v58, %v6567_v63  ;;  %v3484_v41 = vadd.f32 %v3480_v17, %v3470_v61  ;;  %1532 = vst [vmem:[#allocation3 + $0x10] sm:$0xff] %v1441_v9  ;;  %v5478_v63 = vld [vmem:[#allocation3 + $0xa] ss:$0 sm:$0xff]  ;;  %v6657_v13 = vld [vmem:[%s6466_s14 + $0x160] sm:$0xff]  ;;  %v6670_v61 = vld [vmem:[%s6466_s14 + $0x178] sm:$0xff] }
 0x20d   : > { %v3485_v40 = vadd.f32 %v3481_v23, %v3471_v62  ;;  %v3486_v59 = vadd.f32 %v3482_v24, %v3472_v27  ;;  %v1698_v60 = vmul.f32 %v5477_v46, %v6628_v10  ;;  %v1699_v1 = vmul.f32 %v5477_v46, %v1694_v30  ;;  %1548 = vst [vmem:[#allocation3 + $0x90] sm:$0xff] %v1489_v16  ;;  %v6681_v17 = vld [vmem:[%s6466_s14 + $0x180] sm:$0xff]  ;;  %v6684_v23 = vld [vmem:[%s6466_s14 + $0x188] sm:$0xff] }
 0x20e   : > { %v1700_v4 = vmul.f32 %v5477_v46, %v1695_v31  ;;  %v1701_v28 = vmul.f32 %v5477_v46, %v6638_v32  ;;  %v3487_v42 = vadd.f32 %v3483_v21, %v3473_v12  ;;  %v3494_v44 = vmul.f32 %v5475_v7, %v6572_v3 }
 0x20f   : > { %v3495_v45 = vmul.f32 %v5475_v7, %v6577_v8  ;;  %v3496_v5 = vmul.f32 %v5475_v7, %v6580_v11  ;;  %v1702_v15 = vadd.f32 %v1698_v60, %v1688_v56  ;;  %v1703_v49 = vadd.f32 %v1699_v1, %v1689_v18  ;;  %v6689_v60 = vld [vmem:[%s6466_s14 + $0x198] sm:$0xff] }
 0x210   : > { %v1704_v52 = vadd.f32 %v1700_v4, %v1690_v33  ;;  %v1705_v55 = vadd.f32 %v1701_v28, %v1691_v36  ;;  %v3497_v3 = vmul.f32 %v5475_v7, %v6596_v34  ;;  %v3498_v8 = vadd.f32 %v3494_v44, %v3484_v41  ;;  %v6693_v28 = vld [vmem:[%s6466_s14 + $0x1a0] sm:$0xff] }
 0x211   : > { %v3499_v58 = vadd.f32 %v3495_v45, %v3485_v40  ;;  %v3500_v11 = vadd.f32 %v3496_v5, %v3486_v59  ;;  %v1712_v20 = vmul.f32 %v5478_v63, %v6644_v38  ;;  %v1713_v25 = vmul.f32 %v5478_v63, %v6647_v39  ;;  %v1737_v59 = vld [vmem:[%s6466_s14 + $0x190] sm:$0xff] }
 0x212   : > { %v1714_v43 = vmul.f32 %v5478_v63, %v1709_v47  ;;  %v1715_v26 = vmul.f32 %v5478_v63, %v6654_v29  ;;  %v3501_v62 = vadd.f32 %v3497_v3, %v3487_v42  ;;  %v1726_v27 = vmul.f32 %v5479_v48, %v6657_v13  ;;  %v5484_v35 = vld [vmem:[#allocation3 + $0x88] ss:$0 sm:$0xff]  ;;  %v5485_v50 = vld [vmem:[#allocation3 + $0x89] ss:$0 sm:$0xff]  ;;  %v5486_v33 = vld [vmem:[#allocation3 + $0x8a] ss:$0 sm:$0xff] }
 0x213   : > { %v1727_v0 = vmul.f32 %v5479_v48, %v6660_v57  ;;  %v1728_v34 = vmul.f32 %v5479_v48, %v6663_v19  ;;  %v1716_v37 = vadd.f32 %v1712_v20, %v1702_v15  ;;  %v1717_v2 = vadd.f32 %v1713_v25, %v1703_v49  ;;  %v6696_v63 = vld [vmem:[%s6466_s14 + $0x1a8] sm:$0xff]  ;;  %v1751_v3 = vld [vmem:[%s6466_s14 + $0x1b0] sm:$0xff] }
 0x214   : > { %v1718_v6 = vadd.f32 %v1714_v43, %v1704_v52  ;;  %v1719_v7 = vadd.f32 %v1715_v26, %v1705_v55  ;;  %v3508_v46 = vmul.f32 %v5484_v35, %v6610_v53  ;;  %v3509_v51 = vmul.f32 %v5484_v35, %v6613_v54  ;;  %v5480_v53 = vld [vmem:[#allocation3 + $0xc] ss:$0 sm:$0xff]  ;;  %v5481_v55 = vld [vmem:[#allocation3 + $0xd] ss:$0 sm:$0xff]  ;;  %v6709_v26 = vld [vmem:[%s6466_s14 + $0x1c0] sm:$0xff] }
 0x215   : > { %v3510_v9 = vmul.f32 %v5484_v35, %v6616_v14  ;;  %v3511_v16 = vmul.f32 %v5484_v35, %v6620_v22  ;;  %v1729_v12 = vmul.f32 %v5479_v48, %v6670_v61  ;;  %v3522_v24 = vmul.f32 %v5485_v50, %v6628_v10  ;;  %v5487_v48 = vld [vmem:[#allocation3 + $0x8b] ss:$0 sm:$0xff]  ;;  %v5488_v35 = vld [vmem:[#allocation3 + $0x8c] ss:$0 sm:$0xff] }
 0x216   : > { %v3523_v56 = vmul.f32 %v5485_v50, %v1694_v30  ;;  %v3524_v18 = vmul.f32 %v5485_v50, %v1695_v31  ;;  %v3512_v54 = vadd.f32 %v3508_v46, %v3498_v8  ;;  %v3513_v14 = vadd.f32 %v3509_v51, %v3499_v58  ;;  %v6705_v8 = vld [vmem:[%s6466_s14 + $0x1b8] sm:$0xff]  ;;  %v1765_v46 = vld [vmem:[%s6466_s14 + $0x1d0] sm:$0xff] }
 0x217   : > { %v3514_v36 = vadd.f32 %v3510_v9, %v3500_v11  ;;  %v3515_v22 = vadd.f32 %v3511_v16, %v3501_v62  ;;  %v1730_v21 = vadd.f32 %v1726_v27, %v1716_v37  ;;  %v1731_v41 = vadd.f32 %v1727_v0, %v1717_v2  ;;  %v6712_v62 = vld [vmem:[%s6466_s14 + $0x1c8] sm:$0xff]  ;;  %v6722_v51 = vld [vmem:[%s6466_s14 + $0x1d8] sm:$0xff] }
 0x218   : > { %v1732_v40 = vadd.f32 %v1728_v34, %v1718_v6  ;;  %v3525_v1 = vmul.f32 %v5485_v50, %v6638_v32  ;;  %v1733_v4 = vadd.f32 %v1729_v12, %v1719_v7  ;;  %v3526_v10 = vadd.f32 %v3522_v24, %v3512_v54  ;;  %v5482_v50 = vld [vmem:[#allocation3 + $0xe] ss:$0 sm:$0xff] }
 0x219   : > { %v3527_v30 = vadd.f32 %v3523_v56, %v3513_v14  ;;  %v3528_v31 = vadd.f32 %v3524_v18, %v3514_v36  ;;  %v3536_v44 = vmul.f32 %v5486_v33, %v6644_v38  ;;  %v3537_v45 = vmul.f32 %v5486_v33, %v6647_v39  ;;  %v5489_v14 = vld [vmem:[#allocation3 + $0x8d] ss:$0 sm:$0xff] }
 0x21a   : > { %v3529_v42 = vadd.f32 %v3525_v1, %v3515_v22  ;;  %v3538_v5 = vmul.f32 %v5486_v33, %v1709_v47  ;;  %v1740_v32 = vmul.f32 %v5480_v53, %v6681_v17  ;;  %v1741_v15 = vmul.f32 %v5480_v53, %v6684_v23  ;;  %v1778_v1 = vld [vmem:[%s6466_s14 + $0x1e8] sm:$0xff] }
 0x21b   : > { %v1742_v49 = vmul.f32 %v5480_v53, %v1737_v59  ;;  %v1743_v52 = vmul.f32 %v5480_v53, %v6689_v60  ;;  %v3539_v58 = vmul.f32 %v5486_v33, %v6654_v29  ;;  %v3540_v38 = vadd.f32 %v3536_v44, %v3526_v10  ;;  %v6734_v10 = vld [vmem:[%s6466_s14 + $0x1f8] sm:$0xff] }
 0x21c   : > { %v3541_v11 = vadd.f32 %v3537_v45, %v3527_v30  ;;  %v3542_v39 = vadd.f32 %v3538_v5, %v3528_v31  ;;  %v1744_v47 = vadd.f32 %v1740_v32, %v1730_v21  ;;  %v1745_v20 = vadd.f32 %v1741_v15, %v1731_v41  ;;  %v1777_v41 = vld [vmem:[%s6466_s14 + $0x1e0] sm:$0xff] }
 0x21d   : > { %v1746_v25 = vadd.f32 %v1742_v49, %v1732_v40  ;;  %v1747_v43 = vadd.f32 %v1743_v52, %v1733_v4  ;;  %v3543_v27 = vadd.f32 %v3539_v58, %v3529_v42  ;;  %v3550_v0 = vmul.f32 %v5487_v48, %v6657_v13  ;;  %v5483_v40 = vld [vmem:[#allocation3 + $0xf] ss:$0 sm:$0xff]  ;;  %v1779_v4 = vld [vmem:[%s6466_s14 + $0x1f0] sm:$0xff]  ;;  %v5490_v49 = vld [vmem:[#allocation3 + $0x8e] ss:$0 sm:$0xff] }
 0x21e   : > { %v3551_v34 = vmul.f32 %v5487_v48, %v6660_v57  ;;  %v3552_v29 = vmul.f32 %v5487_v48, %v6663_v19  ;;  %v1754_v37 = vmul.f32 %v5481_v55, %v6693_v28  ;;  %v1755_v2 = vmul.f32 %v5481_v55, %v6696_v63 }
 0x21f   : > { %v1756_v6 = vmul.f32 %v5481_v55, %v1751_v3  ;;  %v1757_v7 = vmul.f32 %v5481_v55, %v6705_v8  ;;  %v3553_v9 = vmul.f32 %v5487_v48, %v6670_v61  ;;  %v3554_v16 = vadd.f32 %v3550_v0, %v3540_v38  ;;  %v6741_v38 = vld [vmem:[%s6466_s14 + $0x200] sm:$0xff] }
 0x220   : > { %v3555_v13 = vadd.f32 %v3551_v34, %v3541_v11  ;;  %v3556_v57 = vadd.f32 %v3552_v29, %v3542_v39  ;;  %v1758_v19 = vadd.f32 %v1754_v37, %v1744_v47  ;;  %v1759_v12 = vadd.f32 %v1755_v2, %v1745_v20  ;;  %v5492_v11 = vld [vmem:[#allocation3 + $0x10] ss:$0 sm:$0xff]  ;;  %v5491_v2 = vld [vmem:[#allocation3 + $0x8f] ss:$0 sm:$0xff] }
 0x221   : > { %v1760_v24 = vadd.f32 %v1756_v6, %v1746_v25  ;;  %v1761_v56 = vadd.f32 %v1757_v7, %v1747_v43  ;;  %v3557_v18 = vadd.f32 %v3553_v9, %v3543_v27  ;;  %v3564_v33 = vmul.f32 %v5488_v35, %v6681_v17  ;;  %v6745_v43 = vld [vmem:[%s6466_s14 + $0x208] sm:$0xff] }
 0x222   : > { %v3565_v53 = vmul.f32 %v5488_v35, %v6684_v23  ;;  %v3566_v54 = vmul.f32 %v5488_v35, %v1737_v59  ;;  %v1768_v61 = vmul.f32 %v5482_v50, %v6709_v26  ;;  %v1769_v36 = vmul.f32 %v5482_v50, %v6712_v62 }
 0x223   : > { %v1770_v22 = vmul.f32 %v5482_v50, %v1765_v46  ;;  %v1771_v21 = vmul.f32 %v5482_v50, %v6722_v51  ;;  %v3567_v30 = vmul.f32 %v5488_v35, %v6689_v60  ;;  %v3568_v17 = vadd.f32 %v3564_v33, %v3554_v16  ;;  %v6760_v16 = vld [vmem:[%s6466_s14 + $0x220] sm:$0xff] }
 0x224   : > { %v3569_v23 = vadd.f32 %v3565_v53, %v3555_v13  ;;  %v3570_v59 = vadd.f32 %v3566_v54, %v3556_v57  ;;  %v1772_v31 = vadd.f32 %v1768_v61, %v1758_v19  ;;  %v1773_v42 = vadd.f32 %v1769_v36, %v1759_v12  ;;  %v5493_v13 = vld [vmem:[#allocation3 + $0x11] ss:$0 sm:$0xff]  ;;  %v1806_v19 = vld [vmem:[%s6466_s14 + $0x228] sm:$0xff]  ;;  %v1819_v54 = vld [vmem:[%s6466_s14 + $0x240] sm:$0xff] }
 0x225   : > { %v1774_v44 = vadd.f32 %v1770_v22, %v1760_v24  ;;  %v1775_v45 = vadd.f32 %v1771_v21, %v1761_v56  ;;  %v3571_v5 = vadd.f32 %v3567_v30, %v3557_v18  ;;  %v3578_v48 = vmul.f32 %v5489_v14, %v6693_v28  ;;  %v6748_v28 = vld [vmem:[%s6466_s14 + $0x210] sm:$0xff]  ;;  %v1808_v24 = vld [vmem:[%s6466_s14 + $0x238] sm:$0xff]  ;;  %v1820_v22 = vld [vmem:[%s6466_s14 + $0x248] sm:$0xff] }
 0x226   : > { %v3579_v32 = vmul.f32 %v5489_v14, %v6696_v63  ;;  %v3580_v15 = vmul.f32 %v5489_v14, %v1751_v3  ;;  %v1782_v52 = vmul.f32 %v5483_v40, %v1777_v41  ;;  %v1783_v60 = vmul.f32 %v5483_v40, %v1778_v1  ;;  %v6751_v63 = vld [vmem:[%s6466_s14 + $0x218] sm:$0xff]  ;;  %v1807_v12 = vld [vmem:[%s6466_s14 + $0x230] sm:$0xff] }
 0x227   : > { %v1784_v55 = vmul.f32 %v5483_v40, %v1779_v4  ;;  %v1785_v58 = vmul.f32 %v5483_v40, %v6734_v10  ;;  %v3581_v39 = vmul.f32 %v5489_v14, %v6705_v8  ;;  %v3582_v47 = vadd.f32 %v3578_v48, %v3568_v17  ;;  %v1821_v21 = vld [vmem:[%s6466_s14 + $0x250] sm:$0xff]  ;;  %v6776_v48 = vld [vmem:[%s6466_s14 + $0x268] sm:$0xff] }
 0x228   : > { %v3583_v20 = vadd.f32 %v3579_v32, %v3569_v23  ;;  %v3584_v25 = vadd.f32 %v3580_v15, %v3570_v59  ;;  %v1786_v3 = vadd.f32 %v1782_v52, %v1772_v31  ;;  %v1787_v27 = vadd.f32 %v1783_v60, %v1773_v42  ;;  %v5494_v40 = vld [vmem:[#allocation3 + $0x12] ss:$0 sm:$0xff]  ;;  %v1822_v31 = vld [vmem:[%s6466_s14 + $0x258] sm:$0xff]  ;;  %v6772_v42 = vld [vmem:[%s6466_s14 + $0x260] sm:$0xff] }
 0x229   : > { %v1788_v0 = vadd.f32 %v1784_v55, %v1774_v44  ;;  %v1789_v34 = vadd.f32 %v1785_v58, %v1775_v45  ;;  %v3585_v29 = vadd.f32 %v3581_v39, %v3571_v5  ;;  %v3592_v35 = vmul.f32 %v5490_v49, %v6709_v26  ;;  %v5495_v44 = vld [vmem:[#allocation3 + $0x13] ss:$0 sm:$0xff]  ;;  %v5500_v32 = vld [vmem:[#allocation3 + $0x90] ss:$0 sm:$0xff] }
 0x22a   : > { %v3593_v8 = vmul.f32 %v5490_v49, %v6712_v62  ;;  %v3594_v37 = vmul.f32 %v5490_v49, %v1765_v46  ;;  %v1796_v6 = vmul.f32 %v5492_v11, %v6741_v38  ;;  %v1797_v7 = vmul.f32 %v5492_v11, %v6745_v43 }
 0x22b   : > { %v1798_v50 = vmul.f32 %v5492_v11, %v6748_v28  ;;  %v1799_v9 = vmul.f32 %v5492_v11, %v6751_v63  ;;  %v3595_v57 = vmul.f32 %v5490_v49, %v6722_v51  ;;  %v3596_v26 = vadd.f32 %v3592_v35, %v3582_v47  ;;  %v5502_v35 = vld [vmem:[#allocation3 + $0x92] ss:$0 sm:$0xff] }
 0x22c   : > { %v3597_v62 = vadd.f32 %v3593_v8, %v3583_v20  ;;  %v3598_v46 = vadd.f32 %v3594_v37, %v3584_v25  ;;  %v1800_v56 = vadd.f32 %v1796_v6, %v1786_v3  ;;  %v1801_v18 = vadd.f32 %v1797_v7, %v1787_v27  ;;  %v5501_v3 = vld [vmem:[#allocation3 + $0x91] ss:$0 sm:$0xff]  ;;  %v1836_v7 = vld [vmem:[%s6466_s14 + $0x278] sm:$0xff] }
 0x22d   : > { %v1802_v33 = vadd.f32 %v1798_v50, %v1788_v0  ;;  %v1803_v53 = vadd.f32 %v1799_v9, %v1789_v34  ;;  %v3599_v14 = vadd.f32 %v3595_v57, %v3585_v29  ;;  %v3606_v61 = vmul.f32 %v5491_v2, %v1777_v41  ;;  %v5496_v50 = vld [vmem:[#allocation3 + $0x14] ss:$0 sm:$0xff] }
 0x22e   : > { %v3607_v36 = vmul.f32 %v5491_v2, %v1778_v1  ;;  %v3608_v51 = vmul.f32 %v5491_v2, %v1779_v4  ;;  %v1810_v30 = vmul.f32 %v5493_v13, %v6760_v16  ;;  %v1811_v17 = vmul.f32 %v5493_v13, %v1806_v19  ;;  %v6779_v4 = vld [vmem:[%s6466_s14 + $0x270] sm:$0xff] }
 0x22f   : > { %v1812_v23 = vmul.f32 %v5493_v13, %v1807_v12  ;;  %v1813_v59 = vmul.f32 %v5493_v13, %v1808_v24  ;;  %v3609_v45 = vmul.f32 %v5491_v2, %v6734_v10  ;;  %v3610_v5 = vadd.f32 %v3606_v61, %v3596_v26  ;;  %v5503_v61 = vld [vmem:[#allocation3 + $0x93] ss:$0 sm:$0xff] }
 0x230   : > { %v3611_v41 = vadd.f32 %v3607_v36, %v3597_v62  ;;  %v3612_v1 = vadd.f32 %v3608_v51, %v3598_v46  ;;  %v1814_v15 = vadd.f32 %v1810_v30, %v1800_v56  ;;  %v1815_v49 = vadd.f32 %v1811_v17, %v1801_v18  ;;  %v1848_v62 = vld [vmem:[%s6466_s14 + $0x288] sm:$0xff]  ;;  %v1849_v46 = vld [vmem:[%s6466_s14 + $0x290] sm:$0xff]  ;;  %v1330_v17 = vpop.f32.mrf.mxu1 }
 0x231   : > { %v1816_v52 = vadd.f32 %v1812_v23, %v1802_v33  ;;  %v1817_v60 = vadd.f32 %v1813_v59, %v1803_v53  ;;  %v3613_v55 = vadd.f32 %v3609_v45, %v3599_v14  ;;  %v1824_v58 = vmul.f32 %v5494_v40, %v1819_v54  ;;  %v1443_v23 = vpop.f32.mrf.mxu0  ;;  %v1861_v45 = vld [vmem:[%s6466_s14 + $0x2a0] sm:$0xff] }
 0x232   : > { %v1825_v11 = vmul.f32 %v5494_v40, %v1820_v22  ;;  %v1826_v39 = vmul.f32 %v5494_v40, %v1821_v21  ;;  %v1827_v47 = vmul.f32 %v5494_v40, %v1822_v31  ;;  %v1838_v10 = vmul.f32 %v5495_v44, %v6772_v42 }
 0x233   : > { %v1839_v20 = vmul.f32 %v5495_v44, %v6776_v48  ;;  %v1840_v25 = vmul.f32 %v5495_v44, %v6779_v4  ;;  %v3620_v27 = vmul.f32 %v5500_v32, %v6741_v38  ;;  %v3621_v0 = vmul.f32 %v5500_v32, %v6745_v43  ;;  %v1847_v38 = vld [vmem:[%s6466_s14 + $0x280] sm:$0xff] }
 0x234   : > { %v3622_v34 = vmul.f32 %v5500_v32, %v6748_v28  ;;  %v3623_v29 = vmul.f32 %v5500_v32, %v6751_v63  ;;  %v1828_v8 = vadd.f32 %v1824_v58, %v1814_v15  ;;  %v1829_v37 = vadd.f32 %v1825_v11, %v1815_v49 }
 0x235   : > { %v1830_v2 = vadd.f32 %v1826_v39, %v1816_v52  ;;  %v1831_v6 = vadd.f32 %v1827_v47, %v1817_v60  ;;  %v3624_v9 = vadd.f32 %v3620_v27, %v3610_v5  ;;  %v3625_v13 = vadd.f32 %v3621_v0, %v3611_v41  ;;  %v1862_v41 = vld [vmem:[%s6466_s14 + $0x2a8] sm:$0xff]  ;;  %v5504_v52 = vld [vmem:[#allocation3 + $0x94] ss:$0 sm:$0xff] }
 0x236   : > { %v3626_v57 = vadd.f32 %v3622_v34, %v3612_v1  ;;  %v3627_v26 = vadd.f32 %v3623_v29, %v3613_v55  ;;  %v3634_v43 = vmul.f32 %v5501_v3, %v6760_v16  ;;  %v3635_v56 = vmul.f32 %v5501_v3, %v1806_v19  ;;  %v1863_v1 = vld [vmem:[%s6466_s14 + $0x2b0] sm:$0xff] }
 0x237   : > { %v3636_v28 = vmul.f32 %v5501_v3, %v1807_v12  ;;  %v3637_v18 = vmul.f32 %v5501_v3, %v1808_v24  ;;  %v3648_v63 = vmul.f32 %v5502_v35, %v1819_v54  ;;  %v3649_v33 = vmul.f32 %v5502_v35, %v1820_v22  ;;  %v1850_v24 = vld [vmem:[%s6466_s14 + $0x298] sm:$0xff]  ;;  %v5497_v54 = vld [vmem:[#allocation3 + $0x15] ss:$0 sm:$0xff] }
 0x238   : > { %v3650_v53 = vmul.f32 %v5502_v35, %v1821_v21  ;;  %v3651_v14 = vmul.f32 %v5502_v35, %v1822_v31  ;;  %v3638_v36 = vadd.f32 %v3634_v43, %v3624_v9  ;;  %v3639_v51 = vadd.f32 %v3635_v56, %v3625_v13  ;;  %v1864_v9 = vld [vmem:[%s6466_s14 + $0x2b8] sm:$0xff]  ;;  %v1875_v56 = vld [vmem:[%s6466_s14 + $0x2c0] sm:$0xff] }
 0x239   : > { %v3640_v40 = vadd.f32 %v3636_v28, %v3626_v57  ;;  %v3641_v30 = vadd.f32 %v3637_v18, %v3627_v26  ;;  %v1841_v59 = vmul.f32 %v5495_v44, %v1836_v7  ;;  %v1852_v16 = vmul.f32 %v5496_v50, %v1847_v38  ;;  %v1876_v28 = vld [vmem:[%s6466_s14 + $0x2c8] sm:$0xff] }
 0x23a   : > { %v1853_v19 = vmul.f32 %v5496_v50, %v1848_v62  ;;  %v1854_v12 = vmul.f32 %v5496_v50, %v1849_v46  ;;  %v3652_v5 = vadd.f32 %v3648_v63, %v3638_v36  ;;  %v3653_v22 = vadd.f32 %v3649_v33, %v3639_v51  ;;  %v1333_v63 = vpop.f32.mrf.mxu1  ;;  %v1446_v33 = vpop.f32.mrf.mxu0  ;;  %v5506_v36 = vld [vmem:[#allocation3 + $0x96] ss:$0 sm:$0xff] }
 0x23b   : > { %v3654_v21 = vadd.f32 %v3650_v53, %v3640_v40  ;;  %v3655_v31 = vadd.f32 %v3651_v14, %v3641_v30  ;;  %v3662_v32 = vmul.f32 %v5503_v61, %v6772_v42  ;;  %v3663_v15 = vmul.f32 %v5503_v61, %v6776_v48  ;;  %v5505_v42 = vld [vmem:[#allocation3 + $0x95] ss:$0 sm:$0xff]  ;;  %v1878_v14 = vld [vmem:[%s6466_s14 + $0x2d8] sm:$0xff] }
 0x23c   : > { %v3664_v49 = vmul.f32 %v5503_v61, %v6779_v4  ;;  %v3665_v44 = vmul.f32 %v5503_v61, %v1836_v7  ;;  %v1842_v60 = vadd.f32 %v1838_v10, %v1828_v8  ;;  %v1843_v55 = vadd.f32 %v1839_v20, %v1829_v37  ;;  %v1378_v37 = vpop.f32.mrf.mxu3  ;;  %v1877_v53 = vld [vmem:[%s6466_s14 + $0x2d0] sm:$0xff] }
 0x23d   : > { %v1844_v58 = vadd.f32 %v1840_v25, %v1830_v2  ;;  %v1845_v11 = vadd.f32 %v1841_v59, %v1831_v6  ;;  %v3666_v39 = vadd.f32 %v3662_v32, %v3652_v5  ;;  %v3667_v47 = vadd.f32 %v3663_v15, %v3653_v22  ;;  %v1491_v2 = vpop.f32.mrf.mxu2  ;;  %v1891_v32 = vld [vmem:[%s6466_s14 + $0x2f0] sm:$0xff]  ;;  %v1892_v15 = vld [vmem:[%s6466_s14 + $0x2f8] sm:$0xff] }
 0x23e   : > { %v3668_v3 = vadd.f32 %v3664_v49, %v3654_v21  ;;  %v3669_v27 = vadd.f32 %v3665_v44, %v3655_v31  ;;  %v1855_v0 = vmul.f32 %v5496_v50, %v1850_v24  ;;  %v1866_v34 = vmul.f32 %v5497_v54, %v1861_v45 }
 0x23f   : > { %v1867_v29 = vmul.f32 %v5497_v54, %v1862_v41  ;;  %v1868_v35 = vmul.f32 %v5497_v54, %v1863_v1  ;;  %v3676_v48 = vmul.f32 %v5504_v52, %v1847_v38  ;;  %v3677_v4 = vmul.f32 %v5504_v52, %v1848_v62  ;;  %v5498_v38 = vld [vmem:[#allocation3 + $0x16] ss:$0 sm:$0xff] }
 0x240   : > { %v3678_v7 = vmul.f32 %v5504_v52, %v1849_v46  ;;  %v3679_v13 = vmul.f32 %v5504_v52, %v1850_v24  ;;  %v1856_v10 = vadd.f32 %v1852_v16, %v1842_v60  ;;  %v1857_v20 = vadd.f32 %v1853_v19, %v1843_v55  ;;  %v5507_v55 = vld [vmem:[#allocation3 + $0x97] ss:$0 sm:$0xff] }
 0x241   : > { %v1858_v25 = vadd.f32 %v1854_v12, %v1844_v58  ;;  %v1859_v8 = vadd.f32 %v1855_v0, %v1845_v11  ;;  %v3680_v6 = vadd.f32 %v3676_v48, %v3666_v39  ;;  %v3681_v50 = vadd.f32 %v3677_v4, %v3667_v47 }
 0x242   : > { %v3682_v57 = vadd.f32 %v3678_v7, %v3668_v3  ;;  %v3683_v26 = vadd.f32 %v3679_v13, %v3669_v27  ;;  %v1869_v43 = vmul.f32 %v5497_v54, %v1864_v9  ;;  %v3690_v18 = vmul.f32 %v5505_v42, %v1861_v45  ;;  %v6816_v7 = vld [vmem:[%s6466_s14 + $0x310] sm:$0xff]  ;;  %v6819_v13 = vld [vmem:[%s6466_s14 + $0x318] sm:$0xff] }
 0x243   : > { %v3691_v62 = vmul.f32 %v5505_v42, %v1862_v41  ;;  %v3692_v46 = vmul.f32 %v5505_v42, %v1863_v1  ;;  %v3693_v61 = vmul.f32 %v5505_v42, %v1864_v9  ;;  %v1444_v51 = vadd.f32 %v1443_v23, %v1330_v17  ;;  %v1889_v17 = vld [vmem:[%s6466_s14 + $0x2e0] sm:$0xff]  ;;  %v1890_v23 = vld [vmem:[%s6466_s14 + $0x2e8] sm:$0xff]  ;;  %v5499_v1 = vld [vmem:[#allocation3 + $0x17] ss:$0 sm:$0xff] }
 0x244   : > { %v1492_v40 = vadd.f32 %v1491_v2, %v1378_v37  ;;  %v1447_v30 = vadd.f32 %v1446_v33, %v1333_v63  ;;  %v1870_v59 = vadd.f32 %v1866_v34, %v1856_v10  ;;  %v1871_v16 = vadd.f32 %v1867_v29, %v1857_v20  ;;  %v6810_v29 = vld [vmem:[%s6466_s14 + $0x300] sm:$0xff]  ;;  %v6825_v2 = vld [vmem:[%s6466_s14 + $0x328] sm:$0xff] }
 0x245   : > { %v1872_v19 = vadd.f32 %v1868_v35, %v1858_v25  ;;  %v1873_v12 = vadd.f32 %v1869_v43, %v1859_v8  ;;  %v3694_v24 = vadd.f32 %v3690_v18, %v3680_v6  ;;  %v3695_v45 = vadd.f32 %v3691_v62, %v3681_v50  ;;  %1533 = vst [vmem:[#allocation3 + $0x18] sm:$0xff] %v1444_v51  ;;  %v6813_v35 = vld [vmem:[%s6466_s14 + $0x308] sm:$0xff]  ;;  %v6822_v10 = vld [vmem:[%s6466_s14 + $0x320] sm:$0xff]  ;;  %v6828_v6 = vld [vmem:[%s6466_s14 + $0x330] sm:$0xff] }
 0x246   : > { %v3696_v54 = vadd.f32 %v3692_v46, %v3682_v57  ;;  %v3697_v5 = vadd.f32 %v3693_v61, %v3683_v26  ;;  %v1880_v22 = vmul.f32 %v5498_v38, %v1875_v56  ;;  %v1881_v21 = vmul.f32 %v5498_v38, %v1876_v28  ;;  %1549 = vst [vmem:[#allocation3 + $0x98] sm:$0xff] %v1492_v40  ;;  %v6831_v50 = vld [vmem:[%s6466_s14 + $0x338] sm:$0xff]  ;;  %v6837_v18 = vld [vmem:[%s6466_s14 + $0x348] sm:$0xff]  ;;  %v6840_v62 = vld [vmem:[%s6466_s14 + $0x350] sm:$0xff] }
 0x247   : > { %v1882_v31 = vmul.f32 %v5498_v38, %v1877_v53  ;;  %v1883_v41 = vmul.f32 %v5498_v38, %v1878_v14  ;;  %v3704_v49 = vmul.f32 %v5506_v36, %v1875_v56  ;;  %v3705_v44 = vmul.f32 %v5506_v36, %v1876_v28  ;;  %1534 = vst [vmem:[#allocation3 + $0x20] sm:$0xff] %v1447_v30  ;;  %v6834_v38 = vld [vmem:[%s6466_s14 + $0x340] sm:$0xff]  ;;  %v6843_v46 = vld [vmem:[%s6466_s14 + $0x358] sm:$0xff] }
 0x248   : > { %v3706_v52 = vmul.f32 %v5506_v36, %v1877_v53  ;;  %v3707_v60 = vmul.f32 %v5506_v36, %v1878_v14  ;;  %v1884_v58 = vadd.f32 %v1880_v22, %v1870_v59  ;;  %v1885_v11 = vadd.f32 %v1881_v21, %v1871_v16  ;;  %v6858_v16 = vld [vmem:[%s6466_s14 + $0x360] sm:$0xff]  ;;  %v6871_v22 = vld [vmem:[%s6466_s14 + $0x378] sm:$0xff] }
 0x249   : > { %v1886_v39 = vadd.f32 %v1882_v31, %v1872_v19  ;;  %v1887_v47 = vadd.f32 %v1883_v41, %v1873_v12  ;;  %v3708_v3 = vadd.f32 %v3704_v49, %v3694_v24  ;;  %v3709_v27 = vadd.f32 %v3705_v44, %v3695_v45  ;;  %v6861_v19 = vld [vmem:[%s6466_s14 + $0x368] sm:$0xff]  ;;  %v6864_v12 = vld [vmem:[%s6466_s14 + $0x370] sm:$0xff] }
 0x24a   : > { %v3710_v0 = vadd.f32 %v3706_v52, %v3696_v54  ;;  %v3711_v34 = vadd.f32 %v3707_v60, %v3697_v5  ;;  %v1894_v42 = vmul.f32 %v5499_v1, %v1889_v17  ;;  %v1895_v9 = vmul.f32 %v5499_v1, %v1890_v23 }
 0x24b   : > { %v1896_v48 = vmul.f32 %v5499_v1, %v1891_v32  ;;  %v1897_v4 = vmul.f32 %v5499_v1, %v1892_v15  ;;  %v3718_v20 = vmul.f32 %v5507_v55, %v1889_v17  ;;  %v3719_v25 = vmul.f32 %v5507_v55, %v1890_v23  ;;  %v6874_v1 = vld [vmem:[%s6466_s14 + $0x380] sm:$0xff] }
 0x24c   : > { %v3720_v8 = vmul.f32 %v5507_v55, %v1891_v32  ;;  %v3721_v37 = vmul.f32 %v5507_v55, %v1892_v15  ;;  %v1898_v57 = vadd.f32 %v1894_v42, %v1884_v58  ;;  %v1899_v26 = vadd.f32 %v1895_v9, %v1885_v11  ;;  %v5508_v28 = vld [vmem:[#allocation3 + $0x18] ss:$0 sm:$0xff]  ;;  %v5509_v61 = vld [vmem:[#allocation3 + $0x19] ss:$0 sm:$0xff]  ;;  %v5510_v36 = vld [vmem:[#allocation3 + $0x1a] ss:$0 sm:$0xff] }
 0x24d   : > { %v1900_v43 = vadd.f32 %v1896_v48, %v1886_v39  ;;  %v1901_v56 = vadd.f32 %v1897_v4, %v1887_v47  ;;  %v6845_v63 = vadd.f32 %v3718_v20, %v3708_v3  ;;  %v6847_v33 = vadd.f32 %v3719_v25, %v3709_v27  ;;  %v5511_v21 = vld [vmem:[#allocation3 + $0x1b] ss:$0 sm:$0xff]  ;;  %v6877_v32 = vld [vmem:[%s6466_s14 + $0x388] sm:$0xff]  ;;  %v6880_v15 = vld [vmem:[%s6466_s14 + $0x390] sm:$0xff] }
 0x24e   : > { %v6849_v53 = vadd.f32 %v3720_v8, %v3710_v0  ;;  %v6851_v14 = vadd.f32 %v3721_v37, %v3711_v34  ;;  %v1908_v51 = vmul.f32 %v5508_v28, %v6810_v29  ;;  %v1909_v40 = vmul.f32 %v5508_v28, %v6813_v35  ;;  %v6887_v55 = vld [vmem:[%s6466_s14 + $0x398] sm:$0xff]  ;;  %v6890_v27 = vld [vmem:[%s6466_s14 + $0x3a0] sm:$0xff]  ;;  %v6893_v0 = vld [vmem:[%s6466_s14 + $0x3a8] sm:$0xff] }
 0x24f   : > { %v1910_v30 = vmul.f32 %v5508_v28, %v6816_v7  ;;  %v1911_v59 = vmul.f32 %v5508_v28, %v6819_v13  ;;  %v1922_v24 = vmul.f32 %v5509_v61, %v6822_v10  ;;  %v1923_v45 = vmul.f32 %v5509_v61, %v6825_v2  ;;  %v5512_v58 = vld [vmem:[#allocation3 + $0x1c] ss:$0 sm:$0xff]  ;;  %v6896_v34 = vld [vmem:[%s6466_s14 + $0x3b0] sm:$0xff]  ;;  %v5513_v25 = vld [vmem:[#allocation3 + $0x1d] ss:$0 sm:$0xff] }
 0x250   : > { %v1924_v54 = vmul.f32 %v5509_v61, %v6828_v6  ;;  %v1925_v5 = vmul.f32 %v5509_v61, %v6831_v50  ;;  %v1912_v31 = vadd.f32 %v1908_v51, %v1898_v57  ;;  %v1913_v41 = vadd.f32 %v1909_v40, %v1899_v26  ;;  %v6903_v20 = vld [vmem:[%s6466_s14 + $0x3b8] sm:$0xff]  ;;  %v6916_v40 = vld [vmem:[%s6466_s14 + $0x3d0] sm:$0xff] }
 0x251   : > { %v1914_v17 = vadd.f32 %v1910_v30, %v1900_v43  ;;  %v1915_v23 = vadd.f32 %v1911_v59, %v1901_v56  ;;  %v1936_v49 = vmul.f32 %v5510_v36, %v6834_v38  ;;  %v1937_v44 = vmul.f32 %v5510_v36, %v6837_v18  ;;  %v6906_v43 = vld [vmem:[%s6466_s14 + $0x3c0] sm:$0xff]  ;;  %v6909_v56 = vld [vmem:[%s6466_s14 + $0x3c8] sm:$0xff]  ;;  %v5514_v30 = vld [vmem:[#allocation3 + $0x1e] ss:$0 sm:$0xff] }
 0x252   : > { %v1938_v52 = vmul.f32 %v5510_v36, %v6840_v62  ;;  %v1939_v60 = vmul.f32 %v5510_v36, %v6843_v46  ;;  %v1926_v11 = vadd.f32 %v1922_v24, %v1912_v31  ;;  %v1927_v39 = vadd.f32 %v1923_v45, %v1913_v41 }
 0x253   : > { %v1928_v47 = vadd.f32 %v1924_v54, %v1914_v17  ;;  %v1929_v3 = vadd.f32 %v1925_v5, %v1915_v23  ;;  %v1950_v42 = vmul.f32 %v5511_v21, %v6858_v16  ;;  %v1951_v9 = vmul.f32 %v5511_v21, %v6861_v19  ;;  %v6919_v5 = vld [vmem:[%s6466_s14 + $0x3d8] sm:$0xff]  ;;  %v6926_v23 = vld [vmem:[%s6466_s14 + $0x3e0] sm:$0xff] }
 0x254   : > { %v1952_v48 = vmul.f32 %v5511_v21, %v6864_v12  ;;  %v1953_v4 = vmul.f32 %v5511_v21, %v6871_v22  ;;  %v1940_v8 = vadd.f32 %v1936_v49, %v1926_v11  ;;  %v1941_v37 = vadd.f32 %v1937_v44, %v1927_v39  ;;  %v6929_v49 = vld [vmem:[%s6466_s14 + $0x3e8] sm:$0xff]  ;;  %v5515_v44 = vld [vmem:[#allocation3 + $0x1f] ss:$0 sm:$0xff]  ;;  %v6932_v39 = vld [vmem:[%s6466_s14 + $0x3f0] sm:$0xff] }
 0x255   : > { %v1942_v57 = vadd.f32 %v1938_v52, %v1928_v47  ;;  %v1943_v26 = vadd.f32 %v1939_v60, %v1929_v3  ;;  %v1964_v28 = vmul.f32 %v5512_v58, %v6874_v1  ;;  %v1965_v61 = vmul.f32 %v5512_v58, %v6877_v32  ;;  %v6935_v47 = vld [vmem:[%s6466_s14 + $0x3f8] sm:$0xff] }
 0x256   : > { %v1966_v36 = vmul.f32 %v5512_v58, %v6880_v15  ;;  %v1967_v51 = vmul.f32 %v5512_v58, %v6887_v55  ;;  %v1954_v59 = vadd.f32 %v1950_v42, %v1940_v8  ;;  %v1955_v24 = vadd.f32 %v1951_v9, %v1941_v37 }
 0x257   : > { %v1956_v45 = vadd.f32 %v1952_v48, %v1942_v57  ;;  %v1957_v54 = vadd.f32 %v1953_v4, %v1943_v26  ;;  %v1978_v21 = vmul.f32 %v5513_v25, %v6890_v27  ;;  %v1979_v31 = vmul.f32 %v5513_v25, %v6893_v0  ;;  %v5516_v4 = vld [vmem:[#allocation3 + $0x98] ss:$0 sm:$0xff] }
 0x258   : > { %v1980_v41 = vmul.f32 %v5513_v25, %v6896_v34  ;;  %v1981_v17 = vmul.f32 %v5513_v25, %v6903_v20  ;;  %v1968_v52 = vadd.f32 %v1964_v28, %v1954_v59  ;;  %v1969_v60 = vadd.f32 %v1965_v61, %v1955_v24 }
 0x259   : > { %v1970_v58 = vadd.f32 %v1966_v36, %v1956_v45  ;;  %v1971_v11 = vadd.f32 %v1967_v51, %v1957_v54  ;;  %v1992_v3 = vmul.f32 %v5514_v30, %v6906_v43  ;;  %v1993_v42 = vmul.f32 %v5514_v30, %v6909_v56 }
 0x25a   : > { %v1994_v9 = vmul.f32 %v5514_v30, %v6916_v40  ;;  %v1995_v48 = vmul.f32 %v5514_v30, %v6919_v5  ;;  %v1982_v25 = vadd.f32 %v1978_v21, %v1968_v52  ;;  %v1983_v8 = vadd.f32 %v1979_v31, %v1969_v60 }
 0x25b   : > { %v1984_v37 = vadd.f32 %v1980_v41, %v1970_v58  ;;  %v1985_v57 = vadd.f32 %v1981_v17, %v1971_v11  ;;  %v2006_v26 = vmul.f32 %v5515_v44, %v6926_v23  ;;  %v2007_v28 = vmul.f32 %v5515_v44, %v6929_v49  ;;  %v5517_v41 = vld [vmem:[#allocation3 + $0x99] ss:$0 sm:$0xff]  ;;  %v5518_v11 = vld [vmem:[#allocation3 + $0x9a] ss:$0 sm:$0xff] }
 0x25c   : > { %v2008_v61 = vmul.f32 %v5515_v44, %v6932_v39  ;;  %v2009_v36 = vmul.f32 %v5515_v44, %v6935_v47  ;;  %v1996_v51 = vadd.f32 %v1992_v3, %v1982_v25  ;;  %v1997_v59 = vadd.f32 %v1993_v42, %v1983_v8  ;;  %v5519_v25 = vld [vmem:[#allocation3 + $0x9b] ss:$0 sm:$0xff] }
 0x25d   : > { %v1998_v24 = vadd.f32 %v1994_v9, %v1984_v37  ;;  %v1999_v45 = vadd.f32 %v1995_v48, %v1985_v57  ;;  %v3732_v30 = vmul.f32 %v5516_v4, %v6810_v29  ;;  %v3733_v54 = vmul.f32 %v5516_v4, %v6813_v35 }
 0x25e   : > { %v3734_v21 = vmul.f32 %v5516_v4, %v6816_v7  ;;  %v3735_v31 = vmul.f32 %v5516_v4, %v6819_v13  ;;  %v2010_v17 = vadd.f32 %v2006_v26, %v1996_v51  ;;  %v2011_v52 = vadd.f32 %v2007_v28, %v1997_v59 }
 0x25f   : > { %v2012_v60 = vadd.f32 %v2008_v61, %v1998_v24  ;;  %v2013_v58 = vadd.f32 %v2009_v36, %v1999_v45  ;;  %v3736_v44 = vadd.f32 %v3732_v30, %v6845_v63  ;;  %v3737_v3 = vadd.f32 %v3733_v54, %v6847_v33  ;;  %v5522_v30 = vld [vmem:[#allocation3 + $0x9e] ss:$0 sm:$0xff] }
 0x260   : > { %v3738_v42 = vadd.f32 %v3734_v21, %v6849_v53  ;;  %v3739_v29 = vadd.f32 %v3735_v31, %v6851_v14  ;;  %v2014_v9 = vmax.f32 %v2010_v17, 0.0  ;;  %v2015_v35 = vmax.f32 %v2011_v52, 0.0 }
 0x261   : > { %v2016_v48 = vmax.f32 %v2012_v60, 0.0  ;;  %v2017_v7 = vmax.f32 %v2013_v58, 0.0  ;;  %v3746_v13 = vmul.f32 %v5517_v41, %v6822_v10  ;;  %v3747_v4 = vmul.f32 %v5517_v41, %v6825_v2  ;;  %v5520_v2 = vld [vmem:[#allocation3 + $0x9c] ss:$0 sm:$0xff] }
 0x262   : > { %v3748_v8 = vmul.f32 %v5517_v41, %v6828_v6  ;;  %v3749_v37 = vmul.f32 %v5517_v41, %v6831_v50  ;;  %2018 = vst [vmem:[%s6958_s8] sm:$0xff] %v2014_v9  ;;  %v3760_v63 = vmul.f32 %v5518_v11, %v6834_v38  ;;  %v3761_v33 = vmul.f32 %v5518_v11, %v6837_v18  ;;  %v5521_v18 = vld [vmem:[#allocation3 + $0x9d] ss:$0 sm:$0xff] }
 0x263   : > { %v3762_v53 = vmul.f32 %v5518_v11, %v6840_v62  ;;  %v3763_v10 = vmul.f32 %v5518_v11, %v6843_v46  ;;  %2019 = vst [vmem:[%s6958_s8 + $0x8] sm:$0xff] %v2015_v35  ;;  %v3750_v6 = vadd.f32 %v3746_v13, %v3736_v44  ;;  %v3751_v14 = vadd.f32 %v3747_v4, %v3737_v3  ;;  %v1494_v4 = vpop.f32.mrf.mxu2 }
 0x264   : > { %v3752_v50 = vadd.f32 %v3748_v8, %v3738_v42  ;;  %v3753_v57 = vadd.f32 %v3749_v37, %v3739_v29  ;;  %2020 = vst [vmem:[%s6958_s8 + $0x10] sm:$0xff] %v2016_v48  ;;  %v3774_v26 = vmul.f32 %v5519_v25, %v6858_v16  ;;  %v3775_v28 = vmul.f32 %v5519_v25, %v6861_v19  ;;  %v5524_v8 = vld [vmem:[#allocation3 + $0x20] ss:$0 sm:$0xff] }
 0x265   : > { %v3776_v38 = vmul.f32 %v5519_v25, %v6864_v12  ;;  %v3777_v61 = vmul.f32 %v5519_v25, %v6871_v22  ;;  %2021 = vst [vmem:[%s6958_s8 + $0x18] sm:$0xff] %v2017_v7  ;;  %v3764_v62 = vadd.f32 %v3760_v63, %v3750_v6  ;;  %v3765_v36 = vadd.f32 %v3761_v33, %v3751_v14  ;;  %v2023_v37 = vld [vmem:[%s6466_s14] sm:$0xff]  ;;  %v6994_v63 = vld [vmem:[%s6466_s14 + $0x8] sm:$0xff]  ;;  %v1336_v14 = vpop.f32.mrf.mxu1 }
 0x266   : > { %v3766_v46 = vadd.f32 %v3762_v53, %v3752_v50  ;;  %v3767_v51 = vadd.f32 %v3763_v10, %v3753_v57  ;;  %v3788_v59 = vmul.f32 %v5520_v2, %v6874_v1  ;;  %v3789_v24 = vmul.f32 %v5520_v2, %v6877_v32  ;;  %v5523_v1 = vld [vmem:[#allocation3 + $0x9f] ss:$0 sm:$0xff]  ;;  %v2025_v10 = vld [vmem:[%s6466_s14 + $0x10] sm:$0xff]  ;;  %v1449_v50 = vpop.f32.mrf.mxu0 }
 0x267   : > { %v3790_v45 = vmul.f32 %v5520_v2, %v6880_v15  ;;  %v3791_v16 = vmul.f32 %v5520_v2, %v6887_v55  ;;  %v3778_v19 = vadd.f32 %v3774_v26, %v3764_v62  ;;  %v3779_v54 = vadd.f32 %v3775_v28, %v3765_v36  ;;  %v6998_v2 = vld [vmem:[%s6466_s14 + $0x18] sm:$0xff]  ;;  %v5525_v26 = vld [vmem:[#allocation3 + $0x21] ss:$0 sm:$0xff] }
 0x268   : > { %v3780_v12 = vadd.f32 %v3776_v38, %v3766_v46  ;;  %v3781_v21 = vadd.f32 %v3777_v61, %v3767_v51  ;;  %v3802_v22 = vmul.f32 %v5521_v18, %v6890_v27  ;;  %v3803_v31 = vmul.f32 %v5521_v18, %v6893_v0  ;;  %v7003_v36 = vld [vmem:[%s6466_s14 + $0x20] sm:$0xff]  ;;  %v7006_v46 = vld [vmem:[%s6466_s14 + $0x28] sm:$0xff]  ;;  %v7009_v51 = vld [vmem:[%s6466_s14 + $0x30] sm:$0xff] }
 0x269   : > { %v3804_v41 = vmul.f32 %v5521_v18, %v6896_v34  ;;  %v3805_v17 = vmul.f32 %v5521_v18, %v6903_v20  ;;  %v3792_v52 = vadd.f32 %v3788_v59, %v3778_v19  ;;  %v3793_v32 = vadd.f32 %v3789_v24, %v3779_v54  ;;  %v7012_v59 = vld [vmem:[%s6466_s14 + $0x38] sm:$0xff]  ;;  %v5716_v24 = vld [vmem:[%s6473_s15] sm:$0xff] }
 0x26a   : > { %v3794_v60 = vadd.f32 %v3790_v45, %v3780_v12  ;;  %v3795_v15 = vadd.f32 %v3791_v16, %v3781_v21  ;;  %v3816_v55 = vmul.f32 %v5522_v30, %v6906_v43  ;;  %v3817_v58 = vmul.f32 %v5522_v30, %v6909_v56  ;;  %v5717_v16 = vld [vmem:[%s6473_s15 + $0x8] sm:$0xff]  ;;  %v5526_v12 = vld [vmem:[#allocation3 + $0x22] ss:$0 sm:$0xff]  ;;  %v5718_v21 = vld [vmem:[%s6473_s15 + $0x10] sm:$0xff] }
 0x26b   : > { %v3818_v11 = vmul.f32 %v5522_v30, %v6916_v40  ;;  %v3819_v44 = vmul.f32 %v5522_v30, %v6919_v5  ;;  %v3806_v27 = vadd.f32 %v3802_v22, %v3792_v52  ;;  %v3807_v3 = vadd.f32 %v3803_v31, %v3793_v32  ;;  %v1497_v53 = vpop.f32.mrf.mxu2  ;;  %v5719_v31 = vld [vmem:[%s6473_s15 + $0x18] sm:$0xff]  ;;  %v7023_v52 = vld [vmem:[%s6466_s14 + $0x40] sm:$0xff]  ;;  %v7026_v32 = vld [vmem:[%s6466_s14 + $0x48] sm:$0xff] }
 0x26c   : > { %v3808_v0 = vadd.f32 %v3804_v41, %v3794_v60  ;;  %v3809_v42 = vadd.f32 %v3805_v17, %v3795_v15  ;;  %v3830_v34 = vmul.f32 %v5523_v1, %v6926_v23  ;;  %v3831_v20 = vmul.f32 %v5523_v1, %v6929_v49  ;;  %v7029_v60 = vld [vmem:[%s6466_s14 + $0x50] sm:$0xff]  ;;  %v7032_v15 = vld [vmem:[%s6466_s14 + $0x58] sm:$0xff] }
 0x26d   : > { %v3832_v29 = vmul.f32 %v5523_v1, %v6932_v39  ;;  %v3833_v9 = vmul.f32 %v5523_v1, %v6935_v47  ;;  %v3820_v43 = vadd.f32 %v3816_v55, %v3806_v27  ;;  %v3821_v56 = vadd.f32 %v3817_v58, %v3807_v3  ;;  %v1381_v47 = vpop.f32.mrf.mxu3  ;;  %v5527_v55 = vld [vmem:[#allocation3 + $0x23] ss:$0 sm:$0xff] }
 0x26e   : > { %v3822_v40 = vadd.f32 %v3818_v11, %v3808_v0  ;;  %v3823_v5 = vadd.f32 %v3819_v44, %v3809_v42  ;;  %v2028_v6 = vmul.f32 %v5524_v8, %v2023_v37  ;;  %v2029_v57 = vmul.f32 %v5524_v8, %v6994_v63  ;;  %v7037_v3 = vld [vmem:[%s6466_s14 + $0x60] sm:$0xff]  ;;  %v7040_v0 = vld [vmem:[%s6466_s14 + $0x68] sm:$0xff]  ;;  %v7043_v42 = vld [vmem:[%s6466_s14 + $0x70] sm:$0xff] }
 0x26f   : > { %v3834_v35 = vadd.f32 %v3830_v34, %v3820_v43  ;;  %v3835_v48 = vadd.f32 %v3831_v20, %v3821_v56  ;;  %v1495_v28 = vadd.f32 %v1494_v4, %v1381_v47  ;;  %v1450_v38 = vadd.f32 %v1449_v50, %v1336_v14  ;;  %v7048_v56 = vld [vmem:[%s6466_s14 + $0x78] sm:$0xff]  ;;  %v5528_v4 = vld [vmem:[#allocation3 + $0x24] ss:$0 sm:$0xff] }
 0x270   : > { %v3836_v7 = vadd.f32 %v3832_v29, %v3822_v40  ;;  %v3837_v23 = vadd.f32 %v3833_v9, %v3823_v5  ;;  %v2030_v18 = vmul.f32 %v5524_v8, %v2025_v10  ;;  %v2031_v62 = vmul.f32 %v5524_v8, %v6998_v2 }
 0x271   : > { %v3838_v49 = vmax.f32 %v3834_v35, 0.0  ;;  %v3839_v39 = vmax.f32 %v3835_v48, 0.0  ;;  %1550 = vst [vmem:[#allocation3 + $0xa0] sm:$0xff] %v1495_v28  ;;  %v2032_v45 = vadd.f32 %v5716_v24, %v2028_v6  ;;  %v2033_v30 = vadd.f32 %v5717_v16, %v2029_v57  ;;  %v7066_v57 = vld [vmem:[%s6466_s14 + $0x98] sm:$0xff] }
 0x272   : > { %v3840_v25 = vmax.f32 %v3836_v7, 0.0  ;;  %v3841_v13 = vmax.f32 %v3837_v23, 0.0  ;;  %1535 = vst [vmem:[#allocation3 + $0x28] sm:$0xff] %v1450_v38  ;;  %v2042_v19 = vmul.f32 %v5525_v26, %v7003_v36  ;;  %v2043_v54 = vmul.f32 %v5525_v26, %v7006_v46 }
 0x273   : > { %3842 = vst [vmem:[%s6958_s8 + $0x80] sm:$0xff] %v3838_v49  ;;  %v2034_v22 = vadd.f32 %v5718_v21, %v2030_v18  ;;  %v2035_v41 = vadd.f32 %v5719_v31, %v2031_v62  ;;  %v2044_v17 = vmul.f32 %v5525_v26, %v7009_v51  ;;  %v2045_v1 = vmul.f32 %v5525_v26, %v7012_v59 }
 0x274   : > { %3843 = vst [vmem:[%s6958_s8 + $0x88] sm:$0xff] %v3839_v39  ;;  %v2046_v58 = vadd.f32 %v2042_v19, %v2032_v45  ;;  %v2047_v11 = vadd.f32 %v2043_v54, %v2033_v30  ;;  %v2056_v44 = vmul.f32 %v5526_v12, %v7023_v52  ;;  %v2057_v27 = vmul.f32 %v5526_v12, %v7026_v32  ;;  %v7077_v54 = vld [vmem:[%s6466_s14 + $0xa8] sm:$0xff] }
 0x275   : > { %3844 = vst [vmem:[%s6958_s8 + $0x90] sm:$0xff] %v3840_v25  ;;  %v1384_v33 = vpop.f32.mrf.mxu3  ;;  %v2048_v34 = vadd.f32 %v2044_v17, %v2034_v22  ;;  %v2049_v20 = vadd.f32 %v2045_v1, %v2035_v41  ;;  %v2058_v29 = vmul.f32 %v5526_v12, %v7029_v60  ;;  %v2059_v9 = vmul.f32 %v5526_v12, %v7032_v15  ;;  %v7081_v17 = vld [vmem:[%s6466_s14 + $0xb0] sm:$0xff]  ;;  %v7084_v1 = vld [vmem:[%s6466_s14 + $0xb8] sm:$0xff] }
 0x276   : > { %3845 = vst [vmem:[%s6958_s8 + $0x98] sm:$0xff] %v3841_v13  ;;  %v1498_v61 = vadd.f32 %v1497_v53, %v1384_v33  ;;  %v2070_v40 = vmul.f32 %v5527_v55, %v7037_v3  ;;  %v2071_v5 = vmul.f32 %v5527_v55, %v7040_v0  ;;  %v2060_v35 = vadd.f32 %v2056_v44, %v2046_v58  ;;  %v7055_v13 = vld [vmem:[%s6466_s14 + $0x80] sm:$0xff]  ;;  %v7059_v53 = vld [vmem:[%s6466_s14 + $0x88] sm:$0xff] }
 0x277   : > { %v2061_v48 = vadd.f32 %v2057_v27, %v2047_v11  ;;  %v2072_v7 = vmul.f32 %v5527_v55, %v7043_v42  ;;  %v2062_v49 = vadd.f32 %v2058_v29, %v2048_v34  ;;  %v2063_v39 = vadd.f32 %v2059_v9, %v2049_v20  ;;  %v7088_v11 = vld [vmem:[%s6466_s14 + $0xc0] sm:$0xff] }
 0x278   : > { %1551 = vst [vmem:[#allocation3 + $0xa8] sm:$0xff] %v1498_v61  ;;  %v5532_v43 = vld [vmem:[#allocation3 + $0xa0] ss:$0 sm:$0xff]  ;;  %v2073_v25 = vmul.f32 %v5527_v55, %v7048_v56  ;;  %v5533_v33 = vld [vmem:[#allocation3 + $0xa1] ss:$0 sm:$0xff]  ;;  %v2074_v14 = vadd.f32 %v2070_v40, %v2060_v35  ;;  %v2085_v18 = vmul.f32 %v5528_v4, %v7059_v53  ;;  %v7097_v40 = vld [vmem:[%s6466_s14 + $0xc8] sm:$0xff] }
 0x279   : > { %v3852_v23 = vmul.f32 %v5532_v43, %v2023_v37  ;;  %v3853_v47 = vmul.f32 %v5532_v43, %v6994_v63  ;;  %v3854_v8 = vmul.f32 %v5532_v43, %v2025_v10  ;;  %v3855_v6 = vmul.f32 %v5532_v43, %v6998_v2  ;;  %v7063_v37 = vld [vmem:[%s6466_s14 + $0x90] sm:$0xff]  ;;  %v7069_v61 = vld [vmem:[%s6466_s14 + $0xa0] sm:$0xff] }
 0x27a   : > { %v2075_v50 = vadd.f32 %v2071_v5, %v2061_v48  ;;  %v2076_v28 = vadd.f32 %v2072_v7, %v2062_v49  ;;  %v2077_v38 = vadd.f32 %v2073_v25, %v2063_v39  ;;  %v2084_v10 = vmul.f32 %v5528_v4, %v7055_v13  ;;  %v5529_v2 = vld [vmem:[#allocation3 + $0x25] ss:$0 sm:$0xff]  ;;  %v5534_v30 = vld [vmem:[#allocation3 + $0xa2] ss:$0 sm:$0xff]  ;;  %v5530_v34 = vld [vmem:[#allocation3 + $0x26] ss:$0 sm:$0xff] }
 0x27b   : > { %v3856_v26 = vadd.f32 %v5716_v24, %v3852_v23  ;;  %v3857_v63 = vadd.f32 %v5717_v16, %v3853_v47  ;;  %v3858_v62 = vadd.f32 %v5718_v21, %v3854_v8  ;;  %v3866_v45 = vmul.f32 %v5533_v33, %v7003_v36  ;;  %v5535_v9 = vld [vmem:[#allocation3 + $0xa3] ss:$0 sm:$0xff]  ;;  %v7101_v7 = vld [vmem:[%s6466_s14 + $0xd0] sm:$0xff]  ;;  %v7104_v23 = vld [vmem:[%s6466_s14 + $0xd8] sm:$0xff] }
 0x27c   : > { %v2086_v19 = vmul.f32 %v5528_v4, %v7063_v37  ;;  %v2087_v24 = vmul.f32 %v5528_v4, %v7066_v57  ;;  %v3859_v12 = vadd.f32 %v5719_v31, %v3855_v6  ;;  %v3867_v22 = vmul.f32 %v5533_v33, %v7006_v46 }
 0x27d   : > { %v2088_v16 = vadd.f32 %v2084_v10, %v2074_v14  ;;  %v2089_v41 = vadd.f32 %v2085_v18, %v2075_v50  ;;  %v3868_v21 = vmul.f32 %v5533_v33, %v7009_v51  ;;  %v3870_v36 = vadd.f32 %v3866_v45, %v3856_v26  ;;  %v5536_v50 = vld [vmem:[#allocation3 + $0xa4] ss:$0 sm:$0xff] }
 0x27e   : > { %v2090_v55 = vadd.f32 %v2086_v19, %v2076_v28  ;;  %v2091_v58 = vadd.f32 %v2087_v24, %v2077_v38  ;;  %v3869_v44 = vmul.f32 %v5533_v33, %v7012_v59  ;;  %v3871_v31 = vadd.f32 %v3867_v22, %v3857_v63  ;;  %v5531_v33 = vld [vmem:[#allocation3 + $0x27] ss:$0 sm:$0xff]  ;;  %v7117_v38 = vld [vmem:[%s6466_s14 + $0xe8] sm:$0xff] }
 0x27f   : > { %v2098_v46 = vmul.f32 %v5529_v2, %v7069_v61  ;;  %v2099_v27 = vmul.f32 %v5529_v2, %v7077_v54  ;;  %v3872_v20 = vadd.f32 %v3868_v21, %v3858_v62  ;;  %v3880_v29 = vmul.f32 %v5534_v30, %v7023_v52  ;;  %v7114_v28 = vld [vmem:[%s6466_s14 + $0xe0] sm:$0xff]  ;;  %v7124_v62 = vld [vmem:[%s6466_s14 + $0xf8] sm:$0xff] }
 0x280   : > { %v2100_v51 = vmul.f32 %v5529_v2, %v7081_v17  ;;  %v2101_v43 = vmul.f32 %v5529_v2, %v7084_v1  ;;  %v3873_v5 = vadd.f32 %v3869_v44, %v3859_v12  ;;  %v3881_v59 = vmul.f32 %v5534_v30, %v7026_v32  ;;  %v7121_v2 = vld [vmem:[%s6466_s14 + $0xf0] sm:$0xff]  ;;  %v5537_v21 = vld [vmem:[#allocation3 + $0xa5] ss:$0 sm:$0xff] }
 0x281   : > { %v2102_v35 = vadd.f32 %v2098_v46, %v2088_v16  ;;  %v2103_v48 = vadd.f32 %v2099_v27, %v2089_v41  ;;  %v3882_v52 = vmul.f32 %v5534_v30, %v7029_v60  ;;  %v3884_v49 = vadd.f32 %v3880_v29, %v3870_v36  ;;  %v5540_v36 = vld [vmem:[#allocation3 + $0x28] ss:$0 sm:$0xff]  ;;  %v7142_v29 = vld [vmem:[%s6466_s14 + $0x110] sm:$0xff] }
 0x282   : > { %v2104_v39 = vadd.f32 %v2100_v51, %v2090_v55  ;;  %v2105_v25 = vadd.f32 %v2101_v43, %v2091_v58  ;;  %v3883_v47 = vmul.f32 %v5534_v30, %v7032_v15  ;;  %v3885_v4 = vadd.f32 %v3881_v59, %v3871_v31  ;;  %v7138_v31 = vld [vmem:[%s6466_s14 + $0x108] sm:$0xff] }
 0x283   : > { %v2112_v32 = vmul.f32 %v5530_v34, %v7088_v11  ;;  %v2113_v8 = vmul.f32 %v5530_v34, %v7097_v40  ;;  %v3886_v6 = vadd.f32 %v3882_v52, %v3872_v20  ;;  %v3894_v14 = vmul.f32 %v5535_v9, %v7037_v3  ;;  %v5541_v52 = vld [vmem:[#allocation3 + $0x29] ss:$0 sm:$0xff] }
 0x284   : > { %v2114_v26 = vmul.f32 %v5530_v34, %v7101_v7  ;;  %v2115_v60 = vmul.f32 %v5530_v34, %v7104_v23  ;;  %v3887_v15 = vadd.f32 %v3883_v47, %v3873_v5  ;;  %v3895_v63 = vmul.f32 %v5535_v9, %v7040_v0 }
 0x285   : > { %v2116_v10 = vadd.f32 %v2112_v32, %v2102_v35  ;;  %v2117_v18 = vadd.f32 %v2113_v8, %v2103_v48  ;;  %v3896_v3 = vmul.f32 %v5535_v9, %v7043_v42  ;;  %v3898_v45 = vadd.f32 %v3894_v14, %v3884_v49  ;;  %v5538_v35 = vld [vmem:[#allocation3 + $0xa6] ss:$0 sm:$0xff]  ;;  %v7165_v14 = vld [vmem:[%s6466_s14 + $0x138] sm:$0xff] }
 0x286   : > { %v2118_v30 = vadd.f32 %v2114_v26, %v2104_v39  ;;  %v2119_v19 = vadd.f32 %v2115_v60, %v2105_v25  ;;  %v3897_v24 = vmul.f32 %v5535_v9, %v7048_v56  ;;  %v3899_v12 = vadd.f32 %v3895_v63, %v3885_v4  ;;  %v7135_v56 = vld [vmem:[%s6466_s14 + $0x100] sm:$0xff]  ;;  %v7158_v4 = vld [vmem:[%s6466_s14 + $0x128] sm:$0xff] }
 0x287   : > { %v2126_v22 = vmul.f32 %v5531_v33, %v7114_v28  ;;  %v2127_v0 = vmul.f32 %v5531_v33, %v7117_v38  ;;  %v3900_v16 = vadd.f32 %v3896_v3, %v3886_v6  ;;  %v3908_v41 = vmul.f32 %v5536_v50, %v7055_v13  ;;  %v7145_v13 = vld [vmem:[%s6466_s14 + $0x118] sm:$0xff]  ;;  %v7162_v6 = vld [vmem:[%s6466_s14 + $0x130] sm:$0xff]  ;;  %v5542_v3 = vld [vmem:[#allocation3 + $0x2a] ss:$0 sm:$0xff] }
 0x288   : > { %v2128_v42 = vmul.f32 %v5531_v33, %v7121_v2  ;;  %v2129_v55 = vmul.f32 %v5531_v33, %v7124_v62  ;;  %v3901_v58 = vadd.f32 %v3897_v24, %v3887_v15  ;;  %v3909_v44 = vmul.f32 %v5536_v50, %v7059_v53  ;;  %v7175_v24 = vld [vmem:[%s6466_s14 + $0x140] sm:$0xff] }
 0x289   : > { %v2130_v46 = vadd.f32 %v2126_v22, %v2116_v10  ;;  %v2131_v27 = vadd.f32 %v2127_v0, %v2117_v18  ;;  %v3910_v34 = vmul.f32 %v5536_v50, %v7063_v37  ;;  %v3912_v20 = vadd.f32 %v3908_v41, %v3898_v45  ;;  %v7182_v41 = vld [vmem:[%s6466_s14 + $0x150] sm:$0xff] }
 0x28a   : > { %v2132_v9 = vadd.f32 %v2128_v42, %v2118_v30  ;;  %v2133_v51 = vadd.f32 %v2129_v55, %v2119_v19  ;;  %v3911_v43 = vmul.f32 %v5536_v50, %v7066_v57  ;;  %v3913_v53 = vadd.f32 %v3909_v44, %v3899_v12  ;;  %v7155_v57 = vld [vmem:[%s6466_s14 + $0x120] sm:$0xff]  ;;  %v7178_v12 = vld [vmem:[%s6466_s14 + $0x148] sm:$0xff] }
 0x28b   : > { %v3914_v5 = vadd.f32 %v3910_v34, %v3900_v16  ;;  %v3922_v59 = vmul.f32 %v5537_v21, %v7069_v61  ;;  %v2140_v37 = vmul.f32 %v5540_v36, %v7135_v56  ;;  %v2141_v48 = vmul.f32 %v5540_v36, %v7138_v31  ;;  %v5548_v34 = vld [vmem:[#allocation3 + $0xa8] ss:$0 sm:$0xff] }
 0x28c   : > { %v3915_v49 = vadd.f32 %v3911_v43, %v3901_v58  ;;  %v3923_v39 = vmul.f32 %v5537_v21, %v7077_v54  ;;  %v2142_v25 = vmul.f32 %v5540_v36, %v7142_v29  ;;  %v2143_v47 = vmul.f32 %v5540_v36, %v7145_v13  ;;  %v7195_v43 = vld [vmem:[%s6466_s14 + $0x160] sm:$0xff] }
 0x28d   : > { %v3924_v61 = vmul.f32 %v5537_v21, %v7081_v17  ;;  %v3926_v32 = vadd.f32 %v3922_v59, %v3912_v20  ;;  %v2144_v8 = vadd.f32 %v2140_v37, %v2130_v46  ;;  %v2145_v33 = vadd.f32 %v2141_v48, %v2131_v27  ;;  %v5539_v17 = vld [vmem:[#allocation3 + $0xa7] ss:$0 sm:$0xff]  ;;  %v5543_v27 = vld [vmem:[#allocation3 + $0x2b] ss:$0 sm:$0xff]  ;;  %v7202_v48 = vld [vmem:[%s6466_s14 + $0x170] sm:$0xff] }
 0x28e   : > { %v3925_v54 = vmul.f32 %v5537_v21, %v7084_v1  ;;  %v3927_v50 = vadd.f32 %v3923_v39, %v3913_v53  ;;  %v2146_v26 = vadd.f32 %v2142_v25, %v2132_v9  ;;  %v2147_v60 = vadd.f32 %v2143_v47, %v2133_v51  ;;  %v7185_v21 = vld [vmem:[%s6466_s14 + $0x158] sm:$0xff]  ;;  %v5544_v53 = vld [vmem:[#allocation3 + $0x2c] ss:$0 sm:$0xff] }
 0x28f   : > { %v3928_v15 = vadd.f32 %v3924_v61, %v3914_v5  ;;  %v3936_v63 = vmul.f32 %v5538_v35, %v7088_v11  ;;  %v2154_v10 = vmul.f32 %v5541_v52, %v7155_v57  ;;  %v2155_v18 = vmul.f32 %v5541_v52, %v7158_v4  ;;  %v7212_v61 = vld [vmem:[%s6466_s14 + $0x188] sm:$0xff] }
 0x290   : > { %v3929_v45 = vadd.f32 %v3925_v54, %v3915_v49  ;;  %v3937_v30 = vmul.f32 %v5538_v35, %v7097_v40  ;;  %v2156_v19 = vmul.f32 %v5541_v52, %v7162_v6  ;;  %v2157_v1 = vmul.f32 %v5541_v52, %v7165_v14  ;;  %v7205_v52 = vld [vmem:[%s6466_s14 + $0x178] sm:$0xff]  ;;  %v5549_v54 = vld [vmem:[#allocation3 + $0xa9] ss:$0 sm:$0xff] }
 0x291   : > { %v3938_v11 = vmul.f32 %v5538_v35, %v7101_v7  ;;  %v3940_v22 = vadd.f32 %v3936_v63, %v3926_v32  ;;  %v2158_v0 = vadd.f32 %v2154_v10, %v2144_v8  ;;  %v2159_v16 = vadd.f32 %v2155_v18, %v2145_v33 }
 0x292   : > { %v3939_v40 = vmul.f32 %v5538_v35, %v7104_v23  ;;  %v3941_v36 = vadd.f32 %v3937_v30, %v3927_v50  ;;  %v2160_v42 = vadd.f32 %v2156_v19, %v2146_v26  ;;  %v2161_v55 = vadd.f32 %v2157_v1, %v2147_v60  ;;  %v7220_v60 = vld [vmem:[%s6466_s14 + $0x190] sm:$0xff] }
 0x293   : > { %v3942_v58 = vadd.f32 %v3938_v11, %v3928_v15  ;;  %v3950_v44 = vmul.f32 %v5539_v17, %v7114_v28  ;;  %v2168_v7 = vmul.f32 %v5542_v3, %v7175_v24  ;;  %v2169_v46 = vmul.f32 %v5542_v3, %v7178_v12  ;;  %v7198_v28 = vld [vmem:[%s6466_s14 + $0x168] sm:$0xff]  ;;  %v7223_v15 = vld [vmem:[%s6466_s14 + $0x198] sm:$0xff] }
 0x294   : > { %v3943_v20 = vadd.f32 %v3939_v40, %v3929_v45  ;;  %v3951_v9 = vmul.f32 %v5539_v17, %v7117_v38  ;;  %v2170_v23 = vmul.f32 %v5542_v3, %v7182_v41  ;;  %v2171_v51 = vmul.f32 %v5542_v3, %v7185_v21  ;;  %v7208_v38 = vld [vmem:[%s6466_s14 + $0x180] sm:$0xff]  ;;  %v7231_v45 = vld [vmem:[%s6466_s14 + $0x1a8] sm:$0xff] }
 0x295   : > { %v3952_v5 = vmul.f32 %v5539_v17, %v7121_v2  ;;  %v3954_v59 = vadd.f32 %v3950_v44, %v3940_v22  ;;  %v2172_v35 = vadd.f32 %v2168_v7, %v2158_v0  ;;  %v2173_v37 = vadd.f32 %v2169_v46, %v2159_v16  ;;  %v5546_v7 = vld [vmem:[#allocation3 + $0x2e] ss:$0 sm:$0xff] }
 0x296   : > { %v3953_v49 = vmul.f32 %v5539_v17, %v7124_v62  ;;  %v3955_v39 = vadd.f32 %v3951_v9, %v3941_v36  ;;  %v2174_v25 = vadd.f32 %v2170_v23, %v2160_v42  ;;  %v2175_v47 = vadd.f32 %v2171_v51, %v2161_v55  ;;  %v5545_v17 = vld [vmem:[#allocation3 + $0x2d] ss:$0 sm:$0xff]  ;;  %v5550_v42 = vld [vmem:[#allocation3 + $0xaa] ss:$0 sm:$0xff]  ;;  %v7240_v55 = vld [vmem:[%s6466_s14 + $0x1b0] sm:$0xff]  ;;  %v1452_v51 = vpop.f32.mrf.mxu0 }
 0x297   : > { %v3956_v2 = vadd.f32 %v3952_v5, %v3942_v58  ;;  %v2182_v32 = vmul.f32 %v5543_v27, %v7195_v43  ;;  %v2183_v8 = vmul.f32 %v5543_v27, %v7198_v28  ;;  %v3964_v33 = vmul.f32 %v5548_v34, %v7135_v56  ;;  %v7228_v56 = vld [vmem:[%s6466_s14 + $0x1a0] sm:$0xff]  ;;  %v7243_v58 = vld [vmem:[%s6466_s14 + $0x1b8] sm:$0xff]  ;;  %v7251_v23 = vld [vmem:[%s6466_s14 + $0x1c8] sm:$0xff] }
 0x298   : > { %v3957_v50 = vadd.f32 %v3953_v49, %v3943_v20  ;;  %v2184_v26 = vmul.f32 %v5543_v27, %v7202_v48  ;;  %v2185_v62 = vmul.f32 %v5543_v27, %v7205_v52  ;;  %v2196_v63 = vmul.f32 %v5544_v53, %v7208_v38  ;;  %v7248_v9 = vld [vmem:[%s6466_s14 + $0x1c0] sm:$0xff] }
 0x299   : > { %v2186_v10 = vadd.f32 %v2182_v32, %v2172_v35  ;;  %v2187_v18 = vadd.f32 %v2183_v8, %v2173_v37  ;;  %v2197_v3 = vmul.f32 %v5544_v53, %v7212_v61  ;;  %v3968_v30 = vadd.f32 %v3964_v33, %v3954_v59 }
 0x29a   : > { %v2188_v19 = vadd.f32 %v2184_v26, %v2174_v25  ;;  %v2189_v1 = vadd.f32 %v2185_v62, %v2175_v47  ;;  %v3965_v11 = vmul.f32 %v5548_v34, %v7138_v31  ;;  %v3966_v22 = vmul.f32 %v5548_v34, %v7142_v29  ;;  %v5551_v47 = vld [vmem:[#allocation3 + $0xab] ss:$0 sm:$0xff]  ;;  %v7262_v62 = vld [vmem:[%s6466_s14 + $0x1d0] sm:$0xff] }
 0x29b   : > { %v2198_v0 = vmul.f32 %v5544_v53, %v7220_v60  ;;  %v2199_v16 = vmul.f32 %v5544_v53, %v7223_v15  ;;  %v3967_v40 = vmul.f32 %v5548_v34, %v7145_v13  ;;  %v3978_v36 = vmul.f32 %v5549_v54, %v7155_v57  ;;  %v1339_v34 = vpop.f32.mrf.mxu1 }
 0x29c   : > { %v2210_v44 = vmul.f32 %v5545_v17, %v7228_v56  ;;  %v2211_v31 = vmul.f32 %v5545_v17, %v7231_v45  ;;  %v3969_v29 = vadd.f32 %v3965_v11, %v3955_v39  ;;  %v3970_v46 = vadd.f32 %v3966_v22, %v3956_v2  ;;  %v5552_v11 = vld [vmem:[#allocation3 + $0xac] ss:$0 sm:$0xff] }
 0x29d   : > { %v2200_v27 = vadd.f32 %v2196_v63, %v2186_v10  ;;  %v2201_v20 = vadd.f32 %v2197_v3, %v2187_v18  ;;  %v3971_v13 = vadd.f32 %v3967_v40, %v3957_v50  ;;  %v3982_v57 = vadd.f32 %v3978_v36, %v3968_v30  ;;  %v1500_v50 = vpop.f32.mrf.mxu2  ;;  %v7265_v63 = vld [vmem:[%s6466_s14 + $0x1d8] sm:$0xff]  ;;  %v7268_v18 = vld [vmem:[%s6466_s14 + $0x1e0] sm:$0xff]  ;;  %v7277_v36 = vld [vmem:[%s6466_s14 + $0x1e8] sm:$0xff] }
 0x29e   : > { %v2202_v53 = vadd.f32 %v2198_v0, %v2188_v19  ;;  %v2203_v5 = vadd.f32 %v2199_v16, %v2189_v1  ;;  %v3979_v59 = vmul.f32 %v5549_v54, %v7158_v4  ;;  %v3980_v35 = vmul.f32 %v5549_v54, %v7162_v6  ;;  %v1387_v4 = vpop.f32.mrf.mxu3 }
 0x29f   : > { %v2212_v37 = vmul.f32 %v5545_v17, %v7240_v55  ;;  %v2213_v49 = vmul.f32 %v5545_v17, %v7243_v58  ;;  %v3981_v39 = vmul.f32 %v5549_v54, %v7165_v14  ;;  %v3992_v25 = vmul.f32 %v5550_v42, %v7175_v24  ;;  %v5547_v14 = vld [vmem:[#allocation3 + $0x2f] ss:$0 sm:$0xff] }
 0x2a0   : > { %v2224_v2 = vmul.f32 %v5546_v7, %v7248_v9  ;;  %v2225_v32 = vmul.f32 %v5546_v7, %v7251_v23  ;;  %v3983_v8 = vadd.f32 %v3979_v59, %v3969_v29  ;;  %v3984_v33 = vadd.f32 %v3980_v35, %v3970_v46  ;;  %v1455_v59 = vpop.f32.mrf.mxu0 }
 0x2a1   : > { %v2214_v26 = vadd.f32 %v2210_v44, %v2200_v27  ;;  %v2215_v6 = vadd.f32 %v2211_v31, %v2201_v20  ;;  %v3985_v54 = vadd.f32 %v3981_v39, %v3971_v13  ;;  %v3996_v24 = vadd.f32 %v3992_v25, %v3982_v57  ;;  %v7284_v27 = vld [vmem:[%s6466_s14 + $0x1f8] sm:$0xff] }
 0x2a2   : > { %v2216_v17 = vadd.f32 %v2212_v37, %v2202_v53  ;;  %v2217_v10 = vadd.f32 %v2213_v49, %v2203_v5  ;;  %v3993_v3 = vmul.f32 %v5550_v42, %v7178_v12  ;;  %v3994_v30 = vmul.f32 %v5550_v42, %v7182_v41  ;;  %v7280_v12 = vld [vmem:[%s6466_s14 + $0x1f0] sm:$0xff]  ;;  %v5553_v53 = vld [vmem:[#allocation3 + $0xad] ss:$0 sm:$0xff] }
 0x2a3   : > { %v3995_v19 = vmul.f32 %v5550_v42, %v7185_v21  ;;  %v4006_v1 = vmul.f32 %v5551_v47, %v7195_v43  ;;  %v1453_v22 = vadd.f32 %v1452_v51, %v1339_v34  ;;  %v1501_v0 = vadd.f32 %v1500_v50, %v1387_v4  ;;  %v1342_v5 = vpop.f32.mrf.mxu1  ;;  %v7304_v50 = vld [vmem:[%s6466_s14 + $0x210] sm:$0xff] }
 0x2a4   : > { %v2226_v16 = vmul.f32 %v5546_v7, %v7262_v62  ;;  %v2227_v40 = vmul.f32 %v5546_v7, %v7265_v63  ;;  %v3997_v44 = vadd.f32 %v3993_v3, %v3983_v8  ;;  %v3998_v31 = vadd.f32 %v3994_v30, %v3984_v33 }
 0x2a5   : > { %v2228_v29 = vadd.f32 %v2224_v2, %v2214_v26  ;;  %v2238_v41 = vmul.f32 %v5547_v14, %v7268_v18  ;;  %v3999_v21 = vadd.f32 %v3995_v19, %v3985_v54  ;;  %v4010_v42 = vadd.f32 %v4006_v1, %v3996_v24  ;;  %1536 = vst [vmem:[#allocation3 + $0x30] sm:$0xff] %v1453_v22  ;;  %v7307_v26 = vld [vmem:[%s6466_s14 + $0x218] sm:$0xff] }
 0x2a6   : > { %v2229_v43 = vadd.f32 %v2225_v32, %v2215_v6  ;;  %v2230_v46 = vadd.f32 %v2226_v16, %v2216_v17  ;;  %v4007_v20 = vmul.f32 %v5551_v47, %v7198_v28  ;;  %v4008_v7 = vmul.f32 %v5551_v47, %v7202_v48  ;;  %1552 = vst [vmem:[#allocation3 + $0xb0] sm:$0xff] %v1501_v0  ;;  %v7310_v6 = vld [vmem:[%s6466_s14 + $0x220] sm:$0xff] }
 0x2a7   : > { %v2231_v13 = vadd.f32 %v2227_v40, %v2217_v10  ;;  %v2239_v57 = vmul.f32 %v5547_v14, %v7277_v36  ;;  %v4009_v34 = vmul.f32 %v5551_v47, %v7205_v52  ;;  %v4020_v51 = vmul.f32 %v5552_v11, %v7208_v38  ;;  %v7293_v52 = vld [vmem:[#allocation3 + $0xae] ss:$0 sm:$0xff]  ;;  %v7296_v38 = vld [vmem:[%s6466_s14 + $0x200] sm:$0xff] }
 0x2a8   : > { %v2240_v35 = vmul.f32 %v5547_v14, %v7280_v12  ;;  %v4011_v28 = vadd.f32 %v4007_v20, %v3997_v44  ;;  %v4012_v48 = vadd.f32 %v4008_v7, %v3998_v31  ;;  %v1456_v37 = vadd.f32 %v1455_v59, %v1342_v5  ;;  %v7299_v47 = vld [vmem:[%s6466_s14 + $0x208] sm:$0xff]  ;;  %v7327_v0 = vld [vmem:[%s6466_s14 + $0x240] sm:$0xff] }
 0x2a9   : > { %v2241_v49 = vmul.f32 %v5547_v14, %v7284_v27  ;;  %v2242_v39 = vadd.f32 %v2238_v41, %v2228_v29  ;;  %v4013_v25 = vadd.f32 %v4009_v34, %v3999_v21  ;;  %v4024_v2 = vadd.f32 %v4020_v51, %v4010_v42  ;;  %v7316_v10 = vld [vmem:[%s6466_s14 + $0x228] sm:$0xff]  ;;  %v7341_v41 = vld [vmem:[%s6466_s14 + $0x250] sm:$0xff]  ;;  %v7351_v34 = vld [vmem:[%s6466_s14 + $0x260] sm:$0xff] }
 0x2aa   : > { %v2243_v32 = vadd.f32 %v2239_v57, %v2229_v43  ;;  %v2244_v8 = vadd.f32 %v2240_v35, %v2230_v46  ;;  %v4021_v33 = vmul.f32 %v5552_v11, %v7212_v61  ;;  %v4022_v4 = vmul.f32 %v5552_v11, %v7220_v60  ;;  %1537 = vst [vmem:[#allocation3 + $0x38] sm:$0xff] %v1456_v37  ;;  %v7319_v61 = vld [vmem:[%s6466_s14 + $0x230] sm:$0xff]  ;;  %v7322_v60 = vld [vmem:[%s6466_s14 + $0x238] sm:$0xff]  ;;  %v7357_v35 = vld [vmem:[%s6466_s14 + $0x268] sm:$0xff] }
 0x2ab   : > { %v2245_v14 = vadd.f32 %v2241_v49, %v2231_v13  ;;  %v4023_v54 = vmul.f32 %v5552_v11, %v7223_v15  ;;  %v4034_v24 = vmul.f32 %v5553_v53, %v7228_v56  ;;  %v4035_v17 = vmul.f32 %v5553_v53, %v7231_v45  ;;  %v7330_v15 = vld [vmem:[%s6466_s14 + $0x248] sm:$0xff]  ;;  %v7348_v43 = vld [vmem:[%s6466_s14 + $0x258] sm:$0xff] }
 0x2ac   : > { %v4025_v3 = vadd.f32 %v4021_v33, %v4011_v28  ;;  %v4026_v30 = vadd.f32 %v4022_v4, %v4012_v48  ;;  %v4036_v19 = vmul.f32 %v5553_v53, %v7240_v55  ;;  %v4037_v1 = vmul.f32 %v5553_v53, %v7243_v58  ;;  %v5556_v22 = vld [vmem:[#allocation3 + $0x30] ss:$0 sm:$0xff]  ;;  %v5557_v40 = vld [vmem:[#allocation3 + $0x31] ss:$0 sm:$0xff]  ;;  %v5558_v44 = vld [vmem:[#allocation3 + $0x32] ss:$0 sm:$0xff] }
 0x2ad   : > { %v4027_v56 = vadd.f32 %v4023_v54, %v4013_v25  ;;  %v4038_v45 = vadd.f32 %v4034_v24, %v4024_v2  ;;  %v4048_v11 = vmul.f32 %v7293_v52, %v7248_v9  ;;  %v4049_v16 = vmul.f32 %v7293_v52, %v7251_v23  ;;  %v5559_v46 = vld [vmem:[#allocation3 + $0x33] ss:$0 sm:$0xff]  ;;  %v5555_v28 = vld [vmem:[#allocation3 + $0xaf] ss:$0 sm:$0xff]  ;;  %v7364_v33 = vld [vmem:[%s6466_s14 + $0x278] sm:$0xff] }
 0x2ae   : > { %v2252_v55 = vmul.f32 %v5556_v22, %v7296_v38  ;;  %v2253_v58 = vmul.f32 %v5556_v22, %v7299_v47  ;;  %v2254_v31 = vmul.f32 %v5556_v22, %v7304_v50  ;;  %v2255_v29 = vmul.f32 %v5556_v22, %v7307_v26 }
 0x2af   : > { %v2266_v21 = vmul.f32 %v5557_v40, %v7310_v6  ;;  %v2267_v9 = vmul.f32 %v5557_v40, %v7316_v10  ;;  %v2268_v23 = vmul.f32 %v5557_v40, %v7319_v61  ;;  %v2269_v42 = vmul.f32 %v5557_v40, %v7322_v60  ;;  %v7376_v40 = vld [vmem:[%s6466_s14 + $0x288] sm:$0xff] }
 0x2b0   : > { %v2256_v20 = vadd.f32 %v2252_v55, %v2242_v39  ;;  %v2257_v7 = vadd.f32 %v2253_v58, %v2243_v32  ;;  %v2258_v13 = vadd.f32 %v2254_v31, %v2244_v8  ;;  %v2259_v57 = vadd.f32 %v2255_v29, %v2245_v14  ;;  %v7361_v8 = vld [vmem:[%s6466_s14 + $0x270] sm:$0xff] }
 0x2b1   : > { %v4039_v51 = vadd.f32 %v4035_v17, %v4025_v3  ;;  %v2280_v53 = vmul.f32 %v5558_v44, %v7327_v0  ;;  %v2281_v5 = vmul.f32 %v5558_v44, %v7330_v15  ;;  %v2282_v59 = vmul.f32 %v5558_v44, %v7341_v41  ;;  %v5560_v3 = vld [vmem:[#allocation3 + $0x34] ss:$0 sm:$0xff] }
 0x2b2   : > { %v2270_v48 = vadd.f32 %v2266_v21, %v2256_v20  ;;  %v2271_v37 = vadd.f32 %v2267_v9, %v2257_v7  ;;  %v2272_v49 = vadd.f32 %v2268_v23, %v2258_v13  ;;  %v2273_v39 = vadd.f32 %v2269_v42, %v2259_v57  ;;  %v7391_v20 = vld [vmem:[%s6466_s14 + $0x2a0] sm:$0xff]  ;;  %v7394_v7 = vld [vmem:[%s6466_s14 + $0x2a8] sm:$0xff] }
 0x2b3   : > { %v4040_v25 = vadd.f32 %v4036_v19, %v4026_v30  ;;  %v4041_v2 = vadd.f32 %v4037_v1, %v4027_v56  ;;  %v2283_v32 = vmul.f32 %v5558_v44, %v7348_v43  ;;  %v2294_v4 = vmul.f32 %v5559_v46, %v7351_v34  ;;  %v7373_v56 = vld [vmem:[%s6466_s14 + $0x280] sm:$0xff] }
 0x2b4   : > { %v2284_v14 = vadd.f32 %v2280_v53, %v2270_v48  ;;  %v2285_v54 = vadd.f32 %v2281_v5, %v2271_v37  ;;  %v2286_v24 = vadd.f32 %v2282_v59, %v2272_v49  ;;  %v2295_v17 = vmul.f32 %v5559_v46, %v7357_v35  ;;  %v7402_v53 = vld [vmem:[%s6466_s14 + $0x2b8] sm:$0xff]  ;;  %v5562_v49 = vld [vmem:[#allocation3 + $0x36] ss:$0 sm:$0xff] }
 0x2b5   : > { %v4050_v30 = vmul.f32 %v7293_v52, %v7262_v62  ;;  %v4051_v19 = vmul.f32 %v7293_v52, %v7265_v63  ;;  %v4052_v1 = vadd.f32 %v4048_v11, %v4038_v45  ;;  %v4053_v22 = vadd.f32 %v4049_v16, %v4039_v51  ;;  %v7382_v52 = vld [vmem:[%s6466_s14 + $0x290] sm:$0xff]  ;;  %v7385_v45 = vld [vmem:[%s6466_s14 + $0x298] sm:$0xff] }
 0x2b6   : > { %v2287_v44 = vadd.f32 %v2283_v32, %v2273_v39  ;;  %v2296_v55 = vmul.f32 %v5559_v46, %v7361_v8  ;;  %v2298_v58 = vadd.f32 %v2294_v4, %v2284_v14  ;;  %v2299_v31 = vadd.f32 %v2295_v17, %v2285_v54  ;;  %v5561_v11 = vld [vmem:[#allocation3 + $0x35] ss:$0 sm:$0xff]  ;;  %v5565_v54 = vld [vmem:[#allocation3 + $0xb1] ss:$0 sm:$0xff] }
 0x2b7   : > { %v4054_v29 = vadd.f32 %v4050_v30, %v4040_v25  ;;  %v4055_v21 = vadd.f32 %v4051_v19, %v4041_v2  ;;  %v4062_v62 = vmul.f32 %v5555_v28, %v7268_v18  ;;  %v4063_v63 = vmul.f32 %v5555_v28, %v7277_v36  ;;  %v7399_v51 = vld [vmem:[%s6466_s14 + $0x2b0] sm:$0xff] }
 0x2b8   : > { %v2297_v16 = vmul.f32 %v5559_v46, %v7364_v33  ;;  %v2300_v9 = vadd.f32 %v2296_v55, %v2286_v24  ;;  %v2308_v23 = vmul.f32 %v5560_v3, %v7373_v56  ;;  %v2309_v42 = vmul.f32 %v5560_v3, %v7376_v40  ;;  %v5564_v46 = vld [vmem:[#allocation3 + $0xb0] ss:$0 sm:$0xff]  ;;  %v5566_v19 = vld [vmem:[#allocation3 + $0xb2] ss:$0 sm:$0xff] }
 0x2b9   : > { %v4064_v18 = vmul.f32 %v5555_v28, %v7280_v12  ;;  %v4065_v36 = vmul.f32 %v5555_v28, %v7284_v27  ;;  %v4066_v13 = vadd.f32 %v4062_v62, %v4052_v1  ;;  %v4067_v57 = vadd.f32 %v4063_v63, %v4053_v22  ;;  %v7408_v27 = vld [vmem:[%s6466_s14 + $0x2c0] sm:$0xff] }
 0x2ba   : > { %v2301_v5 = vadd.f32 %v2297_v16, %v2287_v44  ;;  %v2310_v59 = vmul.f32 %v5560_v3, %v7382_v52  ;;  %v2312_v48 = vadd.f32 %v2308_v23, %v2298_v58  ;;  %v2313_v37 = vadd.f32 %v2309_v42, %v2299_v31  ;;  %v7429_v42 = vld [vmem:[%s6466_s14 + $0x2d0] sm:$0xff] }
 0x2bb   : > { %v4068_v39 = vadd.f32 %v4064_v18, %v4054_v29  ;;  %v4069_v25 = vadd.f32 %v4065_v36, %v4055_v21  ;;  %v2311_v12 = vmul.f32 %v5560_v3, %v7385_v45  ;;  %v2322_v2 = vmul.f32 %v5561_v11, %v7391_v20  ;;  %v7432_v18 = vld [vmem:[%s6466_s14 + $0x2d8] sm:$0xff] }
 0x2bc   : > { %v2314_v28 = vadd.f32 %v2310_v59, %v2300_v9  ;;  %v2323_v32 = vmul.f32 %v5561_v11, %v7394_v7  ;;  %v2324_v4 = vmul.f32 %v5561_v11, %v7399_v51  ;;  %v2325_v14 = vmul.f32 %v5561_v11, %v7402_v53  ;;  %v7423_v11 = vld [vmem:[%s6466_s14 + $0x2c8] sm:$0xff] }
 0x2bd   : > { %v4076_v24 = vmul.f32 %v5564_v46, %v7296_v38  ;;  %v4077_v17 = vmul.f32 %v5564_v46, %v7299_v47  ;;  %v4078_v30 = vmul.f32 %v5564_v46, %v7304_v50  ;;  %v4079_v3 = vmul.f32 %v5564_v46, %v7307_v26  ;;  %v5567_v38 = vld [vmem:[#allocation3 + $0xb3] ss:$0 sm:$0xff] }
 0x2be   : > { %v2315_v1 = vadd.f32 %v2311_v12, %v2301_v5  ;;  %v2326_v22 = vadd.f32 %v2322_v2, %v2312_v48  ;;  %v2327_v44 = vadd.f32 %v2323_v32, %v2313_v37  ;;  %v2336_v55 = vmul.f32 %v5562_v49, %v7408_v27  ;;  %v5568_v37 = vld [vmem:[#allocation3 + $0xb4] ss:$0 sm:$0xff] }
 0x2bf   : > { %v4080_v58 = vadd.f32 %v4076_v24, %v4066_v13  ;;  %v4081_v31 = vadd.f32 %v4077_v17, %v4067_v57  ;;  %v4082_v29 = vadd.f32 %v4078_v30, %v4068_v39  ;;  %v4083_v21 = vadd.f32 %v4079_v3, %v4069_v25  ;;  %v5563_v13 = vld [vmem:[#allocation3 + $0x37] ss:$0 sm:$0xff] }
 0x2c0   : > { %v4090_v47 = vmul.f32 %v5565_v54, %v7310_v6  ;;  %v4091_v50 = vmul.f32 %v5565_v54, %v7316_v10  ;;  %v4092_v26 = vmul.f32 %v5565_v54, %v7319_v61  ;;  %v4093_v62 = vmul.f32 %v5565_v54, %v7322_v60 }
 0x2c1   : > { %v2328_v63 = vadd.f32 %v2324_v4, %v2314_v28  ;;  %v4104_v16 = vmul.f32 %v5566_v19, %v7327_v0  ;;  %v4105_v9 = vmul.f32 %v5566_v19, %v7330_v15  ;;  %v4106_v23 = vmul.f32 %v5566_v19, %v7341_v41  ;;  %v7438_v41 = vld [vmem:[%s6466_s14 + $0x2e0] sm:$0xff] }
 0x2c2   : > { %v4094_v6 = vadd.f32 %v4090_v47, %v4080_v58  ;;  %v4095_v10 = vadd.f32 %v4091_v50, %v4081_v31  ;;  %v4096_v36 = vadd.f32 %v4092_v26, %v4082_v29  ;;  %v4097_v61 = vadd.f32 %v4093_v62, %v4083_v21  ;;  %v7462_v31 = vld [vmem:[%s6466_s14 + $0x300] sm:$0xff]  ;;  %v7471_v47 = vld [vmem:[%s6466_s14 + $0x318] sm:$0xff] }
 0x2c3   : > { %v2329_v60 = vadd.f32 %v2325_v14, %v2315_v1  ;;  %v4107_v57 = vmul.f32 %v5566_v19, %v7348_v43  ;;  %v4118_v0 = vmul.f32 %v5567_v38, %v7351_v34  ;;  %v4119_v15 = vmul.f32 %v5567_v38, %v7357_v35  ;;  %v7445_v43 = vld [vmem:[%s6466_s14 + $0x2e8] sm:$0xff]  ;;  %v7448_v34 = vld [vmem:[%s6466_s14 + $0x2f0] sm:$0xff]  ;;  %v7451_v35 = vld [vmem:[%s6466_s14 + $0x2f8] sm:$0xff] }
 0x2c4   : > { %v4108_v46 = vadd.f32 %v4104_v16, %v4094_v6  ;;  %v4109_v5 = vadd.f32 %v4105_v9, %v4095_v10  ;;  %v4110_v59 = vadd.f32 %v4106_v23, %v4096_v36  ;;  %v4120_v48 = vmul.f32 %v5567_v38, %v7361_v8  ;;  %v5569_v1 = vld [vmem:[#allocation3 + $0xb5] ss:$0 sm:$0xff]  ;;  %v7475_v16 = vld [vmem:[%s6466_s14 + $0x320] sm:$0xff]  ;;  %v7484_v36 = vld [vmem:[%s6466_s14 + $0x328] sm:$0xff] }
 0x2c5   : > { %v2337_v39 = vmul.f32 %v5562_v49, %v7423_v11  ;;  %v2338_v25 = vmul.f32 %v5562_v49, %v7429_v42  ;;  %v2339_v12 = vmul.f32 %v5562_v49, %v7432_v18  ;;  %v2340_v2 = vadd.f32 %v2336_v55, %v2326_v22 }
 0x2c6   : > { %v4111_v28 = vadd.f32 %v4107_v57, %v4097_v61  ;;  %v4122_v32 = vadd.f32 %v4118_v0, %v4108_v46  ;;  %v4123_v4 = vadd.f32 %v4119_v15, %v4109_v5  ;;  %v4124_v14 = vadd.f32 %v4120_v48, %v4110_v59  ;;  %v7487_v61 = vld [vmem:[%s6466_s14 + $0x330] sm:$0xff]  ;;  %v5574_v57 = vld [vmem:[#allocation3 + $0x3a] ss:$0 sm:$0xff]  ;;  %v7508_v59 = vld [vmem:[%s6466_s14 + $0x348] sm:$0xff] }
 0x2c7   : > { %v2341_v8 = vadd.f32 %v2337_v39, %v2327_v44  ;;  %v2342_v54 = vadd.f32 %v2338_v25, %v2328_v63  ;;  %v2343_v24 = vadd.f32 %v2339_v12, %v2329_v60  ;;  %v2350_v17 = vmul.f32 %v5563_v13, %v7438_v41  ;;  %v5573_v60 = vld [vmem:[#allocation3 + $0x39] ss:$0 sm:$0xff]  ;;  %v7511_v48 = vld [vmem:[%s6466_s14 + $0x350] sm:$0xff] }
 0x2c8   : > { %v4121_v49 = vmul.f32 %v5567_v38, %v7364_v33  ;;  %v4132_v30 = vmul.f32 %v5568_v37, %v7373_v56  ;;  %v4133_v3 = vmul.f32 %v5568_v37, %v7376_v40  ;;  %v4134_v19 = vmul.f32 %v5568_v37, %v7382_v52  ;;  %v5572_v33 = vld [vmem:[#allocation3 + $0x38] ss:$0 sm:$0xff]  ;;  %v7465_v38 = vld [vmem:[%s6466_s14 + $0x308] sm:$0xff]  ;;  %v7468_v52 = vld [vmem:[%s6466_s14 + $0x310] sm:$0xff] }
 0x2c9   : > { %v2351_v22 = vmul.f32 %v5563_v13, %v7445_v43  ;;  %v2352_v44 = vmul.f32 %v5563_v13, %v7448_v34  ;;  %v2353_v55 = vmul.f32 %v5563_v13, %v7451_v35  ;;  %v2354_v58 = vadd.f32 %v2350_v17, %v2340_v2  ;;  %v7527_v17 = vld [vmem:[%s6466_s14 + $0x370] sm:$0xff] }
 0x2ca   : > { %v4125_v29 = vadd.f32 %v4121_v49, %v4111_v28  ;;  %v4136_v56 = vadd.f32 %v4132_v30, %v4122_v32  ;;  %v4137_v21 = vadd.f32 %v4133_v3, %v4123_v4  ;;  %v4138_v40 = vadd.f32 %v4134_v19, %v4124_v14  ;;  %v7517_v28 = vld [vmem:[%s6466_s14 + $0x360] sm:$0xff]  ;;  %v5575_v32 = vld [vmem:[#allocation3 + $0x3b] ss:$0 sm:$0xff]  ;;  %v7532_v30 = vpop.f32.mrf.mxu3  ;;  %v7534_v3 = vpop.f32.mrf.mxu2 }
 0x2cb   : > { %v2355_v50 = vadd.f32 %v2351_v22, %v2341_v8  ;;  %v2356_v26 = vadd.f32 %v2352_v44, %v2342_v54  ;;  %v2357_v62 = vadd.f32 %v2353_v55, %v2343_v24  ;;  %v4135_v63 = vmul.f32 %v5568_v37, %v7385_v45  ;;  %v7514_v37 = vld [vmem:[%s6466_s14 + $0x358] sm:$0xff]  ;;  %v7524_v24 = vld [vmem:[%s6466_s14 + $0x368] sm:$0xff]  ;;  %v7541_v55 = vld [vmem:[%s6466_s14 + $0x380] sm:$0xff] }
 0x2cc   : > { %v4146_v9 = vmul.f32 %v5569_v1, %v7391_v20  ;;  %v4147_v23 = vmul.f32 %v5569_v1, %v7394_v7  ;;  %v4148_v6 = vmul.f32 %v5569_v1, %v7399_v51  ;;  %v7481_v10 = vmul.f32 %v5569_v1, %v7402_v53  ;;  %v7494_v51 = vld [vmem:[%s6466_s14 + $0x338] sm:$0xff]  ;;  %v7497_v53 = vld [vmem:[%s6466_s14 + $0x340] sm:$0xff]  ;;  %9014 = vst [vmem:[#allocation12_spill] sm:$0xff] %v7541_v55 }
 0x2cd   : > { %v2364_v45 = vmul.f32 %v5572_v33, %v7462_v31  ;;  %v2365_v13 = vmul.f32 %v5572_v33, %v7465_v38  ;;  %v2366_v20 = vmul.f32 %v5572_v33, %v7468_v52  ;;  %v2367_v7 = vmul.f32 %v5572_v33, %v7471_v47  ;;  %v7530_v49 = vld [vmem:[%s6466_s14 + $0x378] sm:$0xff] }
 0x2ce   : > { %v7499_v0 = vadd.f32 %v4135_v63, %v4125_v29  ;;  %v7501_v15 = vadd.f32 %v4146_v9, %v4136_v56  ;;  %v7503_v46 = vadd.f32 %v4147_v23, %v4137_v21  ;;  %v7505_v5 = vadd.f32 %v4148_v6, %v4138_v40  ;;  %9013 = vst [vmem:[#allocation11_spill] sm:$0xff] %v7530_v49  ;;  %v7544_v40 = vld [vmem:[%s6466_s14 + $0x388] sm:$0xff]  ;;  %v7557_v6 = vld [vmem:[%s6466_s14 + $0x3a0] sm:$0xff] }
 0x2cf   : > { %v2368_v39 = vadd.f32 %v2364_v45, %v2354_v58  ;;  %v2369_v25 = vadd.f32 %v2365_v13, %v2355_v50  ;;  %v2370_v12 = vadd.f32 %v2366_v20, %v2356_v26  ;;  %v2371_v2 = vadd.f32 %v2367_v7, %v2357_v62  ;;  %v5576_v58 = vld [vmem:[#allocation3 + $0x3c] ss:$0 sm:$0xff]  ;;  %9015 = vst [vmem:[#allocation13_spill] sm:$0xff] %v7544_v40  ;;  %v7547_v50 = vld [vmem:[%s6466_s14 + $0x390] sm:$0xff] }
 0x2d0   : > { %v2378_v4 = vmul.f32 %v5573_v60, %v7475_v16  ;;  %v2379_v14 = vmul.f32 %v5573_v60, %v7484_v36  ;;  %v2380_v8 = vmul.f32 %v5573_v60, %v7487_v61  ;;  %v2381_v54 = vmul.f32 %v5573_v60, %v7494_v51  ;;  %9016 = vst [vmem:[#allocation14_spill] sm:$0xff] %v7547_v50  ;;  %v7550_v26 = vld [vmem:[%s6466_s14 + $0x398] sm:$0xff] }
 0x2d1   : > { %v2392_v19 = vmul.f32 %v5574_v57, %v7497_v53  ;;  %v2393_v1 = vmul.f32 %v5574_v57, %v7508_v59  ;;  %v2394_v22 = vmul.f32 %v5574_v57, %v7511_v48  ;;  %v2395_v44 = vmul.f32 %v5574_v57, %v7514_v37  ;;  %9017 = vst [vmem:[#allocation15_spill] sm:$0xff] %v7550_v26  ;;  %v5577_v60 = vld [vmem:[#allocation3 + $0x3d] ss:$0 sm:$0xff]  ;;  %v7560_v57 = vld [vmem:[%s6466_s14 + $0x3a8] sm:$0xff] }
 0x2d2   : > { %v2382_v33 = vadd.f32 %v2378_v4, %v2368_v39  ;;  %v2383_v29 = vadd.f32 %v2379_v14, %v2369_v25  ;;  %v2384_v56 = vadd.f32 %v2380_v8, %v2370_v12  ;;  %v2385_v21 = vadd.f32 %v2381_v54, %v2371_v2  ;;  %9018 = vst [vmem:[#allocation16_spill] sm:$0xff] %v7557_v6  ;;  %v7563_v39 = vld [vmem:[%s6466_s14 + $0x3b0] sm:$0xff]  ;;  %v7566_v25 = vld [vmem:[%s6466_s14 + $0x3b8] sm:$0xff]  ;;  %v7573_v14 = vld [vmem:[%s6466_s14 + $0x3c0] sm:$0xff] }
 0x2d3   : > { %v2406_v62 = vmul.f32 %v5575_v32, %v7517_v28  ;;  %v2407_v63 = vmul.f32 %v5575_v32, %v7524_v24  ;;  %v2408_v9 = vmul.f32 %v5575_v32, %v7527_v17  ;;  %v2409_v23 = vmul.f32 %v5575_v32, %v7530_v49  ;;  %9019 = vst [vmem:[#allocation17_spill] sm:$0xff] %v7560_v57  ;;  %v5578_v8 = vld [vmem:[#allocation3 + $0x3e] ss:$0 sm:$0xff] }
 0x2d4   : > { %v2396_v45 = vadd.f32 %v2392_v19, %v2382_v33  ;;  %v2397_v13 = vadd.f32 %v2393_v1, %v2383_v29  ;;  %v2398_v20 = vadd.f32 %v2394_v22, %v2384_v56  ;;  %v2399_v7 = vadd.f32 %v2395_v44, %v2385_v21  ;;  %9020 = vst [vmem:[#allocation18_spill] sm:$0xff] %v7563_v39  ;;  %v7576_v44 = vld [vmem:[%s6466_s14 + $0x3c8] sm:$0xff]  ;;  %v7579_v33 = vld [vmem:[%s6466_s14 + $0x3d0] sm:$0xff]  ;;  %v7582_v29 = vld [vmem:[%s6466_s14 + $0x3d8] sm:$0xff] }
 0x2d5   : > { %9021 = vst [vmem:[#allocation19_spill] sm:$0xff] %v7566_v25  ;;  %v2420_v12 = vmul.f32 %v5576_v58, %v7541_v55  ;;  %v2421_v2 = vmul.f32 %v5576_v58, %v7544_v40  ;;  %v2422_v32 = vmul.f32 %v5576_v58, %v7547_v50  ;;  %v2423_v4 = vmul.f32 %v5576_v58, %v7550_v26  ;;  %v7595_v26 = vld [vmem:[%s6466_s14 + $0x3f0] sm:$0xff]  ;;  %v7598_v50 = vld [vmem:[%s6466_s14 + $0x3f8] sm:$0xff]  ;;  %v1458_v40 = vpop.f32.mrf.mxu0 }
 0x2d6   : > { %9022 = vst [vmem:[#allocation20_spill] sm:$0xff] %v7573_v14  ;;  %v2410_v54 = vadd.f32 %v2406_v62, %v2396_v45  ;;  %v2411_v19 = vadd.f32 %v2407_v63, %v2397_v13  ;;  %v2412_v1 = vadd.f32 %v2408_v9, %v2398_v20  ;;  %v2413_v22 = vadd.f32 %v2409_v23, %v2399_v7  ;;  %v7589_v63 = vld [vmem:[%s6466_s14 + $0x3e0] sm:$0xff]  ;;  %v5579_v9 = vld [vmem:[#allocation3 + $0x3f] ss:$0 sm:$0xff]  ;;  %v7592_v7 = vld [vmem:[%s6466_s14 + $0x3e8] sm:$0xff] }
 0x2d7   : > { %9023 = vst [vmem:[#allocation21_spill] sm:$0xff] %v7576_v44  ;;  %v2434_v56 = vmul.f32 %v5577_v60, %v7557_v6  ;;  %v2435_v58 = vmul.f32 %v5577_v60, %v7560_v57  ;;  %v2436_v21 = vmul.f32 %v5577_v60, %v7563_v39  ;;  %v2437_v62 = vmul.f32 %v5577_v60, %v7566_v25  ;;  %v1345_v25 = vpop.f32.mrf.mxu1 }
 0x2d8   : > { %9024 = vst [vmem:[#allocation22_spill] sm:$0xff] %v7579_v33  ;;  %v2424_v45 = vadd.f32 %v2420_v12, %v2410_v54  ;;  %v2425_v23 = vadd.f32 %v2421_v2, %v2411_v19  ;;  %v2426_v13 = vadd.f32 %v2422_v32, %v2412_v1  ;;  %v2427_v20 = vadd.f32 %v2423_v4, %v2413_v22  ;;  %v1393_v54 = vpop.f32.mrf.mxu3  ;;  %v1506_v19 = vpop.f32.mrf.mxu2  ;;  %v5570_v1 = vld [vmem:[#allocation3 + $0xb6] ss:$0 sm:$0xff] }
 0x2d9   : > { %9025 = vst [vmem:[#allocation23_spill] sm:$0xff] %v7582_v29  ;;  %v2448_v6 = vmul.f32 %v5578_v8, %v7573_v14  ;;  %v2449_v57 = vmul.f32 %v5578_v8, %v7576_v44  ;;  %v2450_v39 = vmul.f32 %v5578_v8, %v7579_v33  ;;  %v2451_v60 = vmul.f32 %v5578_v8, %v7582_v29 }
 0x2da   : > { %9026 = vst [vmem:[#allocation24_spill] sm:$0xff] %v7595_v26  ;;  %v2438_v12 = vadd.f32 %v2434_v56, %v2424_v45  ;;  %v2439_v2 = vadd.f32 %v2435_v58, %v2425_v23  ;;  %v2440_v32 = vadd.f32 %v2436_v21, %v2426_v13  ;;  %v2441_v4 = vadd.f32 %v2437_v62, %v2427_v20 }
 0x2db   : > { %v2462_v22 = vmul.f32 %v5579_v9, %v7589_v63  ;;  %v2463_v55 = vmul.f32 %v5579_v9, %v7592_v7  ;;  %v2464_v14 = vmul.f32 %v5579_v9, %v7595_v26  ;;  %v2465_v44 = vmul.f32 %v5579_v9, %v7598_v50 }
 0x2dc   : > { %v2452_v33 = vadd.f32 %v2448_v6, %v2438_v12  ;;  %v2453_v49 = vadd.f32 %v2449_v57, %v2439_v2  ;;  %v2454_v8 = vadd.f32 %v2450_v39, %v2440_v32  ;;  %v2455_v29 = vadd.f32 %v2451_v60, %v2441_v4 }
 0x2dd   : > { %v4153_v56 = vadd.f32 %v7481_v10, %v7499_v0  ;;  %v1504_v58 = vadd.f32 %v7534_v3, %v7532_v30  ;;  %v1459_v21 = vadd.f32 %v1458_v40, %v1345_v25  ;;  %v1507_v62 = vadd.f32 %v1506_v19, %v1393_v54  ;;  %v5571_v0 = vld [vmem:[#allocation3 + $0xb7] ss:$0 sm:$0xff] }
 0x2de   : > { %v2466_v45 = vadd.f32 %v2462_v22, %v2452_v33  ;;  %v2467_v23 = vadd.f32 %v2463_v55, %v2453_v49  ;;  %v2468_v13 = vadd.f32 %v2464_v14, %v2454_v8  ;;  %v2469_v20 = vadd.f32 %v2465_v44, %v2455_v29 }
 0x2df   : > { %v4160_v26 = vmul.f32 %v5570_v1, %v7408_v27  ;;  %v4161_v6 = vmul.f32 %v5570_v1, %v7423_v11  ;;  %v4162_v57 = vmul.f32 %v5570_v1, %v7429_v42  ;;  %1553 = vst [vmem:[#allocation3 + $0xb8] sm:$0xff] %v1504_v58  ;;  %v4163_v10 = vmul.f32 %v5570_v1, %v7432_v18 }
 0x2e0   : > { %v2470_v39 = vmax.f32 %v2466_v45, 0.0  ;;  %v2471_v30 = vmax.f32 %v2467_v23, 0.0  ;;  %v2472_v3 = vmax.f32 %v2468_v13, 0.0  ;;  %1538 = vst [vmem:[#allocation3 + $0x40] sm:$0xff] %v1459_v21  ;;  %v2473_v49 = vmax.f32 %v2469_v20, 0.0  ;;  %v9027_v21 = vld [vmem:[#allocation11_spill] sm:$0xff] }
 0x2e1   : > { %1554 = vst [vmem:[#allocation3 + $0xc0] sm:$0xff] %v1507_v62  ;;  %v4164_v27 = vadd.f32 %v4160_v26, %v7501_v15  ;;  %v4165_v55 = vadd.f32 %v4161_v6, %v7503_v46  ;;  %v4166_v11 = vadd.f32 %v4162_v57, %v7505_v5  ;;  %v4167_v40 = vadd.f32 %v4163_v10, %v4153_v56  ;;  %v9028_v13 = vld [vmem:[#allocation12_spill] sm:$0xff]  ;;  %v9029_v20 = vld [vmem:[#allocation13_spill] sm:$0xff]  ;;  %v9030_v57 = vld [vmem:[#allocation14_spill] sm:$0xff] }
 0x2e2   : > { %2474 = vst [vmem:[%s6958_s8 + $0x20] sm:$0xff] %v2470_v39  ;;  %v4174_v42 = vmul.f32 %v5571_v0, %v7438_v41  ;;  %v4175_v18 = vmul.f32 %v5571_v0, %v7445_v43  ;;  %v4176_v25 = vmul.f32 %v5571_v0, %v7448_v34  ;;  %v4177_v14 = vmul.f32 %v5571_v0, %v7451_v35  ;;  %v9031_v0 = vld [vmem:[#allocation15_spill] sm:$0xff] }
 0x2e3   : > { %2475 = vst [vmem:[%s6958_s8 + $0x28] sm:$0xff] %v2471_v30 }
 0x2e4   : > { %2476 = vst [vmem:[%s6958_s8 + $0x30] sm:$0xff] %v2472_v3  ;;  %v4178_v44 = vadd.f32 %v4174_v42, %v4164_v27  ;;  %v4179_v33 = vadd.f32 %v4175_v18, %v4165_v55  ;;  %v4180_v15 = vadd.f32 %v4176_v25, %v4166_v11  ;;  %v4181_v26 = vadd.f32 %v4177_v14, %v4167_v40  ;;  %v9033_v55 = vld [vmem:[#allocation17_spill] sm:$0xff]  ;;  %v9034_v40 = vld [vmem:[#allocation18_spill] sm:$0xff]  ;;  %v9035_v18 = vld [vmem:[#allocation19_spill] sm:$0xff] }
 0x2e5   : > { %2477 = vst [vmem:[%s6958_s8 + $0x38] sm:$0xff] %v2473_v49  ;;  %v9032_v49 = vld [vmem:[#allocation16_spill] sm:$0xff] }
 0x2e6   : > { %v5580_v46 = vld [vmem:[#allocation3 + $0xb8] ss:$0 sm:$0xff]  ;;  %v5581_v29 = vld [vmem:[#allocation3 + $0xb9] ss:$0 sm:$0xff]  ;;  %v5582_v5 = vld [vmem:[#allocation3 + $0xba] ss:$0 sm:$0xff] }
 0x2e7   : > { %v4188_v9 = vmul.f32 %v5580_v46, %v7462_v31  ;;  %v4189_v60 = vmul.f32 %v5580_v46, %v7465_v38  ;;  %v4190_v41 = vmul.f32 %v5580_v46, %v7468_v52  ;;  %v4191_v43 = vmul.f32 %v5580_v46, %v7471_v47  ;;  %v5583_v32 = vld [vmem:[#allocation3 + $0xbb] ss:$0 sm:$0xff]  ;;  %v5587_v14 = vld [vmem:[#allocation3 + $0xbf] ss:$0 sm:$0xff]  ;;  %v9036_v46 = vld [vmem:[#allocation20_spill] sm:$0xff] }
 0x2e8   : > { %v4202_v34 = vmul.f32 %v5581_v29, %v7475_v16  ;;  %v4203_v35 = vmul.f32 %v5581_v29, %v7484_v36  ;;  %v4204_v12 = vmul.f32 %v5581_v29, %v7487_v61  ;;  %v4205_v2 = vmul.f32 %v5581_v29, %v7494_v51  ;;  %v5584_v16 = vld [vmem:[#allocation3 + $0xbc] ss:$0 sm:$0xff] }
 0x2e9   : > { %v4192_v4 = vadd.f32 %v4188_v9, %v4178_v44  ;;  %v4193_v54 = vadd.f32 %v4189_v60, %v4179_v33  ;;  %v4194_v19 = vadd.f32 %v4190_v41, %v4180_v15  ;;  %v4195_v1 = vadd.f32 %v4191_v43, %v4181_v26  ;;  %v9038_v60 = vld [vmem:[#allocation22_spill] sm:$0xff]  ;;  %v9039_v43 = vld [vmem:[#allocation23_spill] sm:$0xff] }
 0x2ea   : > { %v4216_v31 = vmul.f32 %v5582_v5, %v7497_v53  ;;  %v4217_v38 = vmul.f32 %v5582_v5, %v7508_v59  ;;  %v4218_v52 = vmul.f32 %v5582_v5, %v7511_v48  ;;  %v4219_v47 = vmul.f32 %v5582_v5, %v7514_v37  ;;  %v5585_v53 = vld [vmem:[#allocation3 + $0xbd] ss:$0 sm:$0xff]  ;;  %v9037_v5 = vld [vmem:[#allocation21_spill] sm:$0xff] }
 0x2eb   : > { %v4206_v22 = vadd.f32 %v4202_v34, %v4192_v4  ;;  %v4207_v36 = vadd.f32 %v4203_v35, %v4193_v54  ;;  %v4208_v8 = vadd.f32 %v4204_v12, %v4194_v19  ;;  %v4209_v61 = vadd.f32 %v4205_v2, %v4195_v1  ;;  %v9040_v19 = vld [vmem:[#allocation24_spill] sm:$0xff] }
 0x2ec   : > { %v4230_v51 = vmul.f32 %v5583_v32, %v7517_v28  ;;  %v4231_v56 = vmul.f32 %v5583_v32, %v7524_v24  ;;  %v4232_v58 = vmul.f32 %v5583_v32, %v7527_v17  ;;  %v4233_v62 = vmul.f32 %v5583_v32, %v9027_v21  ;;  %v5586_v28 = vld [vmem:[#allocation3 + $0xbe] ss:$0 sm:$0xff]  ;;  %v7663_v21 = vld [vmem:[%s6466_s14 + $0x8] sm:$0xff] }
 0x2ed   : > { %v4220_v45 = vadd.f32 %v4216_v31, %v4206_v22  ;;  %v4221_v59 = vadd.f32 %v4217_v38, %v4207_v36  ;;  %v4222_v23 = vadd.f32 %v4218_v52, %v4208_v8  ;;  %v4223_v48 = vadd.f32 %v4219_v47, %v4209_v61 }
 0x2ee   : > { %v4244_v37 = vmul.f32 %v5584_v16, %v9028_v13  ;;  %v4245_v6 = vmul.f32 %v5584_v16, %v9029_v20  ;;  %v4246_v10 = vmul.f32 %v5584_v16, %v9030_v57  ;;  %v4247_v39 = vmul.f32 %v5584_v16, %v9031_v0  ;;  %v7679_v13 = vld [vmem:[%s6466_s14 + $0x20] sm:$0xff]  ;;  %v7685_v20 = vld [vmem:[%s6466_s14 + $0x30] sm:$0xff]  ;;  %v7693_v0 = vld [vmem:[%s6473_s15 + $0x8] sm:$0xff] }
 0x2ef   : > { %v4234_v30 = vadd.f32 %v4230_v51, %v4220_v45  ;;  %v4235_v24 = vadd.f32 %v4231_v56, %v4221_v59  ;;  %v4236_v3 = vadd.f32 %v4232_v58, %v4222_v23  ;;  %v4237_v17 = vadd.f32 %v4233_v62, %v4223_v48  ;;  %v7660_v58 = vld [vmem:[%s6466_s14] sm:$0xff]  ;;  %v7667_v62 = vld [vmem:[%s6466_s14 + $0x10] sm:$0xff] }
 0x2f0   : > { %v4258_v27 = vmul.f32 %v5585_v53, %v9032_v49  ;;  %v4259_v11 = vmul.f32 %v5585_v53, %v9033_v55  ;;  %v4260_v42 = vmul.f32 %v5585_v53, %v9034_v40  ;;  %v4261_v25 = vmul.f32 %v5585_v53, %v9035_v18  ;;  %v7672_v53 = vld [vmem:[%s6466_s14 + $0x18] sm:$0xff]  ;;  %v5589_v48 = vld [vmem:[#allocation3 + $0x41] ss:$0 sm:$0xff]  ;;  %v7713_v40 = vld [vmem:[%s6466_s14 + $0x50] sm:$0xff] }
 0x2f1   : > { %v4248_v44 = vadd.f32 %v4244_v37, %v4234_v30  ;;  %v4249_v33 = vadd.f32 %v4245_v6, %v4235_v24  ;;  %v4250_v15 = vadd.f32 %v4246_v10, %v4236_v3  ;;  %v4251_v26 = vadd.f32 %v4247_v39, %v4237_v17  ;;  %v7682_v37 = vld [vmem:[%s6466_s14 + $0x28] sm:$0xff]  ;;  %v7689_v57 = vld [vmem:[%s6473_s15] sm:$0xff]  ;;  %v7700_v24 = vld [vmem:[%s6473_s15 + $0x10] sm:$0xff] }
 0x2f2   : > { %v4272_v29 = vmul.f32 %v5586_v28, %v9036_v46  ;;  %v4273_v9 = vmul.f32 %v5586_v28, %v9037_v5  ;;  %v4274_v41 = vmul.f32 %v5586_v28, %v9038_v60  ;;  %v4275_v34 = vmul.f32 %v5586_v28, %v9039_v43  ;;  %v7697_v28 = vld [vmem:[%s6466_s14 + $0x38] sm:$0xff]  ;;  %v5590_v30 = vld [vmem:[#allocation3 + $0x42] ss:$0 sm:$0xff]  ;;  %v7730_v60 = vld [vmem:[%s6466_s14 + $0x68] sm:$0xff] }
 0x2f3   : > { %v4262_v35 = vadd.f32 %v4258_v27, %v4248_v44  ;;  %v4263_v12 = vadd.f32 %v4259_v11, %v4249_v33  ;;  %v4264_v2 = vadd.f32 %v4260_v42, %v4250_v15  ;;  %v4265_v32 = vadd.f32 %v4261_v25, %v4251_v26  ;;  %v7707_v55 = vld [vmem:[%s6466_s14 + $0x40] sm:$0xff]  ;;  %v7710_v11 = vld [vmem:[%s6466_s14 + $0x48] sm:$0xff]  ;;  %v7716_v42 = vld [vmem:[%s6473_s15 + $0x18] sm:$0xff] }
 0x2f4   : > { %v4286_v4 = vmul.f32 %v5587_v14, %v7589_v63  ;;  %v4287_v54 = vmul.f32 %v5587_v14, %v7592_v7  ;;  %v4288_v1 = vmul.f32 %v5587_v14, %v9040_v19  ;;  %v4289_v31 = vmul.f32 %v5587_v14, %v7598_v50  ;;  %v5588_v50 = vld [vmem:[#allocation3 + $0x40] ss:$0 sm:$0xff]  ;;  %v7721_v14 = vld [vmem:[%s6466_s14 + $0x58] sm:$0xff]  ;;  %v5591_v15 = vld [vmem:[#allocation3 + $0x43] ss:$0 sm:$0xff] }
 0x2f5   : > { %v4276_v38 = vadd.f32 %v4272_v29, %v4262_v35  ;;  %v4277_v52 = vadd.f32 %v4273_v9, %v4263_v12  ;;  %v4278_v47 = vadd.f32 %v4274_v41, %v4264_v2  ;;  %v4279_v16 = vadd.f32 %v4275_v34, %v4265_v32  ;;  %v7727_v9 = vld [vmem:[%s6466_s14 + $0x60] sm:$0xff]  ;;  %v7733_v41 = vld [vmem:[%s6466_s14 + $0x70] sm:$0xff]  ;;  %v7737_v35 = vld [vmem:[%s6466_s14 + $0x78] sm:$0xff] }
 0x2f6   : > { %v2484_v45 = vmul.f32 %v5588_v50, %v7660_v58  ;;  %v2485_v59 = vmul.f32 %v5588_v50, %v7663_v21  ;;  %v2486_v23 = vmul.f32 %v5588_v50, %v7667_v62  ;;  %v2487_v6 = vmul.f32 %v5588_v50, %v7672_v53 }
 0x2f7   : > { %v4290_v22 = vadd.f32 %v4286_v4, %v4276_v38  ;;  %v4291_v36 = vadd.f32 %v4287_v54, %v4277_v52  ;;  %v4292_v63 = vadd.f32 %v4288_v1, %v4278_v47  ;;  %v4293_v7 = vadd.f32 %v4289_v31, %v4279_v16  ;;  %v5592_v38 = vld [vmem:[#allocation3 + $0x44] ss:$0 sm:$0xff]  ;;  %v7747_v47 = vld [vmem:[%s6466_s14 + $0x88] sm:$0xff]  ;;  %v7750_v16 = vld [vmem:[%s6466_s14 + $0x90] sm:$0xff] }
 0x2f8   : > { %v2488_v10 = vadd.f32 %v7689_v57, %v2484_v45  ;;  %v2489_v39 = vadd.f32 %v7693_v0, %v2485_v59  ;;  %v2490_v3 = vadd.f32 %v7700_v24, %v2486_v23  ;;  %v2498_v17 = vmul.f32 %v5589_v48, %v7679_v13  ;;  %v7744_v52 = vld [vmem:[%s6466_s14 + $0x80] sm:$0xff]  ;;  %v7762_v59 = vld [vmem:[%s6466_s14 + $0xa8] sm:$0xff]  ;;  %v7765_v23 = vld [vmem:[%s6466_s14 + $0xb0] sm:$0xff] }
 0x2f9   : > { %v4294_v8 = vmax.f32 %v4290_v22, 0.0  ;;  %v4295_v61 = vmax.f32 %v4291_v36, 0.0  ;;  %v4296_v51 = vmax.f32 %v4292_v63, 0.0  ;;  %v4297_v56 = vmax.f32 %v4293_v7, 0.0  ;;  %v7753_v7 = vld [vmem:[%s6466_s14 + $0x98] sm:$0xff] }
 0x2fa   : > { %v2499_v49 = vmul.f32 %v5589_v48, %v7682_v37  ;;  %v2500_v27 = vmul.f32 %v5589_v48, %v7685_v20  ;;  %v2491_v18 = vadd.f32 %v7716_v42, %v2487_v6  ;;  %v2501_v25 = vmul.f32 %v5589_v48, %v7697_v28  ;;  %v5593_v45 = vld [vmem:[#allocation3 + $0x45] ss:$0 sm:$0xff]  ;;  %v5596_v48 = vld [vmem:[#allocation3 + $0xc0] ss:$0 sm:$0xff]  ;;  %v1348_v6 = vpop.f32.mrf.mxu1 }
 0x2fb   : > { %4298 = vst [vmem:[%s6958_s8 + $0xa0] sm:$0xff] %v4294_v8  ;;  %v2512_v44 = vmul.f32 %v5590_v30, %v7707_v55  ;;  %v2513_v33 = vmul.f32 %v5590_v30, %v7710_v11  ;;  %v2502_v26 = vadd.f32 %v2498_v17, %v2488_v10  ;;  %v2514_v5 = vmul.f32 %v5590_v30, %v7713_v40  ;;  %v1461_v10 = vpop.f32.mrf.mxu0 }
 0x2fc   : > { %4299 = vst [vmem:[%s6958_s8 + $0xa8] sm:$0xff] %v4295_v61  ;;  %v2503_v46 = vadd.f32 %v2499_v49, %v2489_v39  ;;  %v2504_v29 = vadd.f32 %v2500_v27, %v2490_v3  ;;  %v2505_v43 = vadd.f32 %v2501_v25, %v2491_v18  ;;  %v2515_v34 = vmul.f32 %v5590_v30, %v7721_v14  ;;  %v7769_v49 = vld [vmem:[%s6466_s14 + $0xb8] sm:$0xff]  ;;  %v5594_v27 = vld [vmem:[#allocation3 + $0x46] ss:$0 sm:$0xff] }
 0x2fd   : > { %4300 = vst [vmem:[%s6958_s8 + $0xb0] sm:$0xff] %v4296_v51  ;;  %v2526_v12 = vmul.f32 %v5591_v15, %v7727_v9  ;;  %v2527_v2 = vmul.f32 %v5591_v15, %v7730_v60  ;;  %v2516_v32 = vadd.f32 %v2512_v44, %v2502_v26  ;;  %v2528_v19 = vmul.f32 %v5591_v15, %v7733_v41  ;;  %v1396_v26 = vpop.f32.mrf.mxu3 }
 0x2fe   : > { %4301 = vst [vmem:[%s6958_s8 + $0xb8] sm:$0xff] %v4297_v56  ;;  %v2517_v4 = vadd.f32 %v2513_v33, %v2503_v46  ;;  %v2518_v54 = vadd.f32 %v2514_v5, %v2504_v29  ;;  %v2519_v1 = vadd.f32 %v2515_v34, %v2505_v43  ;;  %v2529_v31 = vmul.f32 %v5591_v15, %v7737_v35  ;;  %v7759_v56 = vld [vmem:[%s6466_s14 + $0xa0] sm:$0xff]  ;;  %v1509_v46 = vpop.f32.mrf.mxu2  ;;  %v7778_v29 = vld [vmem:[%s6466_s14 + $0xc8] sm:$0xff]  ;;  %v7781_v5 = vld [vmem:[%s6466_s14 + $0xd0] sm:$0xff] }
 0x2ff   : > { %v2530_v22 = vadd.f32 %v2526_v12, %v2516_v32  ;;  %v2540_v61 = vmul.f32 %v5592_v38, %v7744_v52  ;;  %v2541_v51 = vmul.f32 %v5592_v38, %v7747_v47  ;;  %v2542_v50 = vmul.f32 %v5592_v38, %v7750_v16  ;;  %v7775_v15 = vld [vmem:[%s6466_s14 + $0xc0] sm:$0xff]  ;;  %v7784_v43 = vld [vmem:[%s6466_s14 + $0xd8] sm:$0xff] }
 0x300   : > { %v2531_v36 = vadd.f32 %v2527_v2, %v2517_v4  ;;  %v2532_v63 = vadd.f32 %v2528_v19, %v2518_v54  ;;  %v2533_v8 = vadd.f32 %v2529_v31, %v2519_v1  ;;  %v2543_v39 = vmul.f32 %v5592_v38, %v7753_v7  ;;  %v5595_v31 = vld [vmem:[#allocation3 + $0x47] ss:$0 sm:$0xff] }
 0x301   : > { %v2544_v30 = vadd.f32 %v2540_v61, %v2530_v22  ;;  %v2554_v25 = vmul.f32 %v5593_v45, %v7759_v56  ;;  %v2555_v44 = vmul.f32 %v5593_v45, %v7762_v59  ;;  %v2556_v33 = vmul.f32 %v5593_v45, %v7765_v23  ;;  %v7793_v22 = vld [vmem:[%s6466_s14 + $0xe0] sm:$0xff]  ;;  %v7799_v61 = vld [vmem:[%s6466_s14 + $0xe8] sm:$0xff] }
 0x302   : > { %v2545_v3 = vadd.f32 %v2541_v51, %v2531_v36  ;;  %v2546_v17 = vadd.f32 %v2542_v50, %v2532_v63  ;;  %v2547_v18 = vadd.f32 %v2543_v39, %v2533_v8  ;;  %v4308_v34 = vmul.f32 %v5596_v48, %v7660_v58  ;;  %v5597_v36 = vld [vmem:[#allocation3 + $0xc1] ss:$0 sm:$0xff]  ;;  %v7802_v51 = vld [vmem:[%s6466_s14 + $0xf0] sm:$0xff] }
 0x303   : > { %v4309_v12 = vmul.f32 %v5596_v48, %v7663_v21  ;;  %v4310_v2 = vmul.f32 %v5596_v48, %v7667_v62  ;;  %v4311_v32 = vmul.f32 %v5596_v48, %v7672_v53  ;;  %v2557_v4 = vmul.f32 %v5593_v45, %v7769_v49 }
 0x304   : > { %v2558_v54 = vadd.f32 %v2554_v25, %v2544_v30  ;;  %v2559_v19 = vadd.f32 %v2555_v44, %v2545_v3  ;;  %v2560_v1 = vadd.f32 %v2556_v33, %v2546_v17  ;;  %v2568_v38 = vmul.f32 %v5594_v27, %v7775_v15  ;;  %v7810_v17 = vld [vmem:[%s6466_s14 + $0xf8] sm:$0xff]  ;;  %v1464_v25 = vpop.f32.mrf.mxu0 }
 0x305   : > { %v1462_v58 = vadd.f32 %v1461_v10, %v1348_v6  ;;  %v1510_v63 = vadd.f32 %v1509_v46, %v1396_v26  ;;  %v2561_v21 = vadd.f32 %v2557_v4, %v2547_v18  ;;  %v2569_v62 = vmul.f32 %v5594_v27, %v7778_v29  ;;  %v5598_v18 = vld [vmem:[#allocation3 + $0xc2] ss:$0 sm:$0xff]  ;;  %v5599_v46 = vld [vmem:[#allocation3 + $0xc3] ss:$0 sm:$0xff] }
 0x306   : > { %v2570_v53 = vmul.f32 %v5594_v27, %v7781_v5  ;;  %v2571_v8 = vmul.f32 %v5594_v27, %v7784_v43  ;;  %v4312_v50 = vadd.f32 %v7689_v57, %v4308_v34  ;;  %v4313_v45 = vadd.f32 %v7693_v0, %v4309_v12 }
 0x307   : > { %v4314_v48 = vadd.f32 %v7700_v24, %v4310_v2  ;;  %v4315_v6 = vadd.f32 %v7716_v42, %v4311_v32  ;;  %1539 = vst [vmem:[#allocation3 + $0x48] sm:$0xff] %v1462_v58  ;;  %v2572_v10 = vadd.f32 %v2568_v38, %v2558_v54  ;;  %v2573_v39 = vadd.f32 %v2569_v62, %v2559_v19  ;;  %v1351_v42 = vpop.f32.mrf.mxu1  ;;  %v7823_v19 = vld [vmem:[%s6466_s14 + $0x108] sm:$0xff]  ;;  %v7829_v38 = vld [vmem:[%s6466_s14 + $0x118] sm:$0xff] }
 0x308   : > { %v2574_v30 = vadd.f32 %v2570_v53, %v2560_v1  ;;  %v2582_v3 = vmul.f32 %v5595_v31, %v7793_v22  ;;  %1555 = vst [vmem:[#allocation3 + $0xc8] sm:$0xff] %v1510_v63  ;;  %v4322_v27 = vmul.f32 %v5597_v36, %v7679_v13  ;;  %v4323_v57 = vmul.f32 %v5597_v36, %v7682_v37  ;;  %v7826_v1 = vld [vmem:[%s6466_s14 + $0x110] sm:$0xff]  ;;  %v7839_v62 = vld [vmem:[%s6466_s14 + $0x128] sm:$0xff] }
 0x309   : > { %v4324_v0 = vmul.f32 %v5597_v36, %v7685_v20  ;;  %v4325_v24 = vmul.f32 %v5597_v36, %v7697_v28  ;;  %v2575_v44 = vadd.f32 %v2571_v8, %v2561_v21  ;;  %v2583_v33 = vmul.f32 %v5595_v31, %v7799_v61  ;;  %v7819_v28 = vld [vmem:[%s6466_s14 + $0x100] sm:$0xff]  ;;  %v7842_v53 = vld [vmem:[%s6466_s14 + $0x130] sm:$0xff] }
 0x30a   : > { %v2584_v26 = vmul.f32 %v5595_v31, %v7802_v51  ;;  %v1465_v13 = vadd.f32 %v1464_v25, %v1351_v42  ;;  %v4326_v34 = vadd.f32 %v4322_v27, %v4312_v50  ;;  %v4327_v12 = vadd.f32 %v4323_v57, %v4313_v45  ;;  %v7862_v42 = vld [vmem:[%s6466_s14 + $0x148] sm:$0xff] }
 0x30b   : > { %v4328_v37 = vadd.f32 %v4324_v0, %v4314_v48  ;;  %v4329_v20 = vadd.f32 %v4325_v24, %v4315_v6  ;;  %v2585_v2 = vmul.f32 %v5595_v31, %v7810_v17  ;;  %v2586_v32 = vadd.f32 %v2582_v3, %v2572_v10  ;;  %v7836_v31 = vld [vmem:[%s6466_s14 + $0x120] sm:$0xff]  ;;  %v7848_v10 = vld [vmem:[%s6466_s14 + $0x138] sm:$0xff] }
 0x30c   : > { %v2587_v4 = vadd.f32 %v2583_v33, %v2573_v39  ;;  %v2588_v54 = vadd.f32 %v2584_v26, %v2574_v30  ;;  %1540 = vst [vmem:[#allocation3 + $0x50] sm:$0xff] %v1465_v13  ;;  %v4336_v36 = vmul.f32 %v5598_v18, %v7707_v55  ;;  %v4337_v58 = vmul.f32 %v5598_v18, %v7710_v11  ;;  %v5600_v30 = vld [vmem:[#allocation3 + $0xc4] ss:$0 sm:$0xff] }
 0x30d   : > { %v4338_v63 = vmul.f32 %v5598_v18, %v7713_v40  ;;  %v4339_v21 = vmul.f32 %v5598_v18, %v7721_v14  ;;  %v2589_v8 = vadd.f32 %v2585_v2, %v2575_v44  ;;  %v4350_v50 = vmul.f32 %v5599_v46, %v7727_v9 }
 0x30e   : > { %v4351_v45 = vmul.f32 %v5599_v46, %v7730_v60  ;;  %v4352_v55 = vmul.f32 %v5599_v46, %v7733_v41  ;;  %v5604_v48 = vld [vmem:[#allocation3 + $0x48] ss:$0 sm:$0xff]  ;;  %v4340_v11 = vadd.f32 %v4336_v36, %v4326_v34  ;;  %v4341_v40 = vadd.f32 %v4337_v58, %v4327_v12  ;;  %v5605_v39 = vld [vmem:[#allocation3 + $0x49] ss:$0 sm:$0xff]  ;;  %v7855_v41 = vld [vmem:[%s6466_s14 + $0x140] sm:$0xff] }
 0x30f   : > { %v4342_v6 = vadd.f32 %v4338_v63, %v4328_v37  ;;  %v4343_v14 = vadd.f32 %v4339_v21, %v4329_v20  ;;  %v2596_v3 = vmul.f32 %v5604_v48, %v7819_v28  ;;  %v2597_v27 = vmul.f32 %v5604_v48, %v7823_v19  ;;  %v5606_v25 = vld [vmem:[#allocation3 + $0x4a] ss:$0 sm:$0xff]  ;;  %v7865_v34 = vld [vmem:[%s6466_s14 + $0x150] sm:$0xff]  ;;  %v7869_v20 = vld [vmem:[%s6466_s14 + $0x158] sm:$0xff] }
 0x310   : > { %v2598_v9 = vmul.f32 %v5604_v48, %v7826_v1  ;;  %v2599_v60 = vmul.f32 %v5604_v48, %v7829_v38  ;;  %v4353_v57 = vmul.f32 %v5599_v46, %v7737_v35  ;;  %v2610_v0 = vmul.f32 %v5605_v39, %v7836_v31  ;;  %v5601_v36 = vld [vmem:[#allocation3 + $0xc5] ss:$0 sm:$0xff] }
 0x311   : > { %v2611_v24 = vmul.f32 %v5605_v39, %v7839_v62  ;;  %v2612_v18 = vmul.f32 %v5605_v39, %v7842_v53  ;;  %v2600_v44 = vadd.f32 %v2596_v3, %v2586_v32  ;;  %v2601_v33 = vadd.f32 %v2597_v27, %v2587_v4  ;;  %v7872_v32 = vld [vmem:[%s6466_s14 + $0x160] sm:$0xff] }
 0x312   : > { %v2602_v26 = vadd.f32 %v2598_v9, %v2588_v54  ;;  %v2603_v13 = vadd.f32 %v2599_v60, %v2589_v8  ;;  %v4354_v12 = vadd.f32 %v4350_v50, %v4340_v11  ;;  %v4355_v37 = vadd.f32 %v4351_v45, %v4341_v40  ;;  %v7878_v45 = vld [vmem:[%s6466_s14 + $0x168] sm:$0xff] }
 0x313   : > { %v4356_v35 = vadd.f32 %v4352_v55, %v4342_v6  ;;  %v2613_v46 = vmul.f32 %v5605_v39, %v7848_v10  ;;  %v4357_v2 = vadd.f32 %v4353_v57, %v4343_v14  ;;  %v2614_v58 = vadd.f32 %v2610_v0, %v2600_v44  ;;  %v5607_v55 = vld [vmem:[#allocation3 + $0x4b] ss:$0 sm:$0xff]  ;;  %v7885_v14 = vld [vmem:[%s6466_s14 + $0x170] sm:$0xff]  ;;  %v5608_v44 = vld [vmem:[#allocation3 + $0x4c] ss:$0 sm:$0xff] }
 0x314   : > { %v2615_v63 = vadd.f32 %v2611_v24, %v2601_v33  ;;  %v2616_v21 = vadd.f32 %v2612_v18, %v2602_v26  ;;  %v2624_v54 = vmul.f32 %v5606_v25, %v7855_v41  ;;  %v2625_v8 = vmul.f32 %v5606_v25, %v7862_v42  ;;  %v7889_v24 = vld [vmem:[%s6466_s14 + $0x178] sm:$0xff] }
 0x315   : > { %v2617_v4 = vadd.f32 %v2613_v46, %v2603_v13  ;;  %v2626_v50 = vmul.f32 %v5606_v25, %v7865_v34  ;;  %v4364_v48 = vmul.f32 %v5600_v30, %v7744_v52  ;;  %v4365_v11 = vmul.f32 %v5600_v30, %v7747_v47  ;;  %v5602_v47 = vld [vmem:[#allocation3 + $0xc6] ss:$0 sm:$0xff] }
 0x316   : > { %v4366_v40 = vmul.f32 %v5600_v30, %v7750_v16  ;;  %v4367_v6 = vmul.f32 %v5600_v30, %v7753_v7  ;;  %v2627_v39 = vmul.f32 %v5606_v25, %v7869_v20  ;;  %v2628_v3 = vadd.f32 %v2624_v54, %v2614_v58  ;;  %v7895_v25 = vld [vmem:[%s6466_s14 + $0x180] sm:$0xff]  ;;  %v7909_v54 = vld [vmem:[%s6466_s14 + $0x198] sm:$0xff] }
 0x317   : > { %v2629_v27 = vadd.f32 %v2625_v8, %v2615_v63  ;;  %v2630_v9 = vadd.f32 %v2626_v50, %v2616_v21  ;;  %v4368_v60 = vadd.f32 %v4364_v48, %v4354_v12  ;;  %v4369_v57 = vadd.f32 %v4365_v11, %v4355_v37  ;;  %v7902_v37 = vld [vmem:[%s6466_s14 + $0x188] sm:$0xff] }
 0x318   : > { %v4370_v0 = vadd.f32 %v4366_v40, %v4356_v35  ;;  %v4371_v52 = vadd.f32 %v4367_v6, %v4357_v2  ;;  %v2631_v16 = vadd.f32 %v2627_v39, %v2617_v4  ;;  %v2638_v7 = vmul.f32 %v5607_v55, %v7872_v32  ;;  %v7905_v35 = vld [vmem:[%s6466_s14 + $0x190] sm:$0xff]  ;;  %v5609_v48 = vld [vmem:[#allocation3 + $0x4d] ss:$0 sm:$0xff] }
 0x319   : > { %v2639_v30 = vmul.f32 %v5607_v55, %v7878_v45  ;;  %v2640_v18 = vmul.f32 %v5607_v55, %v7885_v14  ;;  %v4378_v33 = vmul.f32 %v5601_v36, %v7759_v56  ;;  %v4379_v26 = vmul.f32 %v5601_v36, %v7762_v59 }
 0x31a   : > { %v4380_v13 = vmul.f32 %v5601_v36, %v7765_v23  ;;  %v4381_v12 = vmul.f32 %v5601_v36, %v7769_v49  ;;  %v2641_v46 = vmul.f32 %v5607_v55, %v7889_v24  ;;  %v2642_v2 = vadd.f32 %v2638_v7, %v2628_v3  ;;  %v5603_v23 = vld [vmem:[#allocation3 + $0xc7] ss:$0 sm:$0xff]  ;;  %v7922_v3 = vld [vmem:[%s6466_s14 + $0x1a8] sm:$0xff]  ;;  %v7929_v7 = vld [vmem:[%s6466_s14 + $0x1b8] sm:$0xff] }
 0x31b   : > { %v2643_v58 = vadd.f32 %v2639_v30, %v2629_v27  ;;  %v2644_v63 = vadd.f32 %v2640_v18, %v2630_v9  ;;  %v4382_v21 = vadd.f32 %v4378_v33, %v4368_v60  ;;  %v4383_v4 = vadd.f32 %v4379_v26, %v4369_v57  ;;  %v7915_v55 = vld [vmem:[%s6466_s14 + $0x1a0] sm:$0xff]  ;;  %v7925_v27 = vld [vmem:[%s6466_s14 + $0x1b0] sm:$0xff]  ;;  %v5610_v33 = vld [vmem:[#allocation3 + $0x4e] ss:$0 sm:$0xff] }
 0x31c   : > { %v4384_v56 = vadd.f32 %v4380_v13, %v4370_v0  ;;  %v4385_v59 = vadd.f32 %v4381_v12, %v4371_v52  ;;  %v2645_v49 = vadd.f32 %v2641_v46, %v2631_v16  ;;  %v2652_v36 = vmul.f32 %v5608_v44, %v7895_v25  ;;  %v7935_v18 = vld [vmem:[%s6466_s14 + $0x1c0] sm:$0xff] }
 0x31d   : > { %v2653_v8 = vmul.f32 %v5608_v44, %v7902_v37  ;;  %v2654_v50 = vmul.f32 %v5608_v44, %v7905_v35  ;;  %v4392_v11 = vmul.f32 %v5602_v47, %v7775_v15  ;;  %v4393_v40 = vmul.f32 %v5602_v47, %v7778_v29 }
 0x31e   : > { %v4394_v6 = vmul.f32 %v5602_v47, %v7781_v5  ;;  %v4395_v39 = vmul.f32 %v5602_v47, %v7784_v43  ;;  %v2655_v9 = vmul.f32 %v5608_v44, %v7909_v54  ;;  %v2656_v60 = vadd.f32 %v2652_v36, %v2642_v2  ;;  %v7938_v44 = vld [vmem:[%s6466_s14 + $0x1c8] sm:$0xff]  ;;  %v7945_v2 = vld [vmem:[%s6466_s14 + $0x1d0] sm:$0xff] }
 0x31f   : > { %v2657_v57 = vadd.f32 %v2653_v8, %v2643_v58  ;;  %v2658_v0 = vadd.f32 %v2654_v50, %v2644_v63  ;;  %v4396_v52 = vadd.f32 %v4392_v11, %v4382_v21  ;;  %v4397_v15 = vadd.f32 %v4393_v40, %v4383_v4  ;;  %v5612_v58 = vld [vmem:[#allocation3 + $0xc8] ss:$0 sm:$0xff]  ;;  %v7955_v50 = vld [vmem:[%s6466_s14 + $0x1e0] sm:$0xff]  ;;  %v5611_v11 = vld [vmem:[#allocation3 + $0x4f] ss:$0 sm:$0xff] }
 0x320   : > { %v4398_v16 = vadd.f32 %v4394_v6, %v4384_v56  ;;  %v4399_v29 = vadd.f32 %v4395_v39, %v4385_v59  ;;  %v2659_v5 = vadd.f32 %v2655_v9, %v2645_v49  ;;  %v2666_v43 = vmul.f32 %v5609_v48, %v7915_v55  ;;  %v7961_v40 = vld [vmem:[%s6466_s14 + $0x1f0] sm:$0xff] }
 0x321   : > { %v2667_v47 = vmul.f32 %v5609_v48, %v7922_v3  ;;  %v2668_v30 = vmul.f32 %v5609_v48, %v7925_v27  ;;  %v4406_v26 = vmul.f32 %v5603_v23, %v7793_v22  ;;  %v4407_v13 = vmul.f32 %v5603_v23, %v7799_v61  ;;  %v7949_v61 = vld [vmem:[%s6466_s14 + $0x1d8] sm:$0xff] }
 0x322   : > { %v4408_v12 = vmul.f32 %v5603_v23, %v7802_v51  ;;  %v4409_v46 = vmul.f32 %v5603_v23, %v7810_v17  ;;  %v2669_v63 = vmul.f32 %v5609_v48, %v7929_v7  ;;  %v2670_v21 = vadd.f32 %v2666_v43, %v2656_v60  ;;  %v7958_v48 = vld [vmem:[%s6466_s14 + $0x1e8] sm:$0xff] }
 0x323   : > { %v2671_v4 = vadd.f32 %v2667_v47, %v2657_v57  ;;  %v2672_v56 = vadd.f32 %v2668_v30, %v2658_v0  ;;  %v4410_v59 = vadd.f32 %v4406_v26, %v4396_v52  ;;  %v4411_v49 = vadd.f32 %v4407_v13, %v4397_v15  ;;  %v5613_v57 = vld [vmem:[#allocation3 + $0xc9] ss:$0 sm:$0xff]  ;;  %v5614_v26 = vld [vmem:[#allocation3 + $0xca] ss:$0 sm:$0xff] }
 0x324   : > { %v4412_v22 = vadd.f32 %v4408_v12, %v4398_v16  ;;  %v4413_v36 = vadd.f32 %v4409_v46, %v4399_v29  ;;  %v2673_v51 = vadd.f32 %v2669_v63, %v2659_v5  ;;  %v2680_v17 = vmul.f32 %v5610_v33, %v7935_v18  ;;  %v7969_v29 = vld [vmem:[%s6466_s14 + $0x1f8] sm:$0xff] }
 0x325   : > { %v2681_v23 = vmul.f32 %v5610_v33, %v7938_v44  ;;  %v2682_v8 = vmul.f32 %v5610_v33, %v7945_v2  ;;  %v4420_v6 = vmul.f32 %v5612_v58, %v7819_v28  ;;  %v4421_v39 = vmul.f32 %v5612_v58, %v7823_v19 }
 0x326   : > { %v4422_v9 = vmul.f32 %v5612_v58, %v7826_v1  ;;  %v4423_v60 = vmul.f32 %v5612_v58, %v7829_v38  ;;  %v2683_v0 = vmul.f32 %v5610_v33, %v7949_v61  ;;  %v2684_v52 = vadd.f32 %v2680_v17, %v2670_v21  ;;  %v7978_v58 = vld [vmem:[#allocation3 + $0xcb] ss:$0 sm:$0xff] }
 0x327   : > { %v2685_v15 = vadd.f32 %v2681_v23, %v2671_v4  ;;  %v2686_v16 = vadd.f32 %v2682_v8, %v2672_v56  ;;  %v4424_v5 = vadd.f32 %v4420_v6, %v4410_v59  ;;  %v4425_v43 = vadd.f32 %v4421_v39, %v4411_v49  ;;  %v7982_v59 = vld [vmem:[%s6466_s14 + $0x200] sm:$0xff]  ;;  %v5620_v49 = vld [vmem:[#allocation3 + $0x50] ss:$0 sm:$0xff] }
 0x328   : > { %v4426_v47 = vadd.f32 %v4422_v9, %v4412_v22  ;;  %v4427_v30 = vadd.f32 %v4423_v60, %v4413_v36  ;;  %v2687_v28 = vadd.f32 %v2683_v0, %v2673_v51  ;;  %v2694_v19 = vmul.f32 %v5611_v11, %v7955_v50  ;;  %v7991_v51 = vld [vmem:[%s6466_s14 + $0x218] sm:$0xff]  ;;  %v7997_v6 = vld [vmem:[%s6466_s14 + $0x220] sm:$0xff] }
 0x329   : > { %v2695_v1 = vmul.f32 %v5611_v11, %v7958_v48  ;;  %v2696_v38 = vmul.f32 %v5611_v11, %v7961_v40  ;;  %v4434_v33 = vmul.f32 %v5613_v57, %v7836_v31  ;;  %v4435_v13 = vmul.f32 %v5613_v57, %v7839_v62 }
 0x32a   : > { %v4436_v12 = vmul.f32 %v5613_v57, %v7842_v53  ;;  %v4437_v46 = vmul.f32 %v5613_v57, %v7848_v10  ;;  %v2697_v63 = vmul.f32 %v5611_v11, %v7969_v29  ;;  %v2698_v21 = vadd.f32 %v2694_v19, %v2684_v52  ;;  %v7985_v53 = vld [vmem:[%s6466_s14 + $0x208] sm:$0xff]  ;;  %v7988_v10 = vld [vmem:[%s6466_s14 + $0x210] sm:$0xff]  ;;  %v8029_v19 = vld [vmem:[%s6466_s14 + $0x258] sm:$0xff] }
 0x32b   : > { %v2699_v4 = vadd.f32 %v2695_v1, %v2685_v15  ;;  %v2700_v56 = vadd.f32 %v2696_v38, %v2686_v16  ;;  %v4438_v31 = vadd.f32 %v4434_v33, %v4424_v5  ;;  %v4439_v22 = vadd.f32 %v4435_v13, %v4425_v43  ;;  %v8020_v15 = vld [vmem:[%s6466_s14 + $0x240] sm:$0xff]  ;;  %9043 = vst [vmem:[#allocation13_spill] sm:$0xff] %v8029_v19  ;;  %v5616_v1 = vld [vmem:[#allocation3 + $0xcc] ss:$0 sm:$0xff] }
 0x32c   : > { %v4440_v62 = vadd.f32 %v4436_v12, %v4426_v47  ;;  %v4441_v36 = vadd.f32 %v4437_v46, %v4427_v30  ;;  %v2701_v17 = vadd.f32 %v2697_v63, %v2687_v28  ;;  %v4448_v23 = vmul.f32 %v5614_v26, %v7855_v41  ;;  %v8007_v41 = vld [vmem:[%s6466_s14 + $0x228] sm:$0xff]  ;;  %v8026_v28 = vld [vmem:[%s6466_s14 + $0x250] sm:$0xff] }
 0x32d   : > { %v4449_v8 = vmul.f32 %v5614_v26, %v7862_v42  ;;  %v4450_v11 = vmul.f32 %v5614_v26, %v7865_v34  ;;  %v4451_v39 = vmul.f32 %v5614_v26, %v7869_v20  ;;  %v4462_v9 = vmul.f32 %v7978_v58, %v7872_v32  ;;  %v8010_v42 = vld [vmem:[%s6466_s14 + $0x230] sm:$0xff]  ;;  %v8023_v30 = vld [vmem:[%s6466_s14 + $0x248] sm:$0xff]  ;;  %9042 = vst [vmem:[#allocation12_spill] sm:$0xff] %v8026_v28 }
 0x32e   : > { %v4463_v60 = vmul.f32 %v7978_v58, %v7878_v45  ;;  %v4464_v57 = vmul.f32 %v7978_v58, %v7885_v14  ;;  %v5621_v34 = vld [vmem:[#allocation3 + $0x51] ss:$0 sm:$0xff]  ;;  %v2708_v0 = vmul.f32 %v5620_v49, %v7982_v59  ;;  %v2709_v20 = vmul.f32 %v5620_v49, %v7985_v53  ;;  %v8017_v45 = vld [vmem:[%s6466_s14 + $0x238] sm:$0xff]  ;;  %v5622_v14 = vld [vmem:[#allocation3 + $0x52] ss:$0 sm:$0xff]  ;;  %9041 = vst [vmem:[#allocation11_spill] sm:$0xff] %v8023_v30 }
 0x32f   : > { %v2710_v32 = vmul.f32 %v5620_v49, %v7988_v10  ;;  %v2711_v52 = vmul.f32 %v5620_v49, %v7991_v51  ;;  %v4452_v16 = vadd.f32 %v4448_v23, %v4438_v31  ;;  %v4453_v5 = vadd.f32 %v4449_v8, %v4439_v22  ;;  %v8035_v31 = vpop.f32.mrf.mxu3  ;;  %v8037_v22 = vpop.f32.mrf.mxu2 }
 0x330   : > { %v4454_v43 = vadd.f32 %v4450_v11, %v4440_v62  ;;  %v4455_v47 = vadd.f32 %v4451_v39, %v4441_v36  ;;  %v2712_v38 = vadd.f32 %v2708_v0, %v2698_v21  ;;  %v2713_v26 = vadd.f32 %v2709_v20, %v2699_v4  ;;  %v8044_v36 = vld [vmem:[%s6466_s14 + $0x260] sm:$0xff]  ;;  %v8050_v0 = vld [vmem:[%s6466_s14 + $0x270] sm:$0xff]  ;;  %v8053_v20 = vld [vmem:[%s6466_s14 + $0x278] sm:$0xff] }
 0x331   : > { %v2714_v33 = vadd.f32 %v2710_v32, %v2700_v56  ;;  %v2715_v13 = vadd.f32 %v2711_v52, %v2701_v17  ;;  %v2722_v12 = vmul.f32 %v5621_v34, %v7997_v6  ;;  %v2723_v46 = vmul.f32 %v5621_v34, %v8007_v41  ;;  %v5623_v17 = vld [vmem:[#allocation3 + $0x53] ss:$0 sm:$0xff] }
 0x332   : > { %v2724_v63 = vmul.f32 %v5621_v34, %v8010_v42  ;;  %v2725_v49 = vmul.f32 %v5621_v34, %v8017_v45  ;;  %v2736_v21 = vmul.f32 %v5622_v14, %v8020_v15  ;;  %v2737_v4 = vmul.f32 %v5622_v14, %v8023_v30  ;;  %v8047_v34 = vld [vmem:[%s6466_s14 + $0x268] sm:$0xff] }
 0x333   : > { %v2738_v56 = vmul.f32 %v5622_v14, %v8026_v28  ;;  %v2739_v62 = vmul.f32 %v5622_v14, %v8029_v19  ;;  %v2726_v23 = vadd.f32 %v2722_v12, %v2712_v38  ;;  %v2727_v8 = vadd.f32 %v2723_v46, %v2713_v26  ;;  %v5617_v38 = vld [vmem:[#allocation3 + $0xcd] ss:$0 sm:$0xff] }
 0x334   : > { %v2728_v11 = vadd.f32 %v2724_v63, %v2714_v33  ;;  %v2729_v39 = vadd.f32 %v2725_v49, %v2715_v13  ;;  %v4465_v32 = vmul.f32 %v7978_v58, %v7889_v24  ;;  %v4476_v52 = vmul.f32 %v5616_v1, %v7895_v25  ;;  %v8065_v58 = vld [vmem:[%s6466_s14 + $0x280] sm:$0xff] }
 0x335   : > { %v4477_v14 = vmul.f32 %v5616_v1, %v7902_v37  ;;  %v4478_v19 = vmul.f32 %v5616_v1, %v7905_v35  ;;  %v2740_v26 = vadd.f32 %v2736_v21, %v2726_v23  ;;  %v2741_v33 = vadd.f32 %v2737_v4, %v2727_v8  ;;  %v5624_v37 = vld [vmem:[#allocation3 + $0x54] ss:$0 sm:$0xff]  ;;  %v8068_v21 = vld [vmem:[%s6466_s14 + $0x288] sm:$0xff] }
 0x336   : > { %v2742_v13 = vadd.f32 %v2738_v56, %v2728_v11  ;;  %v2743_v12 = vadd.f32 %v2739_v62, %v2729_v39  ;;  %v2750_v46 = vmul.f32 %v5623_v17, %v8044_v36  ;;  %v2751_v63 = vmul.f32 %v5623_v17, %v8047_v34  ;;  %v8071_v4 = vld [vmem:[%s6466_s14 + $0x290] sm:$0xff]  ;;  %v8074_v56 = vld [vmem:[%s6466_s14 + $0x298] sm:$0xff] }
 0x337   : > { %v2752_v24 = vmul.f32 %v5623_v17, %v8050_v0  ;;  %v2753_v25 = vmul.f32 %v5623_v17, %v8053_v20  ;;  %v4466_v35 = vadd.f32 %v4462_v9, %v4452_v16  ;;  %v4467_v49 = vadd.f32 %v4463_v60, %v4453_v5  ;;  %9044 = vst [vmem:[#allocation14_spill] sm:$0xff] %v8071_v4  ;;  %v5625_v16 = vld [vmem:[#allocation3 + $0x55] ss:$0 sm:$0xff] }
 0x338   : > { %v4468_v28 = vadd.f32 %v4464_v57, %v4454_v43  ;;  %v4469_v30 = vadd.f32 %v4465_v32, %v4455_v47  ;;  %9045 = vst [vmem:[#allocation15_spill] sm:$0xff] %v8074_v56  ;;  %v2754_v62 = vadd.f32 %v2750_v46, %v2740_v26  ;;  %v2755_v23 = vadd.f32 %v2751_v63, %v2741_v33  ;;  %v8085_v32 = vld [vmem:[%s6466_s14 + $0x2a0] sm:$0xff]  ;;  %v8088_v26 = vld [vmem:[%s6466_s14 + $0x2a8] sm:$0xff] }
 0x339   : > { %v2756_v8 = vadd.f32 %v2752_v24, %v2742_v13  ;;  %v2757_v17 = vadd.f32 %v2753_v25, %v2743_v12  ;;  %v4479_v11 = vmul.f32 %v5616_v1, %v7909_v54  ;;  %v4490_v9 = vmul.f32 %v5617_v38, %v7915_v55  ;;  %v8091_v54 = vld [vmem:[%s6466_s14 + $0x2b0] sm:$0xff]  ;;  %v1402_v13 = vpop.f32.mrf.mxu3  ;;  %v1515_v12 = vpop.f32.mrf.mxu2 }
 0x33a   : > { %v4491_v60 = vmul.f32 %v5617_v38, %v7922_v3  ;;  %v4492_v57 = vmul.f32 %v5617_v38, %v7925_v27  ;;  %v2764_v5 = vmul.f32 %v5624_v37, %v8065_v58  ;;  %v2765_v43 = vmul.f32 %v5624_v37, %v8068_v21  ;;  %9046 = vst [vmem:[#allocation16_spill] sm:$0xff] %v8091_v54  ;;  %v8094_v27 = vld [vmem:[%s6466_s14 + $0x2b8] sm:$0xff] }
 0x33b   : > { %v2766_v47 = vmul.f32 %v5624_v37, %v8071_v4  ;;  %v2767_v39 = vmul.f32 %v5624_v37, %v8074_v56  ;;  %v4480_v55 = vadd.f32 %v4476_v52, %v4466_v35  ;;  %v4481_v1 = vadd.f32 %v4477_v14, %v4467_v49  ;;  %9047 = vst [vmem:[#allocation17_spill] sm:$0xff] %v8094_v27  ;;  %v5618_v56 = vld [vmem:[#allocation3 + $0xce] ss:$0 sm:$0xff]  ;;  %v8102_v35 = vld [vmem:[%s6466_s14 + $0x2c0] sm:$0xff]  ;;  %v5626_v49 = vld [vmem:[#allocation3 + $0x56] ss:$0 sm:$0xff] }
 0x33c   : > { %v4482_v3 = vadd.f32 %v4478_v19, %v4468_v28  ;;  %v4483_v33 = vadd.f32 %v4479_v11, %v4469_v30  ;;  %v2768_v46 = vadd.f32 %v2764_v5, %v2754_v62  ;;  %v2769_v63 = vadd.f32 %v2765_v43, %v2755_v23  ;;  %v1354_v28 = vpop.f32.mrf.mxu1  ;;  %v1467_v19 = vpop.f32.mrf.mxu0  ;;  %v8107_v5 = vld [vmem:[%s6466_s14 + $0x2c8] sm:$0xff]  ;;  %v8110_v43 = vld [vmem:[%s6466_s14 + $0x2d0] sm:$0xff] }
 0x33d   : > { %v2770_v24 = vadd.f32 %v2766_v47, %v2756_v8  ;;  %v2771_v25 = vadd.f32 %v2767_v39, %v2757_v17  ;;  %v4493_v37 = vmul.f32 %v5617_v38, %v7929_v7  ;;  %v2778_v4 = vmul.f32 %v5625_v16, %v8085_v32  ;;  %v8113_v47 = vld [vmem:[%s6466_s14 + $0x2d8] sm:$0xff] }
 0x33e   : > { %v2779_v52 = vmul.f32 %v5625_v16, %v8088_v26  ;;  %v2780_v30 = vmul.f32 %v5625_v16, %v8091_v54  ;;  %v2781_v14 = vmul.f32 %v5625_v16, %v8094_v27  ;;  %v1513_v7 = vadd.f32 %v8037_v22, %v8035_v31 }
 0x33f   : > { %v1468_v38 = vadd.f32 %v1467_v19, %v1354_v28  ;;  %v1516_v62 = vadd.f32 %v1515_v12, %v1402_v13  ;;  %v4494_v23 = vadd.f32 %v4490_v9, %v4480_v55  ;;  %v4495_v8 = vadd.f32 %v4491_v60, %v4481_v1 }
 0x340   : > { %v4496_v17 = vadd.f32 %v4492_v57, %v4482_v3  ;;  %v4497_v11 = vadd.f32 %v4493_v37, %v4483_v33  ;;  %v2782_v16 = vadd.f32 %v2778_v4, %v2768_v46  ;;  %v2783_v39 = vadd.f32 %v2779_v52, %v2769_v63  ;;  %1556 = vst [vmem:[#allocation3 + $0xd0] sm:$0xff] %v1513_v7  ;;  %v5619_v57 = vld [vmem:[#allocation3 + $0xcf] ss:$0 sm:$0xff]  ;;  %v8133_v46 = vld [vmem:[%s6466_s14 + $0x2f8] sm:$0xff] }
 0x341   : > { %v2784_v27 = vadd.f32 %v2780_v30, %v2770_v24  ;;  %v2785_v54 = vadd.f32 %v2781_v14, %v2771_v25  ;;  %v4504_v31 = vmul.f32 %v5618_v56, %v7935_v18  ;;  %v4505_v22 = vmul.f32 %v5618_v56, %v7938_v44  ;;  %1541 = vst [vmem:[#allocation3 + $0x58] sm:$0xff] %v1468_v38  ;;  %v8124_v18 = vld [vmem:[%s6466_s14 + $0x2e0] sm:$0xff]  ;;  %v5627_v44 = vld [vmem:[#allocation3 + $0x57] ss:$0 sm:$0xff] }
 0x342   : > { %v4506_v9 = vmul.f32 %v5618_v56, %v7945_v2  ;;  %v4507_v60 = vmul.f32 %v5618_v56, %v7949_v61  ;;  %v2792_v55 = vmul.f32 %v5626_v49, %v8102_v35  ;;  %v2793_v4 = vmul.f32 %v5626_v49, %v8107_v5  ;;  %1557 = vst [vmem:[#allocation3 + $0xd8] sm:$0xff] %v1516_v62  ;;  %v8127_v61 = vld [vmem:[%s6466_s14 + $0x2e8] sm:$0xff]  ;;  %v8130_v56 = vld [vmem:[%s6466_s14 + $0x2f0] sm:$0xff] }
 0x343   : > { %v2794_v1 = vmul.f32 %v5626_v49, %v8110_v43  ;;  %v2795_v3 = vmul.f32 %v5626_v49, %v8113_v47  ;;  %v4508_v33 = vadd.f32 %v4504_v31, %v4494_v23  ;;  %v4509_v2 = vadd.f32 %v4505_v22, %v4495_v8 }
 0x344   : > { %v4510_v13 = vadd.f32 %v4506_v9, %v4496_v17  ;;  %v4511_v12 = vadd.f32 %v4507_v60, %v4497_v11  ;;  %v2796_v63 = vadd.f32 %v2792_v55, %v2782_v16  ;;  %v2797_v24 = vadd.f32 %v2793_v4, %v2783_v39 }
 0x345   : > { %v2798_v25 = vadd.f32 %v2794_v1, %v2784_v27  ;;  %v2799_v37 = vadd.f32 %v2795_v3, %v2785_v54  ;;  %v4518_v52 = vmul.f32 %v5619_v57, %v7955_v50  ;;  %v4519_v30 = vmul.f32 %v5619_v57, %v7958_v48 }
 0x346   : > { %v4520_v28 = vmul.f32 %v5619_v57, %v7961_v40  ;;  %v4521_v19 = vmul.f32 %v5619_v57, %v7969_v29  ;;  %v2806_v14 = vmul.f32 %v5627_v44, %v8124_v18  ;;  %v2807_v49 = vmul.f32 %v5627_v44, %v8127_v61 }
 0x347   : > { %v2808_v7 = vmul.f32 %v5627_v44, %v8130_v56  ;;  %v2809_v38 = vmul.f32 %v5627_v44, %v8133_v46  ;;  %v4522_v62 = vadd.f32 %v4518_v52, %v4508_v33  ;;  %v4523_v23 = vadd.f32 %v4519_v30, %v4509_v2  ;;  %v5628_v8 = vld [vmem:[#allocation3 + $0xd0] ss:$0 sm:$0xff]  ;;  %v5629_v17 = vld [vmem:[#allocation3 + $0xd1] ss:$0 sm:$0xff]  ;;  %v5630_v11 = vld [vmem:[#allocation3 + $0xd2] ss:$0 sm:$0xff] }
 0x348   : > { %v4524_v27 = vadd.f32 %v4520_v28, %v4510_v13  ;;  %v4525_v54 = vadd.f32 %v4521_v19, %v4511_v12  ;;  %v8143_v50 = vadd.f32 %v2806_v14, %v2796_v63  ;;  %v8145_v48 = vadd.f32 %v2807_v49, %v2797_v24  ;;  %v5631_v4 = vld [vmem:[#allocation3 + $0xd3] ss:$0 sm:$0xff] }
 0x349   : > { %v8147_v40 = vadd.f32 %v2808_v7, %v2798_v25  ;;  %v8149_v29 = vadd.f32 %v2809_v38, %v2799_v37  ;;  %v4532_v16 = vmul.f32 %v5628_v8, %v7982_v59  ;;  %v4533_v39 = vmul.f32 %v5628_v8, %v7985_v53  ;;  %v9048_v53 = vld [vmem:[#allocation11_spill] sm:$0xff]  ;;  %v9051_v38 = vld [vmem:[#allocation14_spill] sm:$0xff] }
 0x34a   : > { %v4534_v31 = vmul.f32 %v5628_v8, %v7988_v10  ;;  %v4535_v22 = vmul.f32 %v5628_v8, %v7991_v51  ;;  %v4546_v9 = vmul.f32 %v5629_v17, %v7997_v6  ;;  %v4547_v60 = vmul.f32 %v5629_v17, %v8007_v41  ;;  %v9049_v10 = vld [vmem:[#allocation12_spill] sm:$0xff]  ;;  %v9050_v51 = vld [vmem:[#allocation13_spill] sm:$0xff] }
 0x34b   : > { %v4548_v57 = vmul.f32 %v5629_v17, %v8010_v42  ;;  %v4549_v55 = vmul.f32 %v5629_v17, %v8017_v45  ;;  %v4536_v1 = vadd.f32 %v4532_v16, %v4522_v62  ;;  %v4537_v3 = vadd.f32 %v4533_v39, %v4523_v23  ;;  %v5632_v6 = vld [vmem:[#allocation3 + $0xd4] ss:$0 sm:$0xff]  ;;  %v9052_v23 = vld [vmem:[#allocation15_spill] sm:$0xff]  ;;  %v5635_v39 = vld [vmem:[#allocation3 + $0xd7] ss:$0 sm:$0xff] }
 0x34c   : > { %v4538_v44 = vadd.f32 %v4534_v31, %v4524_v27  ;;  %v4539_v33 = vadd.f32 %v4535_v22, %v4525_v54  ;;  %v4560_v59 = vmul.f32 %v5630_v11, %v8020_v15  ;;  %v4561_v2 = vmul.f32 %v5630_v11, %v9048_v53  ;;  %v5633_v15 = vld [vmem:[#allocation3 + $0xd5] ss:$0 sm:$0xff] }
 0x34d   : > { %v4562_v13 = vmul.f32 %v5630_v11, %v9049_v10  ;;  %v4563_v12 = vmul.f32 %v5630_v11, %v9050_v51  ;;  %v4550_v63 = vadd.f32 %v4546_v9, %v4536_v1  ;;  %v4551_v41 = vadd.f32 %v4547_v60, %v4537_v3  ;;  %v9053_v11 = vld [vmem:[#allocation16_spill] sm:$0xff]  ;;  %v9054_v16 = vld [vmem:[#allocation17_spill] sm:$0xff]  ;;  %v8189_v10 = vld [vmem:[%s6466_s14 + $0x318] sm:$0xff] }
 0x34e   : > { %v4552_v24 = vadd.f32 %v4548_v57, %v4538_v44  ;;  %v4553_v42 = vadd.f32 %v4549_v55, %v4539_v33  ;;  %v4574_v45 = vmul.f32 %v5631_v4, %v8044_v36  ;;  %v4575_v25 = vmul.f32 %v5631_v4, %v8047_v34  ;;  %v5634_v34 = vld [vmem:[#allocation3 + $0xd6] ss:$0 sm:$0xff]  ;;  %v8176_v57 = vld [vmem:[%s6466_s14 + $0x300] sm:$0xff]  ;;  %v8179_v55 = vld [vmem:[%s6466_s14 + $0x308] sm:$0xff] }
 0x34f   : > { %v4576_v37 = vmul.f32 %v5631_v4, %v8050_v0  ;;  %v4577_v52 = vmul.f32 %v5631_v4, %v8053_v20  ;;  %v4564_v30 = vadd.f32 %v4560_v59, %v4550_v63  ;;  %v4565_v28 = vadd.f32 %v4561_v2, %v4551_v41  ;;  %v8186_v3 = vld [vmem:[%s6466_s14 + $0x310] sm:$0xff]  ;;  %v5636_v44 = vld [vmem:[#allocation3 + $0x58] ss:$0 sm:$0xff]  ;;  %v8199_v41 = vld [vmem:[%s6466_s14 + $0x328] sm:$0xff] }
 0x350   : > { %v4566_v19 = vadd.f32 %v4562_v13, %v4552_v24  ;;  %v4567_v14 = vadd.f32 %v4563_v12, %v4553_v42  ;;  %v4588_v49 = vmul.f32 %v5632_v6, %v8065_v58  ;;  %v4589_v7 = vmul.f32 %v5632_v6, %v8068_v21  ;;  %v5637_v24 = vld [vmem:[#allocation3 + $0x59] ss:$0 sm:$0xff] }
 0x351   : > { %v4590_v62 = vmul.f32 %v5632_v6, %v9051_v38  ;;  %v4591_v36 = vmul.f32 %v5632_v6, %v9052_v23  ;;  %v4578_v27 = vadd.f32 %v4574_v45, %v4564_v30  ;;  %v4579_v0 = vadd.f32 %v4575_v25, %v4565_v28  ;;  %v8209_v45 = vld [vmem:[%s6466_s14 + $0x338] sm:$0xff]  ;;  %v8212_v25 = vld [vmem:[%s6466_s14 + $0x340] sm:$0xff] }
 0x352   : > { %v4580_v54 = vadd.f32 %v4576_v37, %v4566_v19  ;;  %v4581_v20 = vadd.f32 %v4577_v52, %v4567_v14  ;;  %v4602_v8 = vmul.f32 %v5633_v15, %v8085_v32  ;;  %v4603_v17 = vmul.f32 %v5633_v15, %v8088_v26  ;;  %v5638_v37 = vld [vmem:[#allocation3 + $0x5a] ss:$0 sm:$0xff]  ;;  %v8223_v19 = vld [vmem:[%s6466_s14 + $0x348] sm:$0xff]  ;;  %v8226_v14 = vld [vmem:[%s6466_s14 + $0x350] sm:$0xff] }
 0x353   : > { %v4604_v58 = vmul.f32 %v5633_v15, %v9053_v11  ;;  %v4605_v21 = vmul.f32 %v5633_v15, %v9054_v16  ;;  %v4592_v31 = vadd.f32 %v4588_v49, %v4578_v27  ;;  %v4593_v22 = vadd.f32 %v4589_v7, %v4579_v0  ;;  %v8229_v49 = vld [vmem:[%s6466_s14 + $0x358] sm:$0xff] }
 0x354   : > { %v4594_v9 = vadd.f32 %v4590_v62, %v4580_v54  ;;  %v4595_v60 = vadd.f32 %v4591_v36, %v4581_v20  ;;  %v4616_v4 = vmul.f32 %v5634_v34, %v8102_v35  ;;  %v4617_v32 = vmul.f32 %v5634_v34, %v8107_v5  ;;  %v8236_v36 = vld [vmem:[%s6466_s14 + $0x360] sm:$0xff]  ;;  %v8246_v20 = vld [vmem:[%s6466_s14 + $0x370] sm:$0xff]  ;;  %v5640_v16 = vld [vmem:[#allocation3 + $0x5c] ss:$0 sm:$0xff] }
 0x355   : > { %v4618_v26 = vmul.f32 %v5634_v34, %v8110_v43  ;;  %v4619_v1 = vmul.f32 %v5634_v34, %v8113_v47  ;;  %v4606_v33 = vadd.f32 %v4602_v8, %v4592_v31  ;;  %v4607_v59 = vadd.f32 %v4603_v17, %v4593_v22  ;;  %v8196_v47 = vld [vmem:[%s6466_s14 + $0x320] sm:$0xff]  ;;  %v5639_v34 = vld [vmem:[#allocation3 + $0x5b] ss:$0 sm:$0xff] }
 0x356   : > { %v4608_v53 = vadd.f32 %v4604_v58, %v4594_v9  ;;  %v4609_v2 = vadd.f32 %v4605_v21, %v4595_v60  ;;  %v4630_v13 = vmul.f32 %v5635_v39, %v8124_v18  ;;  %v4631_v35 = vmul.f32 %v5635_v39, %v8127_v61  ;;  %v8202_v18 = vld [vmem:[%s6466_s14 + $0x330] sm:$0xff]  ;;  %v8256_v58 = vld [vmem:[%s6466_s14 + $0x380] sm:$0xff]  ;;  %v8259_v9 = vld [vmem:[%s6466_s14 + $0x388] sm:$0xff] }
 0x357   : > { %v4632_v5 = vmul.f32 %v5635_v39, %v8130_v56  ;;  %v4633_v43 = vmul.f32 %v5635_v39, %v8133_v46  ;;  %v4620_v51 = vadd.f32 %v4616_v4, %v4606_v33  ;;  %v4621_v12 = vadd.f32 %v4617_v32, %v4607_v59  ;;  %v8262_v60 = vld [vmem:[%s6466_s14 + $0x390] sm:$0xff]  ;;  %v8265_v4 = vld [vmem:[%s6466_s14 + $0x398] sm:$0xff]  ;;  %v8272_v33 = vld [vmem:[%s6466_s14 + $0x3a0] sm:$0xff] }
 0x358   : > { %v4622_v6 = vadd.f32 %v4618_v26, %v4608_v53  ;;  %v4623_v63 = vadd.f32 %v4619_v1, %v4609_v2  ;;  %v2820_v61 = vmul.f32 %v5636_v44, %v8176_v57  ;;  %v2821_v56 = vmul.f32 %v5636_v44, %v8179_v55  ;;  %v5641_v59 = vld [vmem:[#allocation3 + $0x5d] ss:$0 sm:$0xff] }
 0x359   : > { %v2822_v46 = vmul.f32 %v5636_v44, %v8186_v3  ;;  %v2823_v42 = vmul.f32 %v5636_v44, %v8189_v10  ;;  %v8214_v52 = vadd.f32 %v4630_v13, %v4620_v51  ;;  %v8216_v15 = vadd.f32 %v4631_v35, %v4621_v12  ;;  %v8281_v51 = vld [vmem:[%s6466_s14 + $0x3b8] sm:$0xff] }
 0x35a   : > { %v8218_v30 = vadd.f32 %v4632_v5, %v4622_v6  ;;  %v8220_v28 = vadd.f32 %v4633_v43, %v4623_v63  ;;  %v2824_v7 = vadd.f32 %v2820_v61, %v8143_v50  ;;  %v2825_v38 = vadd.f32 %v2821_v56, %v8145_v48  ;;  %v8243_v48 = vld [vmem:[%s6466_s14 + $0x368] sm:$0xff]  ;;  %v8278_v43 = vld [vmem:[%s6466_s14 + $0x3b0] sm:$0xff]  ;;  %v8288_v61 = vld [vmem:[%s6466_s14 + $0x3c0] sm:$0xff] }
 0x35b   : > { %v2826_v62 = vadd.f32 %v2822_v46, %v8147_v40  ;;  %v2827_v23 = vadd.f32 %v2823_v42, %v8149_v29  ;;  %v2834_v27 = vmul.f32 %v5637_v24, %v8196_v47  ;;  %v2835_v0 = vmul.f32 %v5637_v24, %v8199_v41  ;;  %v8249_v40 = vld [vmem:[%s6466_s14 + $0x378] sm:$0xff]  ;;  %v8275_v5 = vld [vmem:[%s6466_s14 + $0x3a8] sm:$0xff] }
 0x35c   : > { %v2836_v54 = vmul.f32 %v5637_v24, %v8202_v18  ;;  %v2837_v50 = vmul.f32 %v5637_v24, %v8209_v45  ;;  %v2848_v29 = vmul.f32 %v5638_v37, %v8212_v25  ;;  %v2849_v8 = vmul.f32 %v5638_v37, %v8223_v19  ;;  %v5642_v56 = vld [vmem:[#allocation3 + $0x5e] ss:$0 sm:$0xff] }
 0x35d   : > { %v2850_v17 = vmul.f32 %v5638_v37, %v8226_v14  ;;  %v2851_v11 = vmul.f32 %v5638_v37, %v8229_v49  ;;  %v2838_v21 = vadd.f32 %v2834_v27, %v2824_v7  ;;  %v2839_v39 = vadd.f32 %v2835_v0, %v2825_v38  ;;  %v8291_v38 = vld [vmem:[%s6466_s14 + $0x3c8] sm:$0xff] }
 0x35e   : > { %v2840_v31 = vadd.f32 %v2836_v54, %v2826_v62  ;;  %v2841_v22 = vadd.f32 %v2837_v50, %v2827_v23  ;;  %v2862_v32 = vmul.f32 %v5639_v34, %v8236_v36  ;;  %v2863_v26 = vmul.f32 %v5639_v34, %v8243_v48  ;;  %v8294_v62 = vld [vmem:[%s6466_s14 + $0x3d0] sm:$0xff]  ;;  %v8297_v23 = vld [vmem:[%s6466_s14 + $0x3d8] sm:$0xff]  ;;  %v8304_v50 = vld [vmem:[%s6466_s14 + $0x3e0] sm:$0xff] }
 0x35f   : > { %v2864_v1 = vmul.f32 %v5639_v34, %v8246_v20  ;;  %v2865_v44 = vmul.f32 %v5639_v34, %v8249_v40  ;;  %v2852_v53 = vadd.f32 %v2848_v29, %v2838_v21  ;;  %v2853_v2 = vadd.f32 %v2849_v8, %v2839_v39  ;;  %v5643_v29 = vld [vmem:[#allocation3 + $0x5f] ss:$0 sm:$0xff]  ;;  %v8307_v21 = vld [vmem:[%s6466_s14 + $0x3e8] sm:$0xff]  ;;  %v8310_v39 = vld [vmem:[%s6466_s14 + $0x3f0] sm:$0xff] }
 0x360   : > { %v2854_v13 = vadd.f32 %v2850_v17, %v2840_v31  ;;  %v2855_v35 = vadd.f32 %v2851_v11, %v2841_v22  ;;  %v2876_v12 = vmul.f32 %v5640_v16, %v8256_v58  ;;  %v2877_v6 = vmul.f32 %v5640_v16, %v8259_v9  ;;  %v8313_v31 = vld [vmem:[%s6466_s14 + $0x3f8] sm:$0xff] }
 0x361   : > { %v2878_v63 = vmul.f32 %v5640_v16, %v8262_v60  ;;  %v2879_v24 = vmul.f32 %v5640_v16, %v8265_v4  ;;  %v2866_v46 = vadd.f32 %v2862_v32, %v2852_v53  ;;  %v2867_v42 = vadd.f32 %v2863_v26, %v2853_v2 }
 0x362   : > { %v2868_v37 = vadd.f32 %v2864_v1, %v2854_v13  ;;  %v2869_v7 = vadd.f32 %v2865_v44, %v2855_v35  ;;  %v2890_v34 = vmul.f32 %v5641_v59, %v8272_v33  ;;  %v2891_v27 = vmul.f32 %v5641_v59, %v8275_v5  ;;  %v5644_v44 = vld [vmem:[#allocation3 + $0xd8] ss:$0 sm:$0xff] }
 0x363   : > { %v2892_v0 = vmul.f32 %v5641_v59, %v8278_v43  ;;  %v2893_v54 = vmul.f32 %v5641_v59, %v8281_v51  ;;  %v2880_v8 = vadd.f32 %v2876_v12, %v2866_v46  ;;  %v2881_v17 = vadd.f32 %v2877_v6, %v2867_v42 }
 0x364   : > { %v2882_v11 = vadd.f32 %v2878_v63, %v2868_v37  ;;  %v2883_v16 = vadd.f32 %v2879_v24, %v2869_v7  ;;  %v2904_v22 = vmul.f32 %v5642_v56, %v8288_v61  ;;  %v2905_v32 = vmul.f32 %v5642_v56, %v8291_v38 }
 0x365   : > { %v2906_v26 = vmul.f32 %v5642_v56, %v8294_v62  ;;  %v2907_v1 = vmul.f32 %v5642_v56, %v8297_v23  ;;  %v2894_v59 = vadd.f32 %v2890_v34, %v2880_v8  ;;  %v2895_v53 = vadd.f32 %v2891_v27, %v2881_v17 }
 0x366   : > { %v2896_v2 = vadd.f32 %v2892_v0, %v2882_v11  ;;  %v2897_v13 = vadd.f32 %v2893_v54, %v2883_v16  ;;  %v2918_v35 = vmul.f32 %v5643_v29, %v8304_v50  ;;  %v2919_v12 = vmul.f32 %v5643_v29, %v8307_v21  ;;  %v5645_v0 = vld [vmem:[#allocation3 + $0xd9] ss:$0 sm:$0xff]  ;;  %v5646_v16 = vld [vmem:[#allocation3 + $0xda] ss:$0 sm:$0xff] }
 0x367   : > { %v2920_v6 = vmul.f32 %v5643_v29, %v8310_v39  ;;  %v2921_v63 = vmul.f32 %v5643_v29, %v8313_v31  ;;  %v2908_v24 = vadd.f32 %v2904_v22, %v2894_v59  ;;  %v2909_v46 = vadd.f32 %v2905_v32, %v2895_v53 }
 0x368   : > { %v2910_v42 = vadd.f32 %v2906_v26, %v2896_v2  ;;  %v2911_v37 = vadd.f32 %v2907_v1, %v2897_v13  ;;  %v4644_v7 = vmul.f32 %v5644_v44, %v8176_v57  ;;  %v4645_v56 = vmul.f32 %v5644_v44, %v8179_v55  ;;  %v5647_v1 = vld [vmem:[#allocation3 + $0xdb] ss:$0 sm:$0xff]  ;;  %v5648_v13 = vld [vmem:[#allocation3 + $0xdc] ss:$0 sm:$0xff] }
 0x369   : > { %v4646_v34 = vmul.f32 %v5644_v44, %v8186_v3  ;;  %v4647_v27 = vmul.f32 %v5644_v44, %v8189_v10  ;;  %v2922_v54 = vadd.f32 %v2918_v35, %v2908_v24  ;;  %v2923_v8 = vadd.f32 %v2919_v12, %v2909_v46 }
 0x36a   : > { %v2924_v17 = vadd.f32 %v2920_v6, %v2910_v42  ;;  %v2925_v11 = vadd.f32 %v2921_v63, %v2911_v37  ;;  %v4648_v29 = vadd.f32 %v4644_v7, %v8214_v52  ;;  %v4649_v22 = vadd.f32 %v4645_v56, %v8216_v15  ;;  %v5650_v7 = vld [vmem:[#allocation3 + $0xde] ss:$0 sm:$0xff] }
 0x36b   : > { %v4650_v32 = vadd.f32 %v4646_v34, %v8218_v30  ;;  %v4651_v57 = vadd.f32 %v4647_v27, %v8220_v28  ;;  %v2926_v55 = vmax.f32 %v2922_v54, 0.0  ;;  %v2927_v3 = vmax.f32 %v2923_v8, 0.0 }
 0x36c   : > { %v2928_v26 = vmax.f32 %v2924_v17, 0.0  ;;  %v2929_v10 = vmax.f32 %v2925_v11, 0.0  ;;  %v4658_v44 = vmul.f32 %v5645_v0, %v8196_v47  ;;  %v4659_v59 = vmul.f32 %v5645_v0, %v8199_v41 }
 0x36d   : > { %v4660_v53 = vmul.f32 %v5645_v0, %v8202_v18  ;;  %v4661_v52 = vmul.f32 %v5645_v0, %v8209_v45  ;;  %2930 = vst [vmem:[%s6958_s8 + $0x40] sm:$0xff] %v2926_v55  ;;  %v4672_v15 = vmul.f32 %v5646_v16, %v8212_v25  ;;  %v4673_v30 = vmul.f32 %v5646_v16, %v8223_v19  ;;  %v5649_v19 = vld [vmem:[#allocation3 + $0xdd] ss:$0 sm:$0xff]  ;;  %v1518_v55 = vpop.f32.mrf.mxu2 }
 0x36e   : > { %v4674_v28 = vmul.f32 %v5646_v16, %v8226_v14  ;;  %v4675_v2 = vmul.f32 %v5646_v16, %v8229_v49  ;;  %2931 = vst [vmem:[%s6958_s8 + $0x48] sm:$0xff] %v2927_v3  ;;  %v4662_v35 = vadd.f32 %v4658_v44, %v4648_v29  ;;  %v4663_v47 = vadd.f32 %v4659_v59, %v4649_v22  ;;  %v1470_v22 = vpop.f32.mrf.mxu0 }
 0x36f   : > { %v4664_v12 = vadd.f32 %v4660_v53, %v4650_v32  ;;  %v4665_v41 = vadd.f32 %v4661_v52, %v4651_v57  ;;  %2932 = vst [vmem:[%s6958_s8 + $0x50] sm:$0xff] %v2928_v26  ;;  %v4686_v18 = vmul.f32 %v5647_v1, %v8236_v36  ;;  %v4687_v45 = vmul.f32 %v5647_v1, %v8243_v48 }
 0x370   : > { %v4688_v25 = vmul.f32 %v5647_v1, %v8246_v20  ;;  %v4689_v6 = vmul.f32 %v5647_v1, %v8249_v40  ;;  %2933 = vst [vmem:[%s6958_s8 + $0x58] sm:$0xff] %v2929_v10  ;;  %v4676_v14 = vadd.f32 %v4672_v15, %v4662_v35  ;;  %v4677_v63 = vadd.f32 %v4673_v30, %v4663_v47 }
 0x371   : > { %v4678_v49 = vadd.f32 %v4674_v28, %v4664_v12  ;;  %v4679_v24 = vadd.f32 %v4675_v2, %v4665_v41  ;;  %v4700_v46 = vmul.f32 %v5648_v13, %v8256_v58  ;;  %v4701_v42 = vmul.f32 %v5648_v13, %v8259_v9  ;;  %v5651_v58 = vld [vmem:[#allocation3 + $0xdf] ss:$0 sm:$0xff]  ;;  %v8368_v28 = vld [vmem:[%s6466_s14] sm:$0xff]  ;;  %v8371_v2 = vld [vmem:[%s6466_s14 + $0x8] sm:$0xff] }
 0x372   : > { %v4702_v37 = vmul.f32 %v5648_v13, %v8262_v60  ;;  %v4703_v36 = vmul.f32 %v5648_v13, %v8265_v4  ;;  %v4690_v48 = vadd.f32 %v4686_v18, %v4676_v14  ;;  %v4691_v56 = vadd.f32 %v4687_v45, %v4677_v63  ;;  %v8374_v12 = vld [vmem:[%s6466_s14 + $0x10] sm:$0xff]  ;;  %v8377_v41 = vld [vmem:[%s6466_s14 + $0x18] sm:$0xff]  ;;  %v8383_v14 = vld [vmem:[%s6466_s14 + $0x20] sm:$0xff] }
 0x373   : > { %v4692_v20 = vadd.f32 %v4688_v25, %v4678_v49  ;;  %v4693_v34 = vadd.f32 %v4689_v6, %v4679_v24  ;;  %v4714_v40 = vmul.f32 %v5649_v19, %v8272_v33  ;;  %v4715_v27 = vmul.f32 %v5649_v19, %v8275_v5  ;;  %v1357_v33 = vpop.f32.mrf.mxu1  ;;  %v8386_v63 = vld [vmem:[%s6466_s14 + $0x28] sm:$0xff]  ;;  %v8390_v24 = vld [vmem:[%s6466_s14 + $0x30] sm:$0xff] }
 0x374   : > { %v4716_v0 = vmul.f32 %v5649_v19, %v8278_v43  ;;  %v4717_v54 = vmul.f32 %v5649_v19, %v8281_v51  ;;  %v4704_v8 = vadd.f32 %v4700_v46, %v4690_v48  ;;  %v4705_v9 = vadd.f32 %v4701_v42, %v4691_v56  ;;  %v1405_v51 = vpop.f32.mrf.mxu3  ;;  %v8393_v46 = vld [vmem:[%s6466_s14 + $0x38] sm:$0xff]  ;;  %v5725_v56 = vld [vmem:[%s6473_s15 + $0x8] sm:$0xff] }
 0x375   : > { %v4706_v17 = vadd.f32 %v4702_v37, %v4692_v20  ;;  %v4707_v60 = vadd.f32 %v4703_v36, %v4693_v34  ;;  %v4728_v4 = vmul.f32 %v5650_v7, %v8288_v61  ;;  %v4729_v11 = vmul.f32 %v5650_v7, %v8291_v38  ;;  %v5726_v34 = vld [vmem:[%s6473_s15 + $0x10] sm:$0xff] }
 0x376   : > { %v4730_v16 = vmul.f32 %v5650_v7, %v8294_v62  ;;  %v4731_v29 = vmul.f32 %v5650_v7, %v8297_v23  ;;  %v4718_v5 = vadd.f32 %v4714_v40, %v4704_v8  ;;  %v4719_v32 = vadd.f32 %v4715_v27, %v4705_v9  ;;  %v1473_v47 = vpop.f32.mrf.mxu0  ;;  %v8398_v7 = vld [vmem:[%s6473_s15] sm:$0xff] }
 0x377   : > { %v4720_v43 = vadd.f32 %v4716_v0, %v4706_v17  ;;  %v4721_v57 = vadd.f32 %v4717_v54, %v4707_v60  ;;  %v4742_v3 = vmul.f32 %v5651_v58, %v8304_v50  ;;  %v4743_v26 = vmul.f32 %v5651_v58, %v8307_v21  ;;  %v8405_v0 = vld [vmem:[%s6466_s14 + $0x40] sm:$0xff]  ;;  %v8408_v54 = vld [vmem:[%s6466_s14 + $0x48] sm:$0xff]  ;;  %v8413_v17 = vld [vmem:[%s6466_s14 + $0x50] sm:$0xff] }
 0x378   : > { %v4744_v61 = vmul.f32 %v5651_v58, %v8310_v39  ;;  %v4745_v38 = vmul.f32 %v5651_v58, %v8313_v31  ;;  %v4732_v10 = vadd.f32 %v4728_v4, %v4718_v5  ;;  %v4733_v62 = vadd.f32 %v4729_v11, %v4719_v32  ;;  %v5727_v58 = vld [vmem:[%s6473_s15 + $0x18] sm:$0xff]  ;;  %v8422_v32 = vld [vmem:[%s6466_s14 + $0x60] sm:$0xff]  ;;  %s5225_s15 = scalar_lea.hbm %s8988_s7, %s5383_s9 }
 0x379   : > { %v4734_v23 = vadd.f32 %v4730_v16, %v4720_v43  ;;  %v4735_v1 = vadd.f32 %v4731_v29, %v4721_v57  ;;  %v1471_v44 = vadd.f32 %v1470_v22, %v1357_v33  ;;  %v1519_v59 = vadd.f32 %v1518_v55, %v1405_v51  ;;  %v8416_v60 = vld [vmem:[%s6466_s14 + $0x58] sm:$0xff]  ;;  %v8425_v43 = vld [vmem:[%s6466_s14 + $0x68] sm:$0xff]  ;;  %v8429_v55 = vld [vmem:[%s6466_s14 + $0x70] sm:$0xff]  ;;  %s5228_s11 = sshll.u32 %s5225_s15, 4  ;;  %s5229_s11 = int_to_ptr.hbm [resolvable:$true] %s5228_s11 }
 0x37a   : > { %v4746_v53 = vadd.f32 %v4742_v3, %v4732_v10  ;;  %v4747_v50 = vadd.f32 %v4743_v26, %v4733_v62  ;;  %v8432_v3 = vld [vmem:[%s6466_s14 + $0x78] sm:$0xff]  ;;  %s5742_s17 = sshra.s32 %s5229_s11, 4  ;;  %s5743_s17 = int_to_ptr.hbm [resolvable:$true] %s5742_s17 }
 0x37b   : > { %v4748_v52 = vadd.f32 %v4744_v61, %v4734_v23  ;;  %v4749_v21 = vadd.f32 %v4745_v38, %v4735_v1  ;;  %1542 = vst [vmem:[#allocation3 + $0x60] sm:$0xff] %v1471_v44  ;;  %v1360_v35 = vpop.f32.mrf.mxu1  ;;  %s5744_s18 = scalar_lea.hbm %s5743_s17, 256  ;;  %p5749_p3 = scmp.lt.s32.totalorder %s5743_s17, %s8988_s7 }
 0x37c   : > { %v4750_v39 = vmax.f32 %v4746_v53, 0.0  ;;  %v4751_v31 = vmax.f32 %v4747_v50, 0.0  ;;  %1558 = vst [vmem:[#allocation3 + $0xe0] sm:$0xff] %v1519_v59  ;;  %v1474_v45 = vadd.f32 %v1473_v47, %v1360_v35  ;;  %v8439_v53 = vld [vmem:[%s6466_s14 + $0x80] sm:$0xff]  ;;  %p5745_p0 = scmp.ne.s32.totalorder %s5743_s17, %s5744_s18  ;;  %p5750_p4 = scmp.lt.s32.totalorder %s5748_s21, %s5744_s18 }
 0x37d   : > { %v4752_v15 = vmax.f32 %v4748_v52, 0.0  ;;  %v4753_v30 = vmax.f32 %v4749_v21, 0.0  ;;  %v8442_v52 = vld [vmem:[%s6466_s14 + $0x88] sm:$0xff]  ;;  %v8445_v21 = vld [vmem:[%s6466_s14 + $0x90] sm:$0xff] }
 0x37e   : > { %4754 = vst [vmem:[%s6958_s8 + $0xc0] sm:$0xff] %v4750_v39  ;;  %p5746_p1 = pnand %p5745_p0, %p5878_p6  ;;  %p5751_p5 = por %p5750_p4, %p5749_p3 }
 0x37f   : > { %4755 = vst [vmem:[%s6958_s8 + $0xc8] sm:$0xff] %v4751_v31 }
 0x380   : > { %4756 = vst [vmem:[%s6958_s8 + $0xd0] sm:$0xff] %v4752_v15  ;;  %p5747_p2 = pneg %p5746_p1 }
 0x381   : > { %4757 = vst [vmem:[%s6958_s8 + $0xd8] sm:$0xff] %v4753_v30  ;;  %v8448_v30 = vld [vmem:[%s6466_s14 + $0x98] sm:$0xff] }
 0x382   : > { %v5652_v13 = vld [vmem:[#allocation3 + $0x60] ss:$0 sm:$0xff]  ;;  %v5653_v18 = vld [vmem:[#allocation3 + $0x61] ss:$0 sm:$0xff]  ;;  %v5654_v36 = vld [vmem:[#allocation3 + $0x62] ss:$0 sm:$0xff]  ;;  %p5752_p7 = pnand %p5751_p5, %p5747_p2 }
 0x383   : > { %v2940_v25 = vmul.f32 %v5652_v13, %v8368_v28  ;;  %v2941_v6 = vmul.f32 %v5652_v13, %v8371_v2  ;;  %v2942_v19 = vmul.f32 %v5652_v13, %v8374_v12  ;;  %v2943_v49 = vmul.f32 %v5652_v13, %v8377_v41  ;;  %1543 = vst [vmem:[#allocation3 + $0x68] sm:$0xff] %v1474_v45  ;;  %v5655_v16 = vld [vmem:[#allocation3 + $0x63] ss:$0 sm:$0xff]  ;;  %v5660_v59 = vld [vmem:[#allocation3 + $0xe0] ss:$0 sm:$0xff] }
 0x384   : > { %v2954_v42 = vmul.f32 %v5653_v18, %v8383_v14  ;;  %v2955_v37 = vmul.f32 %v5653_v18, %v8386_v63  ;;  %v2956_v27 = vmul.f32 %v5653_v18, %v8390_v24  ;;  %v2957_v9 = vmul.f32 %v5653_v18, %v8393_v46  ;;  %v5656_v50 = vld [vmem:[#allocation3 + $0x64] ss:$0 sm:$0xff] }
 0x385   : > { %v2944_v48 = vadd.f32 %v8398_v7, %v2940_v25  ;;  %v2945_v20 = vadd.f32 %v5725_v56, %v2941_v6  ;;  %v2946_v40 = vadd.f32 %v5726_v34, %v2942_v19  ;;  %v2947_v8 = vadd.f32 %v5727_v58, %v2943_v49  ;;  %v8457_v19 = vld [vmem:[%s6466_s14 + $0xa0] sm:$0xff] }
 0x386   : > { %v2968_v4 = vmul.f32 %v5654_v36, %v8405_v0  ;;  %v2969_v11 = vmul.f32 %v5654_v36, %v8408_v54  ;;  %v2970_v5 = vmul.f32 %v5654_v36, %v8413_v17  ;;  %v2971_v51 = vmul.f32 %v5654_v36, %v8416_v60  ;;  %v5657_v49 = vld [vmem:[#allocation3 + $0x65] ss:$0 sm:$0xff]  ;;  %v8465_v36 = vld [vmem:[%s6466_s14 + $0xb0] sm:$0xff] }
 0x387   : > { %v2958_v29 = vadd.f32 %v2954_v42, %v2944_v48  ;;  %v2959_v33 = vadd.f32 %v2955_v37, %v2945_v20  ;;  %v2960_v22 = vadd.f32 %v2956_v27, %v2946_v40  ;;  %v2961_v57 = vadd.f32 %v2957_v9, %v2947_v8  ;;  %v8468_v40 = vld [vmem:[%s6466_s14 + $0xb8] sm:$0xff] }
 0x388   : > { %v2982_v26 = vmul.f32 %v5655_v16, %v8422_v32  ;;  %v2983_v61 = vmul.f32 %v5655_v16, %v8425_v43  ;;  %v2984_v23 = vmul.f32 %v5655_v16, %v8429_v55  ;;  %v2985_v44 = vmul.f32 %v5655_v16, %v8432_v3 }
 0x389   : > { %v2972_v38 = vadd.f32 %v2968_v4, %v2958_v29  ;;  %v2973_v10 = vadd.f32 %v2969_v11, %v2959_v33  ;;  %v2974_v62 = vadd.f32 %v2970_v5, %v2960_v22  ;;  %v2975_v1 = vadd.f32 %v2971_v51, %v2961_v57  ;;  %v8475_v29 = vld [vmem:[%s6466_s14 + $0xc0] sm:$0xff]  ;;  %v8479_v57 = vld [vmem:[%s6466_s14 + $0xc8] sm:$0xff]  ;;  %v8482_v51 = vld [vmem:[%s6466_s14 + $0xd0] sm:$0xff] }
 0x38a   : > { %v4764_v35 = vmul.f32 %v5660_v59, %v8368_v28  ;;  %v4765_v47 = vmul.f32 %v5660_v59, %v8371_v2  ;;  %v4766_v18 = vmul.f32 %v5660_v59, %v8374_v12  ;;  %v2996_v45 = vmul.f32 %v5656_v50, %v8439_v53  ;;  %v8462_v28 = vld [vmem:[%s6466_s14 + $0xa8] sm:$0xff]  ;;  %v5661_v2 = vld [vmem:[#allocation3 + $0xe1] ss:$0 sm:$0xff]  ;;  %v5658_v33 = vld [vmem:[#allocation3 + $0x66] ss:$0 sm:$0xff] }
 0x38b   : > { %v2986_v39 = vadd.f32 %v2982_v26, %v2972_v38  ;;  %v2987_v31 = vadd.f32 %v2983_v61, %v2973_v10  ;;  %v2988_v15 = vadd.f32 %v2984_v23, %v2974_v62  ;;  %v2989_v13 = vadd.f32 %v2985_v44, %v2975_v1  ;;  %v5662_v26 = vld [vmem:[#allocation3 + $0xe2] ss:$0 sm:$0xff] }
 0x38c   : > { %v2997_v25 = vmul.f32 %v5656_v50, %v8442_v52  ;;  %v2998_v6 = vmul.f32 %v5656_v50, %v8445_v21  ;;  %v4767_v42 = vmul.f32 %v5660_v59, %v8377_v41  ;;  %v2999_v37 = vmul.f32 %v5656_v50, %v8448_v30  ;;  %v8495_v50 = vld [vmem:[%s6466_s14 + $0xe0] sm:$0xff] }
 0x38d   : > { %v3000_v12 = vadd.f32 %v2996_v45, %v2986_v39  ;;  %v4768_v8 = vadd.f32 %v8398_v7, %v4764_v35  ;;  %v4769_v9 = vadd.f32 %v5725_v56, %v4765_v47  ;;  %v4770_v41 = vadd.f32 %v5726_v34, %v4766_v18  ;;  %v5659_v39 = vld [vmem:[#allocation3 + $0x67] ss:$0 sm:$0xff]  ;;  %v5663_v45 = vld [vmem:[#allocation3 + $0xe3] ss:$0 sm:$0xff] }
 0x38e   : > { %v3001_v48 = vadd.f32 %v2997_v25, %v2987_v31  ;;  %v3002_v20 = vadd.f32 %v2998_v6, %v2988_v15  ;;  %v3003_v27 = vadd.f32 %v2999_v37, %v2989_v13  ;;  %v3010_v4 = vmul.f32 %v5657_v49, %v8457_v19  ;;  %v8499_v13 = vld [vmem:[%s6466_s14 + $0xe8] sm:$0xff] }
 0x38f   : > { %v3011_v11 = vmul.f32 %v5657_v49, %v8462_v28  ;;  %v3012_v16 = vmul.f32 %v5657_v49, %v8465_v36  ;;  %v4771_v22 = vadd.f32 %v5727_v58, %v4767_v42  ;;  %v3013_v5 = vmul.f32 %v5657_v49, %v8468_v40  ;;  %v8488_v58 = vld [vmem:[%s6466_s14 + $0xd8] sm:$0xff] }
 0x390   : > { %v4778_v7 = vmul.f32 %v5661_v2, %v8383_v14  ;;  %v4779_v56 = vmul.f32 %v5661_v2, %v8386_v63  ;;  %v4780_v34 = vmul.f32 %v5661_v2, %v8390_v24  ;;  %v3014_v61 = vadd.f32 %v3010_v4, %v3000_v12  ;;  %v8508_v42 = vld [vmem:[%s6466_s14 + $0xf8] sm:$0xff] }
 0x391   : > { %v3015_v38 = vadd.f32 %v3011_v11, %v3001_v48  ;;  %v3016_v10 = vadd.f32 %v3012_v16, %v3002_v20  ;;  %v4781_v62 = vmul.f32 %v5661_v2, %v8393_v46  ;;  %v3017_v23 = vadd.f32 %v3013_v5, %v3003_v27  ;;  %v8502_v46 = vld [vmem:[%s6466_s14 + $0xf0] sm:$0xff]  ;;  %v5665_v11 = vld [vmem:[#allocation3 + $0xe5] ss:$0 sm:$0xff]  ;;  %v1521_v5 = vpop.f32.mrf.mxu2 }
 0x392   : > { %v4782_v1 = vadd.f32 %v4778_v7, %v4768_v8  ;;  %v4783_v44 = vadd.f32 %v4779_v56, %v4769_v9  ;;  %v4784_v59 = vadd.f32 %v4780_v34, %v4770_v41  ;;  %v3024_v14 = vmul.f32 %v5658_v33, %v8475_v29  ;;  %v5664_v8 = vld [vmem:[#allocation3 + $0xe4] ss:$0 sm:$0xff] }
 0x393   : > { %v3025_v63 = vmul.f32 %v5658_v33, %v8479_v57  ;;  %v3026_v24 = vmul.f32 %v5658_v33, %v8482_v51  ;;  %v4785_v31 = vadd.f32 %v4781_v62, %v4771_v22  ;;  %v3027_v15 = vmul.f32 %v5658_v33, %v8488_v58  ;;  %v8519_v16 = vld [vmem:[%s6466_s14 + $0x100] sm:$0xff]  ;;  %v5668_v33 = vld [vmem:[#allocation3 + $0x68] ss:$0 sm:$0xff]  ;;  %v1408_v22 = vpop.f32.mrf.mxu3 }
 0x394   : > { %v4792_v35 = vmul.f32 %v5662_v26, %v8405_v0  ;;  %v4793_v47 = vmul.f32 %v5662_v26, %v8408_v54  ;;  %v4794_v18 = vmul.f32 %v5662_v26, %v8413_v17  ;;  %v3028_v25 = vadd.f32 %v3024_v14, %v3014_v61  ;;  %v8523_v61 = vld [vmem:[%s6466_s14 + $0x108] sm:$0xff] }
 0x395   : > { %v3029_v6 = vadd.f32 %v3025_v63, %v3015_v38  ;;  %v3030_v49 = vadd.f32 %v3026_v24, %v3016_v10  ;;  %v4795_v37 = vmul.f32 %v5662_v26, %v8416_v60  ;;  %v3031_v2 = vadd.f32 %v3027_v15, %v3017_v23  ;;  %v8526_v38 = vld [vmem:[%s6466_s14 + $0x110] sm:$0xff]  ;;  %v8543_v15 = vld [vmem:[%s6466_s14 + $0x120] sm:$0xff] }
 0x396   : > { %v4796_v12 = vadd.f32 %v4792_v35, %v4782_v1  ;;  %v4797_v48 = vadd.f32 %v4793_v47, %v4783_v44  ;;  %v4798_v20 = vadd.f32 %v4794_v18, %v4784_v59  ;;  %v3038_v27 = vmul.f32 %v5659_v39, %v8495_v50  ;;  %v5669_v35 = vld [vmem:[#allocation3 + $0x69] ss:$0 sm:$0xff] }
 0x397   : > { %v3039_v0 = vmul.f32 %v5659_v39, %v8499_v13  ;;  %v3040_v54 = vmul.f32 %v5659_v39, %v8502_v46  ;;  %v4799_v17 = vadd.f32 %v4795_v37, %v4785_v31  ;;  %v3041_v9 = vmul.f32 %v5659_v39, %v8508_v42 }
 0x398   : > { %v4806_v41 = vmul.f32 %v5663_v45, %v8422_v32  ;;  %v4807_v60 = vmul.f32 %v5663_v45, %v8425_v43  ;;  %v4808_v4 = vmul.f32 %v5663_v45, %v8429_v55  ;;  %v3042_v7 = vadd.f32 %v3038_v27, %v3028_v25  ;;  %v8529_v32 = vld [vmem:[%s6466_s14 + $0x118] sm:$0xff] }
 0x399   : > { %v3043_v56 = vadd.f32 %v3039_v0, %v3029_v6  ;;  %v3044_v34 = vadd.f32 %v3040_v54, %v3030_v49  ;;  %v4809_v26 = vmul.f32 %v5663_v45, %v8432_v3  ;;  %v3045_v43 = vadd.f32 %v3041_v9, %v3031_v2  ;;  %v5666_v3 = vld [vmem:[#allocation3 + $0xe6] ss:$0 sm:$0xff]  ;;  %v8547_v6 = vld [vmem:[%s6466_s14 + $0x128] sm:$0xff]  ;;  %v8550_v49 = vld [vmem:[%s6466_s14 + $0x130] sm:$0xff]  ;;  %v1363_v2 = vpop.f32.mrf.mxu1 }
 0x39a   : > { %v4810_v10 = vadd.f32 %v4806_v41, %v4796_v12  ;;  %v4811_v55 = vadd.f32 %v4807_v60, %v4797_v48  ;;  %v4812_v62 = vadd.f32 %v4808_v4, %v4798_v20  ;;  %v4820_v1 = vmul.f32 %v5664_v8, %v8439_v53  ;;  %v1476_v12 = vpop.f32.mrf.mxu0  ;;  %v8559_v0 = vld [vmem:[%s6466_s14 + $0x140] sm:$0xff]  ;;  %v5670_v54 = vld [vmem:[#allocation3 + $0x6a] ss:$0 sm:$0xff]  ;;  %v8569_v60 = vld [vmem:[%s6466_s14 + $0x150] sm:$0xff] }
 0x39b   : > { %v4813_v23 = vadd.f32 %v4809_v26, %v4799_v17  ;;  %v4821_v44 = vmul.f32 %v5664_v8, %v8442_v52  ;;  %v4822_v59 = vmul.f32 %v5664_v8, %v8445_v21  ;;  %v3052_v14 = vmul.f32 %v5668_v33, %v8519_v16  ;;  %v1411_v17 = vpop.f32.mrf.mxu3  ;;  %v8566_v41 = vld [vmem:[%s6466_s14 + $0x148] sm:$0xff]  ;;  %v8572_v4 = vld [vmem:[%s6466_s14 + $0x158] sm:$0xff] }
 0x39c   : > { %v3053_v63 = vmul.f32 %v5668_v33, %v8523_v61  ;;  %v3054_v24 = vmul.f32 %v5668_v33, %v8526_v38  ;;  %v3055_v39 = vmul.f32 %v5668_v33, %v8529_v32  ;;  %v4823_v31 = vmul.f32 %v5664_v8, %v8448_v30  ;;  %v8553_v30 = vld [vmem:[%s6466_s14 + $0x138] sm:$0xff]  ;;  %v1524_v8 = vpop.f32.mrf.mxu2 }
 0x39d   : > { %v4834_v53 = vmul.f32 %v5665_v11, %v8457_v19  ;;  %v4835_v52 = vmul.f32 %v5665_v11, %v8462_v28  ;;  %v4836_v21 = vmul.f32 %v5665_v11, %v8465_v36  ;;  %v4824_v47 = vadd.f32 %v4820_v1, %v4810_v10 }
 0x39e   : > { %v4825_v18 = vadd.f32 %v4821_v44, %v4811_v55  ;;  %v4826_v45 = vadd.f32 %v4822_v59, %v4812_v62  ;;  %v4837_v25 = vmul.f32 %v5665_v11, %v8468_v40  ;;  %v4827_v19 = vadd.f32 %v4823_v31, %v4813_v23  ;;  %v8580_v44 = vld [vmem:[%s6466_s14 + $0x160] sm:$0xff]  ;;  %v5671_v59 = vld [vmem:[#allocation3 + $0x6b] ss:$0 sm:$0xff] }
 0x39f   : > { %v4848_v28 = vmul.f32 %v5666_v3, %v8475_v29  ;;  %v4849_v36 = vmul.f32 %v5666_v3, %v8479_v57  ;;  %v4850_v37 = vmul.f32 %v5666_v3, %v8482_v51  ;;  %v3056_v48 = vadd.f32 %v3052_v14, %v3042_v7 }
 0x3a0   : > { %v3057_v40 = vadd.f32 %v3053_v63, %v3043_v56  ;;  %v3058_v20 = vadd.f32 %v3054_v24, %v3044_v34  ;;  %v3059_v27 = vadd.f32 %v3055_v39, %v3045_v43  ;;  %v3066_v29 = vmul.f32 %v5669_v35, %v8543_v15  ;;  %v8583_v24 = vld [vmem:[%s6466_s14 + $0x168] sm:$0xff]  ;;  %v5667_v39 = vld [vmem:[#allocation3 + $0xe7] ss:$0 sm:$0xff] }
 0x3a1   : > { %v3067_v57 = vmul.f32 %v5669_v35, %v8547_v6  ;;  %v3068_v9 = vmul.f32 %v5669_v35, %v8550_v49  ;;  %v3069_v51 = vmul.f32 %v5669_v35, %v8553_v30  ;;  %v4838_v11 = vadd.f32 %v4834_v53, %v4824_v47 }
 0x3a2   : > { %v4839_v33 = vadd.f32 %v4835_v52, %v4825_v18  ;;  %v4840_v7 = vadd.f32 %v4836_v21, %v4826_v45  ;;  %v4851_v56 = vmul.f32 %v5666_v3, %v8488_v58  ;;  %v4841_v34 = vadd.f32 %v4837_v25, %v4827_v19 }
 0x3a3   : > { %v1522_v26 = vadd.f32 %v1521_v5, %v1408_v22  ;;  %v1477_v43 = vadd.f32 %v1476_v12, %v1363_v2  ;;  %v1525_v10 = vadd.f32 %v1524_v8, %v1411_v17  ;;  %v3080_v55 = vmul.f32 %v5670_v54, %v8559_v0  ;;  %v8586_v22 = vld [vmem:[%s6466_s14 + $0x170] sm:$0xff]  ;;  %v8589_v5 = vld [vmem:[%s6466_s14 + $0x178] sm:$0xff]  ;;  %v5672_v17 = vld [vmem:[#allocation3 + $0x6c] ss:$0 sm:$0xff] }
 0x3a4   : > { %v3081_v62 = vmul.f32 %v5670_v54, %v8566_v41  ;;  %v3082_v23 = vmul.f32 %v5670_v54, %v8569_v60  ;;  %v3083_v1 = vmul.f32 %v5670_v54, %v8572_v4  ;;  %v3070_v14 = vadd.f32 %v3066_v29, %v3056_v48  ;;  %v8609_v54 = vld [vmem:[%s6466_s14 + $0x198] sm:$0xff] }
 0x3a5   : > { %v3071_v63 = vadd.f32 %v3067_v57, %v3057_v40  ;;  %v3072_v58 = vadd.f32 %v3068_v9, %v3058_v20  ;;  %v3073_v3 = vadd.f32 %v3069_v51, %v3059_v27  ;;  %1559 = vst [vmem:[#allocation3 + $0xe8] sm:$0xff] %v1522_v26  ;;  %v4852_v31 = vadd.f32 %v4848_v28, %v4838_v11  ;;  %v8600_v40 = vld [vmem:[%s6466_s14 + $0x180] sm:$0xff]  ;;  %v8603_v20 = vld [vmem:[%s6466_s14 + $0x188] sm:$0xff]  ;;  %v8606_v27 = vld [vmem:[%s6466_s14 + $0x190] sm:$0xff] }
 0x3a6   : > { %1544 = vst [vmem:[#allocation3 + $0x70] sm:$0xff] %v1477_v43  ;;  %v4853_v53 = vadd.f32 %v4849_v36, %v4839_v33  ;;  %v4854_v52 = vadd.f32 %v4850_v37, %v4840_v7  ;;  %v4855_v21 = vadd.f32 %v4851_v56, %v4841_v34  ;;  %v3094_v35 = vmul.f32 %v5671_v59, %v8580_v44 }
 0x3a7   : > { %1560 = vst [vmem:[#allocation3 + $0xf0] sm:$0xff] %v1525_v10  ;;  %v3095_v47 = vmul.f32 %v5671_v59, %v8583_v24  ;;  %v3096_v18 = vmul.f32 %v5671_v59, %v8586_v22  ;;  %v3097_v45 = vmul.f32 %v5671_v59, %v8589_v5  ;;  %v3084_v25 = vadd.f32 %v3080_v55, %v3070_v14  ;;  %v8629_v14 = vld [vmem:[%s6466_s14 + $0x1b8] sm:$0xff] }
 0x3a8   : > { %v3085_v19 = vadd.f32 %v3081_v62, %v3071_v63  ;;  %v3086_v2 = vadd.f32 %v3082_v23, %v3072_v58  ;;  %v3087_v28 = vadd.f32 %v3083_v1, %v3073_v3  ;;  %v4862_v36 = vmul.f32 %v5667_v39, %v8495_v50  ;;  %v8620_v62 = vld [vmem:[%s6466_s14 + $0x1a0] sm:$0xff]  ;;  %v8623_v23 = vld [vmem:[%s6466_s14 + $0x1a8] sm:$0xff] }
 0x3a9   : > { %v4863_v37 = vmul.f32 %v5667_v39, %v8499_v13  ;;  %v4864_v12 = vmul.f32 %v5667_v39, %v8502_v46  ;;  %v4865_v48 = vmul.f32 %v5667_v39, %v8508_v42  ;;  %v3098_v46 = vadd.f32 %v3094_v35, %v3084_v25 }
 0x3aa   : > { %v4866_v8 = vadd.f32 %v4862_v36, %v4852_v31  ;;  %v3099_v9 = vadd.f32 %v3095_v47, %v3085_v19  ;;  %v3100_v42 = vadd.f32 %v3096_v18, %v3086_v2  ;;  %v3101_v51 = vadd.f32 %v3097_v45, %v3087_v28  ;;  %v8636_v47 = vld [vmem:[%s6466_s14 + $0x1c0] sm:$0xff]  ;;  %v8639_v18 = vld [vmem:[%s6466_s14 + $0x1c8] sm:$0xff]  ;;  %v8642_v45 = vld [vmem:[%s6466_s14 + $0x1d0] sm:$0xff] }
 0x3ab   : > { %v4867_v29 = vadd.f32 %v4863_v37, %v4853_v53  ;;  %v4868_v57 = vadd.f32 %v4864_v12, %v4854_v52  ;;  %v4869_v50 = vadd.f32 %v4865_v48, %v4855_v21  ;;  %v3108_v26 = vmul.f32 %v5672_v17, %v8600_v40  ;;  %v5674_v36 = vld [vmem:[#allocation3 + $0x6e] ss:$0 sm:$0xff]  ;;  %v8649_v37 = vld [vmem:[%s6466_s14 + $0x1d8] sm:$0xff] }
 0x3ac   : > { %v5676_v13 = vld [vmem:[#allocation3 + $0xe8] ss:$0 sm:$0xff]  ;;  %v5677_v11 = vld [vmem:[#allocation3 + $0xe9] ss:$0 sm:$0xff]  ;;  %v3109_v43 = vmul.f32 %v5672_v17, %v8603_v20  ;;  %v3110_v10 = vmul.f32 %v5672_v17, %v8606_v27  ;;  %v3111_v55 = vmul.f32 %v5672_v17, %v8609_v54  ;;  %v5678_v31 = vld [vmem:[#allocation3 + $0xea] ss:$0 sm:$0xff] }
 0x3ad   : > { %v4876_v33 = vmul.f32 %v5676_v13, %v8519_v16  ;;  %v4877_v7 = vmul.f32 %v5676_v13, %v8523_v61  ;;  %v4878_v56 = vmul.f32 %v5676_v13, %v8526_v38  ;;  %v4879_v34 = vmul.f32 %v5676_v13, %v8529_v32  ;;  %v8626_v16 = vld [vmem:[%s6466_s14 + $0x1b0] sm:$0xff]  ;;  %v5673_v61 = vld [vmem:[#allocation3 + $0x6d] ss:$0 sm:$0xff] }
 0x3ae   : > { %v4890_v63 = vmul.f32 %v5677_v11, %v8543_v15  ;;  %v4891_v58 = vmul.f32 %v5677_v11, %v8547_v6  ;;  %v4892_v3 = vmul.f32 %v5677_v11, %v8550_v49  ;;  %v4893_v39 = vmul.f32 %v5677_v11, %v8553_v30 }
 0x3af   : > { %v4880_v38 = vadd.f32 %v4876_v33, %v4866_v8  ;;  %v4881_v32 = vadd.f32 %v4877_v7, %v4867_v29  ;;  %v4882_v1 = vadd.f32 %v4878_v56, %v4868_v57  ;;  %v4883_v59 = vadd.f32 %v4879_v34, %v4869_v50  ;;  %v5679_v29 = vld [vmem:[#allocation3 + $0xeb] ss:$0 sm:$0xff]  ;;  %v5675_v34 = vld [vmem:[#allocation3 + $0x6f] ss:$0 sm:$0xff] }
 0x3b0   : > { %v3112_v53 = vadd.f32 %v3108_v26, %v3098_v46  ;;  %v3113_v52 = vadd.f32 %v3109_v43, %v3099_v9  ;;  %v3114_v21 = vadd.f32 %v3110_v10, %v3100_v42  ;;  %v3115_v35 = vadd.f32 %v3111_v55, %v3101_v51  ;;  %v8656_v9 = vld [vmem:[%s6466_s14 + $0x1e0] sm:$0xff]  ;;  %v8659_v42 = vld [vmem:[%s6466_s14 + $0x1e8] sm:$0xff]  ;;  %v8662_v51 = vld [vmem:[%s6466_s14 + $0x1f0] sm:$0xff] }
 0x3b1   : > { %v4894_v25 = vadd.f32 %v4890_v63, %v4880_v38  ;;  %v4895_v15 = vadd.f32 %v4891_v58, %v4881_v32  ;;  %v4896_v19 = vadd.f32 %v4892_v3, %v4882_v1  ;;  %v4897_v6 = vadd.f32 %v4893_v39, %v4883_v59  ;;  %v8669_v26 = vld [vmem:[%s6466_s14 + $0x1f8] sm:$0xff]  ;;  %v5680_v38 = vld [vmem:[#allocation3 + $0xec] ss:$0 sm:$0xff] }
 0x3b2   : > { %v3122_v49 = vmul.f32 %v5673_v61, %v8620_v62  ;;  %v3123_v30 = vmul.f32 %v5673_v61, %v8623_v23  ;;  %v3124_v2 = vmul.f32 %v5673_v61, %v8626_v16  ;;  %v3125_v28 = vmul.f32 %v5673_v61, %v8629_v14 }
 0x3b3   : > { %v4904_v12 = vmul.f32 %v5678_v31, %v8559_v0  ;;  %v4905_v48 = vmul.f32 %v5678_v31, %v8566_v41  ;;  %v4906_v17 = vmul.f32 %v5678_v31, %v8569_v60  ;;  %v4907_v8 = vmul.f32 %v5678_v31, %v8572_v4 }
 0x3b4   : > { %v3126_v57 = vadd.f32 %v3122_v49, %v3112_v53  ;;  %v3127_v50 = vadd.f32 %v3123_v30, %v3113_v52  ;;  %v3128_v13 = vadd.f32 %v3124_v2, %v3114_v21  ;;  %v3129_v46 = vadd.f32 %v3125_v28, %v3115_v35  ;;  %v8687_v28 = vld [vmem:[%s6466_s14 + $0x208] sm:$0xff] }
 0x3b5   : > { %v4908_v11 = vadd.f32 %v4904_v12, %v4894_v25  ;;  %v4909_v0 = vadd.f32 %v4905_v48, %v4895_v15  ;;  %v4910_v33 = vadd.f32 %v4906_v17, %v4896_v19  ;;  %v4911_v41 = vadd.f32 %v4907_v8, %v4897_v6  ;;  %v8684_v15 = vld [vmem:[%s6466_s14 + $0x200] sm:$0xff]  ;;  %v5684_v19 = vld [vmem:[#allocation3 + $0x70] ss:$0 sm:$0xff]  ;;  %v8693_v12 = vld [vmem:[%s6466_s14 + $0x218] sm:$0xff] }
 0x3b6   : > { %v3136_v60 = vmul.f32 %v5674_v36, %v8636_v47  ;;  %v3137_v4 = vmul.f32 %v5674_v36, %v8639_v18  ;;  %v3138_v7 = vmul.f32 %v5674_v36, %v8642_v45  ;;  %v3139_v56 = vmul.f32 %v5674_v36, %v8649_v37  ;;  %v8690_v36 = vld [vmem:[%s6466_s14 + $0x210] sm:$0xff] }
 0x3b7   : > { %v4918_v43 = vmul.f32 %v5679_v29, %v8580_v44  ;;  %v4919_v10 = vmul.f32 %v5679_v29, %v8583_v24  ;;  %v4920_v55 = vmul.f32 %v5679_v29, %v8586_v22  ;;  %v4921_v61 = vmul.f32 %v5679_v29, %v8589_v5  ;;  %v5681_v5 = vld [vmem:[#allocation3 + $0xed] ss:$0 sm:$0xff] }
 0x3b8   : > { %v3140_v32 = vadd.f32 %v3136_v60, %v3126_v57  ;;  %v3141_v1 = vadd.f32 %v3137_v4, %v3127_v50  ;;  %v3142_v59 = vadd.f32 %v3138_v7, %v3128_v13  ;;  %v3143_v63 = vadd.f32 %v3139_v56, %v3129_v46  ;;  %v5682_v57 = vld [vmem:[#allocation3 + $0xee] ss:$0 sm:$0xff]  ;;  %v8713_v4 = vld [vmem:[%s6466_s14 + $0x238] sm:$0xff] }
 0x3b9   : > { %v4922_v58 = vadd.f32 %v4918_v43, %v4908_v11  ;;  %v4923_v3 = vadd.f32 %v4919_v10, %v4909_v0  ;;  %v4924_v39 = vadd.f32 %v4920_v55, %v4910_v33  ;;  %v4925_v31 = vadd.f32 %v4921_v61, %v4911_v41  ;;  %v8704_v0 = vld [vmem:[%s6466_s14 + $0x220] sm:$0xff]  ;;  %v5683_v10 = vld [vmem:[#allocation3 + $0xef] ss:$0 sm:$0xff] }
 0x3ba   : > { %v3150_v53 = vmul.f32 %v5675_v34, %v8656_v9  ;;  %v3151_v44 = vmul.f32 %v5675_v34, %v8659_v42  ;;  %v3152_v24 = vmul.f32 %v5675_v34, %v8662_v51  ;;  %v3153_v22 = vmul.f32 %v5675_v34, %v8669_v26 }
 0x3bb   : > { %v4932_v52 = vmul.f32 %v5680_v38, %v8600_v40  ;;  %v4933_v21 = vmul.f32 %v5680_v38, %v8603_v20  ;;  %v4934_v35 = vmul.f32 %v5680_v38, %v8606_v27  ;;  %v4935_v25 = vmul.f32 %v5680_v38, %v8609_v54 }
 0x3bc   : > { %v3154_v6 = vadd.f32 %v3150_v53, %v3140_v32  ;;  %v3155_v49 = vadd.f32 %v3151_v44, %v3141_v1  ;;  %v3156_v30 = vadd.f32 %v3152_v24, %v3142_v59  ;;  %v3157_v2 = vadd.f32 %v3153_v22, %v3143_v63  ;;  %v3187_v1 = vld [vmem:[%s6466_s14 + $0x240] sm:$0xff]  ;;  %v5686_v59 = vld [vmem:[#allocation3 + $0x72] ss:$0 sm:$0xff] }
 0x3bd   : > { %v4936_v40 = vadd.f32 %v4932_v52, %v4922_v58  ;;  %v4937_v20 = vadd.f32 %v4933_v21, %v4923_v3  ;;  %v4938_v48 = vadd.f32 %v4934_v35, %v4924_v39  ;;  %v4939_v27 = vadd.f32 %v4935_v25, %v4925_v31  ;;  %v3189_v3 = vld [vmem:[%s6466_s14 + $0x250] sm:$0xff]  ;;  %v8732_v21 = vld [vmem:[%s6466_s14 + $0x260] sm:$0xff]  ;;  %v8735_v35 = vld [vmem:[%s6466_s14 + $0x268] sm:$0xff] }
 0x3be   : > { %v4946_v54 = vmul.f32 %v5681_v5, %v8620_v62  ;;  %v4947_v17 = vmul.f32 %v5681_v5, %v8623_v23  ;;  %v4948_v8 = vmul.f32 %v5681_v5, %v8626_v16  ;;  %v4949_v29 = vmul.f32 %v5681_v5, %v8629_v14  ;;  %v5685_v62 = vld [vmem:[#allocation3 + $0x71] ss:$0 sm:$0xff]  ;;  %v8707_v16 = vld [vmem:[%s6466_s14 + $0x228] sm:$0xff]  ;;  %v5687_v25 = vld [vmem:[#allocation3 + $0x73] ss:$0 sm:$0xff] }
 0x3bf   : > { %v3164_v50 = vmul.f32 %v5684_v19, %v8684_v15  ;;  %v3165_v13 = vmul.f32 %v5684_v19, %v8687_v28  ;;  %v3166_v46 = vmul.f32 %v5684_v19, %v8690_v36  ;;  %v3167_v11 = vmul.f32 %v5684_v19, %v8693_v12  ;;  %v8710_v14 = vld [vmem:[%s6466_s14 + $0x230] sm:$0xff] }
 0x3c0   : > { %v4950_v33 = vadd.f32 %v4946_v54, %v4936_v40  ;;  %v4951_v23 = vadd.f32 %v4947_v17, %v4937_v20  ;;  %v4952_v41 = vadd.f32 %v4948_v8, %v4938_v48  ;;  %v4953_v60 = vadd.f32 %v4949_v29, %v4939_v27  ;;  %v3204_v40 = vld [vmem:[%s6466_s14 + $0x278] sm:$0xff]  ;;  %v5692_v20 = vld [vmem:[#allocation3 + $0xf0] ss:$0 sm:$0xff] }
 0x3c1   : > { %v4960_v7 = vmul.f32 %v5682_v57, %v8636_v47  ;;  %v4961_v56 = vmul.f32 %v5682_v57, %v8639_v18  ;;  %v4962_v34 = vmul.f32 %v5682_v57, %v8642_v45  ;;  %v4963_v43 = vmul.f32 %v5682_v57, %v8649_v37  ;;  %v3188_v45 = vld [vmem:[%s6466_s14 + $0x248] sm:$0xff]  ;;  %v3190_v37 = vld [vmem:[%s6466_s14 + $0x258] sm:$0xff] }
 0x3c2   : > { %v3168_v55 = vadd.f32 %v3164_v50, %v3154_v6  ;;  %v3169_v61 = vadd.f32 %v3165_v13, %v3155_v49  ;;  %v3170_v38 = vadd.f32 %v3166_v46, %v3156_v30  ;;  %v3171_v32 = vadd.f32 %v3167_v11, %v3157_v2  ;;  %v3203_v2 = vld [vmem:[%s6466_s14 + $0x270] sm:$0xff] }
 0x3c3   : > { %v3178_v63 = vmul.f32 %v5685_v62, %v8704_v0  ;;  %v3179_v47 = vmul.f32 %v5685_v62, %v8707_v16  ;;  %v3180_v18 = vmul.f32 %v5685_v62, %v8710_v14  ;;  %v3181_v58 = vmul.f32 %v5685_v62, %v8713_v4  ;;  %v5693_v13 = vld [vmem:[#allocation3 + $0xf1] ss:$0 sm:$0xff] }
 0x3c4   : > { %v4964_v39 = vadd.f32 %v4960_v7, %v4950_v33  ;;  %v4965_v31 = vadd.f32 %v4961_v56, %v4951_v23  ;;  %v4966_v53 = vadd.f32 %v4962_v34, %v4952_v41  ;;  %v4967_v44 = vadd.f32 %v4963_v43, %v4953_v60  ;;  %v5694_v23 = vld [vmem:[#allocation3 + $0xf2] ss:$0 sm:$0xff]  ;;  %v5688_v34 = vld [vmem:[#allocation3 + $0x74] ss:$0 sm:$0xff] }
 0x3c5   : > { %v4974_v24 = vmul.f32 %v5683_v10, %v8656_v9  ;;  %v4975_v22 = vmul.f32 %v5683_v10, %v8659_v42  ;;  %v4976_v5 = vmul.f32 %v5683_v10, %v8662_v51  ;;  %v4977_v52 = vmul.f32 %v5683_v10, %v8669_v26 }
 0x3c6   : > { %v3192_v19 = vmul.f32 %v5686_v59, %v3187_v1  ;;  %v3193_v6 = vmul.f32 %v5686_v59, %v3188_v45  ;;  %v3194_v49 = vmul.f32 %v5686_v59, %v3189_v3  ;;  %v3195_v30 = vmul.f32 %v5686_v59, %v3190_v37 }
 0x3c7   : > { %v3182_v48 = vadd.f32 %v3178_v63, %v3168_v55  ;;  %v3183_v9 = vadd.f32 %v3179_v47, %v3169_v61  ;;  %v3184_v27 = vadd.f32 %v3180_v18, %v3170_v38  ;;  %v3185_v42 = vadd.f32 %v3181_v58, %v3171_v32  ;;  %v3215_v38 = vld [vmem:[%s6466_s14 + $0x280] sm:$0xff]  ;;  %v3216_v32 = vld [vmem:[%s6466_s14 + $0x288] sm:$0xff]  ;;  %v5695_v58 = vld [vmem:[#allocation3 + $0xf3] ss:$0 sm:$0xff] }
 0x3c8   : > { %v4978_v54 = vadd.f32 %v4974_v24, %v4964_v39  ;;  %v4979_v51 = vadd.f32 %v4975_v22, %v4965_v31  ;;  %v4980_v17 = vadd.f32 %v4976_v5, %v4966_v53  ;;  %v4981_v26 = vadd.f32 %v4977_v52, %v4967_v44  ;;  %v3217_v22 = vld [vmem:[%s6466_s14 + $0x290] sm:$0xff]  ;;  %v3218_v5 = vld [vmem:[%s6466_s14 + $0x298] sm:$0xff] }
 0x3c9   : > { %v3206_v8 = vmul.f32 %v5687_v25, %v8732_v21  ;;  %v3207_v29 = vmul.f32 %v5687_v25, %v8735_v35  ;;  %v3208_v57 = vmul.f32 %v5687_v25, %v3203_v2  ;;  %v3209_v50 = vmul.f32 %v5687_v25, %v3204_v40 }
 0x3ca   : > { %v4988_v46 = vmul.f32 %v5692_v20, %v8684_v15  ;;  %v4989_v11 = vmul.f32 %v5692_v20, %v8687_v28  ;;  %v4990_v62 = vmul.f32 %v5692_v20, %v8690_v36  ;;  %v4991_v33 = vmul.f32 %v5692_v20, %v8693_v12 }
 0x3cb   : > { %v3196_v41 = vadd.f32 %v3192_v19, %v3182_v48  ;;  %v3197_v60 = vadd.f32 %v3193_v6, %v3183_v9  ;;  %v3198_v7 = vadd.f32 %v3194_v49, %v3184_v27  ;;  %v3199_v56 = vadd.f32 %v3195_v30, %v3185_v42  ;;  %v5696_v49 = vld [vmem:[#allocation3 + $0xf4] ss:$0 sm:$0xff] }
 0x3cc   : > { %v4992_v43 = vadd.f32 %v4988_v46, %v4978_v54  ;;  %v4993_v10 = vadd.f32 %v4989_v11, %v4979_v51  ;;  %v4994_v55 = vadd.f32 %v4990_v62, %v4980_v17  ;;  %v4995_v61 = vadd.f32 %v4991_v33, %v4981_v26  ;;  %v3231_v11 = vld [vmem:[%s6466_s14 + $0x2b0] sm:$0xff] }
 0x3cd   : > { %v5002_v15 = vmul.f32 %v5693_v13, %v8704_v0  ;;  %v5003_v28 = vmul.f32 %v5693_v13, %v8707_v16  ;;  %v5004_v36 = vmul.f32 %v5693_v13, %v8710_v14  ;;  %v5005_v12 = vmul.f32 %v5693_v13, %v8713_v4  ;;  %v5689_v16 = vld [vmem:[#allocation3 + $0x75] ss:$0 sm:$0xff] }
 0x3ce   : > { %v5016_v59 = vmul.f32 %v5694_v23, %v3187_v1  ;;  %v5017_v63 = vmul.f32 %v5694_v23, %v3188_v45  ;;  %v5018_v47 = vmul.f32 %v5694_v23, %v3189_v3  ;;  %v5019_v18 = vmul.f32 %v5694_v23, %v3190_v37  ;;  %v3229_v1 = vld [vmem:[%s6466_s14 + $0x2a0] sm:$0xff]  ;;  %v3230_v45 = vld [vmem:[%s6466_s14 + $0x2a8] sm:$0xff] }
 0x3cf   : > { %v5006_v39 = vadd.f32 %v5002_v15, %v4992_v43  ;;  %v5007_v31 = vadd.f32 %v5003_v28, %v4993_v10  ;;  %v5008_v53 = vadd.f32 %v5004_v36, %v4994_v55  ;;  %v5009_v44 = vadd.f32 %v5005_v12, %v4995_v61  ;;  %v5690_v15 = vld [vmem:[#allocation3 + $0x76] ss:$0 sm:$0xff] }
 0x3d0   : > { %v3220_v24 = vmul.f32 %v5688_v34, %v3215_v38  ;;  %v3221_v0 = vmul.f32 %v5688_v34, %v3216_v32  ;;  %v5030_v3 = vmul.f32 %v5695_v58, %v8732_v21  ;;  %v5031_v37 = vmul.f32 %v5695_v58, %v8735_v35  ;;  %v5697_v21 = vld [vmem:[#allocation3 + $0xf5] ss:$0 sm:$0xff]  ;;  %v3232_v35 = vld [vmem:[%s6466_s14 + $0x2b8] sm:$0xff] }
 0x3d1   : > { %v5020_v52 = vadd.f32 %v5016_v59, %v5006_v39  ;;  %v5021_v14 = vadd.f32 %v5017_v63, %v5007_v31  ;;  %v5022_v25 = vadd.f32 %v5018_v47, %v5008_v53  ;;  %v5023_v4 = vadd.f32 %v5019_v18, %v5009_v44  ;;  %v3245_v12 = vld [vmem:[%s6466_s14 + $0x2d0] sm:$0xff]  ;;  %v3246_v59 = vld [vmem:[%s6466_s14 + $0x2d8] sm:$0xff] }
 0x3d2   : > { %v5032_v19 = vmul.f32 %v5695_v58, %v3203_v2  ;;  %v5033_v6 = vmul.f32 %v5695_v58, %v3204_v40  ;;  %v3210_v30 = vadd.f32 %v3206_v8, %v3196_v41  ;;  %v3211_v20 = vadd.f32 %v3207_v29, %v3197_v60  ;;  %v1366_v8 = vpop.f32.mrf.mxu1  ;;  %v1479_v29 = vpop.f32.mrf.mxu0  ;;  %v5698_v18 = vld [vmem:[#allocation3 + $0xf6] ss:$0 sm:$0xff] }
 0x3d3   : > { %v3212_v48 = vadd.f32 %v3208_v57, %v3198_v7  ;;  %v3213_v9 = vadd.f32 %v3209_v50, %v3199_v56  ;;  %v5034_v27 = vadd.f32 %v5030_v3, %v5020_v52  ;;  %v5035_v42 = vadd.f32 %v5031_v37, %v5021_v14  ;;  %v1414_v60 = vpop.f32.mrf.mxu3  ;;  %v1527_v7 = vpop.f32.mrf.mxu2  ;;  %v5691_v3 = vld [vmem:[#allocation3 + $0x77] ss:$0 sm:$0xff] }
 0x3d4   : > { %v5036_v54 = vadd.f32 %v5032_v19, %v5022_v25  ;;  %v5037_v51 = vadd.f32 %v5033_v6, %v5023_v4  ;;  %v3222_v17 = vmul.f32 %v5688_v34, %v3217_v22  ;;  %v3223_v26 = vmul.f32 %v5688_v34, %v3218_v5  ;;  %v3259_v37 = vld [vmem:[%s6466_s14 + $0x2f0] sm:$0xff]  ;;  %v3260_v19 = vld [vmem:[%s6466_s14 + $0x2f8] sm:$0xff] }
 0x3d5   : > { %v3234_v13 = vmul.f32 %v5689_v16, %v3229_v1  ;;  %v3235_v46 = vmul.f32 %v5689_v16, %v3230_v45  ;;  %v5044_v2 = vmul.f32 %v5696_v49, %v3215_v38  ;;  %v5045_v62 = vmul.f32 %v5696_v49, %v3216_v32  ;;  %v3243_v38 = vld [vmem:[%s6466_s14 + $0x2c0] sm:$0xff]  ;;  %v3244_v32 = vld [vmem:[%s6466_s14 + $0x2c8] sm:$0xff] }
 0x3d6   : > { %v5046_v40 = vmul.f32 %v5696_v49, %v3217_v22  ;;  %v5047_v33 = vmul.f32 %v5696_v49, %v3218_v5  ;;  %v3224_v57 = vadd.f32 %v3220_v24, %v3210_v30  ;;  %v3225_v50 = vadd.f32 %v3221_v0, %v3211_v20 }
 0x3d7   : > { %v3226_v23 = vadd.f32 %v3222_v17, %v3212_v48  ;;  %v3227_v41 = vadd.f32 %v3223_v26, %v3213_v9  ;;  %v5048_v56 = vadd.f32 %v5044_v2, %v5034_v27  ;;  %v5049_v34 = vadd.f32 %v5045_v62, %v5035_v42  ;;  %v5699_v48 = vld [vmem:[#allocation3 + $0xf7] ss:$0 sm:$0xff] }
 0x3d8   : > { %v5050_v43 = vadd.f32 %v5046_v40, %v5036_v54  ;;  %v5051_v10 = vadd.f32 %v5047_v33, %v5037_v51  ;;  %v3236_v55 = vmul.f32 %v5689_v16, %v3231_v11  ;;  %v3237_v61 = vmul.f32 %v5689_v16, %v3232_v35  ;;  %v8774_v40 = vld [vmem:[%s6466_s14 + $0x310] sm:$0xff]  ;;  %v8777_v33 = vld [vmem:[%s6466_s14 + $0x318] sm:$0xff] }
 0x3d9   : > { %v5058_v28 = vmul.f32 %v5697_v21, %v3229_v1  ;;  %v5059_v36 = vmul.f32 %v5697_v21, %v3230_v45  ;;  %v5060_v63 = vmul.f32 %v5697_v21, %v3231_v11  ;;  %v5061_v47 = vmul.f32 %v5697_v21, %v3232_v35  ;;  %v3257_v1 = vld [vmem:[%s6466_s14 + $0x2e0] sm:$0xff]  ;;  %v3258_v45 = vld [vmem:[%s6466_s14 + $0x2e8] sm:$0xff] }
 0x3da   : > { %v1480_v58 = vadd.f32 %v1479_v29, %v1366_v8  ;;  %v1528_v39 = vadd.f32 %v1527_v7, %v1414_v60  ;;  %v3238_v31 = vadd.f32 %v3234_v13, %v3224_v57  ;;  %v3239_v53 = vadd.f32 %v3235_v46, %v3225_v50  ;;  %v8768_v46 = vld [vmem:[%s6466_s14 + $0x300] sm:$0xff]  ;;  %v8771_v21 = vld [vmem:[%s6466_s14 + $0x308] sm:$0xff]  ;;  %v8786_v60 = vld [vmem:[%s6466_s14 + $0x330] sm:$0xff] }
 0x3db   : > { %v3240_v44 = vadd.f32 %v3236_v55, %v3226_v23  ;;  %v3241_v24 = vadd.f32 %v3237_v61, %v3227_v41  ;;  %v5062_v0 = vadd.f32 %v5058_v28, %v5048_v56  ;;  %v5063_v22 = vadd.f32 %v5059_v36, %v5049_v34  ;;  %v8780_v8 = vld [vmem:[%s6466_s14 + $0x320] sm:$0xff]  ;;  %v8783_v41 = vld [vmem:[%s6466_s14 + $0x328] sm:$0xff]  ;;  %v8789_v7 = vld [vmem:[%s6466_s14 + $0x338] sm:$0xff] }
 0x3dc   : > { %v5064_v5 = vadd.f32 %v5060_v63, %v5050_v43  ;;  %v5065_v16 = vadd.f32 %v5061_v47, %v5051_v10  ;;  %1545 = vst [vmem:[#allocation3 + $0x78] sm:$0xff] %v1480_v58  ;;  %v3248_v52 = vmul.f32 %v5690_v15, %v3243_v38  ;;  %v3249_v14 = vmul.f32 %v5690_v15, %v3244_v32  ;;  %v8792_v61 = vld [vmem:[%s6466_s14 + $0x340] sm:$0xff] }
 0x3dd   : > { %v3250_v25 = vmul.f32 %v5690_v15, %v3245_v12  ;;  %v3251_v4 = vmul.f32 %v5690_v15, %v3246_v59  ;;  %1561 = vst [vmem:[#allocation3 + $0xf8] sm:$0xff] %v1528_v39  ;;  %v5072_v6 = vmul.f32 %v5698_v18, %v3243_v38  ;;  %v5073_v49 = vmul.f32 %v5698_v18, %v3244_v32  ;;  %v8795_v38 = vld [vmem:[%s6466_s14 + $0x348] sm:$0xff]  ;;  %v8798_v32 = vld [vmem:[%s6466_s14 + $0x350] sm:$0xff]  ;;  %v8801_v15 = vld [vmem:[%s6466_s14 + $0x358] sm:$0xff] }
 0x3de   : > { %v5074_v30 = vmul.f32 %v5698_v18, %v3245_v12  ;;  %v5075_v20 = vmul.f32 %v5698_v18, %v3246_v59  ;;  %v3252_v9 = vadd.f32 %v3248_v52, %v3238_v31  ;;  %v3253_v27 = vadd.f32 %v3249_v14, %v3239_v53  ;;  %v8816_v53 = vld [vmem:[%s6466_s14 + $0x360] sm:$0xff]  ;;  %v8829_v52 = vld [vmem:[%s6466_s14 + $0x378] sm:$0xff] }
 0x3df   : > { %v3254_v42 = vadd.f32 %v3250_v25, %v3240_v44  ;;  %v3255_v54 = vadd.f32 %v3251_v4, %v3241_v24  ;;  %v5076_v51 = vadd.f32 %v5072_v6, %v5062_v0  ;;  %v5077_v17 = vadd.f32 %v5073_v49, %v5063_v22  ;;  %v8819_v44 = vld [vmem:[%s6466_s14 + $0x368] sm:$0xff]  ;;  %v8822_v24 = vld [vmem:[%s6466_s14 + $0x370] sm:$0xff] }
 0x3e0   : > { %v5078_v26 = vadd.f32 %v5074_v30, %v5064_v5  ;;  %v5079_v13 = vadd.f32 %v5075_v20, %v5065_v16  ;;  %v3262_v11 = vmul.f32 %v5691_v3, %v3257_v1  ;;  %v3263_v35 = vmul.f32 %v5691_v3, %v3258_v45 }
 0x3e1   : > { %v3264_v2 = vmul.f32 %v5691_v3, %v3259_v37  ;;  %v3265_v62 = vmul.f32 %v5691_v3, %v3260_v19  ;;  %v5086_v29 = vmul.f32 %v5699_v48, %v3257_v1  ;;  %v5087_v57 = vmul.f32 %v5699_v48, %v3258_v45  ;;  %v8832_v3 = vld [vmem:[%s6466_s14 + $0x380] sm:$0xff] }
 0x3e2   : > { %v5088_v50 = vmul.f32 %v5699_v48, %v3259_v37  ;;  %v5089_v23 = vmul.f32 %v5699_v48, %v3260_v19  ;;  %v3266_v56 = vadd.f32 %v3262_v11, %v3252_v9  ;;  %v3267_v34 = vadd.f32 %v3263_v35, %v3253_v27  ;;  %v8835_v37 = vld [vmem:[%s6466_s14 + $0x388] sm:$0xff]  ;;  %v8838_v19 = vld [vmem:[%s6466_s14 + $0x390] sm:$0xff]  ;;  %v8845_v48 = vld [vmem:[%s6466_s14 + $0x398] sm:$0xff] }
 0x3e3   : > { %v3268_v43 = vadd.f32 %v3264_v2, %v3254_v42  ;;  %v3269_v10 = vadd.f32 %v3265_v62, %v3255_v54  ;;  %v5700_v55 = vld [vmem:[#allocation3 + $0x78] ss:$0 sm:$0xff]  ;;  %v8803_v28 = vadd.f32 %v5086_v29, %v5076_v51  ;;  %v8805_v36 = vadd.f32 %v5087_v57, %v5077_v17  ;;  %v5701_v63 = vld [vmem:[#allocation3 + $0x79] ss:$0 sm:$0xff]  ;;  %v5702_v47 = vld [vmem:[#allocation3 + $0x7a] ss:$0 sm:$0xff] }
 0x3e4   : > { %v8807_v12 = vadd.f32 %v5088_v50, %v5078_v26  ;;  %v8809_v59 = vadd.f32 %v5089_v23, %v5079_v13  ;;  %v3276_v18 = vmul.f32 %v5700_v55, %v8768_v46  ;;  %v3277_v58 = vmul.f32 %v5700_v55, %v8771_v21  ;;  %v5703_v14 = vld [vmem:[#allocation3 + $0x7b] ss:$0 sm:$0xff]  ;;  %v5704_v9 = vld [vmem:[#allocation3 + $0x7c] ss:$0 sm:$0xff]  ;;  %v8848_v17 = vld [vmem:[%s6466_s14 + $0x3a0] sm:$0xff] }
 0x3e5   : > { %v3278_v39 = vmul.f32 %v5700_v55, %v8774_v40  ;;  %v3279_v31 = vmul.f32 %v5700_v55, %v8777_v33  ;;  %v3290_v0 = vmul.f32 %v5701_v63, %v8780_v8  ;;  %v3291_v22 = vmul.f32 %v5701_v63, %v8783_v41  ;;  %v8851_v26 = vld [vmem:[%s6466_s14 + $0x3a8] sm:$0xff]  ;;  %v8854_v13 = vld [vmem:[%s6466_s14 + $0x3b0] sm:$0xff]  ;;  %v8861_v29 = vld [vmem:[%s6466_s14 + $0x3b8] sm:$0xff] }
 0x3e6   : > { %v3292_v5 = vmul.f32 %v5701_v63, %v8786_v60  ;;  %v3293_v16 = vmul.f32 %v5701_v63, %v8789_v7  ;;  %v3280_v25 = vadd.f32 %v3276_v18, %v3266_v56  ;;  %v3281_v4 = vadd.f32 %v3277_v58, %v3267_v34  ;;  %v5705_v57 = vld [vmem:[#allocation3 + $0x7d] ss:$0 sm:$0xff]  ;;  %v8871_v18 = vld [vmem:[%s6466_s14 + $0x3c8] sm:$0xff]  ;;  %v5706_v58 = vld [vmem:[#allocation3 + $0x7e] ss:$0 sm:$0xff] }
 0x3e7   : > { %v3282_v1 = vadd.f32 %v3278_v39, %v3268_v43  ;;  %v3283_v45 = vadd.f32 %v3279_v31, %v3269_v10  ;;  %v3304_v6 = vmul.f32 %v5702_v47, %v8792_v61  ;;  %v3305_v49 = vmul.f32 %v5702_v47, %v8795_v38  ;;  %v8864_v43 = vld [vmem:[%s6466_s14 + $0x3c0] sm:$0xff] }
 0x3e8   : > { %v3306_v30 = vmul.f32 %v5702_v47, %v8798_v32  ;;  %v3307_v20 = vmul.f32 %v5702_v47, %v8801_v15  ;;  %v3294_v27 = vadd.f32 %v3290_v0, %v3280_v25  ;;  %v3295_v42 = vadd.f32 %v3291_v22, %v3281_v4 }
 0x3e9   : > { %v3296_v54 = vadd.f32 %v3292_v5, %v3282_v1  ;;  %v3297_v51 = vadd.f32 %v3293_v16, %v3283_v45  ;;  %v3318_v11 = vmul.f32 %v5703_v14, %v8816_v53  ;;  %v3319_v35 = vmul.f32 %v5703_v14, %v8819_v44  ;;  %v8874_v5 = vld [vmem:[%s6466_s14 + $0x3d0] sm:$0xff]  ;;  %v8877_v16 = vld [vmem:[%s6466_s14 + $0x3d8] sm:$0xff]  ;;  %v8884_v45 = vld [vmem:[%s6466_s14 + $0x3e0] sm:$0xff] }
 0x3ea   : > { %v3320_v2 = vmul.f32 %v5703_v14, %v8822_v24  ;;  %v3321_v62 = vmul.f32 %v5703_v14, %v8829_v52  ;;  %v3308_v50 = vadd.f32 %v3304_v6, %v3294_v27  ;;  %v3309_v23 = vadd.f32 %v3305_v49, %v3295_v42  ;;  %v5707_v6 = vld [vmem:[#allocation3 + $0x7f] ss:$0 sm:$0xff]  ;;  %v8887_v27 = vld [vmem:[%s6466_s14 + $0x3e8] sm:$0xff]  ;;  %v8890_v42 = vld [vmem:[%s6466_s14 + $0x3f0] sm:$0xff] }
 0x3eb   : > { %v3310_v56 = vadd.f32 %v3306_v30, %v3296_v54  ;;  %v3311_v34 = vadd.f32 %v3307_v20, %v3297_v51  ;;  %v3332_v10 = vmul.f32 %v5704_v9, %v8832_v3  ;;  %v3333_v55 = vmul.f32 %v5704_v9, %v8835_v37  ;;  %v8893_v54 = vld [vmem:[%s6466_s14 + $0x3f8] sm:$0xff] }
 0x3ec   : > { %v3334_v63 = vmul.f32 %v5704_v9, %v8838_v19  ;;  %v3335_v47 = vmul.f32 %v5704_v9, %v8845_v48  ;;  %v3322_v39 = vadd.f32 %v3318_v11, %v3308_v50  ;;  %v3323_v31 = vadd.f32 %v3319_v35, %v3309_v23 }
 0x3ed   : > { %v3324_v0 = vadd.f32 %v3320_v2, %v3310_v56  ;;  %v3325_v22 = vadd.f32 %v3321_v62, %v3311_v34  ;;  %v3346_v14 = vmul.f32 %v5705_v57, %v8848_v17  ;;  %v3347_v25 = vmul.f32 %v5705_v57, %v8851_v26  ;;  %v5708_v62 = vld [vmem:[#allocation3 + $0xf8] ss:$0 sm:$0xff] }
 0x3ee   : > { %v3348_v4 = vmul.f32 %v5705_v57, %v8854_v13  ;;  %v3349_v1 = vmul.f32 %v5705_v57, %v8861_v29  ;;  %v3336_v49 = vadd.f32 %v3332_v10, %v3322_v39  ;;  %v3337_v30 = vadd.f32 %v3333_v55, %v3323_v31 }
 0x3ef   : > { %v3338_v20 = vadd.f32 %v3334_v63, %v3324_v0  ;;  %v3339_v9 = vadd.f32 %v3335_v47, %v3325_v22  ;;  %v3360_v51 = vmul.f32 %v5706_v58, %v8864_v43  ;;  %v3361_v11 = vmul.f32 %v5706_v58, %v8871_v18 }
 0x3f0   : > { %v3362_v35 = vmul.f32 %v5706_v58, %v8874_v5  ;;  %v3363_v2 = vmul.f32 %v5706_v58, %v8877_v16  ;;  %v3350_v57 = vadd.f32 %v3346_v14, %v3336_v49  ;;  %v3351_v50 = vadd.f32 %v3347_v25, %v3337_v30 }
 0x3f1   : > { %v3352_v23 = vadd.f32 %v3348_v4, %v3338_v20  ;;  %v3353_v56 = vadd.f32 %v3349_v1, %v3339_v9  ;;  %v3374_v34 = vmul.f32 %v5707_v6, %v8884_v45  ;;  %v3375_v10 = vmul.f32 %v5707_v6, %v8887_v27  ;;  %v5709_v4 = vld [vmem:[#allocation3 + $0xf9] ss:$0 sm:$0xff]  ;;  %v5710_v9 = vld [vmem:[#allocation3 + $0xfa] ss:$0 sm:$0xff] }
 0x3f2   : > { %v3376_v55 = vmul.f32 %v5707_v6, %v8890_v42  ;;  %v3377_v63 = vmul.f32 %v5707_v6, %v8893_v54  ;;  %v3364_v47 = vadd.f32 %v3360_v51, %v3350_v57  ;;  %v3365_v39 = vadd.f32 %v3361_v11, %v3351_v50 }
 0x3f3   : > { %v3366_v31 = vadd.f32 %v3362_v35, %v3352_v23  ;;  %v3367_v0 = vadd.f32 %v3363_v2, %v3353_v56  ;;  %v5100_v22 = vmul.f32 %v5708_v62, %v8768_v46  ;;  %v5101_v58 = vmul.f32 %v5708_v62, %v8771_v21  ;;  %v5711_v2 = vld [vmem:[#allocation3 + $0xfb] ss:$0 sm:$0xff]  ;;  %v5712_v56 = vld [vmem:[#allocation3 + $0xfc] ss:$0 sm:$0xff] }
 0x3f4   : > { %v5102_v14 = vmul.f32 %v5708_v62, %v8774_v40  ;;  %v5103_v25 = vmul.f32 %v5708_v62, %v8777_v33  ;;  %v3378_v1 = vadd.f32 %v3374_v34, %v3364_v47  ;;  %v3379_v49 = vadd.f32 %v3375_v10, %v3365_v39 }
 0x3f5   : > { %v3380_v30 = vadd.f32 %v3376_v55, %v3366_v31  ;;  %v3381_v20 = vadd.f32 %v3377_v63, %v3367_v0  ;;  %v5104_v6 = vadd.f32 %v5100_v22, %v8803_v28  ;;  %v5105_v51 = vadd.f32 %v5101_v58, %v8805_v36  ;;  %v5714_v22 = vld [vmem:[#allocation3 + $0xfe] ss:$0 sm:$0xff] }
 0x3f6   : > { %v5106_v11 = vadd.f32 %v5102_v14, %v8807_v12  ;;  %v5107_v46 = vadd.f32 %v5103_v25, %v8809_v59  ;;  %v3382_v21 = vmax.f32 %v3378_v1, 0.0  ;;  %v3383_v40 = vmax.f32 %v3379_v49, 0.0  ;;  %v5715_v1 = vld [vmem:[#allocation3 + $0xff] ss:$0 sm:$0xff] }
 0x3f7   : > { %v3384_v35 = vmax.f32 %v3380_v30, 0.0  ;;  %v3385_v33 = vmax.f32 %v3381_v20, 0.0  ;;  %v5114_v62 = vmul.f32 %v5709_v4, %v8780_v8  ;;  %v5115_v57 = vmul.f32 %v5709_v4, %v8783_v41 }
 0x3f8   : > { %v5116_v50 = vmul.f32 %v5709_v4, %v8786_v60  ;;  %v5117_v28 = vmul.f32 %v5709_v4, %v8789_v7  ;;  %3386 = vst [vmem:[%s6958_s8 + $0x60] sm:$0xff] %v3382_v21  ;;  %v5128_v36 = vmul.f32 %v5710_v9, %v8792_v61  ;;  %v5129_v12 = vmul.f32 %v5710_v9, %v8795_v38  ;;  %v5713_v38 = vld [vmem:[#allocation3 + $0xfd] ss:$0 sm:$0xff] }
 0x3f9   : > { %v5130_v59 = vmul.f32 %v5710_v9, %v8798_v32  ;;  %v5131_v23 = vmul.f32 %v5710_v9, %v8801_v15  ;;  %3387 = vst [vmem:[%s6958_s8 + $0x68] sm:$0xff] %v3383_v40  ;;  %v5118_v34 = vadd.f32 %v5114_v62, %v5104_v6  ;;  %v5119_v8 = vadd.f32 %v5115_v57, %v5105_v51 }
 0x3fa   : > { %v5120_v10 = vadd.f32 %v5116_v50, %v5106_v11  ;;  %v5121_v41 = vadd.f32 %v5117_v28, %v5107_v46  ;;  %3388 = vst [vmem:[%s6958_s8 + $0x70] sm:$0xff] %v3384_v35  ;;  %v5142_v60 = vmul.f32 %v5711_v2, %v8816_v53  ;;  %v5143_v7 = vmul.f32 %v5711_v2, %v8819_v44 }
 0x3fb   : > { %v5144_v61 = vmul.f32 %v5711_v2, %v8822_v24  ;;  %v5145_v55 = vmul.f32 %v5711_v2, %v8829_v52  ;;  %3389 = vst [vmem:[%s6958_s8 + $0x78] sm:$0xff] %v3385_v33  ;;  %v5132_v32 = vadd.f32 %v5128_v36, %v5118_v34  ;;  %v5133_v63 = vadd.f32 %v5129_v12, %v5119_v8 }
 0x3fc   : > { %v5134_v15 = vadd.f32 %v5130_v59, %v5120_v10  ;;  %v5135_v47 = vadd.f32 %v5131_v23, %v5121_v41  ;;  %v5156_v39 = vmul.f32 %v5712_v56, %v8832_v3  ;;  %v5157_v31 = vmul.f32 %v5712_v56, %v8835_v37 }
 0x3fd   : > { %v5158_v0 = vmul.f32 %v5712_v56, %v8838_v19  ;;  %v5159_v53 = vmul.f32 %v5712_v56, %v8845_v48  ;;  %v5146_v44 = vadd.f32 %v5142_v60, %v5132_v32  ;;  %v5147_v58 = vadd.f32 %v5143_v7, %v5133_v63 }
 0x3fe   : > { %v5148_v24 = vadd.f32 %v5144_v61, %v5134_v15  ;;  %v5149_v52 = vadd.f32 %v5145_v55, %v5135_v47  ;;  %v5170_v14 = vmul.f32 %v5713_v38, %v8848_v17  ;;  %v5171_v25 = vmul.f32 %v5713_v38, %v8851_v26 }
 0x3ff   : > { %v5172_v4 = vmul.f32 %v5713_v38, %v8854_v13  ;;  %v5173_v3 = vmul.f32 %v5713_v38, %v8861_v29  ;;  %v5160_v37 = vadd.f32 %v5156_v39, %v5146_v44  ;;  %v5161_v49 = vadd.f32 %v5157_v31, %v5147_v58 }
 0x400   : > { %v5162_v19 = vadd.f32 %v5158_v0, %v5148_v24  ;;  %v5163_v30 = vadd.f32 %v5159_v53, %v5149_v52  ;;  %v5184_v48 = vmul.f32 %v5714_v22, %v8864_v43  ;;  %v5185_v20 = vmul.f32 %v5714_v22, %v8871_v18 }
 0x401   : > { %v5186_v9 = vmul.f32 %v5714_v22, %v8874_v5  ;;  %v5187_v6 = vmul.f32 %v5714_v22, %v8877_v16  ;;  %v5174_v17 = vadd.f32 %v5170_v14, %v5160_v37  ;;  %v5175_v26 = vadd.f32 %v5171_v25, %v5161_v49 }
 0x402   : > { %v5176_v13 = vadd.f32 %v5172_v4, %v5162_v19  ;;  %v5177_v51 = vadd.f32 %v5173_v3, %v5163_v30  ;;  %v5198_v29 = vmul.f32 %v5715_v1, %v8884_v45  ;;  %v5199_v11 = vmul.f32 %v5715_v1, %v8887_v27 }
 0x403   : > { %v5200_v46 = vmul.f32 %v5715_v1, %v8890_v42  ;;  %v5201_v43 = vmul.f32 %v5715_v1, %v8893_v54  ;;  %v5188_v21 = vadd.f32 %v5184_v48, %v5174_v17  ;;  %v5189_v18 = vadd.f32 %v5185_v20, %v5175_v26 }
 0x404   : > { %v5190_v5 = vadd.f32 %v5186_v9, %v5176_v13  ;;  %v5191_v16 = vadd.f32 %v5187_v6, %v5177_v51 }
 0x405   : > { %v5202_v40 = vadd.f32 %v5198_v29, %v5188_v21  ;;  %v5203_v45 = vadd.f32 %v5199_v11, %v5189_v18 }
 0x406   : > { %v5204_v27 = vadd.f32 %v5200_v46, %v5190_v5  ;;  %v5205_v35 = vadd.f32 %v5201_v43, %v5191_v16 }
 0x407   : > { %v5206_v42 = vmax.f32 %v5202_v40, 0.0  ;;  %v5207_v54 = vmax.f32 %v5203_v45, 0.0 }
 0x408   : > { %v5208_v33 = vmax.f32 %v5204_v27, 0.0  ;;  %v5209_v2 = vmax.f32 %v5205_v35, 0.0 }
 0x409   : > { %5210 = vst [vmem:[%s6958_s8 + $0xe0] sm:$0xff] %v5206_v42 }
 0x40a   : > { %5211 = vst [vmem:[%s6958_s8 + $0xe8] sm:$0xff] %v5207_v54 }
 0x40b   : > { %5212 = vst [vmem:[%s6958_s8 + $0xf0] sm:$0xff] %v5208_v33 }
 0x40c   : > { %5213 = vst [vmem:[%s6958_s8 + $0xf8] sm:$0xff] %v5209_v2 }
 0x40d   : > { %5755 = shalt.err (!%p5752_p7)
}
 0x40e   : > { %s5792_s22 = smov 128   ;;  %s5793_s8 = smov 256  }
 0x40f   : > { %s5794_s28 = smov 8  }
 0x410   : > { %5418 = dma.vmem_to_hbm [thread:$0]  (%p5878_p6), %s5227_s23, 4096, %s5229_s11, %s5215_s16, %s5792_s22, %s5793_s8, %s5794_s28  }
 0x411 PF: > { %s5243_s14 = sand.u32 1, %s5778_s24   ;;  %p5421_p10 = pnand %p5365_p9, %p5882_p8 }
 0x412   : > { %s5244_s15 = scalar_lea.sflag [#allocation9], %s5243_s14 }
 0x413   : > { %p5422_p11 = pneg %p5421_p10 }
 0x415   : > { %5773 = dma.done.wait (%p5422_p11), %s5244_s15, 4096  }
 0x416   : > { %5775 = vsyncadd (%p5422_p11), %s5244_s15, 4294963200  ;;  %p17_p12 = scmp.ge.s32.totalorder %s5860_s30, 4   ;;  %s9055_s24 = smov %s5782_s25 }
 0x417   : > { %s9056_s25 = smov %s5786_s26  ;;  %s9057_s26 = smov %s5872_s10 }
 0x418   : > { %s9058_s27 = smov %s5860_s30  ;;  %19 = sbr.rel (!%p17_p12) target bundleno = 3 (0x3), region = 267 }
 0x41d   :  { %5250 = vsyncpa [#allocation9], 1 }
 0x41e   :  { %5252 = vsyncpa [#allocation9 + $0x1], 1 }

</bundles_post_ra>
